<compile_context>
chip_gen: v6e
topology: v6e:2x2x1
jax: 0.10.0
libtpu: 0.0.40
codegen_flags: <defaults>
</compile_context>

<pallas_src>
import math
import numpy as np
import jax
import jax.numpy as jnp
from jax import lax
from jax.experimental import pallas as pl
from jax.experimental.pallas import tpu as pltpu  # noqa: F401  (TPU backend)

# ------------------------- model configuration -------------------------
NUM_AP = 16          # sequence length L
NUM_CLASSES = 10
NUM_MAC = 20
EMB_DIM = 8
C_IN = EMB_DIM + 1   # rssi + mac embedding
D_MODEL = 32
N_HEADS = 4
HEAD_DIM = D_MODEL // N_HEADS
DIM_FF = 2048        # PyTorch TransformerEncoderLayer default dim_feedforward
FF_CHUNK = 512
N_FF_CHUNKS = DIM_FF // FF_CHUNK
N_LAYERS = 2
HIDDEN_FC = 128
LN_EPS = 1e-5


# --------------------------- fused kernel -------------------------------
def _make_kernel(batch):
    bl = batch * NUM_AP                      # rows, position-major: r -> (r//B, r%B)
    scale = 1.0 / math.sqrt(HEAD_DIM)

    def kernel(x_ref, mac_ref, emb_ref, cw_ref, cb_ref,
               wq_ref, bq_ref, wk_ref, bk_ref, wv_ref, bv_ref,
               wo_ref, bo_ref, g1_ref, be1_ref, g2_ref, be2_ref,
               w1_ref, b1_ref, w2_ref, b2_ref,
               fc1_ref, fb1_ref, fc2_ref, fb2_ref, o_ref):
        f32 = jnp.float32

        # ---------- embedding lookup (one-hot matmul) + rssi channel ----------
        ids = mac_ref[...]                                            # (BL, 1) int32
        mac_iota = lax.broadcasted_iota(jnp.int32, (bl, NUM_MAC + 1), 1)
        onehot = (mac_iota == ids).astype(f32)                        # (BL, 21)
        feat = jnp.dot(onehot, emb_ref[...],
                       preferred_element_type=f32)                    # (BL, C_IN), col0 = 0
        chan = lax.broadcasted_iota(jnp.int32, (bl, C_IN), 1)
        feat = feat + jnp.where(chan == 0, x_ref[...], 0.0)           # rssi -> channel 0

        # ---------- conv1d(k=3, pad=1) + ReLU ----------
        row = lax.broadcasted_iota(jnp.int32, (bl, bl), 0)
        col = lax.broadcasted_iota(jnp.int32, (bl, bl), 1)
        # neighbor-shift selection matrices (zero rows implement the padding)
        shift_dn = ((col == row - batch) & (row >= batch)).astype(f32)       # pos-1
        shift_up = ((col == row + batch) & (row < bl - batch)).astype(f32)   # pos+1
        prev_feat = jnp.dot(shift_dn, feat, preferred_element_type=f32)
        next_feat = jnp.dot(shift_up, feat, preferred_element_type=f32)
        h = (jnp.dot(prev_feat, cw_ref[0], preferred_element_type=f32)
             + jnp.dot(feat, cw_ref[1], preferred_element_type=f32)
             + jnp.dot(next_feat, cw_ref[2], preferred_element_type=f32)
             + cb_ref[...])
        h = jnp.maximum(h, 0.0)                                        # (BL, D_MODEL)
        # TODO(synk): dropout after conv is identity (inference).

        # rows r, c belong to the same batch element iff r % B == c % B
        same_batch = (row % batch) == (col % batch)

        def layer_norm(y, g, b):
            mu = jnp.mean(y, axis=-1, keepdims=True)
            var = jnp.mean(jnp.square(y - mu), axis=-1, keepdims=True)
            return (y - mu) * lax.rsqrt(var + LN_EPS) * g + b

        # ---------- transformer encoder layers (post-LN, ReLU FFN) ----------
        for l in range(N_LAYERS):
            # multi-head self-attention with per-head weights (no lane slicing)
            attn = jnp.zeros((bl, D_MODEL), f32)
            for hh in range(N_HEADS):
                i = l * N_HEADS + hh
                qh = jnp.dot(h, wq_ref[i], preferred_element_type=f32) + bq_ref[i]
                kh = jnp.dot(h, wk_ref[i], preferred_element_type=f32) + bk_ref[i]
                vh = jnp.dot(h, wv_ref[i], preferred_element_type=f32) + bv_ref[i]
                s = lax.dot_general(qh, kh, (((1,), (1,)), ((), ())),
                                    preferred_element_type=f32) * scale
                s = jnp.where(same_batch, s, -1e30)
                s = s - jnp.max(s, axis=-1, keepdims=True)
                p = jnp.exp(s)
                p = p * pl.reciprocal(jnp.sum(p, axis=-1, keepdims=True), approx=True)
                oh = jnp.dot(p, vh, preferred_element_type=f32)
                attn = attn + jnp.dot(oh, wo_ref[i], preferred_element_type=f32)
            attn = attn + bo_ref[l]

            y = layer_norm(h + attn, g1_ref[l], be1_ref[l])

            # feed-forward: bf16 MXU operands, f32 accumulate, chunked over DIM_FF
            yb = y.astype(jnp.bfloat16)

            def ffn_chunk(c, acc, _l=l, _yb=yb):
                i = _l * N_FF_CHUNKS + c
                hc = jnp.dot(_yb, w1_ref[i], preferred_element_type=f32) + b1_ref[i]
                hc = jnp.maximum(hc, 0.0).astype(jnp.bfloat16)
                return acc + jnp.dot(hc, w2_ref[i], preferred_element_type=f32)

            ff = lax.fori_loop(0, N_FF_CHUNKS, ffn_chunk,
                               jnp.zeros((bl, D_MODEL), f32), unroll=True)
            ff = ff + b2_ref[l]

            h = layer_norm(y + ff, g2_ref[l], be2_ref[l])

        # ---------- classifier head: flatten folded into per-position fc1 blocks ----------
        hid = jnp.zeros((batch, HIDDEN_FC), f32)
        for pos in range(NUM_AP):
            hid = hid + jnp.dot(h[pos * batch:(pos + 1) * batch, :], fc1_ref[pos],
                                preferred_element_type=f32)
        hid = jnp.maximum(hid + fb1_ref[...], 0.0)
        o_ref[...] = jnp.dot(hid, fc2_ref[...], preferred_element_type=f32) + fb2_ref[...]

    return kernel


def pallas_forward(x, mac, KP):
    B, L = x.shape
    assert L == NUM_AP
    # position-major row order: row r <-> (pos = r // B, batch = r % B)
    x_pm = x.T.reshape(B * L, 1).astype(jnp.float32)
    mac_pm = mac.T.reshape(B * L, 1).astype(jnp.int32)
    return pl.pallas_call(
        _make_kernel(B),
        out_shape=jax.ShapeDtypeStruct((B, NUM_CLASSES), jnp.float32),
    )(x_pm, mac_pm, KP["emb9"], KP["conv_w"], KP["conv_b"],
      KP["wq"], KP["bq"], KP["wk"], KP["bk"], KP["wv"], KP["bv"],
      KP["wo"], KP["bo"], KP["g1"], KP["be1"], KP["g2"], KP["be2"],
      KP["w1"], KP["b1"], KP["w2"], KP["b2"],
      KP["fc1"], KP["fc1b"], KP["fc2"], KP["fc2b"])


pallas_forward = jax.jit(pallas_forward)


# -------------------- natural params -> kernel layout --------------------
def prepare_kernel_params(P):
    Hd = HEAD_DIM
    emb9 = jnp.concatenate(
        [jnp.zeros((NUM_MAC + 1, 1), jnp.float32), P["embedding"]], axis=1)
    wq, bq, wk, bk, wv, bv, wo = [], [], [], [], [], [], []
    bo, g1, be1, g2, be2, b2 = [], [], [], [], [], []
    w1c, b1c, w2c = [], [], []
    for lp in P["layers"]:
        for h in range(N_HEADS):
            q_sl = slice(h * Hd, (h + 1) * Hd)
            k_sl = slice(D_MODEL + h * Hd, D_MODEL + (h + 1) * Hd)
            v_sl = slice(2 * D_MODEL + h * Hd, 2 * D_MODEL + (h + 1) * Hd)
            wq.append(lp["wqkv"][:, q_sl]); bq.append(lp["bqkv"][:, q_sl])
            wk.append(lp["wqkv"][:, k_sl]); bk.append(lp["bqkv"][:, k_sl])
            wv.append(lp["wqkv"][:, v_sl]); bv.append(lp["bqkv"][:, v_sl])
            wo.append(lp["wo"][h * Hd:(h + 1) * Hd, :])
        bo.append(lp["bo"]); b2.append(lp["b2"])
        g1.append(lp["g1"]); be1.append(lp["be1"])
        g2.append(lp["g2"]); be2.append(lp["be2"])
        for c in range(N_FF_CHUNKS):
            cs = slice(c * FF_CHUNK, (c + 1) * FF_CHUNK)
            w1c.append(lp["w1"][:, cs].astype(jnp.bfloat16))
            b1c.append(lp["b1"][:, cs])
            w2c.append(lp["w2"][cs, :].astype(jnp.bfloat16))
    return dict(
        emb9=emb9, conv_w=P["conv_w"], conv_b=P["conv_b"],
        wq=jnp.stack(wq), bq=jnp.stack(bq), wk=jnp.stack(wk), bk=jnp.stack(bk),
        wv=jnp.stack(wv), bv=jnp.stack(bv), wo=jnp.stack(wo),
        bo=jnp.stack(bo), g1=jnp.stack(g1), be1=jnp.stack(be1),
        g2=jnp.stack(g2), be2=jnp.stack(be2), b2=jnp.stack(b2),
        w1=jnp.stack(w1c), b1=jnp.stack(b1c), w2=jnp.stack(w2c),
        fc1=P["fc1_w"].reshape(NUM_AP, D_MODEL, HIDDEN_FC),
        fc1b=P["fc1_b"], fc2=P["fc2_w"], fc2b=P["fc2_b"])


# ----------------------- pure-JAX reference (check) ----------------------
def _ref_encoder_layer(x, lp):
    B, L, D = x.shape
    qkv = x @ lp["wqkv"] + lp["bqkv"][0]
    q, k, v = qkv[..., :D], qkv[..., D:2 * D], qkv[..., 2 * D:]
    qh = q.reshape(B, L, N_HEADS, HEAD_DIM).transpose(0, 2, 1, 3)
    kh = k.reshape(B, L, N_HEADS, HEAD_DIM).transpose(0, 2, 1, 3)
    vh = v.reshape(B, L, N_HEADS, HEAD_DIM).transpose(0, 2, 1, 3)
    s = jnp.einsum("bhqd,bhkd->bhqk", qh, kh) / math.sqrt(HEAD_DIM)
    p = jax.nn.softmax(s, axis=-1)
    ao = jnp.einsum("bhqk,bhkd->bhqd", p, vh).transpose(0, 2, 1, 3).reshape(B, L, D)
    ao = ao @ lp["wo"] + lp["bo"][0]

    def ln(y, g, b):
        m = jnp.mean(y, axis=-1, keepdims=True)
        vv = jnp.mean(jnp.square(y - m), axis=-1, keepdims=True)
        return (y - m) * jax.lax.rsqrt(vv + LN_EPS) * g + b

    y = ln(x + ao, lp["g1"][0], lp["be1"][0])
    ff = jnp.maximum(y @ lp["w1"] + lp["b1"][0], 0.0) @ lp["w2"] + lp["b2"][0]
    return ln(y + ff, lp["g2"][0], lp["be2"][0])


def reference_forward(x, mac, P):
    B, L = x.shape
    emb = P["embedding"][mac]
    xc = jnp.concatenate([x[..., None], emb], axis=2)
    xp = jnp.pad(xc, ((0, 0), (1, 1), (0, 0)))
    out = jnp.zeros((B, L, D_MODEL), jnp.float32)
    for k in range(3):
        out = out + jnp.einsum("blc,co->blo", xp[:, k:k + L, :], P["conv_w"][k])
    h = jnp.maximum(out + P["conv_b"][0], 0.0)
    for lp in P["layers"]:
        h = _ref_encoder_layer(h, lp)
    flat = h.reshape(B, -1)
    h1 = jnp.maximum(flat @ P["fc1_w"] + P["fc1_b"][0], 0.0)
    return h1 @ P["fc2_w"] + P["fc2_b"][0]


# ----------------------------- params init ------------------------------
def init_params(key):
    ks = iter(jax.random.split(key, 64))

    def nrm(shape, scale=0.05):
        return scale * jax.random.normal(next(ks), shape, dtype=jnp.float32)

    emb = nrm((NUM_MAC + 1, EMB_DIM)).at[0].set(0.0)   # padding_idx=0
    P = dict(
        embedding=emb,
        conv_w=nrm((3, C_IN, D_MODEL)),                # (kernel, Cin, Cout)
        conv_b=nrm((1, D_MODEL)),
        fc1_w=nrm((D_MODEL * NUM_AP, HIDDEN_FC)),
        fc1_b=nrm((1, HIDDEN_FC)),
        fc2_w=nrm((HIDDEN_FC, NUM_CLASSES)),
        fc2_b=nrm((1, NUM_CLASSES)),
        layers=[],
    )
    for _ in range(N_LAYERS):
        P["layers"].append(dict(
            wqkv=nrm((D_MODEL, 3 * D_MODEL)),
            bqkv=nrm((1, 3 * D_MODEL)),
            wo=nrm((D_MODEL, D_MODEL)),
            bo=nrm((1, D_MODEL)),
            w1=nrm((D_MODEL, DIM_FF)),
            b1=nrm((1, DIM_FF)),
            w2=nrm((DIM_FF, D_MODEL)),
            b2=nrm((1, D_MODEL)),
            g1=jnp.ones((1, D_MODEL), jnp.float32),
            be1=jnp.zeros((1, D_MODEL), jnp.float32),
            g2=jnp.ones((1, D_MODEL), jnp.float32),
            be2=jnp.zeros((1, D_MODEL), jnp.float32),
        ))
    return P


# --------------------------------- main ----------------------------------
if __name__ == "__main__":
    key = jax.random.PRNGKey(0)
    kx, kmac, kp = jax.random.split(key, 3)
    B = 2
    x = jax.random.normal(kx, (B, NUM_AP), dtype=jnp.float32)
    mac = jax.random.randint(kmac, (B, NUM_AP), 0, NUM_MAC + 1, dtype=jnp.int32)
    P = init_params(kp)
    KP = prepare_kernel_params(P)

    out = pallas_forward(x, mac, KP)
    out = jax.block_until_ready(out)
    assert out.shape == (B, NUM_CLASSES)

    # Reference is pure f32; kernel uses bf16 MXU operands for the FFN, hence
    # the slightly relaxed tolerance (observed error is well below this).
    ref = reference_forward(x, mac, P)
    np.testing.assert_allclose(np.asarray(out), np.asarray(ref), rtol=2e-2, atol=2e-2)

    print("KERNEL_OK")
</pallas_src>

<mosaic_0001>
module attributes {stable_mosaic.version = 11 : i64} {
  func.func @kernel(%arg0: memref<32x1xf32, #tpu.memory_space<vmem>>, %arg1: memref<32x1xi32, #tpu.memory_space<vmem>>, %arg2: memref<21x9xf32, #tpu.memory_space<vmem>>, %arg3: memref<3x9x32xf32, #tpu.memory_space<vmem>>, %arg4: memref<1x32xf32, #tpu.memory_space<vmem>>, %arg5: memref<8x32x8xf32, #tpu.memory_space<vmem>>, %arg6: memref<8x1x8xf32, #tpu.memory_space<vmem>>, %arg7: memref<8x32x8xf32, #tpu.memory_space<vmem>>, %arg8: memref<8x1x8xf32, #tpu.memory_space<vmem>>, %arg9: memref<8x32x8xf32, #tpu.memory_space<vmem>>, %arg10: memref<8x1x8xf32, #tpu.memory_space<vmem>>, %arg11: memref<8x8x32xf32, #tpu.memory_space<vmem>>, %arg12: memref<2x1x32xf32, #tpu.memory_space<vmem>>, %arg13: memref<2x1x32xf32, #tpu.memory_space<vmem>>, %arg14: memref<2x1x32xf32, #tpu.memory_space<vmem>>, %arg15: memref<2x1x32xf32, #tpu.memory_space<vmem>>, %arg16: memref<2x1x32xf32, #tpu.memory_space<vmem>>, %arg17: memref<8x32x512xbf16, #tpu.memory_space<vmem>>, %arg18: memref<8x1x512xf32, #tpu.memory_space<vmem>>, %arg19: memref<8x512x32xbf16, #tpu.memory_space<vmem>>, %arg20: memref<2x1x32xf32, #tpu.memory_space<vmem>>, %arg21: memref<16x32x128xf32, #tpu.memory_space<vmem>>, %arg22: memref<1x128xf32, #tpu.memory_space<vmem>>, %arg23: memref<128x10xf32, #tpu.memory_space<vmem>>, %arg24: memref<1x10xf32, #tpu.memory_space<vmem>>, %arg25: memref<2x10xf32, #tpu.memory_space<vmem>>) attributes {dimension_semantics = [], scalar_prefetch = 0 : i64, scratch_operands = 0 : i64, tpu.core_type = #tpu.core_type<tc>} {
    %c0 = arith.constant 0 : index
    %c0_0 = arith.constant 0 : index
    %0 = vector.load %arg1[%c0, %c0_0] : memref<32x1xi32, #tpu.memory_space<vmem>>, vector<32x1xi32>
    %1 = tpu.iota {dimensions = array<i32: 1>} : vector<32x21xi32>
    %2 = vector.broadcast %0 : vector<32x1xi32> to vector<32x21xi32>
    %3 = arith.cmpi eq, %1, %2 : vector<32x21xi32>
    %4 = arith.extui %3 : vector<32x21xi1> to vector<32x21xi32>
    %5 = arith.sitofp %4 : vector<32x21xi32> to vector<32x21xf32>
    %c0_1 = arith.constant 0 : index
    %c0_2 = arith.constant 0 : index
    %6 = vector.load %arg2[%c0_1, %c0_2] : memref<21x9xf32, #tpu.memory_space<vmem>>, vector<21x9xf32>
    %cst = arith.constant dense<0.000000e+00> : vector<32x9xf32>
    %7 = tpu.matmul %5, %6, %cst {dimension_numbers = #tpu.dot_dimension_numbers<[1], [0], [0], [1], [0, 0, 1, 1], [], []>} : vector<32x21xf32>, vector<21x9xf32>, vector<32x9xf32> -> vector<32x9xf32>
    %8 = tpu.iota {dimensions = array<i32: 1>} : vector<32x9xi32>
    %c0_i32 = arith.constant 0 : i32
    %9 = vector.broadcast %c0_i32 : i32 to vector<32x9xi32>
    %10 = arith.cmpi eq, %8, %9 : vector<32x9xi32>
    %c0_3 = arith.constant 0 : index
    %c0_4 = arith.constant 0 : index
    %11 = vector.load %arg0[%c0_3, %c0_4] : memref<32x1xf32, #tpu.memory_space<vmem>>, vector<32x1xf32>
    %cst_5 = arith.constant 0.000000e+00 : f32
    %12 = vector.shape_cast %11 : vector<32x1xf32> to vector<32x1xf32>
    %13 = vector.broadcast %12 : vector<32x1xf32> to vector<32x9xf32>
    %14 = vector.broadcast %cst_5 : f32 to vector<32x9xf32>
    %15 = arith.select %10, %13, %14 : vector<32x9xi1>, vector<32x9xf32>
    %16 = arith.addf %7, %15 : vector<32x9xf32>
    %17 = tpu.iota {dimensions = array<i32: 0>} : vector<32x32xi32>
    %18 = tpu.iota {dimensions = array<i32: 1>} : vector<32x32xi32>
    %c2_i32 = arith.constant 2 : i32
    %19 = vector.broadcast %c2_i32 : i32 to vector<32x32xi32>
    %20 = arith.subi %17, %19 : vector<32x32xi32>
    %21 = arith.cmpi eq, %18, %20 : vector<32x32xi32>
    %c2_i32_6 = arith.constant 2 : i32
    %22 = vector.broadcast %c2_i32_6 : i32 to vector<32x32xi32>
    %23 = arith.cmpi sge, %17, %22 : vector<32x32xi32>
    %24 = arith.andi %21, %23 : vector<32x32xi1>
    %25 = arith.extui %24 : vector<32x32xi1> to vector<32x32xi32>
    %26 = arith.sitofp %25 : vector<32x32xi32> to vector<32x32xf32>
    %c2_i32_7 = arith.constant 2 : i32
    %27 = vector.broadcast %c2_i32_7 : i32 to vector<32x32xi32>
    %28 = arith.addi %17, %27 : vector<32x32xi32>
    %29 = arith.cmpi eq, %18, %28 : vector<32x32xi32>
    %c30_i32 = arith.constant 30 : i32
    %30 = vector.broadcast %c30_i32 : i32 to vector<32x32xi32>
    %31 = arith.cmpi slt, %17, %30 : vector<32x32xi32>
    %32 = arith.andi %29, %31 : vector<32x32xi1>
    %33 = arith.extui %32 : vector<32x32xi1> to vector<32x32xi32>
    %34 = arith.sitofp %33 : vector<32x32xi32> to vector<32x32xf32>
    %cst_8 = arith.constant dense<0.000000e+00> : vector<32x9xf32>
    %35 = tpu.matmul %26, %16, %cst_8 {dimension_numbers = #tpu.dot_dimension_numbers<[1], [0], [0], [1], [0, 0, 1, 1], [], []>} : vector<32x32xf32>, vector<32x9xf32>, vector<32x9xf32> -> vector<32x9xf32>
    %cst_9 = arith.constant dense<0.000000e+00> : vector<32x9xf32>
    %36 = tpu.matmul %34, %16, %cst_9 {dimension_numbers = #tpu.dot_dimension_numbers<[1], [0], [0], [1], [0, 0, 1, 1], [], []>} : vector<32x32xf32>, vector<32x9xf32>, vector<32x9xf32> -> vector<32x9xf32>
    %c0_10 = arith.constant 0 : index
    %c0_11 = arith.constant 0 : index
    %c0_12 = arith.constant 0 : index
    %37 = vector.load %arg3[%c0_10, %c0_11, %c0_12] : memref<3x9x32xf32, #tpu.memory_space<vmem>>, vector<1x9x32xf32>
    %38 = vector.shape_cast %37 : vector<1x9x32xf32> to vector<9x32xf32>
    %cst_13 = arith.constant dense<0.000000e+00> : vector<32x32xf32>
    %39 = tpu.matmul %35, %38, %cst_13 {dimension_numbers = #tpu.dot_dimension_numbers<[1], [0], [0], [1], [0, 0, 1, 1], [], []>} : vector<32x9xf32>, vector<9x32xf32>, vector<32x32xf32> -> vector<32x32xf32>
    %c1 = arith.constant 1 : index
    %c0_14 = arith.constant 0 : index
    %c0_15 = arith.constant 0 : index
    %40 = vector.load %arg3[%c1, %c0_14, %c0_15] : memref<3x9x32xf32, #tpu.memory_space<vmem>>, vector<1x9x32xf32>
    %41 = vector.shape_cast %40 : vector<1x9x32xf32> to vector<9x32xf32>
    %cst_16 = arith.constant dense<0.000000e+00> : vector<32x32xf32>
    %42 = tpu.matmul %16, %41, %cst_16 {dimension_numbers = #tpu.dot_dimension_numbers<[1], [0], [0], [1], [0, 0, 1, 1], [], []>} : vector<32x9xf32>, vector<9x32xf32>, vector<32x32xf32> -> vector<32x32xf32>
    %43 = arith.addf %39, %42 : vector<32x32xf32>
    %c2 = arith.constant 2 : index
    %c0_17 = arith.constant 0 : index
    %c0_18 = arith.constant 0 : index
    %44 = vector.load %arg3[%c2, %c0_17, %c0_18] : memref<3x9x32xf32, #tpu.memory_space<vmem>>, vector<1x9x32xf32>
    %45 = vector.shape_cast %44 : vector<1x9x32xf32> to vector<9x32xf32>
    %cst_19 = arith.constant dense<0.000000e+00> : vector<32x32xf32>
    %46 = tpu.matmul %36, %45, %cst_19 {dimension_numbers = #tpu.dot_dimension_numbers<[1], [0], [0], [1], [0, 0, 1, 1], [], []>} : vector<32x9xf32>, vector<9x32xf32>, vector<32x32xf32> -> vector<32x32xf32>
    %47 = arith.addf %43, %46 : vector<32x32xf32>
    %c0_20 = arith.constant 0 : index
    %c0_21 = arith.constant 0 : index
    %48 = vector.load %arg4[%c0_20, %c0_21] : memref<1x32xf32, #tpu.memory_space<vmem>>, vector<1x32xf32>
    %49 = vector.broadcast %48 : vector<1x32xf32> to vector<32x32xf32>
    %50 = arith.addf %47, %49 : vector<32x32xf32>
    %cst_22 = arith.constant 0.000000e+00 : f32
    %51 = vector.broadcast %cst_22 : f32 to vector<32x32xf32>
    %52 = arith.maximumf %50, %51 : vector<32x32xf32>
    %c2_i32_23 = arith.constant 2 : i32
    %c0_i32_24 = arith.constant 0 : i32
    %53 = arith.cmpi eq, %c2_i32_23, %c0_i32_24 : i32
    %c1_i32 = arith.constant 1 : i32
    %54 = arith.select %53, %c1_i32, %c2_i32_23 : i32
    %55 = vector.broadcast %54 : i32 to vector<32x32xi32>
    %56 = arith.remsi %17, %55 : vector<32x32xi32>
    %c0_i32_25 = arith.constant 0 : i32
    %57 = vector.broadcast %c0_i32_25 : i32 to vector<32x32xi32>
    %58 = arith.cmpi ne, %56, %57 : vector<32x32xi32>
    %c0_i32_26 = arith.constant 0 : i32
    %59 = vector.broadcast %c0_i32_26 : i32 to vector<32x32xi32>
    %60 = arith.cmpi slt, %56, %59 : vector<32x32xi32>
    %c0_i32_27 = arith.constant 0 : i32
    %61 = arith.cmpi slt, %54, %c0_i32_27 : i32
    %62 = vector.broadcast %61 : i1 to vector<32x32xi1>
    %63 = vector.broadcast %62 : vector<32x32xi1> to vector<32x32xi1>
    %64 = arith.xori %60, %63 : vector<32x32xi1>
    %65 = arith.andi %64, %58 : vector<32x32xi1>
    %66 = vector.broadcast %54 : i32 to vector<32x32xi32>
    %67 = arith.addi %56, %66 : vector<32x32xi32>
    %68 = arith.select %65, %67, %56 : vector<32x32xi1>, vector<32x32xi32>
    %c2_i32_28 = arith.constant 2 : i32
    %c0_i32_29 = arith.constant 0 : i32
    %69 = arith.cmpi eq, %c2_i32_28, %c0_i32_29 : i32
    %c1_i32_30 = arith.constant 1 : i32
    %70 = arith.select %69, %c1_i32_30, %c2_i32_28 : i32
    %71 = vector.broadcast %70 : i32 to vector<32x32xi32>
    %72 = arith.remsi %18, %71 : vector<32x32xi32>
    %c0_i32_31 = arith.constant 0 : i32
    %73 = vector.broadcast %c0_i32_31 : i32 to vector<32x32xi32>
    %74 = arith.cmpi ne, %72, %73 : vector<32x32xi32>
    %c0_i32_32 = arith.constant 0 : i32
    %75 = vector.broadcast %c0_i32_32 : i32 to vector<32x32xi32>
    %76 = arith.cmpi slt, %72, %75 : vector<32x32xi32>
    %c0_i32_33 = arith.constant 0 : i32
    %77 = arith.cmpi slt, %70, %c0_i32_33 : i32
    %78 = vector.broadcast %77 : i1 to vector<32x32xi1>
    %79 = vector.broadcast %78 : vector<32x32xi1> to vector<32x32xi1>
    %80 = arith.xori %76, %79 : vector<32x32xi1>
    %81 = arith.andi %80, %74 : vector<32x32xi1>
    %82 = vector.broadcast %70 : i32 to vector<32x32xi32>
    %83 = arith.addi %72, %82 : vector<32x32xi32>
    %84 = arith.select %81, %83, %72 : vector<32x32xi1>, vector<32x32xi32>
    %85 = arith.cmpi eq, %68, %84 : vector<32x32xi32>
    %cst_34 = arith.constant 0.000000e+00 : f32
    %86 = vector.broadcast %cst_34 : f32 to vector<32x32xf32>
    %c0_35 = arith.constant 0 : index
    %c0_36 = arith.constant 0 : index
    %c0_37 = arith.constant 0 : index
    %87 = vector.load %arg5[%c0_35, %c0_36, %c0_37] : memref<8x32x8xf32, #tpu.memory_space<vmem>>, vector<1x32x8xf32>
    %88 = vector.shape_cast %87 : vector<1x32x8xf32> to vector<32x8xf32>
    %cst_38 = arith.constant dense<0.000000e+00> : vector<32x8xf32>
    %89 = tpu.matmul %52, %88, %cst_38 {dimension_numbers = #tpu.dot_dimension_numbers<[1], [0], [0], [1], [0, 0, 1, 1], [], []>} : vector<32x32xf32>, vector<32x8xf32>, vector<32x8xf32> -> vector<32x8xf32>
    %c0_39 = arith.constant 0 : index
    %c0_40 = arith.constant 0 : index
    %c0_41 = arith.constant 0 : index
    %90 = vector.load %arg6[%c0_39, %c0_40, %c0_41] : memref<8x1x8xf32, #tpu.memory_space<vmem>>, vector<1x1x8xf32>
    %91 = vector.shape_cast %90 : vector<1x1x8xf32> to vector<1x8xf32>
    %92 = vector.broadcast %91 : vector<1x8xf32> to vector<32x8xf32>
    %93 = arith.addf %89, %92 : vector<32x8xf32>
    %c0_42 = arith.constant 0 : index
    %c0_43 = arith.constant 0 : index
    %c0_44 = arith.constant 0 : index
    %94 = vector.load %arg7[%c0_42, %c0_43, %c0_44] : memref<8x32x8xf32, #tpu.memory_space<vmem>>, vector<1x32x8xf32>
    %95 = vector.shape_cast %94 : vector<1x32x8xf32> to vector<32x8xf32>
    %cst_45 = arith.constant dense<0.000000e+00> : vector<32x8xf32>
    %96 = tpu.matmul %52, %95, %cst_45 {dimension_numbers = #tpu.dot_dimension_numbers<[1], [0], [0], [1], [0, 0, 1, 1], [], []>} : vector<32x32xf32>, vector<32x8xf32>, vector<32x8xf32> -> vector<32x8xf32>
    %c0_46 = arith.constant 0 : index
    %c0_47 = arith.constant 0 : index
    %c0_48 = arith.constant 0 : index
    %97 = vector.load %arg8[%c0_46, %c0_47, %c0_48] : memref<8x1x8xf32, #tpu.memory_space<vmem>>, vector<1x1x8xf32>
    %98 = vector.shape_cast %97 : vector<1x1x8xf32> to vector<1x8xf32>
    %99 = vector.broadcast %98 : vector<1x8xf32> to vector<32x8xf32>
    %100 = arith.addf %96, %99 : vector<32x8xf32>
    %c0_49 = arith.constant 0 : index
    %c0_50 = arith.constant 0 : index
    %c0_51 = arith.constant 0 : index
    %101 = vector.load %arg9[%c0_49, %c0_50, %c0_51] : memref<8x32x8xf32, #tpu.memory_space<vmem>>, vector<1x32x8xf32>
    %102 = vector.shape_cast %101 : vector<1x32x8xf32> to vector<32x8xf32>
    %cst_52 = arith.constant dense<0.000000e+00> : vector<32x8xf32>
    %103 = tpu.matmul %52, %102, %cst_52 {dimension_numbers = #tpu.dot_dimension_numbers<[1], [0], [0], [1], [0, 0, 1, 1], [], []>} : vector<32x32xf32>, vector<32x8xf32>, vector<32x8xf32> -> vector<32x8xf32>
    %c0_53 = arith.constant 0 : index
    %c0_54 = arith.constant 0 : index
    %c0_55 = arith.constant 0 : index
    %104 = vector.load %arg10[%c0_53, %c0_54, %c0_55] : memref<8x1x8xf32, #tpu.memory_space<vmem>>, vector<1x1x8xf32>
    %105 = vector.shape_cast %104 : vector<1x1x8xf32> to vector<1x8xf32>
    %106 = vector.broadcast %105 : vector<1x8xf32> to vector<32x8xf32>
    %107 = arith.addf %103, %106 : vector<32x8xf32>
    %cst_56 = arith.constant dense<0.000000e+00> : vector<32x32xf32>
    %108 = tpu.matmul %93, %100, %cst_56 {dimension_numbers = #tpu.dot_dimension_numbers<[1], [1], [0], [0], [0, 0, 1, 0], [], []>} : vector<32x8xf32>, vector<32x8xf32>, vector<32x32xf32> -> vector<32x32xf32>
    %cst_57 = arith.constant 0.353553385 : f32
    %109 = vector.broadcast %cst_57 : f32 to vector<32x32xf32>
    %110 = arith.mulf %108, %109 : vector<32x32xf32>
    %cst_58 = arith.constant -1.000000e+30 : f32
    %111 = vector.broadcast %cst_58 : f32 to vector<32x32xf32>
    %112 = arith.select %85, %110, %111 : vector<32x32xi1>, vector<32x32xf32>
    %cst_59 = arith.constant dense<0xFF800000> : vector<32xf32>
    %113 = vector.multi_reduction <maximumf>, %112, %cst_59 [1] : vector<32x32xf32> to vector<32xf32>
    %114 = vector.shape_cast %113 : vector<32xf32> to vector<32x1xf32>
    %115 = vector.broadcast %114 : vector<32x1xf32> to vector<32x32xf32>
    %116 = arith.subf %112, %115 : vector<32x32xf32>
    %117 = math.exp %116 : vector<32x32xf32>
    %cst_60 = arith.constant dense<0.000000e+00> : vector<32xf32>
    %118 = vector.multi_reduction <add>, %117, %cst_60 [1] : vector<32x32xf32> to vector<32xf32>
    %119 = vector.shape_cast %118 : vector<32xf32> to vector<32x1xf32>
    %120 = tpu.reciprocal %119 {approx = true} : vector<32x1xf32> -> vector<32x1xf32>
    %121 = vector.broadcast %120 : vector<32x1xf32> to vector<32x32xf32>
    %122 = arith.mulf %117, %121 : vector<32x32xf32>
    %cst_61 = arith.constant dense<0.000000e+00> : vector<32x8xf32>
    %123 = tpu.matmul %122, %107, %cst_61 {dimension_numbers = #tpu.dot_dimension_numbers<[1], [0], [0], [1], [0, 0, 1, 1], [], []>} : vector<32x32xf32>, vector<32x8xf32>, vector<32x8xf32> -> vector<32x8xf32>
    %c0_62 = arith.constant 0 : index
    %c0_63 = arith.constant 0 : index
    %c0_64 = arith.constant 0 : index
    %124 = vector.load %arg11[%c0_62, %c0_63, %c0_64] : memref<8x8x32xf32, #tpu.memory_space<vmem>>, vector<1x8x32xf32>
    %125 = vector.shape_cast %124 : vector<1x8x32xf32> to vector<8x32xf32>
    %cst_65 = arith.constant dense<0.000000e+00> : vector<32x32xf32>
    %126 = tpu.matmul %123, %125, %cst_65 {dimension_numbers = #tpu.dot_dimension_numbers<[1], [0], [0], [1], [0, 0, 1, 1], [], []>} : vector<32x8xf32>, vector<8x32xf32>, vector<32x32xf32> -> vector<32x32xf32>
    %127 = arith.addf %86, %126 : vector<32x32xf32>
    %c1_66 = arith.constant 1 : index
    %c0_67 = arith.constant 0 : index
    %c0_68 = arith.constant 0 : index
    %128 = vector.load %arg5[%c1_66, %c0_67, %c0_68] : memref<8x32x8xf32, #tpu.memory_space<vmem>>, vector<1x32x8xf32>
    %129 = vector.shape_cast %128 : vector<1x32x8xf32> to vector<32x8xf32>
    %cst_69 = arith.constant dense<0.000000e+00> : vector<32x8xf32>
    %130 = tpu.matmul %52, %129, %cst_69 {dimension_numbers = #tpu.dot_dimension_numbers<[1], [0], [0], [1], [0, 0, 1, 1], [], []>} : vector<32x32xf32>, vector<32x8xf32>, vector<32x8xf32> -> vector<32x8xf32>
    %c1_70 = arith.constant 1 : index
    %c0_71 = arith.constant 0 : index
    %c0_72 = arith.constant 0 : index
    %131 = vector.load %arg6[%c1_70, %c0_71, %c0_72] : memref<8x1x8xf32, #tpu.memory_space<vmem>>, vector<1x1x8xf32>
    %132 = vector.shape_cast %131 : vector<1x1x8xf32> to vector<1x8xf32>
    %133 = vector.broadcast %132 : vector<1x8xf32> to vector<32x8xf32>
    %134 = arith.addf %130, %133 : vector<32x8xf32>
    %c1_73 = arith.constant 1 : index
    %c0_74 = arith.constant 0 : index
    %c0_75 = arith.constant 0 : index
    %135 = vector.load %arg7[%c1_73, %c0_74, %c0_75] : memref<8x32x8xf32, #tpu.memory_space<vmem>>, vector<1x32x8xf32>
    %136 = vector.shape_cast %135 : vector<1x32x8xf32> to vector<32x8xf32>
    %cst_76 = arith.constant dense<0.000000e+00> : vector<32x8xf32>
    %137 = tpu.matmul %52, %136, %cst_76 {dimension_numbers = #tpu.dot_dimension_numbers<[1], [0], [0], [1], [0, 0, 1, 1], [], []>} : vector<32x32xf32>, vector<32x8xf32>, vector<32x8xf32> -> vector<32x8xf32>
    %c1_77 = arith.constant 1 : index
    %c0_78 = arith.constant 0 : index
    %c0_79 = arith.constant 0 : index
    %138 = vector.load %arg8[%c1_77, %c0_78, %c0_79] : memref<8x1x8xf32, #tpu.memory_space<vmem>>, vector<1x1x8xf32>
    %139 = vector.shape_cast %138 : vector<1x1x8xf32> to vector<1x8xf32>
    %140 = vector.broadcast %139 : vector<1x8xf32> to vector<32x8xf32>
    %141 = arith.addf %137, %140 : vector<32x8xf32>
    %c1_80 = arith.constant 1 : index
    %c0_81 = arith.constant 0 : index
    %c0_82 = arith.constant 0 : index
    %142 = vector.load %arg9[%c1_80, %c0_81, %c0_82] : memref<8x32x8xf32, #tpu.memory_space<vmem>>, vector<1x32x8xf32>
    %143 = vector.shape_cast %142 : vector<1x32x8xf32> to vector<32x8xf32>
    %cst_83 = arith.constant dense<0.000000e+00> : vector<32x8xf32>
    %144 = tpu.matmul %52, %143, %cst_83 {dimension_numbers = #tpu.dot_dimension_numbers<[1], [0], [0], [1], [0, 0, 1, 1], [], []>} : vector<32x32xf32>, vector<32x8xf32>, vector<32x8xf32> -> vector<32x8xf32>
    %c1_84 = arith.constant 1 : index
    %c0_85 = arith.constant 0 : index
    %c0_86 = arith.constant 0 : index
    %145 = vector.load %arg10[%c1_84, %c0_85, %c0_86] : memref<8x1x8xf32, #tpu.memory_space<vmem>>, vector<1x1x8xf32>
    %146 = vector.shape_cast %145 : vector<1x1x8xf32> to vector<1x8xf32>
    %147 = vector.broadcast %146 : vector<1x8xf32> to vector<32x8xf32>
    %148 = arith.addf %144, %147 : vector<32x8xf32>
    %cst_87 = arith.constant dense<0.000000e+00> : vector<32x32xf32>
    %149 = tpu.matmul %134, %141, %cst_87 {dimension_numbers = #tpu.dot_dimension_numbers<[1], [1], [0], [0], [0, 0, 1, 0], [], []>} : vector<32x8xf32>, vector<32x8xf32>, vector<32x32xf32> -> vector<32x32xf32>
    %cst_88 = arith.constant 0.353553385 : f32
    %150 = vector.broadcast %cst_88 : f32 to vector<32x32xf32>
    %151 = arith.mulf %149, %150 : vector<32x32xf32>
    %cst_89 = arith.constant -1.000000e+30 : f32
    %152 = vector.broadcast %cst_89 : f32 to vector<32x32xf32>
    %153 = arith.select %85, %151, %152 : vector<32x32xi1>, vector<32x32xf32>
    %cst_90 = arith.constant dense<0xFF800000> : vector<32xf32>
    %154 = vector.multi_reduction <maximumf>, %153, %cst_90 [1] : vector<32x32xf32> to vector<32xf32>
    %155 = vector.shape_cast %154 : vector<32xf32> to vector<32x1xf32>
    %156 = vector.broadcast %155 : vector<32x1xf32> to vector<32x32xf32>
    %157 = arith.subf %153, %156 : vector<32x32xf32>
    %158 = math.exp %157 : vector<32x32xf32>
    %cst_91 = arith.constant dense<0.000000e+00> : vector<32xf32>
    %159 = vector.multi_reduction <add>, %158, %cst_91 [1] : vector<32x32xf32> to vector<32xf32>
    %160 = vector.shape_cast %159 : vector<32xf32> to vector<32x1xf32>
    %161 = tpu.reciprocal %160 {approx = true} : vector<32x1xf32> -> vector<32x1xf32>
    %162 = vector.broadcast %161 : vector<32x1xf32> to vector<32x32xf32>
    %163 = arith.mulf %158, %162 : vector<32x32xf32>
    %cst_92 = arith.constant dense<0.000000e+00> : vector<32x8xf32>
    %164 = tpu.matmul %163, %148, %cst_92 {dimension_numbers = #tpu.dot_dimension_numbers<[1], [0], [0], [1], [0, 0, 1, 1], [], []>} : vector<32x32xf32>, vector<32x8xf32>, vector<32x8xf32> -> vector<32x8xf32>
    %c1_93 = arith.constant 1 : index
    %c0_94 = arith.constant 0 : index
    %c0_95 = arith.constant 0 : index
    %165 = vector.load %arg11[%c1_93, %c0_94, %c0_95] : memref<8x8x32xf32, #tpu.memory_space<vmem>>, vector<1x8x32xf32>
    %166 = vector.shape_cast %165 : vector<1x8x32xf32> to vector<8x32xf32>
    %cst_96 = arith.constant dense<0.000000e+00> : vector<32x32xf32>
    %167 = tpu.matmul %164, %166, %cst_96 {dimension_numbers = #tpu.dot_dimension_numbers<[1], [0], [0], [1], [0, 0, 1, 1], [], []>} : vector<32x8xf32>, vector<8x32xf32>, vector<32x32xf32> -> vector<32x32xf32>
    %168 = arith.addf %127, %167 : vector<32x32xf32>
    %c2_97 = arith.constant 2 : index
    %c0_98 = arith.constant 0 : index
    %c0_99 = arith.constant 0 : index
    %169 = vector.load %arg5[%c2_97, %c0_98, %c0_99] : memref<8x32x8xf32, #tpu.memory_space<vmem>>, vector<1x32x8xf32>
    %170 = vector.shape_cast %169 : vector<1x32x8xf32> to vector<32x8xf32>
    %cst_100 = arith.constant dense<0.000000e+00> : vector<32x8xf32>
    %171 = tpu.matmul %52, %170, %cst_100 {dimension_numbers = #tpu.dot_dimension_numbers<[1], [0], [0], [1], [0, 0, 1, 1], [], []>} : vector<32x32xf32>, vector<32x8xf32>, vector<32x8xf32> -> vector<32x8xf32>
    %c2_101 = arith.constant 2 : index
    %c0_102 = arith.constant 0 : index
    %c0_103 = arith.constant 0 : index
    %172 = vector.load %arg6[%c2_101, %c0_102, %c0_103] : memref<8x1x8xf32, #tpu.memory_space<vmem>>, vector<1x1x8xf32>
    %173 = vector.shape_cast %172 : vector<1x1x8xf32> to vector<1x8xf32>
    %174 = vector.broadcast %173 : vector<1x8xf32> to vector<32x8xf32>
    %175 = arith.addf %171, %174 : vector<32x8xf32>
    %c2_104 = arith.constant 2 : index
    %c0_105 = arith.constant 0 : index
    %c0_106 = arith.constant 0 : index
    %176 = vector.load %arg7[%c2_104, %c0_105, %c0_106] : memref<8x32x8xf32, #tpu.memory_space<vmem>>, vector<1x32x8xf32>
    %177 = vector.shape_cast %176 : vector<1x32x8xf32> to vector<32x8xf32>
    %cst_107 = arith.constant dense<0.000000e+00> : vector<32x8xf32>
    %178 = tpu.matmul %52, %177, %cst_107 {dimension_numbers = #tpu.dot_dimension_numbers<[1], [0], [0], [1], [0, 0, 1, 1], [], []>} : vector<32x32xf32>, vector<32x8xf32>, vector<32x8xf32> -> vector<32x8xf32>
    %c2_108 = arith.constant 2 : index
    %c0_109 = arith.constant 0 : index
    %c0_110 = arith.constant 0 : index
    %179 = vector.load %arg8[%c2_108, %c0_109, %c0_110] : memref<8x1x8xf32, #tpu.memory_space<vmem>>, vector<1x1x8xf32>
    %180 = vector.shape_cast %179 : vector<1x1x8xf32> to vector<1x8xf32>
    %181 = vector.broadcast %180 : vector<1x8xf32> to vector<32x8xf32>
    %182 = arith.addf %178, %181 : vector<32x8xf32>
    %c2_111 = arith.constant 2 : index
    %c0_112 = arith.constant 0 : index
    %c0_113 = arith.constant 0 : index
    %183 = vector.load %arg9[%c2_111, %c0_112, %c0_113] : memref<8x32x8xf32, #tpu.memory_space<vmem>>, vector<1x32x8xf32>
    %184 = vector.shape_cast %183 : vector<1x32x8xf32> to vector<32x8xf32>
    %cst_114 = arith.constant dense<0.000000e+00> : vector<32x8xf32>
    %185 = tpu.matmul %52, %184, %cst_114 {dimension_numbers = #tpu.dot_dimension_numbers<[1], [0], [0], [1], [0, 0, 1, 1], [], []>} : vector<32x32xf32>, vector<32x8xf32>, vector<32x8xf32> -> vector<32x8xf32>
    %c2_115 = arith.constant 2 : index
    %c0_116 = arith.constant 0 : index
    %c0_117 = arith.constant 0 : index
    %186 = vector.load %arg10[%c2_115, %c0_116, %c0_117] : memref<8x1x8xf32, #tpu.memory_space<vmem>>, vector<1x1x8xf32>
    %187 = vector.shape_cast %186 : vector<1x1x8xf32> to vector<1x8xf32>
    %188 = vector.broadcast %187 : vector<1x8xf32> to vector<32x8xf32>
    %189 = arith.addf %185, %188 : vector<32x8xf32>
    %cst_118 = arith.constant dense<0.000000e+00> : vector<32x32xf32>
    %190 = tpu.matmul %175, %182, %cst_118 {dimension_numbers = #tpu.dot_dimension_numbers<[1], [1], [0], [0], [0, 0, 1, 0], [], []>} : vector<32x8xf32>, vector<32x8xf32>, vector<32x32xf32> -> vector<32x32xf32>
    %cst_119 = arith.constant 0.353553385 : f32
    %191 = vector.broadcast %cst_119 : f32 to vector<32x32xf32>
    %192 = arith.mulf %190, %191 : vector<32x32xf32>
    %cst_120 = arith.constant -1.000000e+30 : f32
    %193 = vector.broadcast %cst_120 : f32 to vector<32x32xf32>
    %194 = arith.select %85, %192, %193 : vector<32x32xi1>, vector<32x32xf32>
    %cst_121 = arith.constant dense<0xFF800000> : vector<32xf32>
    %195 = vector.multi_reduction <maximumf>, %194, %cst_121 [1] : vector<32x32xf32> to vector<32xf32>
    %196 = vector.shape_cast %195 : vector<32xf32> to vector<32x1xf32>
    %197 = vector.broadcast %196 : vector<32x1xf32> to vector<32x32xf32>
    %198 = arith.subf %194, %197 : vector<32x32xf32>
    %199 = math.exp %198 : vector<32x32xf32>
    %cst_122 = arith.constant dense<0.000000e+00> : vector<32xf32>
    %200 = vector.multi_reduction <add>, %199, %cst_122 [1] : vector<32x32xf32> to vector<32xf32>
    %201 = vector.shape_cast %200 : vector<32xf32> to vector<32x1xf32>
    %202 = tpu.reciprocal %201 {approx = true} : vector<32x1xf32> -> vector<32x1xf32>
    %203 = vector.broadcast %202 : vector<32x1xf32> to vector<32x32xf32>
    %204 = arith.mulf %199, %203 : vector<32x32xf32>
    %cst_123 = arith.constant dense<0.000000e+00> : vector<32x8xf32>
    %205 = tpu.matmul %204, %189, %cst_123 {dimension_numbers = #tpu.dot_dimension_numbers<[1], [0], [0], [1], [0, 0, 1, 1], [], []>} : vector<32x32xf32>, vector<32x8xf32>, vector<32x8xf32> -> vector<32x8xf32>
    %c2_124 = arith.constant 2 : index
    %c0_125 = arith.constant 0 : index
    %c0_126 = arith.constant 0 : index
    %206 = vector.load %arg11[%c2_124, %c0_125, %c0_126] : memref<8x8x32xf32, #tpu.memory_space<vmem>>, vector<1x8x32xf32>
    %207 = vector.shape_cast %206 : vector<1x8x32xf32> to vector<8x32xf32>
    %cst_127 = arith.constant dense<0.000000e+00> : vector<32x32xf32>
    %208 = tpu.matmul %205, %207, %cst_127 {dimension_numbers = #tpu.dot_dimension_numbers<[1], [0], [0], [1], [0, 0, 1, 1], [], []>} : vector<32x8xf32>, vector<8x32xf32>, vector<32x32xf32> -> vector<32x32xf32>
    %209 = arith.addf %168, %208 : vector<32x32xf32>
    %c3 = arith.constant 3 : index
    %c0_128 = arith.constant 0 : index
    %c0_129 = arith.constant 0 : index
    %210 = vector.load %arg5[%c3, %c0_128, %c0_129] : memref<8x32x8xf32, #tpu.memory_space<vmem>>, vector<1x32x8xf32>
    %211 = vector.shape_cast %210 : vector<1x32x8xf32> to vector<32x8xf32>
    %cst_130 = arith.constant dense<0.000000e+00> : vector<32x8xf32>
    %212 = tpu.matmul %52, %211, %cst_130 {dimension_numbers = #tpu.dot_dimension_numbers<[1], [0], [0], [1], [0, 0, 1, 1], [], []>} : vector<32x32xf32>, vector<32x8xf32>, vector<32x8xf32> -> vector<32x8xf32>
    %c3_131 = arith.constant 3 : index
    %c0_132 = arith.constant 0 : index
    %c0_133 = arith.constant 0 : index
    %213 = vector.load %arg6[%c3_131, %c0_132, %c0_133] : memref<8x1x8xf32, #tpu.memory_space<vmem>>, vector<1x1x8xf32>
    %214 = vector.shape_cast %213 : vector<1x1x8xf32> to vector<1x8xf32>
    %215 = vector.broadcast %214 : vector<1x8xf32> to vector<32x8xf32>
    %216 = arith.addf %212, %215 : vector<32x8xf32>
    %c3_134 = arith.constant 3 : index
    %c0_135 = arith.constant 0 : index
    %c0_136 = arith.constant 0 : index
    %217 = vector.load %arg7[%c3_134, %c0_135, %c0_136] : memref<8x32x8xf32, #tpu.memory_space<vmem>>, vector<1x32x8xf32>
    %218 = vector.shape_cast %217 : vector<1x32x8xf32> to vector<32x8xf32>
    %cst_137 = arith.constant dense<0.000000e+00> : vector<32x8xf32>
    %219 = tpu.matmul %52, %218, %cst_137 {dimension_numbers = #tpu.dot_dimension_numbers<[1], [0], [0], [1], [0, 0, 1, 1], [], []>} : vector<32x32xf32>, vector<32x8xf32>, vector<32x8xf32> -> vector<32x8xf32>
    %c3_138 = arith.constant 3 : index
    %c0_139 = arith.constant 0 : index
    %c0_140 = arith.constant 0 : index
    %220 = vector.load %arg8[%c3_138, %c0_139, %c0_140] : memref<8x1x8xf32, #tpu.memory_space<vmem>>, vector<1x1x8xf32>
    %221 = vector.shape_cast %220 : vector<1x1x8xf32> to vector<1x8xf32>
    %222 = vector.broadcast %221 : vector<1x8xf32> to vector<32x8xf32>
    %223 = arith.addf %219, %222 : vector<32x8xf32>
    %c3_141 = arith.constant 3 : index
    %c0_142 = arith.constant 0 : index
    %c0_143 = arith.constant 0 : index
    %224 = vector.load %arg9[%c3_141, %c0_142, %c0_143] : memref<8x32x8xf32, #tpu.memory_space<vmem>>, vector<1x32x8xf32>
    %225 = vector.shape_cast %224 : vector<1x32x8xf32> to vector<32x8xf32>
    %cst_144 = arith.constant dense<0.000000e+00> : vector<32x8xf32>
    %226 = tpu.matmul %52, %225, %cst_144 {dimension_numbers = #tpu.dot_dimension_numbers<[1], [0], [0], [1], [0, 0, 1, 1], [], []>} : vector<32x32xf32>, vector<32x8xf32>, vector<32x8xf32> -> vector<32x8xf32>
    %c3_145 = arith.constant 3 : index
    %c0_146 = arith.constant 0 : index
    %c0_147 = arith.constant 0 : index
    %227 = vector.load %arg10[%c3_145, %c0_146, %c0_147] : memref<8x1x8xf32, #tpu.memory_space<vmem>>, vector<1x1x8xf32>
    %228 = vector.shape_cast %227 : vector<1x1x8xf32> to vector<1x8xf32>
    %229 = vector.broadcast %228 : vector<1x8xf32> to vector<32x8xf32>
    %230 = arith.addf %226, %229 : vector<32x8xf32>
    %cst_148 = arith.constant dense<0.000000e+00> : vector<32x32xf32>
    %231 = tpu.matmul %216, %223, %cst_148 {dimension_numbers = #tpu.dot_dimension_numbers<[1], [1], [0], [0], [0, 0, 1, 0], [], []>} : vector<32x8xf32>, vector<32x8xf32>, vector<32x32xf32> -> vector<32x32xf32>
    %cst_149 = arith.constant 0.353553385 : f32
    %232 = vector.broadcast %cst_149 : f32 to vector<32x32xf32>
    %233 = arith.mulf %231, %232 : vector<32x32xf32>
    %cst_150 = arith.constant -1.000000e+30 : f32
    %234 = vector.broadcast %cst_150 : f32 to vector<32x32xf32>
    %235 = arith.select %85, %233, %234 : vector<32x32xi1>, vector<32x32xf32>
    %cst_151 = arith.constant dense<0xFF800000> : vector<32xf32>
    %236 = vector.multi_reduction <maximumf>, %235, %cst_151 [1] : vector<32x32xf32> to vector<32xf32>
    %237 = vector.shape_cast %236 : vector<32xf32> to vector<32x1xf32>
    %238 = vector.broadcast %237 : vector<32x1xf32> to vector<32x32xf32>
    %239 = arith.subf %235, %238 : vector<32x32xf32>
    %240 = math.exp %239 : vector<32x32xf32>
    %cst_152 = arith.constant dense<0.000000e+00> : vector<32xf32>
    %241 = vector.multi_reduction <add>, %240, %cst_152 [1] : vector<32x32xf32> to vector<32xf32>
    %242 = vector.shape_cast %241 : vector<32xf32> to vector<32x1xf32>
    %243 = tpu.reciprocal %242 {approx = true} : vector<32x1xf32> -> vector<32x1xf32>
    %244 = vector.broadcast %243 : vector<32x1xf32> to vector<32x32xf32>
    %245 = arith.mulf %240, %244 : vector<32x32xf32>
    %cst_153 = arith.constant dense<0.000000e+00> : vector<32x8xf32>
    %246 = tpu.matmul %245, %230, %cst_153 {dimension_numbers = #tpu.dot_dimension_numbers<[1], [0], [0], [1], [0, 0, 1, 1], [], []>} : vector<32x32xf32>, vector<32x8xf32>, vector<32x8xf32> -> vector<32x8xf32>
    %c3_154 = arith.constant 3 : index
    %c0_155 = arith.constant 0 : index
    %c0_156 = arith.constant 0 : index
    %247 = vector.load %arg11[%c3_154, %c0_155, %c0_156] : memref<8x8x32xf32, #tpu.memory_space<vmem>>, vector<1x8x32xf32>
    %248 = vector.shape_cast %247 : vector<1x8x32xf32> to vector<8x32xf32>
    %cst_157 = arith.constant dense<0.000000e+00> : vector<32x32xf32>
    %249 = tpu.matmul %246, %248, %cst_157 {dimension_numbers = #tpu.dot_dimension_numbers<[1], [0], [0], [1], [0, 0, 1, 1], [], []>} : vector<32x8xf32>, vector<8x32xf32>, vector<32x32xf32> -> vector<32x32xf32>
    %250 = arith.addf %209, %249 : vector<32x32xf32>
    %c0_158 = arith.constant 0 : index
    %c0_159 = arith.constant 0 : index
    %c0_160 = arith.constant 0 : index
    %251 = vector.load %arg12[%c0_158, %c0_159, %c0_160] : memref<2x1x32xf32, #tpu.memory_space<vmem>>, vector<1x1x32xf32>
    %252 = vector.shape_cast %251 : vector<1x1x32xf32> to vector<1x32xf32>
    %253 = vector.broadcast %252 : vector<1x32xf32> to vector<32x32xf32>
    %254 = arith.addf %250, %253 : vector<32x32xf32>
    %255 = arith.addf %52, %254 : vector<32x32xf32>
    %c0_161 = arith.constant 0 : index
    %c0_162 = arith.constant 0 : index
    %c0_163 = arith.constant 0 : index
    %256 = vector.load %arg13[%c0_161, %c0_162, %c0_163] : memref<2x1x32xf32, #tpu.memory_space<vmem>>, vector<1x1x32xf32>
    %257 = vector.shape_cast %256 : vector<1x1x32xf32> to vector<1x32xf32>
    %c0_164 = arith.constant 0 : index
    %c0_165 = arith.constant 0 : index
    %c0_166 = arith.constant 0 : index
    %258 = vector.load %arg14[%c0_164, %c0_165, %c0_166] : memref<2x1x32xf32, #tpu.memory_space<vmem>>, vector<1x1x32xf32>
    %259 = vector.shape_cast %258 : vector<1x1x32xf32> to vector<1x32xf32>
    %cst_167 = arith.constant dense<0.000000e+00> : vector<32xf32>
    %260 = vector.multi_reduction <add>, %255, %cst_167 [1] : vector<32x32xf32> to vector<32xf32>
    %261 = vector.shape_cast %260 : vector<32xf32> to vector<32x1xf32>
    %cst_168 = arith.constant 3.200000e+01 : f32
    %262 = vector.broadcast %cst_168 : f32 to vector<32x1xf32>
    %263 = arith.divf %261, %262 : vector<32x1xf32>
    %264 = vector.broadcast %263 : vector<32x1xf32> to vector<32x32xf32>
    %265 = arith.subf %255, %264 : vector<32x32xf32>
    %266 = arith.mulf %265, %265 : vector<32x32xf32>
    %cst_169 = arith.constant dense<0.000000e+00> : vector<32xf32>
    %267 = vector.multi_reduction <add>, %266, %cst_169 [1] : vector<32x32xf32> to vector<32xf32>
    %268 = vector.shape_cast %267 : vector<32xf32> to vector<32x1xf32>
    %cst_170 = arith.constant 3.200000e+01 : f32
    %269 = vector.broadcast %cst_170 : f32 to vector<32x1xf32>
    %270 = arith.divf %268, %269 : vector<32x1xf32>
    %271 = vector.broadcast %263 : vector<32x1xf32> to vector<32x32xf32>
    %272 = arith.subf %255, %271 : vector<32x32xf32>
    %cst_171 = arith.constant 9.99999974E-6 : f32
    %273 = vector.broadcast %cst_171 : f32 to vector<32x1xf32>
    %274 = arith.addf %270, %273 : vector<32x1xf32>
    %275 = math.rsqrt %274 : vector<32x1xf32>
    %276 = vector.broadcast %275 : vector<32x1xf32> to vector<32x32xf32>
    %277 = arith.mulf %272, %276 : vector<32x32xf32>
    %278 = vector.broadcast %257 : vector<1x32xf32> to vector<32x32xf32>
    %279 = arith.mulf %277, %278 : vector<32x32xf32>
    %280 = vector.broadcast %259 : vector<1x32xf32> to vector<32x32xf32>
    %281 = arith.addf %279, %280 : vector<32x32xf32>
    %282 = arith.truncf %281 : vector<32x32xf32> to vector<32x32xbf16>
    %cst_172 = arith.constant 0.000000e+00 : f32
    %283 = vector.broadcast %cst_172 : f32 to vector<32x32xf32>
    %c0_i32_173 = arith.constant 0 : i32
    %c0_i32_174 = arith.constant 0 : i32
    %284 = arith.addi %c0_i32_174, %c0_i32_173 : i32
    %285 = arith.index_cast %284 : i32 to index
    %c0_175 = arith.constant 0 : index
    %c0_176 = arith.constant 0 : index
    %286 = vector.load %arg17[%285, %c0_175, %c0_176] : memref<8x32x512xbf16, #tpu.memory_space<vmem>>, vector<1x32x512xbf16>
    %287 = vector.shape_cast %286 : vector<1x32x512xbf16> to vector<32x512xbf16>
    %cst_177 = arith.constant dense<0.000000e+00> : vector<32x512xf32>
    %288 = tpu.matmul %282, %287, %cst_177 {dimension_numbers = #tpu.dot_dimension_numbers<[1], [0], [0], [1], [0, 0, 1, 1], [], []>} : vector<32x32xbf16>, vector<32x512xbf16>, vector<32x512xf32> -> vector<32x512xf32>
    %289 = arith.index_cast %284 : i32 to index
    %c0_178 = arith.constant 0 : index
    %c0_179 = arith.constant 0 : index
    %290 = vector.load %arg18[%289, %c0_178, %c0_179] : memref<8x1x512xf32, #tpu.memory_space<vmem>>, vector<1x1x512xf32>
    %291 = vector.shape_cast %290 : vector<1x1x512xf32> to vector<1x512xf32>
    %292 = vector.broadcast %291 : vector<1x512xf32> to vector<32x512xf32>
    %293 = arith.addf %288, %292 : vector<32x512xf32>
    %cst_180 = arith.constant 0.000000e+00 : f32
    %294 = vector.broadcast %cst_180 : f32 to vector<32x512xf32>
    %295 = arith.maximumf %293, %294 : vector<32x512xf32>
    %296 = arith.truncf %295 : vector<32x512xf32> to vector<32x512xbf16>
    %297 = arith.index_cast %284 : i32 to index
    %c0_181 = arith.constant 0 : index
    %c0_182 = arith.constant 0 : index
    %298 = vector.load %arg19[%297, %c0_181, %c0_182] : memref<8x512x32xbf16, #tpu.memory_space<vmem>>, vector<1x512x32xbf16>
    %299 = vector.shape_cast %298 : vector<1x512x32xbf16> to vector<512x32xbf16>
    %cst_183 = arith.constant dense<0.000000e+00> : vector<32x32xf32>
    %300 = tpu.matmul %296, %299, %cst_183 {dimension_numbers = #tpu.dot_dimension_numbers<[1], [0], [0], [1], [0, 0, 1, 1], [], []>} : vector<32x512xbf16>, vector<512x32xbf16>, vector<32x32xf32> -> vector<32x32xf32>
    %301 = arith.addf %283, %300 : vector<32x32xf32>
    %c1_i32_184 = arith.constant 1 : i32
    %c0_i32_185 = arith.constant 0 : i32
    %302 = arith.addi %c0_i32_185, %c1_i32_184 : i32
    %303 = arith.index_cast %302 : i32 to index
    %c0_186 = arith.constant 0 : index
    %c0_187 = arith.constant 0 : index
    %304 = vector.load %arg17[%303, %c0_186, %c0_187] : memref<8x32x512xbf16, #tpu.memory_space<vmem>>, vector<1x32x512xbf16>
    %305 = vector.shape_cast %304 : vector<1x32x512xbf16> to vector<32x512xbf16>
    %cst_188 = arith.constant dense<0.000000e+00> : vector<32x512xf32>
    %306 = tpu.matmul %282, %305, %cst_188 {dimension_numbers = #tpu.dot_dimension_numbers<[1], [0], [0], [1], [0, 0, 1, 1], [], []>} : vector<32x32xbf16>, vector<32x512xbf16>, vector<32x512xf32> -> vector<32x512xf32>
    %307 = arith.index_cast %302 : i32 to index
    %c0_189 = arith.constant 0 : index
    %c0_190 = arith.constant 0 : index
    %308 = vector.load %arg18[%307, %c0_189, %c0_190] : memref<8x1x512xf32, #tpu.memory_space<vmem>>, vector<1x1x512xf32>
    %309 = vector.shape_cast %308 : vector<1x1x512xf32> to vector<1x512xf32>
    %310 = vector.broadcast %309 : vector<1x512xf32> to vector<32x512xf32>
    %311 = arith.addf %306, %310 : vector<32x512xf32>
    %cst_191 = arith.constant 0.000000e+00 : f32
    %312 = vector.broadcast %cst_191 : f32 to vector<32x512xf32>
    %313 = arith.maximumf %311, %312 : vector<32x512xf32>
    %314 = arith.truncf %313 : vector<32x512xf32> to vector<32x512xbf16>
    %315 = arith.index_cast %302 : i32 to index
    %c0_192 = arith.constant 0 : index
    %c0_193 = arith.constant 0 : index
    %316 = vector.load %arg19[%315, %c0_192, %c0_193] : memref<8x512x32xbf16, #tpu.memory_space<vmem>>, vector<1x512x32xbf16>
    %317 = vector.shape_cast %316 : vector<1x512x32xbf16> to vector<512x32xbf16>
    %cst_194 = arith.constant dense<0.000000e+00> : vector<32x32xf32>
    %318 = tpu.matmul %314, %317, %cst_194 {dimension_numbers = #tpu.dot_dimension_numbers<[1], [0], [0], [1], [0, 0, 1, 1], [], []>} : vector<32x512xbf16>, vector<512x32xbf16>, vector<32x32xf32> -> vector<32x32xf32>
    %319 = arith.addf %301, %318 : vector<32x32xf32>
    %c2_i32_195 = arith.constant 2 : i32
    %c0_i32_196 = arith.constant 0 : i32
    %320 = arith.addi %c0_i32_196, %c2_i32_195 : i32
    %321 = arith.index_cast %320 : i32 to index
    %c0_197 = arith.constant 0 : index
    %c0_198 = arith.constant 0 : index
    %322 = vector.load %arg17[%321, %c0_197, %c0_198] : memref<8x32x512xbf16, #tpu.memory_space<vmem>>, vector<1x32x512xbf16>
    %323 = vector.shape_cast %322 : vector<1x32x512xbf16> to vector<32x512xbf16>
    %cst_199 = arith.constant dense<0.000000e+00> : vector<32x512xf32>
    %324 = tpu.matmul %282, %323, %cst_199 {dimension_numbers = #tpu.dot_dimension_numbers<[1], [0], [0], [1], [0, 0, 1, 1], [], []>} : vector<32x32xbf16>, vector<32x512xbf16>, vector<32x512xf32> -> vector<32x512xf32>
    %325 = arith.index_cast %320 : i32 to index
    %c0_200 = arith.constant 0 : index
    %c0_201 = arith.constant 0 : index
    %326 = vector.load %arg18[%325, %c0_200, %c0_201] : memref<8x1x512xf32, #tpu.memory_space<vmem>>, vector<1x1x512xf32>
    %327 = vector.shape_cast %326 : vector<1x1x512xf32> to vector<1x512xf32>
    %328 = vector.broadcast %327 : vector<1x512xf32> to vector<32x512xf32>
    %329 = arith.addf %324, %328 : vector<32x512xf32>
    %cst_202 = arith.constant 0.000000e+00 : f32
    %330 = vector.broadcast %cst_202 : f32 to vector<32x512xf32>
    %331 = arith.maximumf %329, %330 : vector<32x512xf32>
    %332 = arith.truncf %331 : vector<32x512xf32> to vector<32x512xbf16>
    %333 = arith.index_cast %320 : i32 to index
    %c0_203 = arith.constant 0 : index
    %c0_204 = arith.constant 0 : index
    %334 = vector.load %arg19[%333, %c0_203, %c0_204] : memref<8x512x32xbf16, #tpu.memory_space<vmem>>, vector<1x512x32xbf16>
    %335 = vector.shape_cast %334 : vector<1x512x32xbf16> to vector<512x32xbf16>
    %cst_205 = arith.constant dense<0.000000e+00> : vector<32x32xf32>
    %336 = tpu.matmul %332, %335, %cst_205 {dimension_numbers = #tpu.dot_dimension_numbers<[1], [0], [0], [1], [0, 0, 1, 1], [], []>} : vector<32x512xbf16>, vector<512x32xbf16>, vector<32x32xf32> -> vector<32x32xf32>
    %337 = arith.addf %319, %336 : vector<32x32xf32>
    %c3_i32 = arith.constant 3 : i32
    %c0_i32_206 = arith.constant 0 : i32
    %338 = arith.addi %c0_i32_206, %c3_i32 : i32
    %339 = arith.index_cast %338 : i32 to index
    %c0_207 = arith.constant 0 : index
    %c0_208 = arith.constant 0 : index
    %340 = vector.load %arg17[%339, %c0_207, %c0_208] : memref<8x32x512xbf16, #tpu.memory_space<vmem>>, vector<1x32x512xbf16>
    %341 = vector.shape_cast %340 : vector<1x32x512xbf16> to vector<32x512xbf16>
    %cst_209 = arith.constant dense<0.000000e+00> : vector<32x512xf32>
    %342 = tpu.matmul %282, %341, %cst_209 {dimension_numbers = #tpu.dot_dimension_numbers<[1], [0], [0], [1], [0, 0, 1, 1], [], []>} : vector<32x32xbf16>, vector<32x512xbf16>, vector<32x512xf32> -> vector<32x512xf32>
    %343 = arith.index_cast %338 : i32 to index
    %c0_210 = arith.constant 0 : index
    %c0_211 = arith.constant 0 : index
    %344 = vector.load %arg18[%343, %c0_210, %c0_211] : memref<8x1x512xf32, #tpu.memory_space<vmem>>, vector<1x1x512xf32>
    %345 = vector.shape_cast %344 : vector<1x1x512xf32> to vector<1x512xf32>
    %346 = vector.broadcast %345 : vector<1x512xf32> to vector<32x512xf32>
    %347 = arith.addf %342, %346 : vector<32x512xf32>
    %cst_212 = arith.constant 0.000000e+00 : f32
    %348 = vector.broadcast %cst_212 : f32 to vector<32x512xf32>
    %349 = arith.maximumf %347, %348 : vector<32x512xf32>
    %350 = arith.truncf %349 : vector<32x512xf32> to vector<32x512xbf16>
    %351 = arith.index_cast %338 : i32 to index
    %c0_213 = arith.constant 0 : index
    %c0_214 = arith.constant 0 : index
    %352 = vector.load %arg19[%351, %c0_213, %c0_214] : memref<8x512x32xbf16, #tpu.memory_space<vmem>>, vector<1x512x32xbf16>
    %353 = vector.shape_cast %352 : vector<1x512x32xbf16> to vector<512x32xbf16>
    %cst_215 = arith.constant dense<0.000000e+00> : vector<32x32xf32>
    %354 = tpu.matmul %350, %353, %cst_215 {dimension_numbers = #tpu.dot_dimension_numbers<[1], [0], [0], [1], [0, 0, 1, 1], [], []>} : vector<32x512xbf16>, vector<512x32xbf16>, vector<32x32xf32> -> vector<32x32xf32>
    %355 = arith.addf %337, %354 : vector<32x32xf32>
    %c4_i32 = arith.constant 4 : i32
    %c0_216 = arith.constant 0 : index
    %c0_217 = arith.constant 0 : index
    %c0_218 = arith.constant 0 : index
    %356 = vector.load %arg20[%c0_216, %c0_217, %c0_218] : memref<2x1x32xf32, #tpu.memory_space<vmem>>, vector<1x1x32xf32>
    %357 = vector.shape_cast %356 : vector<1x1x32xf32> to vector<1x32xf32>
    %358 = vector.broadcast %357 : vector<1x32xf32> to vector<32x32xf32>
    %359 = arith.addf %355, %358 : vector<32x32xf32>
    %360 = arith.addf %281, %359 : vector<32x32xf32>
    %c0_219 = arith.constant 0 : index
    %c0_220 = arith.constant 0 : index
    %c0_221 = arith.constant 0 : index
    %361 = vector.load %arg15[%c0_219, %c0_220, %c0_221] : memref<2x1x32xf32, #tpu.memory_space<vmem>>, vector<1x1x32xf32>
    %362 = vector.shape_cast %361 : vector<1x1x32xf32> to vector<1x32xf32>
    %c0_222 = arith.constant 0 : index
    %c0_223 = arith.constant 0 : index
    %c0_224 = arith.constant 0 : index
    %363 = vector.load %arg16[%c0_222, %c0_223, %c0_224] : memref<2x1x32xf32, #tpu.memory_space<vmem>>, vector<1x1x32xf32>
    %364 = vector.shape_cast %363 : vector<1x1x32xf32> to vector<1x32xf32>
    %cst_225 = arith.constant dense<0.000000e+00> : vector<32xf32>
    %365 = vector.multi_reduction <add>, %360, %cst_225 [1] : vector<32x32xf32> to vector<32xf32>
    %366 = vector.shape_cast %365 : vector<32xf32> to vector<32x1xf32>
    %cst_226 = arith.constant 3.200000e+01 : f32
    %367 = vector.broadcast %cst_226 : f32 to vector<32x1xf32>
    %368 = arith.divf %366, %367 : vector<32x1xf32>
    %369 = vector.broadcast %368 : vector<32x1xf32> to vector<32x32xf32>
    %370 = arith.subf %360, %369 : vector<32x32xf32>
    %371 = arith.mulf %370, %370 : vector<32x32xf32>
    %cst_227 = arith.constant dense<0.000000e+00> : vector<32xf32>
    %372 = vector.multi_reduction <add>, %371, %cst_227 [1] : vector<32x32xf32> to vector<32xf32>
    %373 = vector.shape_cast %372 : vector<32xf32> to vector<32x1xf32>
    %cst_228 = arith.constant 3.200000e+01 : f32
    %374 = vector.broadcast %cst_228 : f32 to vector<32x1xf32>
    %375 = arith.divf %373, %374 : vector<32x1xf32>
    %376 = vector.broadcast %368 : vector<32x1xf32> to vector<32x32xf32>
    %377 = arith.subf %360, %376 : vector<32x32xf32>
    %cst_229 = arith.constant 9.99999974E-6 : f32
    %378 = vector.broadcast %cst_229 : f32 to vector<32x1xf32>
    %379 = arith.addf %375, %378 : vector<32x1xf32>
    %380 = math.rsqrt %379 : vector<32x1xf32>
    %381 = vector.broadcast %380 : vector<32x1xf32> to vector<32x32xf32>
    %382 = arith.mulf %377, %381 : vector<32x32xf32>
    %383 = vector.broadcast %362 : vector<1x32xf32> to vector<32x32xf32>
    %384 = arith.mulf %382, %383 : vector<32x32xf32>
    %385 = vector.broadcast %364 : vector<1x32xf32> to vector<32x32xf32>
    %386 = arith.addf %384, %385 : vector<32x32xf32>
    %cst_230 = arith.constant 0.000000e+00 : f32
    %387 = vector.broadcast %cst_230 : f32 to vector<32x32xf32>
    %c4 = arith.constant 4 : index
    %c0_231 = arith.constant 0 : index
    %c0_232 = arith.constant 0 : index
    %388 = vector.load %arg5[%c4, %c0_231, %c0_232] : memref<8x32x8xf32, #tpu.memory_space<vmem>>, vector<1x32x8xf32>
    %389 = vector.shape_cast %388 : vector<1x32x8xf32> to vector<32x8xf32>
    %cst_233 = arith.constant dense<0.000000e+00> : vector<32x8xf32>
    %390 = tpu.matmul %386, %389, %cst_233 {dimension_numbers = #tpu.dot_dimension_numbers<[1], [0], [0], [1], [0, 0, 1, 1], [], []>} : vector<32x32xf32>, vector<32x8xf32>, vector<32x8xf32> -> vector<32x8xf32>
    %c4_234 = arith.constant 4 : index
    %c0_235 = arith.constant 0 : index
    %c0_236 = arith.constant 0 : index
    %391 = vector.load %arg6[%c4_234, %c0_235, %c0_236] : memref<8x1x8xf32, #tpu.memory_space<vmem>>, vector<1x1x8xf32>
    %392 = vector.shape_cast %391 : vector<1x1x8xf32> to vector<1x8xf32>
    %393 = vector.broadcast %392 : vector<1x8xf32> to vector<32x8xf32>
    %394 = arith.addf %390, %393 : vector<32x8xf32>
    %c4_237 = arith.constant 4 : index
    %c0_238 = arith.constant 0 : index
    %c0_239 = arith.constant 0 : index
    %395 = vector.load %arg7[%c4_237, %c0_238, %c0_239] : memref<8x32x8xf32, #tpu.memory_space<vmem>>, vector<1x32x8xf32>
    %396 = vector.shape_cast %395 : vector<1x32x8xf32> to vector<32x8xf32>
    %cst_240 = arith.constant dense<0.000000e+00> : vector<32x8xf32>
    %397 = tpu.matmul %386, %396, %cst_240 {dimension_numbers = #tpu.dot_dimension_numbers<[1], [0], [0], [1], [0, 0, 1, 1], [], []>} : vector<32x32xf32>, vector<32x8xf32>, vector<32x8xf32> -> vector<32x8xf32>
    %c4_241 = arith.constant 4 : index
    %c0_242 = arith.constant 0 : index
    %c0_243 = arith.constant 0 : index
    %398 = vector.load %arg8[%c4_241, %c0_242, %c0_243] : memref<8x1x8xf32, #tpu.memory_space<vmem>>, vector<1x1x8xf32>
    %399 = vector.shape_cast %398 : vector<1x1x8xf32> to vector<1x8xf32>
    %400 = vector.broadcast %399 : vector<1x8xf32> to vector<32x8xf32>
    %401 = arith.addf %397, %400 : vector<32x8xf32>
    %c4_244 = arith.constant 4 : index
    %c0_245 = arith.constant 0 : index
    %c0_246 = arith.constant 0 : index
    %402 = vector.load %arg9[%c4_244, %c0_245, %c0_246] : memref<8x32x8xf32, #tpu.memory_space<vmem>>, vector<1x32x8xf32>
    %403 = vector.shape_cast %402 : vector<1x32x8xf32> to vector<32x8xf32>
    %cst_247 = arith.constant dense<0.000000e+00> : vector<32x8xf32>
    %404 = tpu.matmul %386, %403, %cst_247 {dimension_numbers = #tpu.dot_dimension_numbers<[1], [0], [0], [1], [0, 0, 1, 1], [], []>} : vector<32x32xf32>, vector<32x8xf32>, vector<32x8xf32> -> vector<32x8xf32>
    %c4_248 = arith.constant 4 : index
    %c0_249 = arith.constant 0 : index
    %c0_250 = arith.constant 0 : index
    %405 = vector.load %arg10[%c4_248, %c0_249, %c0_250] : memref<8x1x8xf32, #tpu.memory_space<vmem>>, vector<1x1x8xf32>
    %406 = vector.shape_cast %405 : vector<1x1x8xf32> to vector<1x8xf32>
    %407 = vector.broadcast %406 : vector<1x8xf32> to vector<32x8xf32>
    %408 = arith.addf %404, %407 : vector<32x8xf32>
    %cst_251 = arith.constant dense<0.000000e+00> : vector<32x32xf32>
    %409 = tpu.matmul %394, %401, %cst_251 {dimension_numbers = #tpu.dot_dimension_numbers<[1], [1], [0], [0], [0, 0, 1, 0], [], []>} : vector<32x8xf32>, vector<32x8xf32>, vector<32x32xf32> -> vector<32x32xf32>
    %cst_252 = arith.constant 0.353553385 : f32
    %410 = vector.broadcast %cst_252 : f32 to vector<32x32xf32>
    %411 = arith.mulf %409, %410 : vector<32x32xf32>
    %cst_253 = arith.constant -1.000000e+30 : f32
    %412 = vector.broadcast %cst_253 : f32 to vector<32x32xf32>
    %413 = arith.select %85, %411, %412 : vector<32x32xi1>, vector<32x32xf32>
    %cst_254 = arith.constant dense<0xFF800000> : vector<32xf32>
    %414 = vector.multi_reduction <maximumf>, %413, %cst_254 [1] : vector<32x32xf32> to vector<32xf32>
    %415 = vector.shape_cast %414 : vector<32xf32> to vector<32x1xf32>
    %416 = vector.broadcast %415 : vector<32x1xf32> to vector<32x32xf32>
    %417 = arith.subf %413, %416 : vector<32x32xf32>
    %418 = math.exp %417 : vector<32x32xf32>
    %cst_255 = arith.constant dense<0.000000e+00> : vector<32xf32>
    %419 = vector.multi_reduction <add>, %418, %cst_255 [1] : vector<32x32xf32> to vector<32xf32>
    %420 = vector.shape_cast %419 : vector<32xf32> to vector<32x1xf32>
    %421 = tpu.reciprocal %420 {approx = true} : vector<32x1xf32> -> vector<32x1xf32>
    %422 = vector.broadcast %421 : vector<32x1xf32> to vector<32x32xf32>
    %423 = arith.mulf %418, %422 : vector<32x32xf32>
    %cst_256 = arith.constant dense<0.000000e+00> : vector<32x8xf32>
    %424 = tpu.matmul %423, %408, %cst_256 {dimension_numbers = #tpu.dot_dimension_numbers<[1], [0], [0], [1], [0, 0, 1, 1], [], []>} : vector<32x32xf32>, vector<32x8xf32>, vector<32x8xf32> -> vector<32x8xf32>
    %c4_257 = arith.constant 4 : index
    %c0_258 = arith.constant 0 : index
    %c0_259 = arith.constant 0 : index
    %425 = vector.load %arg11[%c4_257, %c0_258, %c0_259] : memref<8x8x32xf32, #tpu.memory_space<vmem>>, vector<1x8x32xf32>
    %426 = vector.shape_cast %425 : vector<1x8x32xf32> to vector<8x32xf32>
    %cst_260 = arith.constant dense<0.000000e+00> : vector<32x32xf32>
    %427 = tpu.matmul %424, %426, %cst_260 {dimension_numbers = #tpu.dot_dimension_numbers<[1], [0], [0], [1], [0, 0, 1, 1], [], []>} : vector<32x8xf32>, vector<8x32xf32>, vector<32x32xf32> -> vector<32x32xf32>
    %428 = arith.addf %387, %427 : vector<32x32xf32>
    %c5 = arith.constant 5 : index
    %c0_261 = arith.constant 0 : index
    %c0_262 = arith.constant 0 : index
    %429 = vector.load %arg5[%c5, %c0_261, %c0_262] : memref<8x32x8xf32, #tpu.memory_space<vmem>>, vector<1x32x8xf32>
    %430 = vector.shape_cast %429 : vector<1x32x8xf32> to vector<32x8xf32>
    %cst_263 = arith.constant dense<0.000000e+00> : vector<32x8xf32>
    %431 = tpu.matmul %386, %430, %cst_263 {dimension_numbers = #tpu.dot_dimension_numbers<[1], [0], [0], [1], [0, 0, 1, 1], [], []>} : vector<32x32xf32>, vector<32x8xf32>, vector<32x8xf32> -> vector<32x8xf32>
    %c5_264 = arith.constant 5 : index
    %c0_265 = arith.constant 0 : index
    %c0_266 = arith.constant 0 : index
    %432 = vector.load %arg6[%c5_264, %c0_265, %c0_266] : memref<8x1x8xf32, #tpu.memory_space<vmem>>, vector<1x1x8xf32>
    %433 = vector.shape_cast %432 : vector<1x1x8xf32> to vector<1x8xf32>
    %434 = vector.broadcast %433 : vector<1x8xf32> to vector<32x8xf32>
    %435 = arith.addf %431, %434 : vector<32x8xf32>
    %c5_267 = arith.constant 5 : index
    %c0_268 = arith.constant 0 : index
    %c0_269 = arith.constant 0 : index
    %436 = vector.load %arg7[%c5_267, %c0_268, %c0_269] : memref<8x32x8xf32, #tpu.memory_space<vmem>>, vector<1x32x8xf32>
    %437 = vector.shape_cast %436 : vector<1x32x8xf32> to vector<32x8xf32>
    %cst_270 = arith.constant dense<0.000000e+00> : vector<32x8xf32>
    %438 = tpu.matmul %386, %437, %cst_270 {dimension_numbers = #tpu.dot_dimension_numbers<[1], [0], [0], [1], [0, 0, 1, 1], [], []>} : vector<32x32xf32>, vector<32x8xf32>, vector<32x8xf32> -> vector<32x8xf32>
    %c5_271 = arith.constant 5 : index
    %c0_272 = arith.constant 0 : index
    %c0_273 = arith.constant 0 : index
    %439 = vector.load %arg8[%c5_271, %c0_272, %c0_273] : memref<8x1x8xf32, #tpu.memory_space<vmem>>, vector<1x1x8xf32>
    %440 = vector.shape_cast %439 : vector<1x1x8xf32> to vector<1x8xf32>
    %441 = vector.broadcast %440 : vector<1x8xf32> to vector<32x8xf32>
    %442 = arith.addf %438, %441 : vector<32x8xf32>
    %c5_274 = arith.constant 5 : index
    %c0_275 = arith.constant 0 : index
    %c0_276 = arith.constant 0 : index
    %443 = vector.load %arg9[%c5_274, %c0_275, %c0_276] : memref<8x32x8xf32, #tpu.memory_space<vmem>>, vector<1x32x8xf32>
    %444 = vector.shape_cast %443 : vector<1x32x8xf32> to vector<32x8xf32>
    %cst_277 = arith.constant dense<0.000000e+00> : vector<32x8xf32>
    %445 = tpu.matmul %386, %444, %cst_277 {dimension_numbers = #tpu.dot_dimension_numbers<[1], [0], [0], [1], [0, 0, 1, 1], [], []>} : vector<32x32xf32>, vector<32x8xf32>, vector<32x8xf32> -> vector<32x8xf32>
    %c5_278 = arith.constant 5 : index
    %c0_279 = arith.constant 0 : index
    %c0_280 = arith.constant 0 : index
    %446 = vector.load %arg10[%c5_278, %c0_279, %c0_280] : memref<8x1x8xf32, #tpu.memory_space<vmem>>, vector<1x1x8xf32>
    %447 = vector.shape_cast %446 : vector<1x1x8xf32> to vector<1x8xf32>
    %448 = vector.broadcast %447 : vector<1x8xf32> to vector<32x8xf32>
    %449 = arith.addf %445, %448 : vector<32x8xf32>
    %cst_281 = arith.constant dense<0.000000e+00> : vector<32x32xf32>
    %450 = tpu.matmul %435, %442, %cst_281 {dimension_numbers = #tpu.dot_dimension_numbers<[1], [1], [0], [0], [0, 0, 1, 0], [], []>} : vector<32x8xf32>, vector<32x8xf32>, vector<32x32xf32> -> vector<32x32xf32>
    %cst_282 = arith.constant 0.353553385 : f32
    %451 = vector.broadcast %cst_282 : f32 to vector<32x32xf32>
    %452 = arith.mulf %450, %451 : vector<32x32xf32>
    %cst_283 = arith.constant -1.000000e+30 : f32
    %453 = vector.broadcast %cst_283 : f32 to vector<32x32xf32>
    %454 = arith.select %85, %452, %453 : vector<32x32xi1>, vector<32x32xf32>
    %cst_284 = arith.constant dense<0xFF800000> : vector<32xf32>
    %455 = vector.multi_reduction <maximumf>, %454, %cst_284 [1] : vector<32x32xf32> to vector<32xf32>
    %456 = vector.shape_cast %455 : vector<32xf32> to vector<32x1xf32>
    %457 = vector.broadcast %456 : vector<32x1xf32> to vector<32x32xf32>
    %458 = arith.subf %454, %457 : vector<32x32xf32>
    %459 = math.exp %458 : vector<32x32xf32>
    %cst_285 = arith.constant dense<0.000000e+00> : vector<32xf32>
    %460 = vector.multi_reduction <add>, %459, %cst_285 [1] : vector<32x32xf32> to vector<32xf32>
    %461 = vector.shape_cast %460 : vector<32xf32> to vector<32x1xf32>
    %462 = tpu.reciprocal %461 {approx = true} : vector<32x1xf32> -> vector<32x1xf32>
    %463 = vector.broadcast %462 : vector<32x1xf32> to vector<32x32xf32>
    %464 = arith.mulf %459, %463 : vector<32x32xf32>
    %cst_286 = arith.constant dense<0.000000e+00> : vector<32x8xf32>
    %465 = tpu.matmul %464, %449, %cst_286 {dimension_numbers = #tpu.dot_dimension_numbers<[1], [0], [0], [1], [0, 0, 1, 1], [], []>} : vector<32x32xf32>, vector<32x8xf32>, vector<32x8xf32> -> vector<32x8xf32>
    %c5_287 = arith.constant 5 : index
    %c0_288 = arith.constant 0 : index
    %c0_289 = arith.constant 0 : index
    %466 = vector.load %arg11[%c5_287, %c0_288, %c0_289] : memref<8x8x32xf32, #tpu.memory_space<vmem>>, vector<1x8x32xf32>
    %467 = vector.shape_cast %466 : vector<1x8x32xf32> to vector<8x32xf32>
    %cst_290 = arith.constant dense<0.000000e+00> : vector<32x32xf32>
    %468 = tpu.matmul %465, %467, %cst_290 {dimension_numbers = #tpu.dot_dimension_numbers<[1], [0], [0], [1], [0, 0, 1, 1], [], []>} : vector<32x8xf32>, vector<8x32xf32>, vector<32x32xf32> -> vector<32x32xf32>
    %469 = arith.addf %428, %468 : vector<32x32xf32>
    %c6 = arith.constant 6 : index
    %c0_291 = arith.constant 0 : index
    %c0_292 = arith.constant 0 : index
    %470 = vector.load %arg5[%c6, %c0_291, %c0_292] : memref<8x32x8xf32, #tpu.memory_space<vmem>>, vector<1x32x8xf32>
    %471 = vector.shape_cast %470 : vector<1x32x8xf32> to vector<32x8xf32>
    %cst_293 = arith.constant dense<0.000000e+00> : vector<32x8xf32>
    %472 = tpu.matmul %386, %471, %cst_293 {dimension_numbers = #tpu.dot_dimension_numbers<[1], [0], [0], [1], [0, 0, 1, 1], [], []>} : vector<32x32xf32>, vector<32x8xf32>, vector<32x8xf32> -> vector<32x8xf32>
    %c6_294 = arith.constant 6 : index
    %c0_295 = arith.constant 0 : index
    %c0_296 = arith.constant 0 : index
    %473 = vector.load %arg6[%c6_294, %c0_295, %c0_296] : memref<8x1x8xf32, #tpu.memory_space<vmem>>, vector<1x1x8xf32>
    %474 = vector.shape_cast %473 : vector<1x1x8xf32> to vector<1x8xf32>
    %475 = vector.broadcast %474 : vector<1x8xf32> to vector<32x8xf32>
    %476 = arith.addf %472, %475 : vector<32x8xf32>
    %c6_297 = arith.constant 6 : index
    %c0_298 = arith.constant 0 : index
    %c0_299 = arith.constant 0 : index
    %477 = vector.load %arg7[%c6_297, %c0_298, %c0_299] : memref<8x32x8xf32, #tpu.memory_space<vmem>>, vector<1x32x8xf32>
    %478 = vector.shape_cast %477 : vector<1x32x8xf32> to vector<32x8xf32>
    %cst_300 = arith.constant dense<0.000000e+00> : vector<32x8xf32>
    %479 = tpu.matmul %386, %478, %cst_300 {dimension_numbers = #tpu.dot_dimension_numbers<[1], [0], [0], [1], [0, 0, 1, 1], [], []>} : vector<32x32xf32>, vector<32x8xf32>, vector<32x8xf32> -> vector<32x8xf32>
    %c6_301 = arith.constant 6 : index
    %c0_302 = arith.constant 0 : index
    %c0_303 = arith.constant 0 : index
    %480 = vector.load %arg8[%c6_301, %c0_302, %c0_303] : memref<8x1x8xf32, #tpu.memory_space<vmem>>, vector<1x1x8xf32>
    %481 = vector.shape_cast %480 : vector<1x1x8xf32> to vector<1x8xf32>
    %482 = vector.broadcast %481 : vector<1x8xf32> to vector<32x8xf32>
    %483 = arith.addf %479, %482 : vector<32x8xf32>
    %c6_304 = arith.constant 6 : index
    %c0_305 = arith.constant 0 : index
    %c0_306 = arith.constant 0 : index
    %484 = vector.load %arg9[%c6_304, %c0_305, %c0_306] : memref<8x32x8xf32, #tpu.memory_space<vmem>>, vector<1x32x8xf32>
    %485 = vector.shape_cast %484 : vector<1x32x8xf32> to vector<32x8xf32>
    %cst_307 = arith.constant dense<0.000000e+00> : vector<32x8xf32>
    %486 = tpu.matmul %386, %485, %cst_307 {dimension_numbers = #tpu.dot_dimension_numbers<[1], [0], [0], [1], [0, 0, 1, 1], [], []>} : vector<32x32xf32>, vector<32x8xf32>, vector<32x8xf32> -> vector<32x8xf32>
    %c6_308 = arith.constant 6 : index
    %c0_309 = arith.constant 0 : index
    %c0_310 = arith.constant 0 : index
    %487 = vector.load %arg10[%c6_308, %c0_309, %c0_310] : memref<8x1x8xf32, #tpu.memory_space<vmem>>, vector<1x1x8xf32>
    %488 = vector.shape_cast %487 : vector<1x1x8xf32> to vector<1x8xf32>
    %489 = vector.broadcast %488 : vector<1x8xf32> to vector<32x8xf32>
    %490 = arith.addf %486, %489 : vector<32x8xf32>
    %cst_311 = arith.constant dense<0.000000e+00> : vector<32x32xf32>
    %491 = tpu.matmul %476, %483, %cst_311 {dimension_numbers = #tpu.dot_dimension_numbers<[1], [1], [0], [0], [0, 0, 1, 0], [], []>} : vector<32x8xf32>, vector<32x8xf32>, vector<32x32xf32> -> vector<32x32xf32>
    %cst_312 = arith.constant 0.353553385 : f32
    %492 = vector.broadcast %cst_312 : f32 to vector<32x32xf32>
    %493 = arith.mulf %491, %492 : vector<32x32xf32>
    %cst_313 = arith.constant -1.000000e+30 : f32
    %494 = vector.broadcast %cst_313 : f32 to vector<32x32xf32>
    %495 = arith.select %85, %493, %494 : vector<32x32xi1>, vector<32x32xf32>
    %cst_314 = arith.constant dense<0xFF800000> : vector<32xf32>
    %496 = vector.multi_reduction <maximumf>, %495, %cst_314 [1] : vector<32x32xf32> to vector<32xf32>
    %497 = vector.shape_cast %496 : vector<32xf32> to vector<32x1xf32>
    %498 = vector.broadcast %497 : vector<32x1xf32> to vector<32x32xf32>
    %499 = arith.subf %495, %498 : vector<32x32xf32>
    %500 = math.exp %499 : vector<32x32xf32>
    %cst_315 = arith.constant dense<0.000000e+00> : vector<32xf32>
    %501 = vector.multi_reduction <add>, %500, %cst_315 [1] : vector<32x32xf32> to vector<32xf32>
    %502 = vector.shape_cast %501 : vector<32xf32> to vector<32x1xf32>
    %503 = tpu.reciprocal %502 {approx = true} : vector<32x1xf32> -> vector<32x1xf32>
    %504 = vector.broadcast %503 : vector<32x1xf32> to vector<32x32xf32>
    %505 = arith.mulf %500, %504 : vector<32x32xf32>
    %cst_316 = arith.constant dense<0.000000e+00> : vector<32x8xf32>
    %506 = tpu.matmul %505, %490, %cst_316 {dimension_numbers = #tpu.dot_dimension_numbers<[1], [0], [0], [1], [0, 0, 1, 1], [], []>} : vector<32x32xf32>, vector<32x8xf32>, vector<32x8xf32> -> vector<32x8xf32>
    %c6_317 = arith.constant 6 : index
    %c0_318 = arith.constant 0 : index
    %c0_319 = arith.constant 0 : index
    %507 = vector.load %arg11[%c6_317, %c0_318, %c0_319] : memref<8x8x32xf32, #tpu.memory_space<vmem>>, vector<1x8x32xf32>
    %508 = vector.shape_cast %507 : vector<1x8x32xf32> to vector<8x32xf32>
    %cst_320 = arith.constant dense<0.000000e+00> : vector<32x32xf32>
    %509 = tpu.matmul %506, %508, %cst_320 {dimension_numbers = #tpu.dot_dimension_numbers<[1], [0], [0], [1], [0, 0, 1, 1], [], []>} : vector<32x8xf32>, vector<8x32xf32>, vector<32x32xf32> -> vector<32x32xf32>
    %510 = arith.addf %469, %509 : vector<32x32xf32>
    %c7 = arith.constant 7 : index
    %c0_321 = arith.constant 0 : index
    %c0_322 = arith.constant 0 : index
    %511 = vector.load %arg5[%c7, %c0_321, %c0_322] : memref<8x32x8xf32, #tpu.memory_space<vmem>>, vector<1x32x8xf32>
    %512 = vector.shape_cast %511 : vector<1x32x8xf32> to vector<32x8xf32>
    %cst_323 = arith.constant dense<0.000000e+00> : vector<32x8xf32>
    %513 = tpu.matmul %386, %512, %cst_323 {dimension_numbers = #tpu.dot_dimension_numbers<[1], [0], [0], [1], [0, 0, 1, 1], [], []>} : vector<32x32xf32>, vector<32x8xf32>, vector<32x8xf32> -> vector<32x8xf32>
    %c7_324 = arith.constant 7 : index
    %c0_325 = arith.constant 0 : index
    %c0_326 = arith.constant 0 : index
    %514 = vector.load %arg6[%c7_324, %c0_325, %c0_326] : memref<8x1x8xf32, #tpu.memory_space<vmem>>, vector<1x1x8xf32>
    %515 = vector.shape_cast %514 : vector<1x1x8xf32> to vector<1x8xf32>
    %516 = vector.broadcast %515 : vector<1x8xf32> to vector<32x8xf32>
    %517 = arith.addf %513, %516 : vector<32x8xf32>
    %c7_327 = arith.constant 7 : index
    %c0_328 = arith.constant 0 : index
    %c0_329 = arith.constant 0 : index
    %518 = vector.load %arg7[%c7_327, %c0_328, %c0_329] : memref<8x32x8xf32, #tpu.memory_space<vmem>>, vector<1x32x8xf32>
    %519 = vector.shape_cast %518 : vector<1x32x8xf32> to vector<32x8xf32>
    %cst_330 = arith.constant dense<0.000000e+00> : vector<32x8xf32>
    %520 = tpu.matmul %386, %519, %cst_330 {dimension_numbers = #tpu.dot_dimension_numbers<[1], [0], [0], [1], [0, 0, 1, 1], [], []>} : vector<32x32xf32>, vector<32x8xf32>, vector<32x8xf32> -> vector<32x8xf32>
    %c7_331 = arith.constant 7 : index
    %c0_332 = arith.constant 0 : index
    %c0_333 = arith.constant 0 : index
    %521 = vector.load %arg8[%c7_331, %c0_332, %c0_333] : memref<8x1x8xf32, #tpu.memory_space<vmem>>, vector<1x1x8xf32>
    %522 = vector.shape_cast %521 : vector<1x1x8xf32> to vector<1x8xf32>
    %523 = vector.broadcast %522 : vector<1x8xf32> to vector<32x8xf32>
    %524 = arith.addf %520, %523 : vector<32x8xf32>
    %c7_334 = arith.constant 7 : index
    %c0_335 = arith.constant 0 : index
    %c0_336 = arith.constant 0 : index
    %525 = vector.load %arg9[%c7_334, %c0_335, %c0_336] : memref<8x32x8xf32, #tpu.memory_space<vmem>>, vector<1x32x8xf32>
    %526 = vector.shape_cast %525 : vector<1x32x8xf32> to vector<32x8xf32>
    %cst_337 = arith.constant dense<0.000000e+00> : vector<32x8xf32>
    %527 = tpu.matmul %386, %526, %cst_337 {dimension_numbers = #tpu.dot_dimension_numbers<[1], [0], [0], [1], [0, 0, 1, 1], [], []>} : vector<32x32xf32>, vector<32x8xf32>, vector<32x8xf32> -> vector<32x8xf32>
    %c7_338 = arith.constant 7 : index
    %c0_339 = arith.constant 0 : index
    %c0_340 = arith.constant 0 : index
    %528 = vector.load %arg10[%c7_338, %c0_339, %c0_340] : memref<8x1x8xf32, #tpu.memory_space<vmem>>, vector<1x1x8xf32>
    %529 = vector.shape_cast %528 : vector<1x1x8xf32> to vector<1x8xf32>
    %530 = vector.broadcast %529 : vector<1x8xf32> to vector<32x8xf32>
    %531 = arith.addf %527, %530 : vector<32x8xf32>
    %cst_341 = arith.constant dense<0.000000e+00> : vector<32x32xf32>
    %532 = tpu.matmul %517, %524, %cst_341 {dimension_numbers = #tpu.dot_dimension_numbers<[1], [1], [0], [0], [0, 0, 1, 0], [], []>} : vector<32x8xf32>, vector<32x8xf32>, vector<32x32xf32> -> vector<32x32xf32>
    %cst_342 = arith.constant 0.353553385 : f32
    %533 = vector.broadcast %cst_342 : f32 to vector<32x32xf32>
    %534 = arith.mulf %532, %533 : vector<32x32xf32>
    %cst_343 = arith.constant -1.000000e+30 : f32
    %535 = vector.broadcast %cst_343 : f32 to vector<32x32xf32>
    %536 = arith.select %85, %534, %535 : vector<32x32xi1>, vector<32x32xf32>
    %cst_344 = arith.constant dense<0xFF800000> : vector<32xf32>
    %537 = vector.multi_reduction <maximumf>, %536, %cst_344 [1] : vector<32x32xf32> to vector<32xf32>
    %538 = vector.shape_cast %537 : vector<32xf32> to vector<32x1xf32>
    %539 = vector.broadcast %538 : vector<32x1xf32> to vector<32x32xf32>
    %540 = arith.subf %536, %539 : vector<32x32xf32>
    %541 = math.exp %540 : vector<32x32xf32>
    %cst_345 = arith.constant dense<0.000000e+00> : vector<32xf32>
    %542 = vector.multi_reduction <add>, %541, %cst_345 [1] : vector<32x32xf32> to vector<32xf32>
    %543 = vector.shape_cast %542 : vector<32xf32> to vector<32x1xf32>
    %544 = tpu.reciprocal %543 {approx = true} : vector<32x1xf32> -> vector<32x1xf32>
    %545 = vector.broadcast %544 : vector<32x1xf32> to vector<32x32xf32>
    %546 = arith.mulf %541, %545 : vector<32x32xf32>
    %cst_346 = arith.constant dense<0.000000e+00> : vector<32x8xf32>
    %547 = tpu.matmul %546, %531, %cst_346 {dimension_numbers = #tpu.dot_dimension_numbers<[1], [0], [0], [1], [0, 0, 1, 1], [], []>} : vector<32x32xf32>, vector<32x8xf32>, vector<32x8xf32> -> vector<32x8xf32>
    %c7_347 = arith.constant 7 : index
    %c0_348 = arith.constant 0 : index
    %c0_349 = arith.constant 0 : index
    %548 = vector.load %arg11[%c7_347, %c0_348, %c0_349] : memref<8x8x32xf32, #tpu.memory_space<vmem>>, vector<1x8x32xf32>
    %549 = vector.shape_cast %548 : vector<1x8x32xf32> to vector<8x32xf32>
    %cst_350 = arith.constant dense<0.000000e+00> : vector<32x32xf32>
    %550 = tpu.matmul %547, %549, %cst_350 {dimension_numbers = #tpu.dot_dimension_numbers<[1], [0], [0], [1], [0, 0, 1, 1], [], []>} : vector<32x8xf32>, vector<8x32xf32>, vector<32x32xf32> -> vector<32x32xf32>
    %551 = arith.addf %510, %550 : vector<32x32xf32>
    %c1_351 = arith.constant 1 : index
    %c0_352 = arith.constant 0 : index
    %c0_353 = arith.constant 0 : index
    %552 = vector.load %arg12[%c1_351, %c0_352, %c0_353] : memref<2x1x32xf32, #tpu.memory_space<vmem>>, vector<1x1x32xf32>
    %553 = vector.shape_cast %552 : vector<1x1x32xf32> to vector<1x32xf32>
    %554 = vector.broadcast %553 : vector<1x32xf32> to vector<32x32xf32>
    %555 = arith.addf %551, %554 : vector<32x32xf32>
    %556 = arith.addf %386, %555 : vector<32x32xf32>
    %c1_354 = arith.constant 1 : index
    %c0_355 = arith.constant 0 : index
    %c0_356 = arith.constant 0 : index
    %557 = vector.load %arg13[%c1_354, %c0_355, %c0_356] : memref<2x1x32xf32, #tpu.memory_space<vmem>>, vector<1x1x32xf32>
    %558 = vector.shape_cast %557 : vector<1x1x32xf32> to vector<1x32xf32>
    %c1_357 = arith.constant 1 : index
    %c0_358 = arith.constant 0 : index
    %c0_359 = arith.constant 0 : index
    %559 = vector.load %arg14[%c1_357, %c0_358, %c0_359] : memref<2x1x32xf32, #tpu.memory_space<vmem>>, vector<1x1x32xf32>
    %560 = vector.shape_cast %559 : vector<1x1x32xf32> to vector<1x32xf32>
    %cst_360 = arith.constant dense<0.000000e+00> : vector<32xf32>
    %561 = vector.multi_reduction <add>, %556, %cst_360 [1] : vector<32x32xf32> to vector<32xf32>
    %562 = vector.shape_cast %561 : vector<32xf32> to vector<32x1xf32>
    %cst_361 = arith.constant 3.200000e+01 : f32
    %563 = vector.broadcast %cst_361 : f32 to vector<32x1xf32>
    %564 = arith.divf %562, %563 : vector<32x1xf32>
    %565 = vector.broadcast %564 : vector<32x1xf32> to vector<32x32xf32>
    %566 = arith.subf %556, %565 : vector<32x32xf32>
    %567 = arith.mulf %566, %566 : vector<32x32xf32>
    %cst_362 = arith.constant dense<0.000000e+00> : vector<32xf32>
    %568 = vector.multi_reduction <add>, %567, %cst_362 [1] : vector<32x32xf32> to vector<32xf32>
    %569 = vector.shape_cast %568 : vector<32xf32> to vector<32x1xf32>
    %cst_363 = arith.constant 3.200000e+01 : f32
    %570 = vector.broadcast %cst_363 : f32 to vector<32x1xf32>
    %571 = arith.divf %569, %570 : vector<32x1xf32>
    %572 = vector.broadcast %564 : vector<32x1xf32> to vector<32x32xf32>
    %573 = arith.subf %556, %572 : vector<32x32xf32>
    %cst_364 = arith.constant 9.99999974E-6 : f32
    %574 = vector.broadcast %cst_364 : f32 to vector<32x1xf32>
    %575 = arith.addf %571, %574 : vector<32x1xf32>
    %576 = math.rsqrt %575 : vector<32x1xf32>
    %577 = vector.broadcast %576 : vector<32x1xf32> to vector<32x32xf32>
    %578 = arith.mulf %573, %577 : vector<32x32xf32>
    %579 = vector.broadcast %558 : vector<1x32xf32> to vector<32x32xf32>
    %580 = arith.mulf %578, %579 : vector<32x32xf32>
    %581 = vector.broadcast %560 : vector<1x32xf32> to vector<32x32xf32>
    %582 = arith.addf %580, %581 : vector<32x32xf32>
    %583 = arith.truncf %582 : vector<32x32xf32> to vector<32x32xbf16>
    %cst_365 = arith.constant 0.000000e+00 : f32
    %584 = vector.broadcast %cst_365 : f32 to vector<32x32xf32>
    %c0_i32_366 = arith.constant 0 : i32
    %c4_i32_367 = arith.constant 4 : i32
    %585 = arith.addi %c4_i32_367, %c0_i32_366 : i32
    %586 = arith.index_cast %585 : i32 to index
    %c0_368 = arith.constant 0 : index
    %c0_369 = arith.constant 0 : index
    %587 = vector.load %arg17[%586, %c0_368, %c0_369] : memref<8x32x512xbf16, #tpu.memory_space<vmem>>, vector<1x32x512xbf16>
    %588 = vector.shape_cast %587 : vector<1x32x512xbf16> to vector<32x512xbf16>
    %cst_370 = arith.constant dense<0.000000e+00> : vector<32x512xf32>
    %589 = tpu.matmul %583, %588, %cst_370 {dimension_numbers = #tpu.dot_dimension_numbers<[1], [0], [0], [1], [0, 0, 1, 1], [], []>} : vector<32x32xbf16>, vector<32x512xbf16>, vector<32x512xf32> -> vector<32x512xf32>
    %590 = arith.index_cast %585 : i32 to index
    %c0_371 = arith.constant 0 : index
    %c0_372 = arith.constant 0 : index
    %591 = vector.load %arg18[%590, %c0_371, %c0_372] : memref<8x1x512xf32, #tpu.memory_space<vmem>>, vector<1x1x512xf32>
    %592 = vector.shape_cast %591 : vector<1x1x512xf32> to vector<1x512xf32>
    %593 = vector.broadcast %592 : vector<1x512xf32> to vector<32x512xf32>
    %594 = arith.addf %589, %593 : vector<32x512xf32>
    %cst_373 = arith.constant 0.000000e+00 : f32
    %595 = vector.broadcast %cst_373 : f32 to vector<32x512xf32>
    %596 = arith.maximumf %594, %595 : vector<32x512xf32>
    %597 = arith.truncf %596 : vector<32x512xf32> to vector<32x512xbf16>
    %598 = arith.index_cast %585 : i32 to index
    %c0_374 = arith.constant 0 : index
    %c0_375 = arith.constant 0 : index
    %599 = vector.load %arg19[%598, %c0_374, %c0_375] : memref<8x512x32xbf16, #tpu.memory_space<vmem>>, vector<1x512x32xbf16>
    %600 = vector.shape_cast %599 : vector<1x512x32xbf16> to vector<512x32xbf16>
    %cst_376 = arith.constant dense<0.000000e+00> : vector<32x32xf32>
    %601 = tpu.matmul %597, %600, %cst_376 {dimension_numbers = #tpu.dot_dimension_numbers<[1], [0], [0], [1], [0, 0, 1, 1], [], []>} : vector<32x512xbf16>, vector<512x32xbf16>, vector<32x32xf32> -> vector<32x32xf32>
    %602 = arith.addf %584, %601 : vector<32x32xf32>
    %c1_i32_377 = arith.constant 1 : i32
    %c4_i32_378 = arith.constant 4 : i32
    %603 = arith.addi %c4_i32_378, %c1_i32_377 : i32
    %604 = arith.index_cast %603 : i32 to index
    %c0_379 = arith.constant 0 : index
    %c0_380 = arith.constant 0 : index
    %605 = vector.load %arg17[%604, %c0_379, %c0_380] : memref<8x32x512xbf16, #tpu.memory_space<vmem>>, vector<1x32x512xbf16>
    %606 = vector.shape_cast %605 : vector<1x32x512xbf16> to vector<32x512xbf16>
    %cst_381 = arith.constant dense<0.000000e+00> : vector<32x512xf32>
    %607 = tpu.matmul %583, %606, %cst_381 {dimension_numbers = #tpu.dot_dimension_numbers<[1], [0], [0], [1], [0, 0, 1, 1], [], []>} : vector<32x32xbf16>, vector<32x512xbf16>, vector<32x512xf32> -> vector<32x512xf32>
    %608 = arith.index_cast %603 : i32 to index
    %c0_382 = arith.constant 0 : index
    %c0_383 = arith.constant 0 : index
    %609 = vector.load %arg18[%608, %c0_382, %c0_383] : memref<8x1x512xf32, #tpu.memory_space<vmem>>, vector<1x1x512xf32>
    %610 = vector.shape_cast %609 : vector<1x1x512xf32> to vector<1x512xf32>
    %611 = vector.broadcast %610 : vector<1x512xf32> to vector<32x512xf32>
    %612 = arith.addf %607, %611 : vector<32x512xf32>
    %cst_384 = arith.constant 0.000000e+00 : f32
    %613 = vector.broadcast %cst_384 : f32 to vector<32x512xf32>
    %614 = arith.maximumf %612, %613 : vector<32x512xf32>
    %615 = arith.truncf %614 : vector<32x512xf32> to vector<32x512xbf16>
    %616 = arith.index_cast %603 : i32 to index
    %c0_385 = arith.constant 0 : index
    %c0_386 = arith.constant 0 : index
    %617 = vector.load %arg19[%616, %c0_385, %c0_386] : memref<8x512x32xbf16, #tpu.memory_space<vmem>>, vector<1x512x32xbf16>
    %618 = vector.shape_cast %617 : vector<1x512x32xbf16> to vector<512x32xbf16>
    %cst_387 = arith.constant dense<0.000000e+00> : vector<32x32xf32>
    %619 = tpu.matmul %615, %618, %cst_387 {dimension_numbers = #tpu.dot_dimension_numbers<[1], [0], [0], [1], [0, 0, 1, 1], [], []>} : vector<32x512xbf16>, vector<512x32xbf16>, vector<32x32xf32> -> vector<32x32xf32>
    %620 = arith.addf %602, %619 : vector<32x32xf32>
    %c2_i32_388 = arith.constant 2 : i32
    %c4_i32_389 = arith.constant 4 : i32
    %621 = arith.addi %c4_i32_389, %c2_i32_388 : i32
    %622 = arith.index_cast %621 : i32 to index
    %c0_390 = arith.constant 0 : index
    %c0_391 = arith.constant 0 : index
    %623 = vector.load %arg17[%622, %c0_390, %c0_391] : memref<8x32x512xbf16, #tpu.memory_space<vmem>>, vector<1x32x512xbf16>
    %624 = vector.shape_cast %623 : vector<1x32x512xbf16> to vector<32x512xbf16>
    %cst_392 = arith.constant dense<0.000000e+00> : vector<32x512xf32>
    %625 = tpu.matmul %583, %624, %cst_392 {dimension_numbers = #tpu.dot_dimension_numbers<[1], [0], [0], [1], [0, 0, 1, 1], [], []>} : vector<32x32xbf16>, vector<32x512xbf16>, vector<32x512xf32> -> vector<32x512xf32>
    %626 = arith.index_cast %621 : i32 to index
    %c0_393 = arith.constant 0 : index
    %c0_394 = arith.constant 0 : index
    %627 = vector.load %arg18[%626, %c0_393, %c0_394] : memref<8x1x512xf32, #tpu.memory_space<vmem>>, vector<1x1x512xf32>
    %628 = vector.shape_cast %627 : vector<1x1x512xf32> to vector<1x512xf32>
    %629 = vector.broadcast %628 : vector<1x512xf32> to vector<32x512xf32>
    %630 = arith.addf %625, %629 : vector<32x512xf32>
    %cst_395 = arith.constant 0.000000e+00 : f32
    %631 = vector.broadcast %cst_395 : f32 to vector<32x512xf32>
    %632 = arith.maximumf %630, %631 : vector<32x512xf32>
    %633 = arith.truncf %632 : vector<32x512xf32> to vector<32x512xbf16>
    %634 = arith.index_cast %621 : i32 to index
    %c0_396 = arith.constant 0 : index
    %c0_397 = arith.constant 0 : index
    %635 = vector.load %arg19[%634, %c0_396, %c0_397] : memref<8x512x32xbf16, #tpu.memory_space<vmem>>, vector<1x512x32xbf16>
    %636 = vector.shape_cast %635 : vector<1x512x32xbf16> to vector<512x32xbf16>
    %cst_398 = arith.constant dense<0.000000e+00> : vector<32x32xf32>
    %637 = tpu.matmul %633, %636, %cst_398 {dimension_numbers = #tpu.dot_dimension_numbers<[1], [0], [0], [1], [0, 0, 1, 1], [], []>} : vector<32x512xbf16>, vector<512x32xbf16>, vector<32x32xf32> -> vector<32x32xf32>
    %638 = arith.addf %620, %637 : vector<32x32xf32>
    %c3_i32_399 = arith.constant 3 : i32
    %c4_i32_400 = arith.constant 4 : i32
    %639 = arith.addi %c4_i32_400, %c3_i32_399 : i32
    %640 = arith.index_cast %639 : i32 to index
    %c0_401 = arith.constant 0 : index
    %c0_402 = arith.constant 0 : index
    %641 = vector.load %arg17[%640, %c0_401, %c0_402] : memref<8x32x512xbf16, #tpu.memory_space<vmem>>, vector<1x32x512xbf16>
    %642 = vector.shape_cast %641 : vector<1x32x512xbf16> to vector<32x512xbf16>
    %cst_403 = arith.constant dense<0.000000e+00> : vector<32x512xf32>
    %643 = tpu.matmul %583, %642, %cst_403 {dimension_numbers = #tpu.dot_dimension_numbers<[1], [0], [0], [1], [0, 0, 1, 1], [], []>} : vector<32x32xbf16>, vector<32x512xbf16>, vector<32x512xf32> -> vector<32x512xf32>
    %644 = arith.index_cast %639 : i32 to index
    %c0_404 = arith.constant 0 : index
    %c0_405 = arith.constant 0 : index
    %645 = vector.load %arg18[%644, %c0_404, %c0_405] : memref<8x1x512xf32, #tpu.memory_space<vmem>>, vector<1x1x512xf32>
    %646 = vector.shape_cast %645 : vector<1x1x512xf32> to vector<1x512xf32>
    %647 = vector.broadcast %646 : vector<1x512xf32> to vector<32x512xf32>
    %648 = arith.addf %643, %647 : vector<32x512xf32>
    %cst_406 = arith.constant 0.000000e+00 : f32
    %649 = vector.broadcast %cst_406 : f32 to vector<32x512xf32>
    %650 = arith.maximumf %648, %649 : vector<32x512xf32>
    %651 = arith.truncf %650 : vector<32x512xf32> to vector<32x512xbf16>
    %652 = arith.index_cast %639 : i32 to index
    %c0_407 = arith.constant 0 : index
    %c0_408 = arith.constant 0 : index
    %653 = vector.load %arg19[%652, %c0_407, %c0_408] : memref<8x512x32xbf16, #tpu.memory_space<vmem>>, vector<1x512x32xbf16>
    %654 = vector.shape_cast %653 : vector<1x512x32xbf16> to vector<512x32xbf16>
    %cst_409 = arith.constant dense<0.000000e+00> : vector<32x32xf32>
    %655 = tpu.matmul %651, %654, %cst_409 {dimension_numbers = #tpu.dot_dimension_numbers<[1], [0], [0], [1], [0, 0, 1, 1], [], []>} : vector<32x512xbf16>, vector<512x32xbf16>, vector<32x32xf32> -> vector<32x32xf32>
    %656 = arith.addf %638, %655 : vector<32x32xf32>
    %c4_i32_410 = arith.constant 4 : i32
    %c1_411 = arith.constant 1 : index
    %c0_412 = arith.constant 0 : index
    %c0_413 = arith.constant 0 : index
    %657 = vector.load %arg20[%c1_411, %c0_412, %c0_413] : memref<2x1x32xf32, #tpu.memory_space<vmem>>, vector<1x1x32xf32>
    %658 = vector.shape_cast %657 : vector<1x1x32xf32> to vector<1x32xf32>
    %659 = vector.broadcast %658 : vector<1x32xf32> to vector<32x32xf32>
    %660 = arith.addf %656, %659 : vector<32x32xf32>
    %661 = arith.addf %582, %660 : vector<32x32xf32>
    %c1_414 = arith.constant 1 : index
    %c0_415 = arith.constant 0 : index
    %c0_416 = arith.constant 0 : index
    %662 = vector.load %arg15[%c1_414, %c0_415, %c0_416] : memref<2x1x32xf32, #tpu.memory_space<vmem>>, vector<1x1x32xf32>
    %663 = vector.shape_cast %662 : vector<1x1x32xf32> to vector<1x32xf32>
    %c1_417 = arith.constant 1 : index
    %c0_418 = arith.constant 0 : index
    %c0_419 = arith.constant 0 : index
    %664 = vector.load %arg16[%c1_417, %c0_418, %c0_419] : memref<2x1x32xf32, #tpu.memory_space<vmem>>, vector<1x1x32xf32>
    %665 = vector.shape_cast %664 : vector<1x1x32xf32> to vector<1x32xf32>
    %cst_420 = arith.constant dense<0.000000e+00> : vector<32xf32>
    %666 = vector.multi_reduction <add>, %661, %cst_420 [1] : vector<32x32xf32> to vector<32xf32>
    %667 = vector.shape_cast %666 : vector<32xf32> to vector<32x1xf32>
    %cst_421 = arith.constant 3.200000e+01 : f32
    %668 = vector.broadcast %cst_421 : f32 to vector<32x1xf32>
    %669 = arith.divf %667, %668 : vector<32x1xf32>
    %670 = vector.broadcast %669 : vector<32x1xf32> to vector<32x32xf32>
    %671 = arith.subf %661, %670 : vector<32x32xf32>
    %672 = arith.mulf %671, %671 : vector<32x32xf32>
    %cst_422 = arith.constant dense<0.000000e+00> : vector<32xf32>
    %673 = vector.multi_reduction <add>, %672, %cst_422 [1] : vector<32x32xf32> to vector<32xf32>
    %674 = vector.shape_cast %673 : vector<32xf32> to vector<32x1xf32>
    %cst_423 = arith.constant 3.200000e+01 : f32
    %675 = vector.broadcast %cst_423 : f32 to vector<32x1xf32>
    %676 = arith.divf %674, %675 : vector<32x1xf32>
    %677 = vector.broadcast %669 : vector<32x1xf32> to vector<32x32xf32>
    %678 = arith.subf %661, %677 : vector<32x32xf32>
    %cst_424 = arith.constant 9.99999974E-6 : f32
    %679 = vector.broadcast %cst_424 : f32 to vector<32x1xf32>
    %680 = arith.addf %676, %679 : vector<32x1xf32>
    %681 = math.rsqrt %680 : vector<32x1xf32>
    %682 = vector.broadcast %681 : vector<32x1xf32> to vector<32x32xf32>
    %683 = arith.mulf %678, %682 : vector<32x32xf32>
    %684 = vector.broadcast %663 : vector<1x32xf32> to vector<32x32xf32>
    %685 = arith.mulf %683, %684 : vector<32x32xf32>
    %686 = vector.broadcast %665 : vector<1x32xf32> to vector<32x32xf32>
    %687 = arith.addf %685, %686 : vector<32x32xf32>
    %cst_425 = arith.constant 0.000000e+00 : f32
    %688 = vector.broadcast %cst_425 : f32 to vector<2x128xf32>
    %689 = vector.extract_strided_slice %687 {offsets = [0, 0], sizes = [2, 32], strides = [1, 1]} : vector<32x32xf32> to vector<2x32xf32>
    %c0_426 = arith.constant 0 : index
    %c0_427 = arith.constant 0 : index
    %c0_428 = arith.constant 0 : index
    %690 = vector.load %arg21[%c0_426, %c0_427, %c0_428] : memref<16x32x128xf32, #tpu.memory_space<vmem>>, vector<1x32x128xf32>
    %691 = vector.shape_cast %690 : vector<1x32x128xf32> to vector<32x128xf32>
    %cst_429 = arith.constant dense<0.000000e+00> : vector<2x128xf32>
    %692 = tpu.matmul %689, %691, %cst_429 {dimension_numbers = #tpu.dot_dimension_numbers<[1], [0], [0], [1], [0, 0, 1, 1], [], []>} : vector<2x32xf32>, vector<32x128xf32>, vector<2x128xf32> -> vector<2x128xf32>
    %693 = arith.addf %688, %692 : vector<2x128xf32>
    %694 = vector.extract_strided_slice %687 {offsets = [2, 0], sizes = [2, 32], strides = [1, 1]} : vector<32x32xf32> to vector<2x32xf32>
    %c1_430 = arith.constant 1 : index
    %c0_431 = arith.constant 0 : index
    %c0_432 = arith.constant 0 : index
    %695 = vector.load %arg21[%c1_430, %c0_431, %c0_432] : memref<16x32x128xf32, #tpu.memory_space<vmem>>, vector<1x32x128xf32>
    %696 = vector.shape_cast %695 : vector<1x32x128xf32> to vector<32x128xf32>
    %cst_433 = arith.constant dense<0.000000e+00> : vector<2x128xf32>
    %697 = tpu.matmul %694, %696, %cst_433 {dimension_numbers = #tpu.dot_dimension_numbers<[1], [0], [0], [1], [0, 0, 1, 1], [], []>} : vector<2x32xf32>, vector<32x128xf32>, vector<2x128xf32> -> vector<2x128xf32>
    %698 = arith.addf %693, %697 : vector<2x128xf32>
    %699 = vector.extract_strided_slice %687 {offsets = [4, 0], sizes = [2, 32], strides = [1, 1]} : vector<32x32xf32> to vector<2x32xf32>
    %c2_434 = arith.constant 2 : index
    %c0_435 = arith.constant 0 : index
    %c0_436 = arith.constant 0 : index
    %700 = vector.load %arg21[%c2_434, %c0_435, %c0_436] : memref<16x32x128xf32, #tpu.memory_space<vmem>>, vector<1x32x128xf32>
    %701 = vector.shape_cast %700 : vector<1x32x128xf32> to vector<32x128xf32>
    %cst_437 = arith.constant dense<0.000000e+00> : vector<2x128xf32>
    %702 = tpu.matmul %699, %701, %cst_437 {dimension_numbers = #tpu.dot_dimension_numbers<[1], [0], [0], [1], [0, 0, 1, 1], [], []>} : vector<2x32xf32>, vector<32x128xf32>, vector<2x128xf32> -> vector<2x128xf32>
    %703 = arith.addf %698, %702 : vector<2x128xf32>
    %704 = vector.extract_strided_slice %687 {offsets = [6, 0], sizes = [2, 32], strides = [1, 1]} : vector<32x32xf32> to vector<2x32xf32>
    %c3_438 = arith.constant 3 : index
    %c0_439 = arith.constant 0 : index
    %c0_440 = arith.constant 0 : index
    %705 = vector.load %arg21[%c3_438, %c0_439, %c0_440] : memref<16x32x128xf32, #tpu.memory_space<vmem>>, vector<1x32x128xf32>
    %706 = vector.shape_cast %705 : vector<1x32x128xf32> to vector<32x128xf32>
    %cst_441 = arith.constant dense<0.000000e+00> : vector<2x128xf32>
    %707 = tpu.matmul %704, %706, %cst_441 {dimension_numbers = #tpu.dot_dimension_numbers<[1], [0], [0], [1], [0, 0, 1, 1], [], []>} : vector<2x32xf32>, vector<32x128xf32>, vector<2x128xf32> -> vector<2x128xf32>
    %708 = arith.addf %703, %707 : vector<2x128xf32>
    %709 = vector.extract_strided_slice %687 {offsets = [8, 0], sizes = [2, 32], strides = [1, 1]} : vector<32x32xf32> to vector<2x32xf32>
    %c4_442 = arith.constant 4 : index
    %c0_443 = arith.constant 0 : index
    %c0_444 = arith.constant 0 : index
    %710 = vector.load %arg21[%c4_442, %c0_443, %c0_444] : memref<16x32x128xf32, #tpu.memory_space<vmem>>, vector<1x32x128xf32>
    %711 = vector.shape_cast %710 : vector<1x32x128xf32> to vector<32x128xf32>
    %cst_445 = arith.constant dense<0.000000e+00> : vector<2x128xf32>
    %712 = tpu.matmul %709, %711, %cst_445 {dimension_numbers = #tpu.dot_dimension_numbers<[1], [0], [0], [1], [0, 0, 1, 1], [], []>} : vector<2x32xf32>, vector<32x128xf32>, vector<2x128xf32> -> vector<2x128xf32>
    %713 = arith.addf %708, %712 : vector<2x128xf32>
    %714 = vector.extract_strided_slice %687 {offsets = [10, 0], sizes = [2, 32], strides = [1, 1]} : vector<32x32xf32> to vector<2x32xf32>
    %c5_446 = arith.constant 5 : index
    %c0_447 = arith.constant 0 : index
    %c0_448 = arith.constant 0 : index
    %715 = vector.load %arg21[%c5_446, %c0_447, %c0_448] : memref<16x32x128xf32, #tpu.memory_space<vmem>>, vector<1x32x128xf32>
    %716 = vector.shape_cast %715 : vector<1x32x128xf32> to vector<32x128xf32>
    %cst_449 = arith.constant dense<0.000000e+00> : vector<2x128xf32>
    %717 = tpu.matmul %714, %716, %cst_449 {dimension_numbers = #tpu.dot_dimension_numbers<[1], [0], [0], [1], [0, 0, 1, 1], [], []>} : vector<2x32xf32>, vector<32x128xf32>, vector<2x128xf32> -> vector<2x128xf32>
    %718 = arith.addf %713, %717 : vector<2x128xf32>
    %719 = vector.extract_strided_slice %687 {offsets = [12, 0], sizes = [2, 32], strides = [1, 1]} : vector<32x32xf32> to vector<2x32xf32>
    %c6_450 = arith.constant 6 : index
    %c0_451 = arith.constant 0 : index
    %c0_452 = arith.constant 0 : index
    %720 = vector.load %arg21[%c6_450, %c0_451, %c0_452] : memref<16x32x128xf32, #tpu.memory_space<vmem>>, vector<1x32x128xf32>
    %721 = vector.shape_cast %720 : vector<1x32x128xf32> to vector<32x128xf32>
    %cst_453 = arith.constant dense<0.000000e+00> : vector<2x128xf32>
    %722 = tpu.matmul %719, %721, %cst_453 {dimension_numbers = #tpu.dot_dimension_numbers<[1], [0], [0], [1], [0, 0, 1, 1], [], []>} : vector<2x32xf32>, vector<32x128xf32>, vector<2x128xf32> -> vector<2x128xf32>
    %723 = arith.addf %718, %722 : vector<2x128xf32>
    %724 = vector.extract_strided_slice %687 {offsets = [14, 0], sizes = [2, 32], strides = [1, 1]} : vector<32x32xf32> to vector<2x32xf32>
    %c7_454 = arith.constant 7 : index
    %c0_455 = arith.constant 0 : index
    %c0_456 = arith.constant 0 : index
    %725 = vector.load %arg21[%c7_454, %c0_455, %c0_456] : memref<16x32x128xf32, #tpu.memory_space<vmem>>, vector<1x32x128xf32>
    %726 = vector.shape_cast %725 : vector<1x32x128xf32> to vector<32x128xf32>
    %cst_457 = arith.constant dense<0.000000e+00> : vector<2x128xf32>
    %727 = tpu.matmul %724, %726, %cst_457 {dimension_numbers = #tpu.dot_dimension_numbers<[1], [0], [0], [1], [0, 0, 1, 1], [], []>} : vector<2x32xf32>, vector<32x128xf32>, vector<2x128xf32> -> vector<2x128xf32>
    %728 = arith.addf %723, %727 : vector<2x128xf32>
    %729 = vector.extract_strided_slice %687 {offsets = [16, 0], sizes = [2, 32], strides = [1, 1]} : vector<32x32xf32> to vector<2x32xf32>
    %c8 = arith.constant 8 : index
    %c0_458 = arith.constant 0 : index
    %c0_459 = arith.constant 0 : index
    %730 = vector.load %arg21[%c8, %c0_458, %c0_459] : memref<16x32x128xf32, #tpu.memory_space<vmem>>, vector<1x32x128xf32>
    %731 = vector.shape_cast %730 : vector<1x32x128xf32> to vector<32x128xf32>
    %cst_460 = arith.constant dense<0.000000e+00> : vector<2x128xf32>
    %732 = tpu.matmul %729, %731, %cst_460 {dimension_numbers = #tpu.dot_dimension_numbers<[1], [0], [0], [1], [0, 0, 1, 1], [], []>} : vector<2x32xf32>, vector<32x128xf32>, vector<2x128xf32> -> vector<2x128xf32>
    %733 = arith.addf %728, %732 : vector<2x128xf32>
    %734 = vector.extract_strided_slice %687 {offsets = [18, 0], sizes = [2, 32], strides = [1, 1]} : vector<32x32xf32> to vector<2x32xf32>
    %c9 = arith.constant 9 : index
    %c0_461 = arith.constant 0 : index
    %c0_462 = arith.constant 0 : index
    %735 = vector.load %arg21[%c9, %c0_461, %c0_462] : memref<16x32x128xf32, #tpu.memory_space<vmem>>, vector<1x32x128xf32>
    %736 = vector.shape_cast %735 : vector<1x32x128xf32> to vector<32x128xf32>
    %cst_463 = arith.constant dense<0.000000e+00> : vector<2x128xf32>
    %737 = tpu.matmul %734, %736, %cst_463 {dimension_numbers = #tpu.dot_dimension_numbers<[1], [0], [0], [1], [0, 0, 1, 1], [], []>} : vector<2x32xf32>, vector<32x128xf32>, vector<2x128xf32> -> vector<2x128xf32>
    %738 = arith.addf %733, %737 : vector<2x128xf32>
    %739 = vector.extract_strided_slice %687 {offsets = [20, 0], sizes = [2, 32], strides = [1, 1]} : vector<32x32xf32> to vector<2x32xf32>
    %c10 = arith.constant 10 : index
    %c0_464 = arith.constant 0 : index
    %c0_465 = arith.constant 0 : index
    %740 = vector.load %arg21[%c10, %c0_464, %c0_465] : memref<16x32x128xf32, #tpu.memory_space<vmem>>, vector<1x32x128xf32>
    %741 = vector.shape_cast %740 : vector<1x32x128xf32> to vector<32x128xf32>
    %cst_466 = arith.constant dense<0.000000e+00> : vector<2x128xf32>
    %742 = tpu.matmul %739, %741, %cst_466 {dimension_numbers = #tpu.dot_dimension_numbers<[1], [0], [0], [1], [0, 0, 1, 1], [], []>} : vector<2x32xf32>, vector<32x128xf32>, vector<2x128xf32> -> vector<2x128xf32>
    %743 = arith.addf %738, %742 : vector<2x128xf32>
    %744 = vector.extract_strided_slice %687 {offsets = [22, 0], sizes = [2, 32], strides = [1, 1]} : vector<32x32xf32> to vector<2x32xf32>
    %c11 = arith.constant 11 : index
    %c0_467 = arith.constant 0 : index
    %c0_468 = arith.constant 0 : index
    %745 = vector.load %arg21[%c11, %c0_467, %c0_468] : memref<16x32x128xf32, #tpu.memory_space<vmem>>, vector<1x32x128xf32>
    %746 = vector.shape_cast %745 : vector<1x32x128xf32> to vector<32x128xf32>
    %cst_469 = arith.constant dense<0.000000e+00> : vector<2x128xf32>
    %747 = tpu.matmul %744, %746, %cst_469 {dimension_numbers = #tpu.dot_dimension_numbers<[1], [0], [0], [1], [0, 0, 1, 1], [], []>} : vector<2x32xf32>, vector<32x128xf32>, vector<2x128xf32> -> vector<2x128xf32>
    %748 = arith.addf %743, %747 : vector<2x128xf32>
    %749 = vector.extract_strided_slice %687 {offsets = [24, 0], sizes = [2, 32], strides = [1, 1]} : vector<32x32xf32> to vector<2x32xf32>
    %c12 = arith.constant 12 : index
    %c0_470 = arith.constant 0 : index
    %c0_471 = arith.constant 0 : index
    %750 = vector.load %arg21[%c12, %c0_470, %c0_471] : memref<16x32x128xf32, #tpu.memory_space<vmem>>, vector<1x32x128xf32>
    %751 = vector.shape_cast %750 : vector<1x32x128xf32> to vector<32x128xf32>
    %cst_472 = arith.constant dense<0.000000e+00> : vector<2x128xf32>
    %752 = tpu.matmul %749, %751, %cst_472 {dimension_numbers = #tpu.dot_dimension_numbers<[1], [0], [0], [1], [0, 0, 1, 1], [], []>} : vector<2x32xf32>, vector<32x128xf32>, vector<2x128xf32> -> vector<2x128xf32>
    %753 = arith.addf %748, %752 : vector<2x128xf32>
    %754 = vector.extract_strided_slice %687 {offsets = [26, 0], sizes = [2, 32], strides = [1, 1]} : vector<32x32xf32> to vector<2x32xf32>
    %c13 = arith.constant 13 : index
    %c0_473 = arith.constant 0 : index
    %c0_474 = arith.constant 0 : index
    %755 = vector.load %arg21[%c13, %c0_473, %c0_474] : memref<16x32x128xf32, #tpu.memory_space<vmem>>, vector<1x32x128xf32>
    %756 = vector.shape_cast %755 : vector<1x32x128xf32> to vector<32x128xf32>
    %cst_475 = arith.constant dense<0.000000e+00> : vector<2x128xf32>
    %757 = tpu.matmul %754, %756, %cst_475 {dimension_numbers = #tpu.dot_dimension_numbers<[1], [0], [0], [1], [0, 0, 1, 1], [], []>} : vector<2x32xf32>, vector<32x128xf32>, vector<2x128xf32> -> vector<2x128xf32>
    %758 = arith.addf %753, %757 : vector<2x128xf32>
    %759 = vector.extract_strided_slice %687 {offsets = [28, 0], sizes = [2, 32], strides = [1, 1]} : vector<32x32xf32> to vector<2x32xf32>
    %c14 = arith.constant 14 : index
    %c0_476 = arith.constant 0 : index
    %c0_477 = arith.constant 0 : index
    %760 = vector.load %arg21[%c14, %c0_476, %c0_477] : memref<16x32x128xf32, #tpu.memory_space<vmem>>, vector<1x32x128xf32>
    %761 = vector.shape_cast %760 : vector<1x32x128xf32> to vector<32x128xf32>
    %cst_478 = arith.constant dense<0.000000e+00> : vector<2x128xf32>
    %762 = tpu.matmul %759, %761, %cst_478 {dimension_numbers = #tpu.dot_dimension_numbers<[1], [0], [0], [1], [0, 0, 1, 1], [], []>} : vector<2x32xf32>, vector<32x128xf32>, vector<2x128xf32> -> vector<2x128xf32>
    %763 = arith.addf %758, %762 : vector<2x128xf32>
    %764 = vector.extract_strided_slice %687 {offsets = [30, 0], sizes = [2, 32], strides = [1, 1]} : vector<32x32xf32> to vector<2x32xf32>
    %c15 = arith.constant 15 : index
    %c0_479 = arith.constant 0 : index
    %c0_480 = arith.constant 0 : index
    %765 = vector.load %arg21[%c15, %c0_479, %c0_480] : memref<16x32x128xf32, #tpu.memory_space<vmem>>, vector<1x32x128xf32>
    %766 = vector.shape_cast %765 : vector<1x32x128xf32> to vector<32x128xf32>
    %cst_481 = arith.constant dense<0.000000e+00> : vector<2x128xf32>
    %767 = tpu.matmul %764, %766, %cst_481 {dimension_numbers = #tpu.dot_dimension_numbers<[1], [0], [0], [1], [0, 0, 1, 1], [], []>} : vector<2x32xf32>, vector<32x128xf32>, vector<2x128xf32> -> vector<2x128xf32>
    %768 = arith.addf %763, %767 : vector<2x128xf32>
    %c0_482 = arith.constant 0 : index
    %c0_483 = arith.constant 0 : index
    %769 = vector.load %arg22[%c0_482, %c0_483] : memref<1x128xf32, #tpu.memory_space<vmem>>, vector<1x128xf32>
    %770 = vector.broadcast %769 : vector<1x128xf32> to vector<2x128xf32>
    %771 = arith.addf %768, %770 : vector<2x128xf32>
    %cst_484 = arith.constant 0.000000e+00 : f32
    %772 = vector.broadcast %cst_484 : f32 to vector<2x128xf32>
    %773 = arith.maximumf %771, %772 : vector<2x128xf32>
    %c0_485 = arith.constant 0 : index
    %c0_486 = arith.constant 0 : index
    %774 = vector.load %arg23[%c0_485, %c0_486] : memref<128x10xf32, #tpu.memory_space<vmem>>, vector<128x10xf32>
    %cst_487 = arith.constant dense<0.000000e+00> : vector<2x10xf32>
    %775 = tpu.matmul %773, %774, %cst_487 {dimension_numbers = #tpu.dot_dimension_numbers<[1], [0], [0], [1], [0, 0, 1, 1], [], []>} : vector<2x128xf32>, vector<128x10xf32>, vector<2x10xf32> -> vector<2x10xf32>
    %c0_488 = arith.constant 0 : index
    %c0_489 = arith.constant 0 : index
    %776 = vector.load %arg24[%c0_488, %c0_489] : memref<1x10xf32, #tpu.memory_space<vmem>>, vector<1x10xf32>
    %777 = vector.broadcast %776 : vector<1x10xf32> to vector<2x10xf32>
    %778 = arith.addf %775, %777 : vector<2x10xf32>
    %c0_490 = arith.constant 0 : index
    %c0_491 = arith.constant 0 : index
    %779 = vector.load %arg25[%c0_490, %c0_491] : memref<2x10xf32, #tpu.memory_space<vmem>>, vector<2x10xf32>
    tpu.vector_store %arg25[%c0_490, %c0_491], %778 {strides = array<i32>} : memref<2x10xf32, #tpu.memory_space<vmem>>, vector<2x10xf32>,
    return
  }
}

</mosaic_0001>

<bundles_post_ra>
// kernel: pallas_forward.1
= control target key start
LH: loop header
LB: loop body
LE: loop exit
PB: predicated region body
PF: predicated region fallthrough
CT: control target
= control target key end

     0   :  { %s19241_s0 = inlined_call_operand.vmem [shape: f32[32,1], index: 0, kind: input, shape index: {}]   ;;  %s19242_s1 = inlined_call_operand.vmem [shape: s32[32,1], index: 1, kind: input, shape index: {}]   ;;  %s19243_s2 = inlined_call_operand.vmem [shape: f32[21,9], index: 2, kind: input, shape index: {}]   ;;  %s19244_s3 = inlined_call_operand.vmem [shape: f32[3,9,32], index: 3, kind: input, shape index: {}]   ;;  %s19245_s4 = inlined_call_operand.vmem [shape: f32[1,32], index: 4, kind: input, shape index: {}]   ;;  %s19246_s5 = inlined_call_operand.vmem [shape: f32[8,32,8], index: 5, kind: input, shape index: {}]   ;;  %s19247_s6 = inlined_call_operand.vmem [shape: f32[8,1,8], index: 6, kind: input, shape index: {}]   ;;  %s19248_s7 = inlined_call_operand.vmem [shape: f32[8,32,8], index: 7, kind: input, shape index: {}]   ;;  %s19249_s8 = inlined_call_operand.vmem [shape: f32[8,1,8], index: 8, kind: input, shape index: {}]   ;;  %s19250_s9 = inlined_call_operand.vmem [shape: f32[8,32,8], index: 9, kind: input, shape index: {}]   ;;  %s19251_s10 = inlined_call_operand.vmem [shape: f32[8,1,8], index: 10, kind: input, shape index: {}]   ;;  %s19252_s11 = inlined_call_operand.vmem [shape: f32[8,8,32], index: 11, kind: input, shape index: {}]   ;;  %s19253_s12 = inlined_call_operand.vmem [shape: f32[2,1,32], index: 12, kind: input, shape index: {}]   ;;  %s19254_s13 = inlined_call_operand.vmem [shape: f32[2,1,32], index: 13, kind: input, shape index: {}]   ;;  %s19255_s14 = inlined_call_operand.vmem [shape: f32[2,1,32], index: 14, kind: input, shape index: {}]   ;;  %s19256_s15 = inlined_call_operand.vmem [shape: f32[2,1,32], index: 15, kind: input, shape index: {}]   ;;  %s19257_s16 = inlined_call_operand.vmem [shape: f32[2,1,32], index: 16, kind: input, shape index: {}]   ;;  %s19258_s17 = inlined_call_operand.vmem [shape: bf16[8,32,512], index: 17, kind: input, shape index: {}]   ;;  %s19259_s18 = inlined_call_operand.vmem [shape: f32[8,1,512], index: 18, kind: input, shape index: {}]   ;;  %s19260_s19 = inlined_call_operand.vmem [shape: bf16[8,512,32], index: 19, kind: input, shape index: {}]   ;;  %s19261_s20 = inlined_call_operand.vmem [shape: f32[2,1,32], index: 20, kind: input, shape index: {}]   ;;  %s19262_s21 = inlined_call_operand.vmem [shape: f32[16,32,128], index: 21, kind: input, shape index: {}]   ;;  %s19263_s22 = inlined_call_operand.vmem [shape: f32[1,128], index: 22, kind: input, shape index: {}]   ;;  %s19264_s23 = inlined_call_operand.vmem [shape: f32[128,10], index: 23, kind: input, shape index: {}]   ;;  %s19265_s24 = inlined_call_operand.vmem [shape: f32[1,10], index: 24, kind: input, shape index: {}]   ;;  %s19266_s25 = inlined_call_operand.hbm [shape: f32[2,10], index: 25, kind: output, shape index: {}]  }
   0x1   :  { %19276 = sst [smem:[#allocation5_spill]] %s19241_s0 }
   0x2   :  { %19277 = sst [smem:[#allocation6_spill]] %s19242_s1 }
   0x3   :  { %19278 = sst [smem:[#allocation7_spill]] %s19243_s2 }
   0x4   :  { %19279 = sst [smem:[#allocation8_spill]] %s19244_s3 }
   0x5   :  { %19280 = sst [smem:[#allocation9_spill]] %s19245_s4 }
   0x6   :  { %19281 = sst [smem:[#allocation10_spill]] %s19246_s5 }
   0x7   :  { %19282 = sst [smem:[#allocation11_spill]] %s19247_s6 }
   0x8   :  { %19283 = sst [smem:[#allocation12_spill]] %s19248_s7 }
   0x9   :  { %19284 = sst [smem:[#allocation13_spill]] %s19249_s8 }
   0xa   :  { %19285 = sst [smem:[#allocation14_spill]] %s19250_s9 }
   0xb   :  { %s19286_s6 = sld [smem:[#allocation6_spill]]  ;;  %vm157_vm0 = vcmask 1044480   ;;  %v16115_v2 = vmov 0   ;;  %v86_v12 = vlaneseq  ;;  %vm144_vm1 = vcmask 171008  }
   0xc   :  { %15580 = vset.pattern.permute.xlu1 %v16115_v2  ;;  %15579 = vset.pattern.permute.xlu0 %v16115_v2  ;;  %s19287_s28 = sld [smem:[#allocation7_spill]]  ;;  %v16116_v16 = vmov 0.0  }
   0xd   :  { %s19288_s7 = sld [smem:[#allocation5_spill]]  ;;  %v16284_v13 = vand.u32 127, %v86_v12 }
  0x11   :  { %v84_v0 = vld [vmem:[%s19286_s6 + $0x10] sm:$0xff]  ;;  %v82_v1 = vld [vmem:[%s19286_s6] sm:$0xff]  ;;  %v85_v3 = vld [vmem:[%s19286_s6 + $0x18] sm:$0xff] }
  0x12   :  { %95 = vperm.xlu1 %15580, %v84_v0   ;;  %89 = vperm.xlu0 %15579, %v82_v1   ;;  %v83_v4 = vld [vmem:[%s19286_s6 + $0x8] sm:$0xff]  ;;  %v114_v5 = vld [vmem:[%s19287_s28 + $0x10] sm:$0x1f]  ;;  %v112_v7 = vld [vmem:[%s19287_s28] sm:$0xff] }
  0x13   :  { %14670 = vmatprep.subr.msk.mxu0 %vm157_vm0, %v114_v5  ;;  %v113_v6 = vld [vmem:[%s19287_s28 + $0x8] sm:$0xff]  ;;  %v118_v8 = vld [vmem:[%s19288_s7 + $0x10] sm:$0xff]  ;;  %v119_v9 = vld [vmem:[%s19288_s7 + $0x18] sm:$0xff] }
  0x14   :  { %14671 = vmatpush3.msk.msra.mxu0 %vm157_vm0, %v114_v5  ;;  %v116_v10 = vld [vmem:[%s19288_s7] sm:$0xff]  ;;  %v117_v11 = vld [vmem:[%s19288_s7 + $0x8] sm:$0xff] }
  0x15   :  { %14672 = vmatprep.subr.mxu0 %v113_v6 }
  0x16   :  { %98 = vperm.xlu1 %15580, %v85_v3   ;;  %92 = vperm.xlu0 %15579, %v83_v4  }
  0x17   :  { %14673 = vmatpush3.msra.mxu0 %v113_v6 }
  0x18   :  { %14674 = vmatprep.subr.mxu0 %v112_v7 }
  0x19   :  { %14675 = vmatpush3.msra.mxu0 %v112_v7 }
  0x1a   :  { %132 = vperm.xlu1 %15580, %v118_v8   ;;  %137 = vperm.xlu0 %15579, %v119_v9  }
  0x1e   :  { %122 = vperm.xlu1 %15580, %v116_v10   ;;  %127 = vperm.xlu0 %15579, %v117_v11  }
  0x8d   :  { %v96_v14 = vpop.permute.xlu1 %95  ;;  %v90_v15 = vpop.permute.xlu0 %89 }
  0x8e   :  { %vm102_vm2 = vcmp.eq.s32.totalorder %v16284_v13, %v96_v14  ;;  %vm100_vm3 = vcmp.eq.s32.totalorder %v16284_v13, %v90_v15 }
  0x8f   :  { %v12358_v17 = vsel %vm102_vm2, 1.0, %v16116_v16  ;;  %v12356_v18 = vsel %vm100_vm3, 1.0, %v16116_v16 }
  0x90   :  { %14676 = vmatprep.mubr.msk.f32.mxu0 %vm144_vm1, %v12356_v18 }
  0x91   :  { %v99_v19 = vpop.permute.xlu1 %98  ;;  %v93_v20 = vpop.permute.xlu0 %92 }
  0x92   :  { %vm101_vm4 = vcmp.eq.s32.totalorder %v16284_v13, %v93_v20  ;;  %vm103_vm5 = vcmp.eq.s32.totalorder %v16284_v13, %v99_v19 }
  0x93   :  { %v12357_v21 = vsel %vm101_vm4, 1.0, %v16116_v16  ;;  %v12359_v22 = vsel %vm103_vm5, 1.0, %v16116_v16 }
  0x94   :  { %14677 = vmatmul.mubr.msk.f32.vlgmr.msra.gmra.mxu0 %vm144_vm1, %v12357_v21 }
  0x95   :  { %14679 = vmatprep.mubr.msk.f32.mxu0 %vm144_vm1, %v12358_v17 }
  0x98   :  { %14680 = vmatmul.mubr.msk.f32.gmra.mxu0 %vm144_vm1, %v12359_v22 }
  0x99   :  { %30 = vsyncpa [#allocation3], 0  ;;  %v16298_v23 = vshrl.u32 %v86_v12, 7  ;;  %vm299_vm10 = vcmask 261120   ;;  %v133_v28 = vpop.permute.xlu1 %132  ;;  %v138_v29 = vpop.permute.xlu0 %137  ;;  %vm115_vm11 = vcmp.eq.s32.totalorder %v16284_v13, 0  ;;  %s19289_s9 = sld [smem:[#allocation8_spill]] }
  0x9a   :  { %v143_v35 = vsel %vm115_vm11, %v138_v29, 0.0  ;;  %v142_v42 = vsel %vm115_vm11, %v133_v28, 0.0  ;;  %vm512_vm4 = vcmask 1040384   ;;  %vm499_vm5 = vcmask 72704   ;;  %s19290_s4 = sld [smem:[#allocation10_spill]] }
  0x9b   :  { %v12365_v24 = vadd.s32 4294967294, %v16298_v23  ;;  %v275_v25 = vadd.s32 2, %v16298_v23  ;;  %vm259_vm7 = vcmp.ge.s32.totalorder %v16298_v23, 2  ;;  %v16311_v31 = vadd.s32 8, %v16298_v23  ;;  %s19291_s5 = sld [smem:[#allocation12_spill]] }
  0x9c   :  { %v16314_v33 = vadd.s32 16, %v16298_v23  ;;  %v16317_v34 = vadd.s32 24, %v16298_v23  ;;  %s19292_s29 = sld [smem:[#allocation14_spill]] }
  0x9d   :  { %vm255_vm6 = vcmp.eq.s32.totalorder %v16284_v13, %v12365_v24  ;;  %vm279_vm9 = vcmp.eq.s32.totalorder %v16284_v13, %v275_v25  ;;  %v123_v37 = vpop.permute.xlu1 %122  ;;  %v128_v38 = vpop.permute.xlu0 %127  ;;  %v12366_v40 = vadd.s32 4294967294, %v16311_v31  ;;  %v276_v41 = vadd.s32 2, %v16311_v31  ;;  %s19293_s7 = sld [smem:[#allocation9_spill]] }
  0x9e   :  { %vm263_vm8 = vmand %vm255_vm6, %vm259_vm7  ;;  %v12373_v27 = vsel %vm279_vm9, 1.0, %v16116_v16  ;;  %v12367_v44 = vadd.s32 4294967294, %v16314_v33  ;;  %v277_v45 = vadd.s32 2, %v16314_v33  ;;  %v278_v46 = vadd.s32 2, %v16317_v34  ;;  %s19294_s0 = sld [smem:[#allocation11_spill]] }
  0x9f   :  { %v12369_v26 = vsel %vm263_vm8, 1.0, %v16116_v16  ;;  %14704 = vmatprep.mubr.msk.f32.mxu0 %vm299_vm10, %v12373_v27  ;;  %v140_v48 = vsel %vm115_vm11, %v123_v37, 0.0  ;;  %v141_v49 = vsel %vm115_vm11, %v128_v38, 0.0  ;;  %vm256_vm12 = vcmp.eq.s32.totalorder %v16284_v13, %v12366_v40  ;;  %v12386_v57 = vld [vmem:[%s19289_s9 + $0x18] sm:$0x1]  ;;  %v12385_v61 = vld [vmem:[%s19289_s9 + $0x10] sm:$0xff] }
  0xa0   :  { %14690 = vmatprep.mubr.msk.f32.mxu1 %vm299_vm10, %v12369_v26  ;;  %vm280_vm13 = vcmp.eq.s32.totalorder %v16284_v13, %v276_v41  ;;  %v12368_v51 = vadd.s32 4294967294, %v16317_v34  ;;  %vm257_vm14 = vcmp.eq.s32.totalorder %v16284_v13, %v12367_v44  ;;  %vm281_vm15 = vcmp.eq.s32.totalorder %v16284_v13, %v277_v45  ;;  %v495_v58 = vld [vmem:[%s19289_s9 + $0x8] sm:$0x1]  ;;  %v494_v63 = vld [vmem:[%s19289_s9] sm:$0xff]  ;;  %v890_v10 = vld [vmem:[%s19290_s4 + $0x18] sm:$0xff] }
  0xa1   :  { %vm282_vm0 = vcmp.eq.s32.totalorder %v16284_v13, %v278_v46  ;;  %vm286_vm1 = vcmp.lt.s32.totalorder %v16317_v34, 30  ;;  %v12370_v53 = vsel %vm256_vm12, 1.0, %v16116_v16  ;;  %v12374_v54 = vsel %vm280_vm13, 1.0, %v16116_v16  ;;  %v12398_v62 = vld [vmem:[%s19289_s9 + $0x28] sm:$0x1]  ;;  %v12397_v0 = vld [vmem:[%s19289_s9 + $0x20] sm:$0xff] }
  0xa2   :  { %v12371_v55 = vsel %vm257_vm14, 1.0, %v16116_v16  ;;  %v12375_v56 = vsel %vm281_vm15, 1.0, %v16116_v16  ;;  %vm258_vm2 = vcmp.eq.s32.totalorder %v16284_v13, %v12368_v51  ;;  %vm290_vm3 = vmand %vm282_vm0, %vm286_vm1  ;;  %v998_v11 = vld [vmem:[%s19291_s5 + $0x18] sm:$0xff]  ;;  %v889_v12 = vld [vmem:[%s19290_s4 + $0x10] sm:$0xff]  ;;  %vm1187_vm6 = vcmask 64512  }
  0xa3   :  { %v12372_v59 = vsel %vm258_vm2, 1.0, %v16116_v16  ;;  %v12376_v60 = vsel %vm290_vm3, 1.0, %v16116_v16  ;;  %v997_v14 = vld [vmem:[%s19291_s5 + $0x10] sm:$0xff]  ;;  %v888_v15 = vld [vmem:[%s19290_s4 + $0x8] sm:$0xff]  ;;  %v887_v18 = vld [vmem:[%s19290_s4] sm:$0xff]  ;;  %vm16117_vm12 = vmmov 0  }
  0xa4   :  { %v996_v17 = vld [vmem:[%s19291_s5 + $0x8] sm:$0xff]  ;;  %v995_v19 = vld [vmem:[%s19291_s5] sm:$0xff]  ;;  %v1094_v20 = vld [vmem:[%s19292_s29 + $0x18] sm:$0xff] }
 0x154   :  { %v14678_v30 = vpop.f32.mrf.mxu0 }
 0x155   :  { %v233_v50 = vadd.f32 %v14678_v30, %v141_v49 }
 0x156   :  { %v227_v32 = vpop.f32.mrf.mxu0 }
 0x157   :  { %v228_v52 = vadd.f32 %v227_v32, %v140_v48 }
 0x158   :  { %v14681_v36 = vpop.f32.mrf.mxu0 }
 0x159   :  { %v16321_v39 = vadd.f32 %v14681_v36, %v143_v35  ;;  %v12404_v35 = vld [vmem:[%s19293_s7] ss:$0 sm:$0xff]  ;;  %s19295_s7 = sld [smem:[#allocation13_spill]] }
 0x15a   :  { %v237_v43 = vpop.f32.mrf.mxu0 }
 0x15b   :  { %v238_v47 = vadd.f32 %v237_v43, %v142_v42  ;;  %14682 = vmatprep.subr.mxu1 %v16321_v39  ;;  %14696 = vmatprep.subr.mxu0 %v16321_v39 }
 0x15c   :  { %14683 = vmatpush3.msra.mxu1 %v16321_v39  ;;  %14697 = vmatpush3.msra.mxu0 %v16321_v39 }
 0x15d   :  { %14684 = vmatprep.subr.mxu1 %v238_v47  ;;  %14698 = vmatprep.subr.mxu0 %v238_v47 }
 0x15e   :  { %14685 = vmatpush3.msra.mxu1 %v238_v47  ;;  %14699 = vmatpush3.msra.mxu0 %v238_v47 }
 0x15f   :  { %14686 = vmatprep.subr.mxu1 %v233_v50  ;;  %14700 = vmatprep.subr.mxu0 %v233_v50 }
 0x160   :  { %14687 = vmatpush3.msra.mxu1 %v233_v50  ;;  %14701 = vmatpush3.msra.mxu0 %v233_v50 }
 0x161   :  { %14688 = vmatprep.subr.mxu1 %v228_v52  ;;  %14702 = vmatprep.subr.mxu0 %v228_v52 }
 0x162   :  { %14689 = vmatpush3.msra.mxu1 %v228_v52  ;;  %14703 = vmatpush3.msra.mxu0 %v228_v52 }
 0x163   :  { %14691 = vmatmul.mubr.msk.f32.vlgmr.msra.gmra.mxu1 %vm299_vm10, %v12370_v53  ;;  %14705 = vmatmul.mubr.msk.f32.vlgmr.msra.gmra.mxu0 %vm299_vm10, %v12374_v54 }
 0x164   :  { %14693 = vmatprep.mubr.msk.f32.mxu1 %vm299_vm10, %v12371_v55  ;;  %14707 = vmatprep.mubr.msk.f32.mxu0 %vm299_vm10, %v12375_v56  ;;  %v1092_v55 = vld [vmem:[%s19292_s29 + $0x8] sm:$0xff]  ;;  %v1091_v56 = vld [vmem:[%s19292_s29] sm:$0xff] }
 0x165   :  { %14710 = vmatprep.subr.msk.mxu1 %vm512_vm4, %v12386_v57  ;;  %14720 = vmatprep.subr.msk.mxu0 %vm512_vm4, %v495_v58 }
 0x166   :  { %14711 = vmatpush3.msk.msra.mxu1 %vm512_vm4, %v12386_v57  ;;  %14721 = vmatpush3.msk.msra.mxu0 %vm512_vm4, %v495_v58 }
 0x167   :  { %14694 = vmatmul.mubr.msk.f32.gmra.mxu1 %vm299_vm10, %v12372_v59  ;;  %14708 = vmatmul.mubr.msk.f32.gmra.mxu0 %vm299_vm10, %v12376_v60  ;;  %v12405_v59 = vld [vmem:[%s19294_s0] ss:$0 sm:$0xff] }
 0x168   :  { %14714 = vmatprep.mubr.msk.f32.mxu1 %vm499_vm5, %v228_v52  ;;  %14712 = vmatprep.subr.mxu1 %v12385_v61  ;;  %v1093_v52 = vld [vmem:[%s19292_s29 + $0x10] sm:$0xff] }
 0x169   :  { %14713 = vmatpush3.msra.mxu1 %v12385_v61  ;;  %14722 = vmatprep.subr.mxu0 %v494_v63 }
 0x16a   :  { %14730 = vmatprep.subr.msk.mxu1 %vm512_vm4, %v12398_v62  ;;  %14723 = vmatpush3.msra.mxu0 %v494_v63  ;;  %v12410_v63 = vld [vmem:[%s19295_s7] ss:$0 sm:$0xff] }
 0x16b   :  { %14715 = vmatmul.mubr.msk.f32.vlgmr.msra.gmra.mxu1 %vm499_vm5, %v233_v50  ;;  %14740 = vmatprep.subr.mxu0 %v890_v10 }
 0x16c   :  { %14717 = vmatprep.mubr.msk.f32.mxu1 %vm499_vm5, %v238_v47  ;;  %14731 = vmatpush3.msk.msra.mxu1 %vm512_vm4, %v12398_v62 }
 0x16d   :  { %14732 = vmatprep.subr.mxu1 %v12397_v0 }
 0x16e   :  { %14733 = vmatpush3.msra.mxu1 %v12397_v0 }
 0x16f   :  { %14718 = vmatmul.mubr.msk.f32.gmra.mxu1 %vm499_vm5, %v16321_v39  ;;  %14754 = vmatprep.subr.mxu1 %v998_v11 }
 0x223   :  { %v14692_v1 = vpop.f32.mrf.mxu1  ;;  %v14706_v3 = vpop.f32.mrf.mxu0 }
 0x225   :  { %v378_v4 = vpop.f32.mrf.mxu1  ;;  %v475_v5 = vpop.f32.mrf.mxu0 }
 0x226   :  { %14724 = vmatprep.mubr.msk.f32.mxu0 %vm499_vm5, %v378_v4  ;;  %14734 = vmatprep.mubr.msk.f32.mxu1 %vm499_vm5, %v475_v5 }
 0x227   :  { %v14695_v6 = vpop.f32.mrf.mxu1  ;;  %v14709_v7 = vpop.f32.mrf.mxu0  ;;  %14725 = vmatmul.mubr.msk.f32.vlgmr.msra.gmra.mxu0 %vm499_vm5, %v14692_v1  ;;  %14735 = vmatmul.mubr.msk.f32.vlgmr.msra.gmra.mxu1 %vm499_vm5, %v14706_v3 }
 0x228   :  { %14741 = vmatpush3.msra.mxu0 %v890_v10  ;;  %14755 = vmatpush3.msra.mxu1 %v998_v11  ;;  %v12415_v10 = vld [vmem:[%s19251_s10] ss:$0 sm:$0xff] }
 0x229   :  { %v388_v8 = vpop.f32.mrf.mxu1  ;;  %v485_v9 = vpop.f32.mrf.mxu0  ;;  %14742 = vmatprep.subr.mxu0 %v889_v12  ;;  %14756 = vmatprep.subr.mxu1 %v997_v14 }
 0x22a   :  { %14727 = vmatprep.mubr.msk.f32.mxu0 %vm499_vm5, %v388_v8  ;;  %14737 = vmatprep.mubr.msk.f32.mxu1 %vm499_vm5, %v485_v9 }
 0x22b   :  { %14728 = vmatmul.mubr.msk.f32.gmra.mxu0 %vm499_vm5, %v14695_v6  ;;  %14738 = vmatmul.mubr.msk.f32.gmra.mxu1 %vm499_vm5, %v14709_v7  ;;  %v14716_v21 = vpop.f32.mrf.mxu1 }
 0x22c   :  { %14743 = vmatpush3.msra.mxu0 %v889_v12  ;;  %14757 = vmatpush3.msra.mxu1 %v997_v14 }
 0x22d   :  { %14744 = vmatprep.subr.mxu0 %v888_v15  ;;  %14758 = vmatprep.subr.mxu1 %v996_v17  ;;  %v582_v22 = vpop.f32.mrf.mxu1 }
 0x22e   :  { %14745 = vmatpush3.msra.mxu0 %v888_v15  ;;  %14759 = vmatpush3.msra.mxu1 %v996_v17 }
 0x22f   :  { %14746 = vmatprep.subr.mxu0 %v887_v18  ;;  %14760 = vmatprep.subr.mxu1 %v995_v19  ;;  %v14719_v24 = vpop.f32.mrf.mxu1 }
 0x230   :  { %14747 = vmatpush3.msra.mxu0 %v887_v18  ;;  %14761 = vmatpush3.msra.mxu1 %v995_v19  ;;  %v12445_v19 = vld [vmem:[%s19291_s5 + $0x38] sm:$0xff] }
 0x231   :  { %14768 = vmatprep.subr.mxu0 %v1094_v20  ;;  %v592_v25 = vpop.f32.mrf.mxu1 }
 0x2e7   :  { %v14726_v26 = vpop.f32.mrf.mxu0  ;;  %v14736_v27 = vpop.f32.mrf.mxu1 }
 0x2e8   :  { %v688_v28 = vadd.f32 %v14726_v26, %v14716_v21 }
 0x2e9   :  { %v682_v29 = vpop.f32.mrf.mxu0  ;;  %v785_v30 = vpop.f32.mrf.mxu1 }
 0x2ea   :  { %v805_v32 = vadd.f32 %v14736_v27, %v688_v28  ;;  %v683_v36 = vadd.f32 %v682_v29, %v582_v22  ;;  %v12442_v27 = vld [vmem:[%s19291_s5 + $0x20] sm:$0xff]  ;;  %v834_v28 = vand.u32 1, %v16311_v31  ;;  %v875_v29 = vand.u32 1, %v16284_v13 }
 0x2eb   :  { %v14729_v37 = vpop.f32.mrf.mxu0  ;;  %v14739_v38 = vpop.f32.mrf.mxu1 }
 0x2ec   :  { %v804_v39 = vadd.f32 %v785_v30, %v683_v36  ;;  %v698_v40 = vadd.f32 %v14729_v37, %v14719_v24  ;;  %v816_v41 = vadd.f32 %v12404_v35, %v805_v32  ;;  %v12444_v24 = vld [vmem:[%s19291_s5 + $0x30] sm:$0xff]  ;;  %v827_v30 = vand.u32 1, %v16298_v23 }
 0x2ed   :  { %v692_v42 = vpop.f32.mrf.mxu0  ;;  %v795_v46 = vpop.f32.mrf.mxu1  ;;  %vm16510_vm7 = vcmp.eq.s32.totalorder %v834_v28, %v875_v29  ;;  %v841_v37 = vand.u32 1, %v16314_v33 }
 0x2ee   :  { %v815_v43 = vadd.f32 %v12404_v35, %v804_v39  ;;  %v807_v44 = vadd.f32 %v14739_v38, %v698_v40  ;;  %v693_v45 = vadd.f32 %v692_v42, %v592_v25  ;;  %v16427_v49 = vmax.f32 %v816_v41, 0.0  ;;  %v12443_v25 = vld [vmem:[%s19291_s5 + $0x28] sm:$0xff] }
 0x2ef   :  { %vm16515_vm8 = vcmp.eq.s32.totalorder %v827_v30, %v875_v29  ;;  %v848_v42 = vand.u32 1, %v16317_v34  ;;  %vm16526_vm9 = vcmp.eq.s32.totalorder %v841_v37, %v875_v29 }
 0x2f0   :  { %v16425_v47 = vmax.f32 %v815_v43, 0.0  ;;  %v806_v48 = vadd.f32 %v795_v46, %v693_v45  ;;  %v818_v50 = vadd.f32 %v12404_v35, %v807_v44 }
 0x2f1   :  { %vm16530_vm11 = vcmp.eq.s32.totalorder %v848_v42, %v875_v29 }
 0x2f2   :  { %v817_v51 = vadd.f32 %v12404_v35, %v806_v48  ;;  %14748 = vmatprep.mubr.msk.f32.mxu0 %vm299_vm10, %v16425_v47  ;;  %14762 = vmatprep.mubr.msk.f32.mxu1 %vm299_vm10, %v16425_v47  ;;  %v16442_v54 = vmax.f32 %v818_v50, 0.0 }
 0x2f3   :  { %14749 = vmatmul.mubr.msk.f32.vlgmr.msra.gmra.mxu0 %vm299_vm10, %v16427_v49  ;;  %14763 = vmatmul.mubr.msk.f32.vlgmr.msra.gmra.mxu1 %vm299_vm10, %v16427_v49 }
 0x2f4   :  { %v16440_v53 = vmax.f32 %v817_v51, 0.0  ;;  %14769 = vmatpush3.msra.mxu0 %v1094_v20 }
 0x2f5   :  { %14770 = vmatprep.subr.mxu0 %v1093_v52 }
 0x2f6   :  { %14751 = vmatprep.mubr.msk.f32.mxu0 %vm299_vm10, %v16440_v53  ;;  %14765 = vmatprep.mubr.msk.f32.mxu1 %vm299_vm10, %v16440_v53 }
 0x2f7   :  { %14771 = vmatpush3.msra.mxu0 %v1093_v52  ;;  %14766 = vmatmul.mubr.msk.f32.gmra.mxu1 %vm299_vm10, %v16442_v54 }
 0x2f8   :  { %14752 = vmatmul.mubr.msk.f32.gmra.mxu0 %vm299_vm10, %v16442_v54  ;;  %14772 = vmatprep.subr.mxu0 %v1092_v55 }
 0x2f9   :  { %14773 = vmatpush3.msra.mxu0 %v1092_v55  ;;  %14776 = vmatprep.mubr.msk.f32.mxu0 %vm299_vm10, %v16425_v47 }
 0x2fa   :  { %14774 = vmatprep.subr.mxu0 %v1091_v56 }
 0x2fb   :  { %14775 = vmatpush3.msra.mxu0 %v1091_v56 }
 0x2fc   :  { %14777 = vmatmul.mubr.msk.f32.vlgmr.msra.gmra.mxu0 %vm299_vm10, %v16427_v49 }
 0x2fd   :  { %14779 = vmatprep.mubr.msk.f32.mxu0 %vm299_vm10, %v16440_v53 }
 0x300   :  { %14780 = vmatmul.mubr.msk.f32.gmra.mxu0 %vm299_vm10, %v16442_v54 }
 0x3b3   :  { %v14750_v57 = vpop.f32.mrf.mxu0  ;;  %v14764_v58 = vpop.f32.mrf.mxu1 }
 0x3b4   :  { %v1078_v8 = vadd.f32 %v14764_v58, %v12410_v63  ;;  %v982_v21 = vadd.f32 %v14750_v57, %v12405_v59  ;;  %v12447_v57 = vld [vmem:[%s19295_s7 + $0x1] ss:$0 sm:$0xff] }
 0x3b5   :  { %v976_v60 = vpop.f32.mrf.mxu0  ;;  %v1072_v61 = vpop.f32.mrf.mxu1 }
 0x3b6   :  { %v977_v62 = vadd.f32 %v12405_v59, %v976_v60  ;;  %v1073_v14 = vadd.f32 %v12410_v63, %v1072_v61 }
 0x3b7   :  { %v14767_v0 = vpop.f32.mrf.mxu1 }
 0x3b8   :  { %v14753_v1 = vpop.f32.mrf.mxu0  ;;  %v1088_v3 = vadd.f32 %v14767_v0, %v12410_v63  ;;  %14790 = vmatprep.mubr.msk.f32.mxu1 %vm1187_vm6, %v977_v62 }
 0x3b9   :  { %v1082_v4 = vpop.f32.mrf.mxu1  ;;  %v992_v26 = vadd.f32 %v14753_v1, %v12405_v59 }
 0x3ba   :  { %v986_v5 = vpop.f32.mrf.mxu0  ;;  %v1083_v6 = vadd.f32 %v12410_v63, %v1082_v4  ;;  %14782 = vmatprep.subr.msk.mxu1 %vm1187_vm6, %v1088_v3 }
 0x3bb   :  { %14783 = vmatpush3.xpose.msk.msra.mxu1 %vm1187_vm6, %v1088_v3  ;;  %v987_v22 = vadd.f32 %v12405_v59, %v986_v5 }
 0x3bc   :  { %v14778_v7 = vpop.f32.mrf.mxu0  ;;  %14784 = vmatprep.subr.msk.mxu1 %vm1187_vm6, %v1083_v6 }
 0x3bd   :  { %v1174_v18 = vadd.f32 %v14778_v7, %v12415_v10 }
 0x3be   :  { %v1168_v9 = vpop.f32.mrf.mxu0 }
 0x3bf   :  { %14785 = vmatpush3.xpose.msk.msra.mxu1 %vm1187_vm6, %v1083_v6  ;;  %v1169_v20 = vadd.f32 %v12415_v10, %v1168_v9 }
 0x3c0   :  { %v14781_v11 = vpop.f32.mrf.mxu0  ;;  %14786 = vmatprep.subr.msk.mxu1 %vm1187_vm6, %v1078_v8 }
 0x3c1   :  { %v1184_v12 = vadd.f32 %v14781_v11, %v12415_v10 }
 0x3c2   :  { %v1178_v15 = vpop.f32.mrf.mxu0 }
 0x3c3   :  { %v1179_v17 = vadd.f32 %v12415_v10, %v1178_v15  ;;  %14796 = vmatprep.subr.mxu0 %v1184_v12  ;;  %14787 = vmatpush3.xpose.msk.msra.mxu1 %vm1187_vm6, %v1078_v8 }
 0x3c4   :  { %14797 = vmatpush3.msra.mxu0 %v1184_v12  ;;  %14788 = vmatprep.subr.msk.mxu1 %vm1187_vm6, %v1073_v14 }
 0x3c5   :  { %14798 = vmatprep.subr.mxu0 %v1179_v17 }
 0x3c6   :  { %14799 = vmatpush3.msra.mxu0 %v1179_v17 }
 0x3c7   :  { %14800 = vmatprep.subr.mxu0 %v1174_v18  ;;  %14789 = vmatpush3.xpose.msk.msra.mxu1 %vm1187_vm6, %v1073_v14 }
 0x3c8   :  { %14801 = vmatpush3.msra.mxu0 %v1174_v18  ;;  %14824 = vmatprep.subr.mxu1 %v12445_v19 }
 0x3c9   :  { %14802 = vmatprep.subr.mxu0 %v1169_v20 }
 0x3ca   :  { %14803 = vmatpush3.msra.mxu0 %v1169_v20  ;;  %14791 = vmatmul.mubr.msk.f32.vlgmr.msra.gmra.mxu1 %vm1187_vm6, %v982_v21 }
 0x3cb   :  { %14793 = vmatprep.mubr.msk.f32.mxu1 %vm1187_vm6, %v987_v22  ;;  %14825 = vmatpush3.msra.mxu1 %v12445_v19 }
 0x3cc   :  { %14826 = vmatprep.subr.mxu1 %v12444_v24 }
 0x3cd   :  { %14827 = vmatpush3.msra.mxu1 %v12444_v24 }
 0x3ce   :  { %14794 = vmatmul.mubr.msk.f32.gmra.mxu1 %vm1187_vm6, %v992_v26  ;;  %14828 = vmatprep.subr.mxu1 %v12443_v25 }
 0x3cf   :  { %14829 = vmatpush3.msra.mxu1 %v12443_v25  ;;  %14832 = vmatprep.mubr.msk.f32.mxu1 %vm299_vm10, %v16425_v47  ;;  %v12435_v25 = vld [vmem:[%s19290_s4 + $0x38] sm:$0xff] }
 0x3d0   :  { %14830 = vmatprep.subr.mxu1 %v12442_v27  ;;  %14810 = vmatprep.subr.mxu0 %v12435_v25 }
 0x3d1   :  { %14831 = vmatpush3.msra.mxu1 %v12442_v27 }
 0x3d2   :  { %14833 = vmatmul.mubr.msk.f32.vlgmr.msra.gmra.mxu1 %vm299_vm10, %v16427_v49 }
 0x3d3   :  { %14835 = vmatprep.mubr.msk.f32.mxu1 %vm299_vm10, %v16440_v53 }
 0x3d6   :  { %14836 = vmatmul.mubr.msk.f32.gmra.mxu1 %vm299_vm10, %v16442_v54 }
 0x48a   :  { %v14792_v32 = vpop.f32.mrf.mxu1 }
 0x48b   :  { %v1298_v36 = vmul.f32 0.35355338, %v14792_v32 }
 0x48c   :  { %v1278_v38 = vpop.f32.mrf.mxu1 }
 0x48d   :  { %v1297_v40 = vmul.f32 0.35355338, %v1278_v38  ;;  %v1302_v31 = vsel %vm16510_vm7, %v1298_v36, -1e+30  ;;  %v12434_v38 = vld [vmem:[%s19290_s4 + $0x30] sm:$0xff] }
 0x48e   :  { %v14795_v13 = vpop.f32.mrf.mxu1  ;;  %v1308_v41 = vsel %vm299_vm10, %v1302_v31, -inf }
 0x48f   :  { %1309 = vmax.xlane.f32.xlu1 %v1308_v41  ;;  %v1301_v43 = vsel %vm16515_vm8, %v1297_v40, -1e+30  ;;  %v1300_v46 = vmul.f32 0.35355338, %v14795_v13  ;;  %v12433_v13 = vld [vmem:[%s19290_s4 + $0x28] sm:$0xff]  ;;  %v12432_v41 = vld [vmem:[%s19290_s4 + $0x20] sm:$0xff] }
 0x490   :  { %v1288_v44 = vpop.f32.mrf.mxu1  ;;  %v1305_v33 = vsel %vm299_vm10, %v1301_v43, -inf }
 0x491   :  { %v1299_v48 = vmul.f32 0.35355338, %v1288_v44  ;;  %1306 = vmax.xlane.f32.xlu0 %v1305_v33  ;;  %v1304_v56 = vsel %vm16530_vm11, %v1300_v46, -1e+30  ;;  %v12455_v44 = vld [vmem:[%s19292_s29 + $0x38] sm:$0xff]  ;;  %v12454_v33 = vld [vmem:[%s19292_s29 + $0x30] sm:$0xff] }
 0x492   :  { %v14834_v50 = vpop.f32.mrf.mxu1  ;;  %v1314_v61 = vsel %vm299_vm10, %v1304_v56, -inf  ;;  %v12453_v46 = vld [vmem:[%s19292_s29 + $0x28] sm:$0xff] }
 0x493   :  { %v1303_v34 = vsel %vm16526_vm9, %v1299_v48, -1e+30  ;;  %v1630_v63 = vadd.f32 %v14834_v50, %v12447_v57  ;;  %v12452_v48 = vld [vmem:[%s19292_s29 + $0x20] sm:$0xff] }
 0x494   :  { %v1624_v52 = vpop.f32.mrf.mxu1  ;;  %v1311_v55 = vsel %vm299_vm10, %v1303_v34, -inf  ;;  %v1446_v50 = vld [vmem:[%s19252_s11] sm:$0xff] }
 0x495   :  { %1312 = vmax.xlane.f32.xlu0 %v1311_v55  ;;  %v1625_v0 = vadd.f32 %v12447_v57, %v1624_v52 }
 0x496   :  { %v14837_v58 = vpop.f32.mrf.mxu1 }
 0x497   :  { %v1640_v59 = vadd.f32 %v14837_v58, %v12447_v57  ;;  %v12437_v58 = vld [vmem:[%s19294_s0 + $0x1] ss:$0 sm:$0xff] }
 0x498   :  { %v1634_v60 = vpop.f32.mrf.mxu1 }
 0x499   :  { %v1635_v62 = vadd.f32 %v12447_v57, %v1634_v60  ;;  %14852 = vmatprep.subr.msk.mxu1 %vm1187_vm6, %v1640_v59  ;;  %1315 = vmax.xlane.f32.xlu0 %v1314_v61 }
 0x49a   :  { %14853 = vmatpush3.xpose.msk.msra.mxu1 %vm1187_vm6, %v1640_v59 }
 0x49b   :  { %14854 = vmatprep.subr.msk.mxu1 %vm1187_vm6, %v1635_v62 }
 0x49e   :  { %14855 = vmatpush3.xpose.msk.msra.mxu1 %vm1187_vm6, %v1635_v62 }
 0x49f   :  { %14856 = vmatprep.subr.msk.mxu1 %vm1187_vm6, %v1630_v63 }
 0x4a2   :  { %14857 = vmatpush3.xpose.msk.msra.mxu1 %vm1187_vm6, %v1630_v63  ;;  %v12496_v63 = vld [vmem:[%s19291_s5 + $0x58] sm:$0xff] }
 0x4a3   :  { %14858 = vmatprep.subr.msk.mxu1 %vm1187_vm6, %v1625_v0 }
 0x4a6   :  { %14859 = vmatpush3.xpose.msk.msra.mxu1 %vm1187_vm6, %v1625_v0 }
 0x4a7   :  { %14888 = vmatprep.subr.mxu1 %v1446_v50 }
 0x518   :  { %v1310_v1 = vpop.xlane.xlu1 %1309 }
 0x519   :  { %v1318_v3 = vsub.f32 %v1302_v31, %v1310_v1 }
 0x51a   :  { %v1307_v4 = vpop.xlane.xlu0 %1306 }
 0x51b   :  { %v1323_v5 = vmul.f32 1.442695, %v1318_v3  ;;  %v1317_v6 = vsub.f32 %v1301_v43, %v1307_v4 }
 0x51d   :  { %15933 = vpow2.f32 %v1323_v5  ;;  %v1321_v7 = vmul.f32 1.442695, %v1317_v6  ;;  %v12457_v6 = vld [vmem:[%s19251_s10 + $0x1] ss:$0 sm:$0xff] }
 0x51e   :  { %v1313_v8 = vpop.xlane.xlu0 %1312 }
 0x51f   :  { %15935 = vpow2.f32 %v1321_v7  ;;  %v1319_v9 = vsub.f32 %v1303_v34, %v1313_v8 }
 0x521   :  { %v1325_v10 = vmul.f32 1.442695, %v1319_v9 }
 0x522   :  { %v1316_v11 = vpop.xlane.xlu0 %1315 }
 0x523   :  { %15937 = vpow2.f32 %v1325_v10  ;;  %v1320_v12 = vsub.f32 %v1304_v56, %v1316_v11  ;;  %v12495_v10 = vld [vmem:[%s19291_s5 + $0x50] sm:$0xff] }
 0x525   :  { %v1327_v14 = vmul.f32 1.442695, %v1320_v12  ;;  %v12494_v12 = vld [vmem:[%s19291_s5 + $0x48] sm:$0xff] }
 0x527   :  { %15939 = vpow2.f32 %v1327_v14 }
 0x52a   :  { %v15934_v15 = vpop.eup %15933 }
 0x52b   :  { %v1332_v17 = vsel %vm299_vm10, %v15934_v15, 0.0 }
 0x52c   :  { %v15936_v18 = vpop.eup %15935  ;;  %1333 = vadd.xlane.f32.xlu0 %v1332_v17 }
 0x52d   :  { %v1329_v19 = vsel %vm299_vm10, %v15936_v18, 0.0 }
 0x52e   :  { %1330 = vadd.xlane.f32.xlu1 %v1329_v19 }
 0x530   :  { %v15938_v20 = vpop.eup %15937 }
 0x531   :  { %v1335_v21 = vsel %vm299_vm10, %v15938_v20, 0.0 }
 0x532   :  { %1336 = vadd.xlane.f32.xlu1 %v1335_v21 }
 0x534   :  { %v15940_v22 = vpop.eup %15939 }
 0x535   :  { %v1338_v24 = vsel %vm299_vm10, %v15940_v22, 0.0 }
 0x536   :  { %1339 = vadd.xlane.f32.xlu0 %v1338_v24 }
 0x5b5   :  { %v1334_v26 = vpop.xlane.xlu0 %1333 }
 0x5b6   :  { %15941 = vrcp.f32 %v1334_v26 }
 0x5b7   :  { %v1331_v27 = vpop.xlane.xlu1 %1330 }
 0x5b8   :  { %15943 = vrcp.f32 %v1331_v27 }
 0x5bb   :  { %v1337_v28 = vpop.xlane.xlu1 %1336 }
 0x5bc   :  { %15945 = vrcp.f32 %v1337_v28 }
 0x5bf   :  { %v1340_v29 = vpop.xlane.xlu0 %1339 }
 0x5c0   :  { %15947 = vrcp.f32 %v1340_v29 }
 0x5c3   :  { %v15942_v30 = vpop.eup %15941 }
 0x5c4   :  { %v1346_v37 = vmul.f32 %v15942_v30, %v15934_v15  ;;  %v12493_v15 = vld [vmem:[%s19291_s5 + $0x40] sm:$0xff] }
 0x5c5   :  { %v15944_v32 = vpop.eup %15943 }
 0x5c6   :  { %v1345_v36 = vmul.f32 %v15944_v32, %v15936_v18 }
 0x5c8   :  { %14804 = vmatprep.mubr.msk.f32.mxu0 %vm299_vm10, %v1345_v36 }
 0x5c9   :  { %v15946_v40 = vpop.eup %15945  ;;  %14805 = vmatmul.mubr.msk.f32.vlgmr.msra.gmra.mxu0 %vm299_vm10, %v1346_v37 }
 0x5ca   :  { %v1347_v31 = vmul.f32 %v15946_v40, %v15938_v20  ;;  %14811 = vmatpush3.msra.mxu0 %v12435_v25 }
 0x5cb   :  { %14812 = vmatprep.subr.mxu0 %v12434_v38 }
 0x5cc   :  { %14807 = vmatprep.mubr.msk.f32.mxu0 %vm299_vm10, %v1347_v31  ;;  %14813 = vmatpush3.msra.mxu0 %v12434_v38 }
 0x5cd   :  { %v15948_v42 = vpop.eup %15947  ;;  %14814 = vmatprep.subr.mxu0 %v12433_v13 }
 0x5ce   :  { %v1348_v43 = vmul.f32 %v15948_v42, %v15940_v22  ;;  %14815 = vmatpush3.msra.mxu0 %v12433_v13 }
 0x5cf   :  { %14816 = vmatprep.subr.mxu0 %v12432_v41 }
 0x5d0   :  { %14808 = vmatmul.mubr.msk.f32.gmra.mxu0 %vm299_vm10, %v1348_v43 }
 0x5d1   :  { %14818 = vmatprep.mubr.msk.f32.mxu0 %vm299_vm10, %v16425_v47  ;;  %14817 = vmatpush3.msra.mxu0 %v12432_v41 }
 0x5d2   :  { %14838 = vmatprep.subr.mxu0 %v12455_v44 }
 0x5d4   :  { %14819 = vmatmul.mubr.msk.f32.vlgmr.msra.gmra.mxu0 %vm299_vm10, %v16427_v49 }
 0x5d5   :  { %14821 = vmatprep.mubr.msk.f32.mxu0 %vm299_vm10, %v16440_v53  ;;  %14839 = vmatpush3.msra.mxu0 %v12455_v44  ;;  %v12498_v44 = vld [vmem:[%s19295_s7 + $0x2] ss:$0 sm:$0xff] }
 0x5d6   :  { %14840 = vmatprep.subr.mxu0 %v12454_v33 }
 0x5d7   :  { %14841 = vmatpush3.msra.mxu0 %v12454_v33 }
 0x5d8   :  { %14822 = vmatmul.mubr.msk.f32.gmra.mxu0 %vm299_vm10, %v16442_v54  ;;  %14842 = vmatprep.subr.mxu0 %v12453_v46 }
 0x5d9   :  { %14843 = vmatpush3.msra.mxu0 %v12453_v46  ;;  %14846 = vmatprep.mubr.msk.f32.mxu0 %vm299_vm10, %v16425_v47 }
 0x5da   :  { %14844 = vmatprep.subr.mxu0 %v12452_v48 }
 0x5db   :  { %14845 = vmatpush3.msra.mxu0 %v12452_v48 }
 0x5dc   :  { %14847 = vmatmul.mubr.msk.f32.vlgmr.msra.gmra.mxu0 %vm299_vm10, %v16427_v49 }
 0x5dd   :  { %14849 = vmatprep.mubr.msk.f32.mxu0 %vm299_vm10, %v16440_v53 }
 0x5e0   :  { %14850 = vmatmul.mubr.msk.f32.gmra.mxu0 %vm299_vm10, %v16442_v54 }
 0x689   :  { %v14806_v34 = vpop.f32.mrf.mxu0 }
 0x68b   :  { %v1427_v52 = vpop.f32.mrf.mxu0 }
 0x690   :  { %v14809_v55 = vpop.f32.mrf.mxu0 }
 0x692   :  { %v1437_v56 = vpop.f32.mrf.mxu0 }
 0x694   :  { %v14820_v57 = vpop.f32.mrf.mxu0 }
 0x695   :  { %v1532_v61 = vadd.f32 %v14820_v57, %v12437_v58 }
 0x696   :  { %v1526_v59 = vpop.f32.mrf.mxu0 }
 0x697   :  { %v1527_v60 = vadd.f32 %v12437_v58, %v1526_v59 }
 0x698   :  { %v14823_v62 = vpop.f32.mrf.mxu0 }
 0x699   :  { %14860 = vmatprep.mubr.msk.f32.mxu1 %vm1187_vm6, %v1527_v60  ;;  %v1542_v3 = vadd.f32 %v14823_v62, %v12437_v58 }
 0x69a   :  { %v1536_v0 = vpop.f32.mrf.mxu0  ;;  %14861 = vmatmul.mubr.msk.f32.vlgmr.msra.gmra.mxu1 %vm1187_vm6, %v1532_v61 }
 0x69b   :  { %v1537_v1 = vadd.f32 %v12437_v58, %v1536_v0  ;;  %14889 = vmatpush3.msra.mxu1 %v1446_v50 }
 0x69c   :  { %v14848_v4 = vpop.f32.mrf.mxu0  ;;  %14910 = vmatprep.subr.mxu1 %v12496_v63 }
 0x69d   :  { %14863 = vmatprep.mubr.msk.f32.mxu1 %vm1187_vm6, %v1537_v1  ;;  %v1728_v14 = vadd.f32 %v14848_v4, %v12457_v6 }
 0x69e   :  { %v1722_v5 = vpop.f32.mrf.mxu0  ;;  %14864 = vmatmul.mubr.msk.f32.gmra.mxu1 %vm1187_vm6, %v1542_v3 }
 0x69f   :  { %14890 = vmatprep.mubr.msk.f32.mxu1 %vm1187_vm6, %v1427_v52  ;;  %v1723_v17 = vadd.f32 %v12457_v6, %v1722_v5 }
 0x6a0   :  { %v14851_v7 = vpop.f32.mrf.mxu0 }
 0x6a1   :  { %v1738_v8 = vadd.f32 %v14851_v7, %v12457_v6 }
 0x6a2   :  { %v1732_v9 = vpop.f32.mrf.mxu0  ;;  %14891 = vmatmul.mubr.msk.f32.vlgmr.msra.gmra.mxu1 %vm1187_vm6, %v14806_v34 }
 0x6a3   :  { %v1733_v11 = vadd.f32 %v12457_v6, %v1732_v9  ;;  %14866 = vmatprep.subr.mxu0 %v1738_v8  ;;  %14893 = vmatprep.mubr.msk.f32.mxu1 %vm1187_vm6, %v1437_v56 }
 0x6a4   :  { %14911 = vmatpush3.msra.mxu1 %v12496_v63  ;;  %14867 = vmatpush3.msra.mxu0 %v1738_v8 }
 0x6a5   :  { %14912 = vmatprep.subr.mxu1 %v12495_v10  ;;  %14868 = vmatprep.subr.mxu0 %v1733_v11 }
 0x6a6   :  { %14913 = vmatpush3.msra.mxu1 %v12495_v10  ;;  %14869 = vmatpush3.msra.mxu0 %v1733_v11 }
 0x6a7   :  { %14894 = vmatmul.mubr.msk.f32.gmra.mxu1 %vm1187_vm6, %v14809_v55  ;;  %14914 = vmatprep.subr.mxu1 %v12494_v12 }
 0x6a8   :  { %14870 = vmatprep.subr.mxu0 %v1728_v14  ;;  %14915 = vmatpush3.msra.mxu1 %v12494_v12  ;;  %v12474_v12 = vld [vmem:[%s19252_s11 + $0x8] sm:$0xff] }
 0x6a9   :  { %14918 = vmatprep.mubr.msk.f32.mxu1 %vm299_vm10, %v16425_v47  ;;  %14871 = vmatpush3.msra.mxu0 %v1728_v14 }
 0x6aa   :  { %14916 = vmatprep.subr.mxu1 %v12493_v15  ;;  %14872 = vmatprep.subr.mxu0 %v1723_v17 }
 0x6ab   :  { %14917 = vmatpush3.msra.mxu1 %v12493_v15  ;;  %14873 = vmatpush3.msra.mxu0 %v1723_v17 }
 0x6ac   :  { %14919 = vmatmul.mubr.msk.f32.vlgmr.msra.gmra.mxu1 %vm299_vm10, %v16427_v49  ;;  %14880 = vmatprep.subr.mxu0 %v12474_v12 }
 0x6ad   :  { %14921 = vmatprep.mubr.msk.f32.mxu1 %vm299_vm10, %v16440_v53 }
 0x6b0   :  { %14922 = vmatmul.mubr.msk.f32.gmra.mxu1 %vm299_vm10, %v16442_v54 }
 0x75a   :  { %v14862_v18 = vpop.f32.mrf.mxu1 }
 0x75b   :  { %v1851_v19 = vmul.f32 0.35355338, %v14862_v18 }
 0x75c   :  { %v1831_v20 = vpop.f32.mrf.mxu1 }
 0x75d   :  { %v1850_v21 = vmul.f32 0.35355338, %v1831_v20  ;;  %v1855_v22 = vsel %vm16510_vm7, %v1851_v19, -1e+30 }
 0x75e   :  { %v14865_v24 = vpop.f32.mrf.mxu1  ;;  %v1861_v25 = vsel %vm299_vm10, %v1855_v22, -inf }
 0x75f   :  { %v1853_v26 = vmul.f32 0.35355338, %v14865_v24  ;;  %1862 = vmax.xlane.f32.xlu0 %v1861_v25  ;;  %v1854_v27 = vsel %vm16515_vm8, %v1850_v21, -1e+30 }
 0x760   :  { %v1841_v28 = vpop.f32.mrf.mxu1  ;;  %v1858_v29 = vsel %vm299_vm10, %v1854_v27, -inf }
 0x761   :  { %v1852_v30 = vmul.f32 0.35355338, %v1841_v28  ;;  %1859 = vmax.xlane.f32.xlu1 %v1858_v29  ;;  %v1857_v32 = vsel %vm16530_vm11, %v1853_v26, -1e+30  ;;  %v12486_v28 = vld [vmem:[%s19290_s4 + $0x58] sm:$0xff] }
 0x762   :  { %v16644_v36 = vpop.f32.mrf.mxu1  ;;  %v1867_v37 = vsel %vm299_vm10, %v1857_v32, -inf }
 0x763   :  { %1868 = vmax.xlane.f32.xlu0 %v1867_v37  ;;  %v1856_v38 = vsel %vm16526_vm9, %v1852_v30, -1e+30 }
 0x764   :  { %v16649_v40 = vpop.f32.mrf.mxu1  ;;  %v1864_v31 = vsel %vm299_vm10, %v1856_v38, -inf }
 0x765   :  { %1865 = vmax.xlane.f32.xlu1 %v1864_v31 }
 0x767   :  { %v16652_v13 = vpop.f32.mrf.mxu1 }
 0x769   :  { %v16654_v41 = vpop.f32.mrf.mxu1 }
 0x76c   :  { %v14920_v42 = vpop.f32.mrf.mxu1 }
 0x76d   :  { %v2378_v34 = vadd.f32 %v14920_v42, %v12498_v44  ;;  %v12483_v42 = vld [vmem:[%s19290_s4 + $0x40] sm:$0xff] }
 0x76e   :  { %v2372_v43 = vpop.f32.mrf.mxu1 }
 0x76f   :  { %v2373_v52 = vadd.f32 %v12498_v44, %v2372_v43  ;;  %v12506_v43 = vld [vmem:[%s19292_s29 + $0x58] sm:$0xff] }
 0x770   :  { %v14923_v33 = vpop.f32.mrf.mxu1 }
 0x771   :  { %v2388_v46 = vadd.f32 %v14923_v33, %v12498_v44  ;;  %v12504_v33 = vld [vmem:[%s19292_s29 + $0x48] sm:$0xff] }
 0x772   :  { %v2382_v48 = vpop.f32.mrf.mxu1 }
 0x773   :  { %v2383_v50 = vadd.f32 %v12498_v44, %v2382_v48  ;;  %14938 = vmatprep.subr.msk.mxu1 %vm1187_vm6, %v2388_v46  ;;  %v12505_v44 = vld [vmem:[%s19292_s29 + $0x50] sm:$0xff]  ;;  %v12533_v48 = vld [vmem:[%s19290_s4 + $0x78] sm:$0xff] }
 0x774   :  { %14939 = vmatpush3.xpose.msk.msra.mxu1 %vm1187_vm6, %v2388_v46  ;;  %v12503_v46 = vld [vmem:[%s19292_s29 + $0x40] sm:$0xff] }
 0x775   :  { %14940 = vmatprep.subr.msk.mxu1 %vm1187_vm6, %v2383_v50 }
 0x778   :  { %14941 = vmatpush3.xpose.msk.msra.mxu1 %vm1187_vm6, %v2383_v50 }
 0x779   :  { %14942 = vmatprep.subr.msk.mxu1 %vm1187_vm6, %v2378_v34 }
 0x77c   :  { %14943 = vmatpush3.xpose.msk.msra.mxu1 %vm1187_vm6, %v2378_v34 }
 0x77d   :  { %14944 = vmatprep.subr.msk.mxu1 %vm1187_vm6, %v2373_v52 }
 0x780   :  { %14945 = vmatpush3.xpose.msk.msra.mxu1 %vm1187_vm6, %v2373_v52 }
 0x781   :  { %14974 = vmatprep.subr.mxu1 %v12533_v48 }
 0x7e8   :  { %v1863_v55 = vpop.xlane.xlu0 %1862 }
 0x7e9   :  { %v1871_v56 = vsub.f32 %v1855_v22, %v1863_v55 }
 0x7ea   :  { %v1860_v57 = vpop.xlane.xlu1 %1859 }
 0x7eb   :  { %v1876_v58 = vmul.f32 1.442695, %v1871_v56  ;;  %v1870_v59 = vsub.f32 %v1854_v27, %v1860_v57  ;;  %v12488_v57 = vld [vmem:[%s19294_s0 + $0x2] ss:$0 sm:$0xff] }
 0x7ec   :  { %v1869_v60 = vpop.xlane.xlu0 %1868 }
 0x7ed   :  { %15949 = vpow2.f32 %v1876_v58  ;;  %v1874_v61 = vmul.f32 1.442695, %v1870_v59  ;;  %v1873_v62 = vsub.f32 %v1857_v32, %v1869_v60  ;;  %v12485_v32 = vld [vmem:[%s19290_s4 + $0x50] sm:$0xff] }
 0x7ee   :  { %v1866_v63 = vpop.xlane.xlu1 %1865 }
 0x7ef   :  { %15951 = vpow2.f32 %v1874_v61  ;;  %v1880_v0 = vmul.f32 1.442695, %v1873_v62  ;;  %v1872_v1 = vsub.f32 %v1856_v38, %v1866_v63  ;;  %v12484_v38 = vld [vmem:[%s19290_s4 + $0x48] sm:$0xff]  ;;  %v12532_v62 = vld [vmem:[%s19290_s4 + $0x70] sm:$0xff] }
 0x7f1   :  { %15953 = vpow2.f32 %v1880_v0  ;;  %v1878_v3 = vmul.f32 1.442695, %v1872_v1  ;;  %v12531_v1 = vld [vmem:[%s19290_s4 + $0x68] sm:$0xff] }
 0x7f3   :  { %15955 = vpow2.f32 %v1878_v3 }
 0x7fa   :  { %v15950_v4 = vpop.eup %15949 }
 0x7fb   :  { %v1885_v5 = vsel %vm299_vm10, %v15950_v4, 0.0 }
 0x7fc   :  { %v15952_v6 = vpop.eup %15951  ;;  %1886 = vadd.xlane.f32.xlu0 %v1885_v5  ;;  %v12530_v5 = vld [vmem:[%s19290_s4 + $0x60] sm:$0xff] }
 0x7fd   :  { %v1882_v7 = vsel %vm299_vm10, %v15952_v6, 0.0 }
 0x7fe   :  { %v15954_v8 = vpop.eup %15953  ;;  %1883 = vadd.xlane.f32.xlu1 %v1882_v7  ;;  %v12553_v7 = vld [vmem:[%s19292_s29 + $0x78] sm:$0xff] }
 0x7ff   :  { %v1891_v9 = vsel %vm299_vm10, %v15954_v8, 0.0 }
 0x800   :  { %v15956_v10 = vpop.eup %15955  ;;  %1892 = vadd.xlane.f32.xlu0 %v1891_v9 }
 0x801   :  { %v1888_v11 = vsel %vm299_vm10, %v15956_v10, 0.0 }
 0x802   :  { %1889 = vadd.xlane.f32.xlu1 %v1888_v11 }
 0x885   :  { %v1887_v14 = vpop.xlane.xlu0 %1886 }
 0x886   :  { %15957 = vrcp.f32 %v1887_v14 }
 0x887   :  { %v1884_v15 = vpop.xlane.xlu1 %1883 }
 0x888   :  { %15959 = vrcp.f32 %v1884_v15  ;;  %v12551_v15 = vld [vmem:[%s19292_s29 + $0x68] sm:$0xff] }
 0x889   :  { %v1893_v17 = vpop.xlane.xlu0 %1892 }
 0x88a   :  { %15961 = vrcp.f32 %v1893_v17 }
 0x88b   :  { %v1890_v18 = vpop.xlane.xlu1 %1889 }
 0x88c   :  { %15963 = vrcp.f32 %v1890_v18  ;;  %v12550_v18 = vld [vmem:[%s19292_s29 + $0x60] sm:$0xff] }
 0x893   :  { %v15958_v19 = vpop.eup %15957 }
 0x894   :  { %v1899_v22 = vmul.f32 %v15958_v19, %v15950_v4 }
 0x895   :  { %v15960_v20 = vpop.eup %15959 }
 0x896   :  { %v1898_v21 = vmul.f32 %v15960_v20, %v15952_v6 }
 0x897   :  { %v15962_v24 = vpop.eup %15961 }
 0x898   :  { %14874 = vmatprep.mubr.msk.f32.mxu0 %vm299_vm10, %v1898_v21  ;;  %v1901_v27 = vmul.f32 %v15962_v24, %v15954_v8  ;;  %v12508_v8 = vld [vmem:[%s19251_s10 + $0x2] ss:$0 sm:$0xff] }
 0x899   :  { %v15964_v25 = vpop.eup %15963  ;;  %14875 = vmatmul.mubr.msk.f32.vlgmr.msra.gmra.mxu0 %vm299_vm10, %v1899_v22 }
 0x89a   :  { %v1900_v26 = vmul.f32 %v15964_v25, %v15956_v10  ;;  %14881 = vmatpush3.msra.mxu0 %v12474_v12  ;;  %v12552_v12 = vld [vmem:[%s19292_s29 + $0x70] sm:$0xff] }
 0x89b   :  { %14896 = vmatprep.subr.mxu0 %v12486_v28 }
 0x89c   :  { %14877 = vmatprep.mubr.msk.f32.mxu0 %vm299_vm10, %v1900_v26 }
 0x89d   :  { %14878 = vmatmul.mubr.msk.f32.gmra.mxu0 %vm299_vm10, %v1901_v27 }
 0x959   :  { %v14876_v29 = vpop.f32.mrf.mxu0 }
 0x95b   :  { %v1980_v30 = vpop.f32.mrf.mxu0 }
 0x95c   :  { %14882 = vmatprep.mubr.msk.f32.mxu0 %vm1187_vm6, %v1980_v30 }
 0x95d   :  { %v14879_v37 = vpop.f32.mrf.mxu0  ;;  %14883 = vmatmul.mubr.msk.f32.vlgmr.msra.gmra.mxu0 %vm1187_vm6, %v14876_v29 }
 0x95e   :  { %14897 = vmatpush3.msra.mxu0 %v12486_v28 }
 0x95f   :  { %v1990_v31 = vpop.f32.mrf.mxu0  ;;  %14898 = vmatprep.subr.mxu0 %v12485_v32 }
 0x960   :  { %14885 = vmatprep.mubr.msk.f32.mxu0 %vm1187_vm6, %v1990_v31  ;;  %14899 = vmatpush3.msra.mxu0 %v12485_v32 }
 0x961   :  { %14886 = vmatmul.mubr.msk.f32.gmra.mxu0 %vm1187_vm6, %v14879_v37  ;;  %14900 = vmatprep.subr.mxu0 %v12484_v38  ;;  %v16789_v37 = vld [vmem:[%s19294_s0 + $0x3] ss:$0 sm:$0xff] }
 0x962   :  { %14901 = vmatpush3.msra.mxu0 %v12484_v38  ;;  %14904 = vmatprep.mubr.msk.f32.mxu0 %vm299_vm10, %v16425_v47 }
 0x963   :  { %14902 = vmatprep.subr.mxu0 %v12483_v42 }
 0x964   :  { %14903 = vmatpush3.msra.mxu0 %v12483_v42 }
 0x965   :  { %14905 = vmatmul.mubr.msk.f32.vlgmr.msra.gmra.mxu0 %vm299_vm10, %v16427_v49  ;;  %14924 = vmatprep.subr.mxu0 %v12506_v43 }
 0x966   :  { %14907 = vmatprep.mubr.msk.f32.mxu0 %vm299_vm10, %v16440_v53  ;;  %14925 = vmatpush3.msra.mxu0 %v12506_v43 }
 0x967   :  { %14926 = vmatprep.subr.mxu0 %v12505_v44 }
 0x968   :  { %14927 = vmatpush3.msra.mxu0 %v12505_v44 }
 0x969   :  { %14908 = vmatmul.mubr.msk.f32.gmra.mxu0 %vm299_vm10, %v16442_v54  ;;  %14928 = vmatprep.subr.mxu0 %v12504_v33 }
 0x96a   :  { %14929 = vmatpush3.msra.mxu0 %v12504_v33  ;;  %14932 = vmatprep.mubr.msk.f32.mxu0 %vm299_vm10, %v16425_v47 }
 0x96b   :  { %14930 = vmatprep.subr.mxu0 %v12503_v46 }
 0x96c   :  { %14931 = vmatpush3.msra.mxu0 %v12503_v46 }
 0x96d   :  { %14933 = vmatmul.mubr.msk.f32.vlgmr.msra.gmra.mxu0 %vm299_vm10, %v16427_v49 }
 0x96e   :  { %14935 = vmatprep.mubr.msk.f32.mxu0 %vm299_vm10, %v16440_v53 }
 0x971   :  { %14936 = vmatmul.mubr.msk.f32.gmra.mxu0 %vm299_vm10, %v16442_v54 }
 0xa1d   :  { %v16725_v50 = vpop.f32.mrf.mxu0 }
 0xa1f   :  { %v16727_v34 = vpop.f32.mrf.mxu0 }
 0xa21   :  { %v16729_v52 = vpop.f32.mrf.mxu0 }
 0xa23   :  { %v16731_v55 = vpop.f32.mrf.mxu0 }
 0xa25   :  { %v14906_v56 = vpop.f32.mrf.mxu0 }
 0xa26   :  { %v2280_v60 = vadd.f32 %v14906_v56, %v12488_v57 }
 0xa27   :  { %v2274_v58 = vpop.f32.mrf.mxu0 }
 0xa28   :  { %v2275_v59 = vadd.f32 %v12488_v57, %v2274_v58 }
 0xa29   :  { %v14909_v61 = vpop.f32.mrf.mxu0 }
 0xa2a   :  { %14946 = vmatprep.mubr.msk.f32.mxu1 %vm1187_vm6, %v2275_v59  ;;  %v2290_v3 = vadd.f32 %v14909_v61, %v12488_v57 }
 0xa2b   :  { %v2284_v63 = vpop.f32.mrf.mxu0  ;;  %14947 = vmatmul.mubr.msk.f32.vlgmr.msra.gmra.mxu1 %vm1187_vm6, %v2280_v60 }
 0xa2c   :  { %v2285_v0 = vadd.f32 %v12488_v57, %v2284_v63  ;;  %14975 = vmatpush3.msra.mxu1 %v12533_v48 }
 0xa2d   :  { %v14934_v4 = vpop.f32.mrf.mxu0  ;;  %14976 = vmatprep.subr.mxu1 %v12532_v62 }
 0xa2e   :  { %14949 = vmatprep.mubr.msk.f32.mxu1 %vm1187_vm6, %v2285_v0  ;;  %14977 = vmatpush3.msra.mxu1 %v12532_v62  ;;  %v2476_v17 = vadd.f32 %v14934_v4, %v12508_v8 }
 0xa2f   :  { %v2470_v6 = vpop.f32.mrf.mxu0  ;;  %14950 = vmatmul.mubr.msk.f32.gmra.mxu1 %vm1187_vm6, %v2290_v3  ;;  %14978 = vmatprep.subr.mxu1 %v12531_v1 }
 0xa30   :  { %14979 = vmatpush3.msra.mxu1 %v12531_v1  ;;  %14982 = vmatprep.mubr.msk.f32.mxu1 %vm299_vm10, %v16425_v47  ;;  %v2471_v19 = vadd.f32 %v12508_v8, %v2470_v6 }
 0xa31   :  { %v14937_v9 = vpop.f32.mrf.mxu0  ;;  %14980 = vmatprep.subr.mxu1 %v12530_v5 }
 0xa32   :  { %v2486_v10 = vadd.f32 %v14937_v9, %v12508_v8  ;;  %14981 = vmatpush3.msra.mxu1 %v12530_v5 }
 0xa33   :  { %v2480_v11 = vpop.f32.mrf.mxu0  ;;  %14983 = vmatmul.mubr.msk.f32.vlgmr.msra.gmra.mxu1 %vm299_vm10, %v16427_v49  ;;  %15002 = vmatprep.subr.mxu1 %v12553_v7 }
 0xa34   :  { %v2481_v14 = vadd.f32 %v12508_v8, %v2480_v11  ;;  %14952 = vmatprep.subr.mxu0 %v2486_v10  ;;  %14985 = vmatprep.mubr.msk.f32.mxu1 %vm299_vm10, %v16440_v53 }
 0xa35   :  { %15003 = vmatpush3.msra.mxu1 %v12553_v7  ;;  %14953 = vmatpush3.msra.mxu0 %v2486_v10 }
 0xa36   :  { %15004 = vmatprep.subr.mxu1 %v12552_v12  ;;  %14954 = vmatprep.subr.mxu0 %v2481_v14 }
 0xa37   :  { %15005 = vmatpush3.msra.mxu1 %v12552_v12  ;;  %14955 = vmatpush3.msra.mxu0 %v2481_v14 }
 0xa38   :  { %14986 = vmatmul.mubr.msk.f32.gmra.mxu1 %vm299_vm10, %v16442_v54  ;;  %15006 = vmatprep.subr.mxu1 %v12551_v15 }
 0xa39   :  { %14956 = vmatprep.subr.mxu0 %v2476_v17  ;;  %15007 = vmatpush3.msra.mxu1 %v12551_v15  ;;  %v12525_v15 = vld [vmem:[%s19252_s11 + $0x10] sm:$0xff] }
 0xa3a   :  { %15010 = vmatprep.mubr.msk.f32.mxu1 %vm299_vm10, %v16425_v47  ;;  %14957 = vmatpush3.msra.mxu0 %v2476_v17 }
 0xa3b   :  { %15008 = vmatprep.subr.mxu1 %v12550_v18  ;;  %14958 = vmatprep.subr.mxu0 %v2471_v19 }
 0xa3c   :  { %15009 = vmatpush3.msra.mxu1 %v12550_v18  ;;  %14959 = vmatpush3.msra.mxu0 %v2471_v19 }
 0xa3d   :  { %15011 = vmatmul.mubr.msk.f32.vlgmr.msra.gmra.mxu1 %vm299_vm10, %v16427_v49  ;;  %14966 = vmatprep.subr.mxu0 %v12525_v15 }
 0xa3e   :  { %15013 = vmatprep.mubr.msk.f32.mxu1 %vm299_vm10, %v16440_v53 }
 0xa41   :  { %15014 = vmatmul.mubr.msk.f32.gmra.mxu1 %vm299_vm10, %v16442_v54 }
 0xaeb   :  { %v14948_v20 = vpop.f32.mrf.mxu1 }
 0xaec   :  { %v2599_v21 = vmul.f32 0.35355338, %v14948_v20 }
 0xaed   :  { %v2579_v22 = vpop.f32.mrf.mxu1 }
 0xaee   :  { %v2598_v24 = vmul.f32 0.35355338, %v2579_v22  ;;  %v2603_v25 = vsel %vm16510_vm7, %v2599_v21, -1e+30 }
 0xaef   :  { %v14951_v26 = vpop.f32.mrf.mxu1  ;;  %v2609_v27 = vsel %vm299_vm10, %v2603_v25, -inf }
 0xaf0   :  { %v2601_v28 = vmul.f32 0.35355338, %v14951_v26  ;;  %2610 = vmax.xlane.f32.xlu0 %v2609_v27  ;;  %v2602_v29 = vsel %vm16515_vm8, %v2598_v24, -1e+30 }
 0xaf1   :  { %v2589_v30 = vpop.f32.mrf.mxu1  ;;  %v2606_v32 = vsel %vm299_vm10, %v2602_v29, -inf }
 0xaf2   :  { %v2600_v38 = vmul.f32 0.35355338, %v2589_v30  ;;  %2607 = vmax.xlane.f32.xlu1 %v2606_v32  ;;  %v2605_v31 = vsel %vm16530_vm11, %v2601_v28, -1e+30  ;;  %v12543_v30 = vld [vmem:[%s19291_s5 + $0x78] sm:$0xff] }
 0xaf3   :  { %v14984_v42 = vpop.f32.mrf.mxu1  ;;  %v2615_v43 = vsel %vm299_vm10, %v2605_v31, -inf }
 0xaf4   :  { %v16795_v44 = vadd.f32 %v14984_v42, %v16789_v37  ;;  %2616 = vmax.xlane.f32.xlu0 %v2615_v43  ;;  %v2604_v33 = vsel %vm16526_vm9, %v2600_v38, -1e+30  ;;  %v12541_v43 = vld [vmem:[%s19291_s5 + $0x68] sm:$0xff] }
 0xaf5   :  { %v2929_v46 = vpop.f32.mrf.mxu1  ;;  %v2612_v48 = vsel %vm299_vm10, %v2604_v33, -inf }
 0xaf6   :  { %v2930_v56 = vadd.f32 %v16789_v37, %v2929_v46  ;;  %2613 = vmax.xlane.f32.xlu1 %v2612_v48  ;;  %v12540_v46 = vld [vmem:[%s19291_s5 + $0x60] sm:$0xff]  ;;  %v2182_v48 = vadd.f32 %v16644_v36, %v16725_v50 }
 0xaf7   :  { %v12545_v36 = vld [vmem:[%s19295_s7 + $0x3] ss:$0 sm:$0xff] }
 0xaf8   :  { %15024 = vmatprep.mubr.msk.f32.mxu1 %vm1187_vm6, %v2930_v56 }
 0xb79   :  { %v2611_v57 = vpop.xlane.xlu0 %2610 }
 0xb7a   :  { %v2619_v58 = vsub.f32 %v2603_v25, %v2611_v57 }
 0xb7b   :  { %v2608_v59 = vpop.xlane.xlu1 %2607 }
 0xb7c   :  { %v2624_v60 = vmul.f32 1.442695, %v2619_v58  ;;  %v2618_v61 = vsub.f32 %v2602_v29, %v2608_v59  ;;  %v2192_v59 = vadd.f32 %v16652_v13, %v16729_v52 }
 0xb7d   :  { %v2617_v62 = vpop.xlane.xlu0 %2616 }
 0xb7e   :  { %15965 = vpow2.f32 %v2624_v60  ;;  %v2622_v63 = vmul.f32 1.442695, %v2618_v61  ;;  %v2621_v0 = vsub.f32 %v2605_v31, %v2617_v62  ;;  %v12542_v31 = vld [vmem:[%s19291_s5 + $0x70] sm:$0xff] }
 0xb7f   :  { %v2614_v1 = vpop.xlane.xlu1 %2613 }
 0xb80   :  { %15967 = vpow2.f32 %v2622_v63  ;;  %v2628_v3 = vmul.f32 1.442695, %v2621_v0  ;;  %v2620_v4 = vsub.f32 %v2604_v33, %v2614_v1  ;;  %v14987_v63 = vpop.f32.mrf.mxu1 }
 0xb82   :  { %15969 = vpow2.f32 %v2628_v3  ;;  %v2626_v5 = vmul.f32 1.442695, %v2620_v4  ;;  %v2939_v3 = vpop.f32.mrf.mxu1 }
 0xb84   :  { %15971 = vpow2.f32 %v2626_v5  ;;  %v15012_v13 = vpop.f32.mrf.mxu1 }
 0xb8b   :  { %v15966_v6 = vpop.eup %15965 }
 0xb8c   :  { %v2633_v7 = vsel %vm299_vm10, %v15966_v6, 0.0 }
 0xb8d   :  { %v15968_v8 = vpop.eup %15967  ;;  %2634 = vadd.xlane.f32.xlu0 %v2633_v7  ;;  %v3125_v7 = vpop.f32.mrf.mxu1 }
 0xb8e   :  { %v2630_v9 = vsel %vm299_vm10, %v15968_v8, 0.0 }
 0xb8f   :  { %v15970_v10 = vpop.eup %15969  ;;  %2631 = vadd.xlane.f32.xlu1 %v2630_v9  ;;  %v15015_v9 = vpop.f32.mrf.mxu1 }
 0xb90   :  { %v2639_v11 = vsel %vm299_vm10, %v15970_v10, 0.0 }
 0xb91   :  { %v15972_v12 = vpop.eup %15971  ;;  %2640 = vadd.xlane.f32.xlu0 %v2639_v11 }
 0xb92   :  { %v2636_v14 = vsel %vm299_vm10, %v15972_v12, 0.0 }
 0xb93   :  { %2637 = vadd.xlane.f32.xlu1 %v2636_v14  ;;  %v2940_v14 = vadd.f32 %v16789_v37, %v2939_v3 }
 0xc16   :  { %v2635_v17 = vpop.xlane.xlu0 %2634 }
 0xc17   :  { %15973 = vrcp.f32 %v2635_v17  ;;  %v2945_v17 = vadd.f32 %v14987_v63, %v16789_v37 }
 0xc18   :  { %v2632_v18 = vpop.xlane.xlu1 %2631 }
 0xc19   :  { %15975 = vrcp.f32 %v2632_v18 }
 0xc1a   :  { %v2641_v19 = vpop.xlane.xlu0 %2640 }
 0xc1b   :  { %15977 = vrcp.f32 %v2641_v19 }
 0xc1c   :  { %v2638_v20 = vpop.xlane.xlu1 %2637 }
 0xc1d   :  { %15979 = vrcp.f32 %v2638_v20 }
 0xc24   :  { %v15974_v21 = vpop.eup %15973 }
 0xc25   :  { %v2647_v25 = vmul.f32 %v15974_v21, %v15966_v6 }
 0xc26   :  { %v15976_v22 = vpop.eup %15975 }
 0xc27   :  { %v2646_v24 = vmul.f32 %v15976_v22, %v15968_v8 }
 0xc28   :  { %v15978_v26 = vpop.eup %15977 }
 0xc29   :  { %14960 = vmatprep.mubr.msk.f32.mxu0 %vm299_vm10, %v2646_v24  ;;  %v2649_v29 = vmul.f32 %v15978_v26, %v15970_v10  ;;  %v12555_v10 = vld [vmem:[%s19251_s10 + $0x3] ss:$0 sm:$0xff] }
 0xc2a   :  { %v15980_v27 = vpop.eup %15979  ;;  %14961 = vmatmul.mubr.msk.f32.vlgmr.msra.gmra.mxu0 %vm299_vm10, %v2647_v25  ;;  %v3141_v11 = vadd.f32 %v15015_v9, %v12555_v10  ;;  %v3131_v18 = vadd.f32 %v15012_v13, %v12555_v10  ;;  %v3126_v19 = vadd.f32 %v12555_v10, %v3125_v7  ;;  %v12572_v9 = vld [vmem:[%s19252_s11 + $0x18] sm:$0xff] }
 0xc2b   :  { %v2648_v28 = vmul.f32 %v15980_v27, %v15972_v12  ;;  %14967 = vmatpush3.msra.mxu0 %v12525_v15  ;;  %v3135_v12 = vpop.f32.mrf.mxu1 }
 0xc2c   :  { %14988 = vmatprep.subr.mxu0 %v12543_v30  ;;  %v3136_v15 = vadd.f32 %v12555_v10, %v3135_v12 }
 0xc2d   :  { %14963 = vmatprep.mubr.msk.f32.mxu0 %vm299_vm10, %v2648_v28 }
 0xc2e   :  { %14964 = vmatmul.mubr.msk.f32.gmra.mxu0 %vm299_vm10, %v2649_v29 }
 0xcea   :  { %v14962_v32 = vpop.f32.mrf.mxu0 }
 0xcec   :  { %v2728_v38 = vpop.f32.mrf.mxu0 }
 0xced   :  { %14968 = vmatprep.mubr.msk.f32.mxu0 %vm1187_vm6, %v2728_v38 }
 0xcee   :  { %v14965_v42 = vpop.f32.mrf.mxu0  ;;  %14969 = vmatmul.mubr.msk.f32.vlgmr.msra.gmra.mxu0 %vm1187_vm6, %v14962_v32 }
 0xcef   :  { %14989 = vmatpush3.msra.mxu0 %v12543_v30 }
 0xcf0   :  { %v2738_v33 = vpop.f32.mrf.mxu0  ;;  %14990 = vmatprep.subr.mxu0 %v12542_v31 }
 0xcf1   :  { %14971 = vmatprep.mubr.msk.f32.mxu0 %vm1187_vm6, %v2738_v33  ;;  %14991 = vmatpush3.msra.mxu0 %v12542_v31 }
 0xcf2   :  { %14972 = vmatmul.mubr.msk.f32.gmra.mxu0 %vm1187_vm6, %v14965_v42  ;;  %14992 = vmatprep.subr.mxu0 %v12541_v43 }
 0xcf3   :  { %14993 = vmatpush3.msra.mxu0 %v12541_v43  ;;  %14996 = vmatprep.mubr.msk.f32.mxu0 %vm299_vm10, %v16425_v47 }
 0xcf4   :  { %14994 = vmatprep.subr.mxu0 %v12540_v46 }
 0xcf5   :  { %14995 = vmatpush3.msra.mxu0 %v12540_v46 }
 0xcf6   :  { %14997 = vmatmul.mubr.msk.f32.vlgmr.msra.gmra.mxu0 %vm299_vm10, %v16427_v49 }
 0xcf7   :  { %14999 = vmatprep.mubr.msk.f32.mxu0 %vm299_vm10, %v16440_v53 }
 0xcfa   :  { %15000 = vmatmul.mubr.msk.f32.gmra.mxu0 %vm299_vm10, %v16442_v54 }
 0xcfb   :  { %3705 = vmatprep.mubr.bf16.mxu0 %v16115_v2 }
 0xdae   :  { %v14970_v56 = vpop.f32.mrf.mxu0 }
 0xdaf   :  { %v16840_v57 = vadd.f32 %v14970_v56, %v2182_v48 }
 0xdb0   :  { %v16842_v58 = vpop.f32.mrf.mxu0 }
 0xdb2   :  { %v14973_v60 = vpop.f32.mrf.mxu0 }
 0xdb3   :  { %v16846_v61 = vadd.f32 %v14973_v60, %v2192_v59 }
 0xdb4   :  { %v16848_v62 = vpop.f32.mrf.mxu0 }
 0xdb6   :  { %v14998_v0 = vpop.f32.mrf.mxu0 }
 0xdb7   :  { %v3033_v52 = vadd.f32 %v14998_v0, %v12545_v36 }
 0xdb8   :  { %v3027_v1 = vpop.f32.mrf.mxu0 }
 0xdb9   :  { %v3028_v8 = vadd.f32 %v12545_v36, %v3027_v1 }
 0xdba   :  { %v15001_v50 = vpop.f32.mrf.mxu0 }
 0xdbb   :  { %v3043_v4 = vadd.f32 %v15001_v50, %v12545_v36 }
 0xdbc   :  { %v3037_v5 = vpop.f32.mrf.mxu0 }
 0xdbd   :  { %v3038_v6 = vadd.f32 %v12545_v36, %v3037_v5  ;;  %15016 = vmatprep.subr.msk.mxu1 %vm1187_vm6, %v3043_v4 }
 0xdbe   :  { %15017 = vmatpush3.xpose.msk.msra.mxu1 %vm1187_vm6, %v3043_v4 }
 0xdbf   :  { %15018 = vmatprep.subr.msk.mxu1 %vm1187_vm6, %v3038_v6 }
 0xdc2   :  { %15019 = vmatpush3.xpose.msk.msra.mxu1 %vm1187_vm6, %v3038_v6 }
 0xdc3   :  { %15020 = vmatprep.subr.msk.mxu1 %vm1187_vm6, %v3033_v52 }
 0xdc6   :  { %15021 = vmatpush3.xpose.msk.msra.mxu1 %vm1187_vm6, %v3033_v52 }
 0xdc7   :  { %15022 = vmatprep.subr.msk.mxu1 %vm1187_vm6, %v3028_v8 }
 0xdca   :  { %15023 = vmatpush3.xpose.msk.msra.mxu1 %vm1187_vm6, %v3028_v8 }
 0xdcb   :  { %15030 = vmatprep.subr.mxu1 %v3141_v11 }
 0xdcd   :  { %15025 = vmatmul.mubr.msk.f32.vlgmr.msra.gmra.mxu1 %vm1187_vm6, %v16795_v44 }
 0xdce   :  { %15027 = vmatprep.mubr.msk.f32.mxu1 %vm1187_vm6, %v2940_v14  ;;  %15031 = vmatpush3.msra.mxu1 %v3141_v11 }
 0xdcf   :  { %15032 = vmatprep.subr.mxu1 %v3136_v15 }
 0xdd0   :  { %15033 = vmatpush3.msra.mxu1 %v3136_v15 }
 0xdd1   :  { %15028 = vmatmul.mubr.msk.f32.gmra.mxu1 %vm1187_vm6, %v2945_v17  ;;  %15034 = vmatprep.subr.mxu1 %v3131_v18 }
 0xdd2   :  { %15035 = vmatpush3.msra.mxu1 %v3131_v18 }
 0xdd3   :  { %15036 = vmatprep.subr.mxu1 %v3126_v19 }
 0xdd4   :  { %15037 = vmatpush3.msra.mxu1 %v3126_v19 }
 0xdd5   :  { %15044 = vmatprep.subr.mxu1 %v12572_v9 }
 0xe8d   :  { %v15026_v20 = vpop.f32.mrf.mxu1 }
 0xe8e   :  { %v3254_v21 = vmul.f32 0.35355338, %v15026_v20 }
 0xe8f   :  { %v3234_v22 = vpop.f32.mrf.mxu1 }
 0xe90   :  { %v3253_v24 = vmul.f32 0.35355338, %v3234_v22  ;;  %v3258_v44 = vsel %vm16510_vm7, %v3254_v21, -1e+30 }
 0xe91   :  { %v15029_v25 = vpop.f32.mrf.mxu1  ;;  %v3264_v37 = vsel %vm299_vm10, %v3258_v44, -inf }
 0xe92   :  { %v3256_v26 = vmul.f32 0.35355338, %v15029_v25  ;;  %3265 = vmax.xlane.f32.xlu0 %v3264_v37  ;;  %v3257_v27 = vsel %vm16515_vm8, %v3253_v24, -1e+30 }
 0xe93   :  { %v3244_v28 = vpop.f32.mrf.mxu1  ;;  %v3261_v29 = vsel %vm299_vm10, %v3257_v27, -inf }
 0xe94   :  { %v3255_v30 = vmul.f32 0.35355338, %v3244_v28  ;;  %3262 = vmax.xlane.f32.xlu1 %v3261_v29  ;;  %v3260_v32 = vsel %vm16530_vm11, %v3256_v26, -1e+30  ;;  %v12577_v29 = vld [vmem:[%s19253_s12] ss:$0 sm:$0xff] }
 0xe95   :  { %v3270_v38 = vsel %vm299_vm10, %v3260_v32, -inf }
 0xe96   :  { %3271 = vmax.xlane.f32.xlu0 %v3270_v38  ;;  %v3259_v31 = vsel %vm16526_vm9, %v3255_v30, -1e+30 }
 0xe97   :  { %v3267_v42 = vsel %vm299_vm10, %v3259_v31, -inf }
 0xe98   :  { %3268 = vmax.xlane.f32.xlu1 %v3267_v42 }
 0xf1b   :  { %v3266_v43 = vpop.xlane.xlu0 %3265 }
 0xf1c   :  { %v3274_v33 = vsub.f32 %v3258_v44, %v3266_v43 }
 0xf1d   :  { %v3263_v46 = vpop.xlane.xlu1 %3262 }
 0xf1e   :  { %v3279_v48 = vmul.f32 1.442695, %v3274_v33  ;;  %v3273_v56 = vsub.f32 %v3257_v27, %v3263_v46  ;;  %v2177_v27 = vadd.f32 %v16649_v40, %v16727_v34 }
 0xf1f   :  { %v3272_v59 = vpop.xlane.xlu0 %3271 }
 0xf20   :  { %15981 = vpow2.f32 %v3279_v48  ;;  %v3277_v60 = vmul.f32 1.442695, %v3273_v56  ;;  %v3276_v63 = vsub.f32 %v3260_v32, %v3272_v59  ;;  %v2846_v30 = vadd.f32 %v16842_v58, %v2177_v27 }
 0xf21   :  { %v3269_v0 = vpop.xlane.xlu1 %3268 }
 0xf22   :  { %15983 = vpow2.f32 %v3277_v60  ;;  %v3283_v1 = vmul.f32 1.442695, %v3276_v63  ;;  %v3275_v3 = vsub.f32 %v3259_v31, %v3269_v0  ;;  %v2187_v31 = vadd.f32 %v16654_v41, %v16731_v55 }
 0xf24   :  { %15985 = vpow2.f32 %v3283_v1  ;;  %v3281_v36 = vmul.f32 1.442695, %v3275_v3  ;;  %v2848_v46 = vadd.f32 %v16848_v62, %v2187_v31 }
 0xf26   :  { %15987 = vpow2.f32 %v3281_v36 }
 0xf2d   :  { %v15982_v50 = vpop.eup %15981 }
 0xf2e   :  { %v3288_v4 = vsel %vm299_vm10, %v15982_v50, 0.0 }
 0xf2f   :  { %v15984_v5 = vpop.eup %15983  ;;  %3289 = vadd.xlane.f32.xlu0 %v3288_v4 }
 0xf30   :  { %v3285_v6 = vsel %vm299_vm10, %v15984_v5, 0.0 }
 0xf31   :  { %v15986_v13 = vpop.eup %15985  ;;  %3286 = vadd.xlane.f32.xlu1 %v3285_v6 }
 0xf32   :  { %v3294_v52 = vsel %vm299_vm10, %v15986_v13, 0.0 }
 0xf33   :  { %v15988_v7 = vpop.eup %15987  ;;  %3295 = vadd.xlane.f32.xlu0 %v3294_v52 }
 0xf34   :  { %v3291_v8 = vsel %vm299_vm10, %v15988_v7, 0.0 }
 0xf35   :  { %3292 = vadd.xlane.f32.xlu1 %v3291_v8 }
 0xfb8   :  { %v3290_v10 = vpop.xlane.xlu0 %3289 }
 0xfb9   :  { %15989 = vrcp.f32 %v3290_v10 }
 0xfba   :  { %v3287_v11 = vpop.xlane.xlu1 %3286 }
 0xfbb   :  { %15991 = vrcp.f32 %v3287_v11 }
 0xfbc   :  { %v3296_v12 = vpop.xlane.xlu0 %3295 }
 0xfbd   :  { %15993 = vrcp.f32 %v3296_v12 }
 0xfbe   :  { %v3293_v14 = vpop.xlane.xlu1 %3292 }
 0xfbf   :  { %15995 = vrcp.f32 %v3293_v14 }
 0xfc6   :  { %v15990_v15 = vpop.eup %15989 }
 0xfc7   :  { %v3302_v19 = vmul.f32 %v15990_v15, %v15982_v50  ;;  %v15583_v15 = vld [vmem:[%s19258_s17 + $0x24] ss:$16 sps:$4 sm:$0xff]  }
 0xfc8   :  { %v15992_v17 = vpop.eup %15991  ;;  %3685 = vmatprep.subr.bf16.mxu0 %v15583_v15  ;;  %v15614_v15 = vld [vmem:[%s19260_s19 + $0x1e8] sm:$0xff]  }
 0xfc9   :  { %v3301_v18 = vmul.f32 %v15992_v17, %v15984_v5  ;;  %v15586_v17 = vld [vmem:[%s19258_s17 + $0x2c] ss:$16 sps:$4 sm:$0xff]  }
 0xfca   :  { %v15994_v20 = vpop.eup %15993 }
 0xfcb   :  { %15038 = vmatprep.mubr.msk.f32.mxu1 %vm299_vm10, %v3301_v18  ;;  %v3304_v24 = vmul.f32 %v15994_v20, %v15986_v13  ;;  %v15581_v18 = vld [vmem:[%s19258_s17 + $0x20] ss:$16 sps:$4 sm:$0xff]   ;;  %v15589_v20 = vld [vmem:[%s19258_s17 + $0x4] ss:$16 sps:$4 sm:$0xff]  }
 0xfcc   :  { %v15996_v21 = vpop.eup %15995  ;;  %15039 = vmatmul.mubr.msk.f32.vlgmr.msra.gmra.mxu1 %vm299_vm10, %v3302_v19  ;;  %v15584_v19 = vld [vmem:[%s19258_s17 + $0x28] ss:$16 sps:$4 sm:$0xff]   ;;  %3686 = vmatpush1.bf16.msra.mxu0 %v15581_v18 }
 0xfcd   :  { %v3303_v22 = vmul.f32 %v15996_v21, %v15988_v7  ;;  %15045 = vmatpush3.msra.mxu1 %v12572_v9  ;;  %v15592_v21 = vld [vmem:[%s19258_s17 + $0xc] ss:$16 sps:$4 sm:$0xff]   ;;  %3687 = vmatprep.subr.bf16.mxu0 %v15589_v20  ;;  %v15618_v20 = vld [vmem:[%s19260_s19 + $0x1e0] sm:$0xff]  }
 0xfce   :  { %3738 = vmatprep.subr.bf16.mxu1 %v15586_v17  ;;  %v15615_v17 = vld [vmem:[%s19260_s19 + $0x128] sm:$0xff]  }
 0xfcf   :  { %15041 = vmatprep.mubr.msk.f32.mxu1 %vm299_vm10, %v3303_v22  ;;  %v15587_v22 = vld [vmem:[%s19258_s17] ss:$16 sps:$4 sm:$0xff]   ;;  %v15616_v18 = vld [vmem:[%s19260_s19 + $0x1a8] sm:$0xff]  }
 0xfd0   :  { %15042 = vmatmul.mubr.msk.f32.gmra.mxu1 %vm299_vm10, %v3304_v24  ;;  %v15590_v24 = vld [vmem:[%s19258_s17 + $0x8] ss:$16 sps:$4 sm:$0xff]   ;;  %3688 = vmatpush1.bf16.msra.mxu0 %v15587_v22  ;;  %v15620_v22 = vld [vmem:[%s19260_s19 + $0x1a0] sm:$0xff]  }
0x108c   :  { %v15040_v44 = vpop.f32.mrf.mxu1 }
0x108e   :  { %v3383_v25 = vpop.f32.mrf.mxu1 }
0x108f   :  { %15046 = vmatprep.mubr.msk.f32.mxu1 %vm1187_vm6, %v3383_v25  ;;  %v15598_v25 = vld [vmem:[%s19258_s17 + $0x6c] ss:$16 sps:$4 sm:$0xff]  }
0x1090   :  { %v15043_v37 = vpop.f32.mrf.mxu1  ;;  %15047 = vmatmul.mubr.msk.f32.vlgmr.msra.gmra.mxu1 %vm1187_vm6, %v15040_v44  ;;  %v15595_v44 = vld [vmem:[%s19258_s17 + $0x64] ss:$16 sps:$4 sm:$0xff]  }
0x1091   :  { %3739 = vmatpush1.bf16.msra.mxu1 %v15584_v19  ;;  %3951 = vmatprep.subr.bf16.mxu0 %v15595_v44  ;;  %v15617_v19 = vld [vmem:[%s19260_s19 + $0x160] sm:$0xff]   ;;  %v15622_v44 = vld [vmem:[%s19260_s19 + $0x1d8] sm:$0xff]  }
0x1092   :  { %v3393_v26 = vpop.f32.mrf.mxu1  ;;  %3740 = vmatprep.subr.bf16.mxu1 %v15592_v21  ;;  %v15619_v21 = vld [vmem:[%s19260_s19 + $0x120] sm:$0xff]  }
0x1093   :  { %15049 = vmatprep.mubr.msk.f32.mxu1 %vm1187_vm6, %v3393_v26 }
0x1094   :  { %15050 = vmatmul.mubr.msk.f32.gmra.mxu1 %vm1187_vm6, %v15043_v37 }
0x1095   :  { %3758 = vmatprep.mubr.bf16.mxu1 %v16115_v2  ;;  %3741 = vmatpush1.bf16.msra.mxu1 %v15590_v24  ;;  %v15621_v24 = vld [vmem:[%s19260_s19 + $0x158] sm:$0xff]  }
0x1096   :  { %4004 = vmatprep.subr.bf16.mxu1 %v15598_v25  ;;  %v15623_v25 = vld [vmem:[%s19260_s19 + $0x118] sm:$0xff]  }
0x1150   :  { %v15048_v28 = vpop.f32.mrf.mxu1 }
0x1151   :  { %v3502_v32 = vadd.f32 %v15048_v28, %v16840_v57 }
0x1152   :  { %v3482_v38 = vpop.f32.mrf.mxu1 }
0x1153   :  { %v3513_v42 = vadd.f32 %v12577_v29, %v3502_v32  ;;  %v3501_v43 = vadd.f32 %v3482_v38, %v2846_v30 }
0x1154   :  { %v15051_v33 = vpop.f32.mrf.mxu1 }
0x1155   :  { %v3512_v48 = vadd.f32 %v12577_v29, %v3501_v43  ;;  %v3504_v40 = vadd.f32 %v15051_v33, %v16846_v61  ;;  %v3517_v34 = vadd.f32 %v3513_v42, %v16427_v49 }
0x1156   :  { %v3492_v56 = vpop.f32.mrf.mxu1 }
0x1157   :  { %v3515_v59 = vadd.f32 %v12577_v29, %v3504_v40  ;;  %v3503_v60 = vadd.f32 %v3492_v56, %v2848_v46  ;;  %v3525_v58 = vsel %vm299_vm10, %v3517_v34, 0.0  ;;  %v3516_v57 = vadd.f32 %v3512_v48, %v16425_v47  ;;  %v12578_v48 = vld [vmem:[%s19254_s13] ss:$0 sm:$0xff] }
0x1158   :  { %3526 = vadd.xlane.f32.xlu0 %v3525_v58  ;;  %v12579_v58 = vld [vmem:[%s19255_s14] ss:$0 sm:$0xff] }
0x1159   :  { %v3514_v63 = vadd.f32 %v12577_v29, %v3503_v60  ;;  %v3522_v41 = vsel %vm299_vm10, %v3516_v57, 0.0  ;;  %v3519_v55 = vadd.f32 %v3515_v59, %v16442_v54 }
0x115a   :  { %3523 = vadd.xlane.f32.xlu1 %v3522_v41 }
0x115b   :  { %v3531_v62 = vsel %vm299_vm10, %v3519_v55, 0.0  ;;  %v3518_v61 = vadd.f32 %v3514_v63, %v16440_v53 }
0x115c   :  { %3532 = vadd.xlane.f32.xlu0 %v3531_v62 }
0x115d   :  { %v3528_v49 = vsel %vm299_vm10, %v3518_v61, 0.0 }
0x115e   :  { %3529 = vadd.xlane.f32.xlu1 %v3528_v49  ;;  %v15593_v49 = vld [vmem:[%s19258_s17 + $0x60] ss:$16 sps:$4 sm:$0xff]  }
0x11e1   :  { %v3527_v0 = vpop.xlane.xlu0 %3526 }
0x11e2   :  { %v3536_v1 = vmul.f32 0.03125, %v3527_v0  ;;  %v15596_v0 = vld [vmem:[%s19258_s17 + $0x68] ss:$16 sps:$4 sm:$0xff]  }
0x11e3   :  { %v3524_v3 = vpop.xlane.xlu1 %3523 }
0x11e4   :  { %v3540_v36 = vsub.f32 %v3517_v34, %v3536_v1  ;;  %v3535_v47 = vmul.f32 0.03125, %v3524_v3 }
0x11e5   :  { %v3533_v50 = vpop.xlane.xlu0 %3532 }
0x11e6   :  { %v3539_v4 = vsub.f32 %v3516_v57, %v3535_v47  ;;  %v3538_v5 = vmul.f32 0.03125, %v3533_v50  ;;  %v3544_v6 = vmul.f32 %v3540_v36, %v3540_v36  ;;  %v15604_v47 = vld [vmem:[%s19258_s17 + $0x4c] ss:$16 sps:$4 sm:$0xff]  }
0x11e7   :  { %v3530_v13 = vpop.xlane.xlu1 %3529 }
0x11e8   :  { %v3542_v54 = vsub.f32 %v3519_v55, %v3538_v5  ;;  %v3537_v52 = vmul.f32 0.03125, %v3530_v13  ;;  %v3550_v7 = vsel %vm299_vm10, %v3544_v6, 0.0  ;;  %v3543_v8 = vmul.f32 %v3539_v4, %v3539_v4  ;;  %v15602_v5 = vld [vmem:[%s19258_s17 + $0x48] ss:$16 sps:$4 sm:$0xff]  }
0x11e9   :  { %3551 = vadd.xlane.f32.xlu0 %v3550_v7  ;;  %v15605_v13 = vld [vmem:[%s19260_s19 + $0x178] sm:$0xff]  }
0x11ea   :  { %v3541_v53 = vsub.f32 %v3518_v61, %v3537_v52  ;;  %v3547_v9 = vsel %vm299_vm10, %v3543_v8, 0.0  ;;  %v3546_v10 = vmul.f32 %v3542_v54, %v3542_v54  ;;  %v15607_v8 = vld [vmem:[%s19260_s19 + $0x138] sm:$0xff]  }
0x11eb   :  { %3548 = vadd.xlane.f32.xlu1 %v3547_v9  ;;  %v15609_v9 = vld [vmem:[%s19260_s19 + $0x170] sm:$0xff]  }
0x11ec   :  { %v3556_v11 = vsel %vm299_vm10, %v3546_v10, 0.0  ;;  %v3545_v12 = vmul.f32 %v3541_v53, %v3541_v53  ;;  %v15610_v10 = vld [vmem:[%s19260_s19 + $0x1f0] sm:$0xff]  }
0x11ed   :  { %3557 = vadd.xlane.f32.xlu0 %v3556_v11  ;;  %v15611_v11 = vld [vmem:[%s19260_s19 + $0x130] sm:$0xff]  }
0x11ee   :  { %v3553_v14 = vsel %vm299_vm10, %v3545_v12, 0.0  ;;  %v15612_v12 = vld [vmem:[%s19260_s19 + $0x1b0] sm:$0xff]  }
0x11ef   :  { %3554 = vadd.xlane.f32.xlu1 %v3553_v14  ;;  %v15613_v14 = vld [vmem:[%s19260_s19 + $0x168] sm:$0xff]  }
0x1272   :  { %v3552_v37 = vpop.xlane.xlu0 %3551 }
0x1273   :  { %v3560_v26 = vmul.f32 0.03125, %v3552_v37  ;;  %v15624_v37 = vld [vmem:[%s19260_s19 + $0x198] sm:$0xff]  }
0x1274   :  { %v3549_v27 = vpop.xlane.xlu1 %3548 }
0x1275   :  { %v3564_v28 = vadd.f32 1e-05, %v3560_v26  ;;  %v3559_v29 = vmul.f32 0.03125, %v3549_v27  ;;  %v15625_v26 = vld [vmem:[%s19260_s19 + $0x150] sm:$0xff]  }
0x1276   :  { %v3558_v30 = vpop.xlane.xlu0 %3557  ;;  %v15626_v27 = vld [vmem:[%s19260_s19 + $0x1d0] sm:$0xff]  }
0x1277   :  { %15997 = vrsqrt.f32 %v3564_v28  ;;  %v3563_v32 = vadd.f32 1e-05, %v3559_v29  ;;  %v3562_v38 = vmul.f32 0.03125, %v3558_v30  ;;  %v15627_v28 = vld [vmem:[%s19260_s19 + $0x110] sm:$0xff]   ;;  %v15629_v30 = vld [vmem:[%s19260_s19 + $0x148] sm:$0xff]  }
0x1278   :  { %v3555_v31 = vpop.xlane.xlu1 %3554  ;;  %v15628_v29 = vld [vmem:[%s19260_s19 + $0x190] sm:$0xff]  }
0x1279   :  { %15999 = vrsqrt.f32 %v3563_v32  ;;  %v3566_v42 = vadd.f32 1e-05, %v3562_v38  ;;  %v3561_v43 = vmul.f32 0.03125, %v3555_v31  ;;  %v15630_v32 = vld [vmem:[%s19260_s19 + $0x1c8] sm:$0xff]  }
0x127a   :  { %v15631_v38 = vld [vmem:[%s19260_s19 + $0x108] sm:$0xff]  }
0x127b   :  { %16001 = vrsqrt.f32 %v3566_v42  ;;  %v3565_v33 = vadd.f32 1e-05, %v3561_v43  ;;  %v15632_v31 = vld [vmem:[%s19260_s19 + $0x188] sm:$0xff]   ;;  %v15633_v42 = vld [vmem:[%s19260_s19 + $0x140] sm:$0xff]  }
0x127c   :  { %v15634_v43 = vld [vmem:[%s19260_s19 + $0x1c0] sm:$0xff]  }
0x127d   :  { %16003 = vrsqrt.f32 %v3565_v33  ;;  %v15635_v33 = vld [vmem:[%s19260_s19 + $0x100] sm:$0xff]  }
0x1284   :  { %v15998_v46 = vpop.eup %15997 }
0x1285   :  { %v3572_v40 = vmul.f32 %v15998_v46, %v3540_v36  ;;  %v15601_v36 = vld [vmem:[%s19258_s17 + $0x44] ss:$16 sps:$4 sm:$0xff]  }
0x1286   :  { %v16000_v34 = vpop.eup %15999  ;;  %v15636_v46 = vld [vmem:[%s19260_s19 + $0x180] sm:$0xff]  }
0x1287   :  { %v3582_v56 = vmul.f32 %v12578_v48, %v3572_v40  ;;  %v3571_v59 = vmul.f32 %v16000_v34, %v3539_v4  ;;  %v15599_v4 = vld [vmem:[%s19258_s17 + $0x40] ss:$16 sps:$4 sm:$0xff]   ;;  %v15638_v40 = vld [vmem:[%s19260_s19 + $0xf8] sm:$0xff]  }
0x1288   :  { %v16002_v60 = vpop.eup %16001 }
0x1289   :  { %v3581_v57 = vmul.f32 %v12578_v48, %v3571_v59  ;;  %v16957_v41 = vadd.f32 %v12579_v58, %v3582_v56  ;;  %v3574_v62 = vmul.f32 %v16002_v60, %v3542_v54  ;;  %v15606_v54 = vld [vmem:[%s19260_s19 + $0x1f8] sm:$0xff]  }
0x128a   :  { %v16004_v63 = vpop.eup %16003 }
0x128b   :  { %v16959_v55 = vadd.f32 %v12579_v58, %v3581_v57  ;;  %v3573_v61 = vmul.f32 %v16004_v63, %v3541_v53  ;;  %v3584_v50 = vmul.f32 %v12578_v48, %v3574_v62  ;;  %v15608_v53 = vld [vmem:[%s19260_s19 + $0x1b8] sm:$0xff]  }
0x128d   :  { %v16969_v1 = vpack.c.bf16 %v16957_v41, %v16959_v55  ;;  %v3583_v3 = vmul.f32 %v12578_v48, %v3573_v61  ;;  %v16997_v52 = vadd.f32 %v12579_v58, %v3584_v50  ;;  %v15637_v48 = vld [vmem:[%s19260_s19 + $0x78] sm:$0xff]  }
0x128f   :  { %12588 = vmatmul.mubr.msk.bf16.vlgmr.msra.gmra.mxu0 %vm299_vm10, %v16969_v1  ;;  %12590 = vmatmul.mubr.msk.bf16.vlgmr.msra.gmra.mxu1 %vm299_vm10, %v16969_v1  ;;  %v16987_v6 = vadd.f32 %v12579_v58, %v3583_v3 }
0x1290   :  { %3952 = vmatpush1.bf16.msra.mxu0 %v15593_v49  ;;  %4005 = vmatpush1.bf16.msra.mxu1 %v15596_v0 }
0x1291   :  { %3715 = vmatprep.mubr.bf16.mxu0 %v16115_v2  ;;  %3768 = vmatprep.mubr.bf16.mxu1 %v16115_v2  ;;  %v17001_v7 = vpack.c.bf16 %v16997_v52, %v16987_v6 }
0x1292   :  { %3953 = vmatprep.subr.bf16.mxu0 %v15601_v36  ;;  %4006 = vmatprep.subr.bf16.mxu1 %v15604_v47 }
0x1294   :  { %3954 = vmatpush1.bf16.msra.mxu0 %v15599_v4  ;;  %4007 = vmatpush1.bf16.msra.mxu1 %v15602_v5  ;;  %v17146_v5 = vsub.s32 1, %v16298_v23 }
0x1295   :  { %13945 = vmatprep.subr.bf16.mxu0 %v15605_v13  ;;  %13973 = vmatprep.subr.bf16.mxu1 %v15606_v54  ;;  %v17149_v13 = vsub.s32 3, %v16298_v23  ;;  %v12600_v54 = vld [vmem:[%s19259_s18 + $0x4] sm:$0xf] }
0x1297   :  { %12589 = vmatmul.mubr.msk.bf16.gmra.mxu0 %vm299_vm10, %v17001_v7  ;;  %12591 = vmatmul.mubr.msk.bf16.gmra.mxu1 %vm299_vm10, %v17001_v7 }
0x1298   :  { %3971 = vmatprep.mubr.bf16.mxu0 %v16115_v2  ;;  %4024 = vmatprep.mubr.bf16.mxu1 %v16115_v2 }
0x129f   :  { %12609 = vmatmul.mubr.msk.bf16.vlgmr.msra.gmra.mxu0 %vm299_vm10, %v16969_v1  ;;  %12611 = vmatmul.mubr.msk.bf16.vlgmr.msra.gmra.mxu1 %vm299_vm10, %v16969_v1 }
0x12a0   :  { %3981 = vmatprep.mubr.bf16.mxu0 %v16115_v2  ;;  %4034 = vmatprep.mubr.bf16.mxu1 %v16115_v2 }
0x12a1   :  { %13946 = vmatpush3.bf16.msra.mxu0 %v15607_v8  ;;  %13974 = vmatpush3.bf16.msra.mxu1 %v15608_v53  ;;  %v17155_v8 = vsub.s32 0, %v16298_v23  ;;  %v17158_v53 = vsub.s32 2, %v16298_v23 }
0x12a2   :  { %13947 = vmatprep.subr.bf16.mxu0 %v15609_v9  ;;  %13975 = vmatprep.subr.bf16.mxu1 %v15610_v10 }
0x12a5   :  { %13948 = vmatpush3.bf16.msra.mxu0 %v15611_v11  ;;  %13976 = vmatpush3.bf16.msra.mxu1 %v15612_v12  ;;  %v3886_v11 = vrot.slane %v12600_v54, %v17146_v5  ;;  %v3894_v12 = vrot.slane %v12600_v54, %v17149_v13 }
0x12a6   :  { %13949 = vmatprep.subr.bf16.mxu0 %v15613_v14  ;;  %13977 = vmatprep.subr.bf16.mxu1 %v15614_v15  ;;  %v3882_v14 = vrot.slane %v12600_v54, %v17155_v8  ;;  %v3890_v15 = vrot.slane %v12600_v54, %v17158_v53 }
0x12a7   :  { %12610 = vmatmul.mubr.msk.bf16.gmra.mxu0 %vm299_vm10, %v17001_v7  ;;  %12612 = vmatmul.mubr.msk.bf16.gmra.mxu1 %vm299_vm10, %v17001_v7 }
0x12a9   :  { %13950 = vmatpush3.bf16.msra.mxu0 %v15615_v17  ;;  %13978 = vmatpush3.bf16.msra.mxu1 %v15616_v18 }
0x12aa   :  { %13951 = vmatprep.subr.bf16.mxu0 %v15617_v19  ;;  %13979 = vmatprep.subr.bf16.mxu1 %v15618_v20 }
0x12ad   :  { %13952 = vmatpush3.bf16.msra.mxu0 %v15619_v21  ;;  %13980 = vmatpush3.bf16.msra.mxu1 %v15620_v22 }
0x12ae   :  { %13953 = vmatprep.subr.bf16.mxu0 %v15621_v24  ;;  %13981 = vmatprep.subr.bf16.mxu1 %v15622_v44 }
0x12b1   :  { %13954 = vmatpush3.bf16.msra.mxu0 %v15623_v25  ;;  %13982 = vmatpush3.bf16.msra.mxu1 %v15624_v37 }
0x12b2   :  { %13955 = vmatprep.subr.bf16.mxu0 %v15625_v26  ;;  %13983 = vmatprep.subr.bf16.mxu1 %v15626_v27 }
0x12b5   :  { %13956 = vmatpush3.bf16.msra.mxu0 %v15627_v28  ;;  %13984 = vmatpush3.bf16.msra.mxu1 %v15628_v29 }
0x12b6   :  { %13957 = vmatprep.subr.bf16.mxu0 %v15629_v30  ;;  %13985 = vmatprep.subr.bf16.mxu1 %v15630_v32 }
0x12b9   :  { %13958 = vmatpush3.bf16.msra.mxu0 %v15631_v38  ;;  %13986 = vmatpush3.bf16.msra.mxu1 %v15632_v31  ;;  %v17167_v31 = vld [vmem:[%s19259_s18] sm:$0xf] }
0x12ba   :  { %13959 = vmatprep.subr.bf16.mxu0 %v15633_v42  ;;  %13987 = vmatprep.subr.bf16.mxu1 %v15634_v43 }
0x12bd   :  { %13960 = vmatpush3.bf16.msra.mxu0 %v15635_v33  ;;  %13988 = vmatpush3.bf16.msra.mxu1 %v15636_v46 }
0x12be   :  { %14001 = vmatprep.subr.bf16.mxu0 %v15637_v48  ;;  %14029 = vmatprep.subr.bf16.mxu1 %v15638_v40  ;;  %v17171_v48 = vrot.slane %v17167_v31, %v17146_v5 }
0x134f   :  { %v17115_v34 = vpop.f32.mrf.mxu0  ;;  %v17117_v56 = vpop.f32.mrf.mxu1 }
0x1351   :  { %v17119_v59 = vpop.f32.mrf.mxu0  ;;  %v17121_v60 = vpop.f32.mrf.mxu1 }
0x1353   :  { %v17123_v58 = vpop.f32.mrf.mxu0  ;;  %v17125_v57 = vpop.f32.mrf.mxu1 }
0x1355   :  { %v3713_v63 = vpop.f32.mrf.mxu0  ;;  %v17127_v62 = vpop.f32.mrf.mxu1 }
0x1357   :  { %v17129_v61 = vpop.f32.mrf.mxu0  ;;  %v17131_v49 = vpop.f32.mrf.mxu1 }
0x1359   :  { %v17133_v0 = vpop.f32.mrf.mxu0  ;;  %v17135_v3 = vpop.f32.mrf.mxu1 }
0x135b   :  { %v17137_v36 = vpop.f32.mrf.mxu0  ;;  %v17139_v47 = vpop.f32.mrf.mxu1 }
0x135d   :  { %v17141_v50 = vpop.f32.mrf.mxu0  ;;  %v17143_v4 = vpop.f32.mrf.mxu1 }
0x135f   :  { %v3973_v9 = vpop.f32.mrf.mxu0  ;;  %v4026_v10 = vpop.f32.mrf.mxu1 }
0x1360   :  { %v3974_v23 = vadd.f32 %v3973_v9, %v3882_v14  ;;  %v4027_v25 = vadd.f32 %v4026_v10, %v3890_v15 }
0x1361   :  { %v3975_v17 = vpop.f32.mrf.mxu0  ;;  %v4028_v18 = vpop.f32.mrf.mxu1 }
0x1362   :  { %v3976_v21 = vadd.f32 %v3975_v17, %v3886_v11  ;;  %v4029_v22 = vadd.f32 %v4028_v18, %v3894_v12  ;;  %v4045_v40 = vmax.f32 %v3974_v23, 0.0  ;;  %v4047_v54 = vmax.f32 %v4027_v25, 0.0 }
0x1363   :  { %v3977_v19 = vpop.f32.mrf.mxu0  ;;  %v4030_v20 = vpop.f32.mrf.mxu1  ;;  %v17175_v17 = vrot.slane %v17167_v31, %v17149_v13 }
0x1364   :  { %v3978_v24 = vadd.f32 %v3977_v19, %v3882_v14  ;;  %v4031_v44 = vadd.f32 %v4030_v20, %v3890_v15  ;;  %v4046_v42 = vmax.f32 %v3976_v21, 0.0  ;;  %v4048_v43 = vmax.f32 %v4029_v22, 0.0  ;;  %v15639_v20 = vld [vmem:[%s19260_s19 + $0x38] sm:$0xff]  }
0x1365   :  { %v3979_v37 = vpop.f32.mrf.mxu0  ;;  %v4032_v26 = vpop.f32.mrf.mxu1  ;;  %v15640_v21 = vld [vmem:[%s19260_s19 + $0xb8] sm:$0xff]   ;;  %v3714_v22 = vadd.f32 %v3713_v63, %v17171_v48  ;;  %v3767_v63 = vadd.f32 %v17127_v62, %v17175_v17  ;;  %v3710_v62 = vadd.f32 %v17119_v59, %v17171_v48 }
0x1366   :  { %v3980_v27 = vadd.f32 %v3979_v37, %v3886_v11  ;;  %v4033_v28 = vadd.f32 %v4032_v26, %v3894_v12  ;;  %v4049_v29 = vmax.f32 %v3978_v24, 0.0  ;;  %v4051_v30 = vmax.f32 %v4031_v44, 0.0  ;;  %v15641_v26 = vld [vmem:[%s19260_s19 + $0x70] sm:$0xff]  }
0x1367   :  { %v3983_v32 = vpop.f32.mrf.mxu0  ;;  %v4036_v38 = vpop.f32.mrf.mxu1  ;;  %v3784_v59 = vmax.f32 %v3714_v22, 0.0  ;;  %v15649_v22 = vld [vmem:[%s19260_s19 + $0x60] sm:$0xff]  }
0x1368   :  { %v4050_v33 = vmax.f32 %v3980_v27, 0.0  ;;  %v4052_v46 = vmax.f32 %v4033_v28, 0.0  ;;  %v4061_v24 = vpack.c.bf16 %v4049_v29, %v4045_v40  ;;  %v4063_v44 = vpack.c.bf16 %v4051_v30, %v4047_v54  ;;  %v15642_v27 = vld [vmem:[%s19260_s19 + $0xf0] sm:$0xff]  }
0x1369   :  { %v3985_v9 = vpop.f32.mrf.mxu0  ;;  %v4038_v10 = vpop.f32.mrf.mxu1  ;;  %v3984_v29 = vadd.f32 %v3983_v32, %v3882_v14  ;;  %v4037_v30 = vadd.f32 %v4036_v38, %v3890_v15 }
0x136a   :  { %v4062_v18 = vpack.c.bf16 %v4050_v33, %v4046_v42  ;;  %v4064_v19 = vpack.c.bf16 %v4052_v46, %v4048_v43  ;;  %v3986_v23 = vadd.f32 %v3985_v9, %v3886_v11  ;;  %v4039_v28 = vadd.f32 %v4038_v10, %v3894_v12  ;;  %v15643_v9 = vld [vmem:[%s19260_s19 + $0x30] sm:$0xff]  }
0x136b   :  { %v3987_v25 = vpop.f32.mrf.mxu0  ;;  %v4040_v37 = vpop.f32.mrf.mxu1  ;;  %v15644_v10 = vld [vmem:[%s19260_s19 + $0xb0] sm:$0xff]  }
0x136c   :  { %v3988_v42 = vadd.f32 %v3987_v25, %v3882_v14  ;;  %v4041_v43 = vadd.f32 %v4040_v37, %v3890_v15  ;;  %4358 = vmatprep.mubr.bf16.mxu0 %v4062_v18  ;;  %4407 = vmatprep.mubr.bf16.mxu1 %v4064_v19  ;;  %v3763_v14 = vadd.f32 %v17121_v60, %v17175_v17  ;;  %v4054_v38 = vmax.f32 %v3986_v23, 0.0  ;;  %v15647_v37 = vld [vmem:[%s19260_s19 + $0x28] sm:$0xff]  }
0x136d   :  { %v3989_v33 = vpop.f32.mrf.mxu0  ;;  %v4042_v46 = vpop.f32.mrf.mxu1  ;;  %4359 = vmatmul.mubr.bf16.vlgmr.msra.gmra.mxu0 %v4061_v24  ;;  %4408 = vmatmul.mubr.bf16.vlgmr.msra.gmra.mxu1 %v4063_v44  ;;  %v4056_v18 = vmax.f32 %v4039_v28, 0.0  ;;  %v4053_v24 = vmax.f32 %v3984_v29, 0.0  ;;  %v4055_v60 = vmax.f32 %v4037_v30, 0.0  ;;  %v3780_v23 = vmax.f32 %v3710_v62, 0.0  ;;  %v15651_v30 = vld [vmem:[%s19260_s19 + $0x20] sm:$0xff]   ;;  %v15658_v62 = vld [vmem:[%s19260_s19 + $0xd0] sm:$0xff]  }
0x136e   :  { %v3990_v40 = vadd.f32 %v3989_v33, %v3886_v11  ;;  %v4043_v54 = vadd.f32 %v4042_v46, %v3894_v12  ;;  %14002 = vmatpush3.bf16.msra.mxu0 %v15639_v20  ;;  %14030 = vmatpush3.bf16.msra.mxu1 %v15640_v21  ;;  %v4057_v15 = vmax.f32 %v3988_v42, 0.0  ;;  %v4059_v32 = vmax.f32 %v4041_v43, 0.0  ;;  %v15645_v11 = vld [vmem:[%s19260_s19 + $0x68] sm:$0xff]   ;;  %v15650_v43 = vld [vmem:[%s19260_s19 + $0xe0] sm:$0xff]   ;;  %v15653_v46 = vld [vmem:[%s19260_s19 + $0x58] sm:$0xff]  }
0x136f   :  { %14003 = vmatprep.subr.bf16.mxu0 %v15641_v26  ;;  %14031 = vmatprep.subr.bf16.mxu1 %v15642_v27  ;;  %v15646_v12 = vld [vmem:[%s19260_s19 + $0xe8] sm:$0xff]   ;;  %v3786_v21 = vmax.f32 %v3767_v63, 0.0  ;;  %v3782_v27 = vmax.f32 %v3763_v14, 0.0  ;;  %v3796_v63 = vpack.c.bf16 %v3784_v59, %v3780_v23  ;;  %v15652_v33 = vld [vmem:[%s19260_s19 + $0xa0] sm:$0xff]   ;;  %v15659_v14 = vld [vmem:[%s19260_s19 + $0x10] sm:$0xff]  }
0x1370   :  { %v4058_v19 = vmax.f32 %v3990_v40, 0.0  ;;  %v4060_v20 = vmax.f32 %v4043_v54, 0.0  ;;  %v15648_v26 = vld [vmem:[%s19260_s19 + $0xa8] sm:$0xff]   ;;  %v4065_v28 = vpack.c.bf16 %v4057_v15, %v4053_v24  ;;  %v4067_v42 = vpack.c.bf16 %v4059_v32, %v4055_v60  ;;  %v15654_v40 = vld [vmem:[%s19260_s19 + $0xd8] sm:$0xff]   ;;  %v15660_v15 = vld [vmem:[%s19260_s19 + $0x90] sm:$0xff]  }
0x1371   :  { %v3798_v29 = vpack.c.bf16 %v3786_v21, %v3782_v27  ;;  %v15655_v54 = vld [vmem:[%s19260_s19 + $0x18] sm:$0xff]   ;;  %v15661_v32 = vld [vmem:[%s19260_s19 + $0x48] sm:$0xff]   ;;  %v3724_v24 = vadd.f32 %v17141_v50, %v17171_v48  ;;  %v3777_v60 = vadd.f32 %v17143_v4, %v17175_v17  ;;  %v15668_v50 = vld [vmem:[%s19260_s19 + $0x80] sm:$0xff]  }
0x1372   :  { %14004 = vmatpush3.bf16.msra.mxu0 %v15643_v9  ;;  %14032 = vmatpush3.bf16.msra.mxu1 %v15644_v10  ;;  %v4066_v44 = vpack.c.bf16 %v4058_v19, %v4054_v38  ;;  %v4068_v25 = vpack.c.bf16 %v4060_v20, %v4056_v18  ;;  %v15656_v9 = vld [vmem:[%s19260_s19 + $0x98] sm:$0xff]   ;;  %v15657_v10 = vld [vmem:[%s19260_s19 + $0x50] sm:$0xff]   ;;  %v3618_v38 = vrot.slane %v17167_v31, %v17158_v53  ;;  %v15663_v19 = vld [vmem:[%s19260_s19 + $0x8] sm:$0xff]  }
0x1373   :  { %14005 = vmatprep.subr.bf16.mxu0 %v15645_v11  ;;  %14033 = vmatprep.subr.bf16.mxu1 %v15646_v12  ;;  %v15662_v11 = vld [vmem:[%s19260_s19 + $0xc8] sm:$0xff]   ;;  %v3610_v12 = vrot.slane %v17167_v31, %v17155_v8  ;;  %v15665_v31 = vld [vmem:[%s19260_s19 + $0x40] sm:$0xff]  }
0x1374   :  { %4366 = vmatprep.mubr.bf16.mxu0 %v4066_v44  ;;  %4415 = vmatprep.mubr.bf16.mxu1 %v4068_v25  ;;  %v15664_v20 = vld [vmem:[%s19260_s19 + $0x88] sm:$0xff]   ;;  %v3765_v59 = vadd.f32 %v17125_v57, %v3618_v38  ;;  %v3761_v57 = vadd.f32 %v17117_v56, %v3618_v38  ;;  %v3720_v25 = vadd.f32 %v17133_v0, %v17171_v48  ;;  %v15671_v56 = vld [vmem:[%s19258_s17 + $0xa4] ss:$16 sps:$4 sm:$0xff]   ;;  %v3792_v48 = vmax.f32 %v3724_v24, 0.0 }
0x1375   :  { %4367 = vmatmul.mubr.bf16.gmra.mxu0 %v4065_v28  ;;  %4416 = vmatmul.mubr.bf16.gmra.mxu1 %v4067_v42  ;;  %v3712_v18 = vadd.f32 %v17123_v58, %v3610_v12  ;;  %v15666_v58 = vld [vmem:[%s19260_s19 + $0xc0] sm:$0xff]   ;;  %v3708_v21 = vadd.f32 %v17115_v34, %v3610_v12  ;;  %v15674_v0 = vld [vmem:[%s19258_s17 + $0xac] ss:$16 sps:$4 sm:$0xff]  }
0x1376   :  { %14006 = vmatpush3.bf16.msra.mxu0 %v15647_v37  ;;  %14034 = vmatpush3.bf16.msra.mxu1 %v15648_v26  ;;  %v3773_v37 = vadd.f32 %v17135_v3, %v17175_v17  ;;  %v15667_v34 = vld [vmem:[%s19260_s19] sm:$0xff]   ;;  %v3785_v4 = vmax.f32 %v3765_v59, 0.0  ;;  %v3794_v17 = vmax.f32 %v3777_v60, 0.0  ;;  %v3781_v26 = vmax.f32 %v3761_v57, 0.0  ;;  %v15688_v59 = vld [vmem:[%s19260_s19 + $0x2b0] sm:$0xff]   ;;  %v15692_v24 = vld [vmem:[%s19260_s19 + $0x2a8] sm:$0xff]  }
0x1377   :  { %4648 = vmatprep.mubr.bf16.mxu0 %v3796_v63  ;;  %4697 = vmatprep.mubr.bf16.mxu1 %v3798_v29  ;;  %v3783_v44 = vmax.f32 %v3712_v18, 0.0  ;;  %v3779_v3 = vmax.f32 %v3708_v21, 0.0  ;;  %v3788_v27 = vmax.f32 %v3720_v25, 0.0  ;;  %v15669_v63 = vld [vmem:[%s19258_s17 + $0xa0] ss:$16 sps:$4 sm:$0xff]   ;;  %v15691_v21 = vld [vmem:[%s19260_s19 + $0x228] sm:$0xff]  }
0x1378   :  { %14007 = vmatprep.subr.bf16.mxu0 %v15649_v22  ;;  %14035 = vmatprep.subr.bf16.mxu1 %v15650_v43  ;;  %v3790_v28 = vmax.f32 %v3773_v37, 0.0  ;;  %v3797_v42 = vpack.c.bf16 %v3785_v4, %v3781_v26  ;;  %v3722_v22 = vadd.f32 %v17137_v36, %v3610_v12  ;;  %v3775_v43 = vadd.f32 %v17139_v47, %v3618_v38  ;;  %v15672_v29 = vld [vmem:[%s19258_s17 + $0xa8] ss:$16 sps:$4 sm:$0xff]   ;;  %v15680_v36 = vld [vmem:[%s19258_s17 + $0x8c] ss:$16 sps:$4 sm:$0xff]   ;;  %v15685_v18 = vld [vmem:[%s19260_s19 + $0x270] sm:$0xff]  }
0x1379   :  { %v3795_v23 = vpack.c.bf16 %v3783_v44, %v3779_v3  ;;  %v3718_v47 = vadd.f32 %v17129_v61, %v3610_v12  ;;  %v15683_v12 = vld [vmem:[%s19260_s19 + $0x238] sm:$0xff]   ;;  %v15693_v60 = vld [vmem:[%s19260_s19 + $0x260] sm:$0xff]   ;;  %v15703_v3 = vld [vmem:[%s19260_s19 + $0x210] sm:$0xff]  }
0x137a   :  { %14008 = vmatpush3.bf16.msra.mxu0 %v15651_v30  ;;  %14036 = vmatpush3.bf16.msra.mxu1 %v15652_v33  ;;  %v3800_v30 = vpack.c.bf16 %v3792_v48, %v3788_v27  ;;  %v3802_v33 = vpack.c.bf16 %v3794_v17, %v3790_v28  ;;  %v15694_v57 = vld [vmem:[%s19260_s19 + $0x2e0] sm:$0xff]   ;;  %v15697_v37 = vld [vmem:[%s19260_s19 + $0x258] sm:$0xff]   ;;  %v15704_v48 = vld [vmem:[%s19260_s19 + $0x290] sm:$0xff]  }
0x137b   :  { %14009 = vmatprep.subr.bf16.mxu0 %v15653_v46  ;;  %14037 = vmatprep.subr.bf16.mxu1 %v15654_v40  ;;  %v15677_v46 = vld [vmem:[%s19258_s17 + $0x84] ss:$16 sps:$4 sm:$0xff]   ;;  %v3771_v40 = vadd.f32 %v17131_v49, %v3618_v38  ;;  %v3787_v61 = vmax.f32 %v3718_v47, 0.0  ;;  %v15684_v38 = vld [vmem:[%s19260_s19 + $0x2b8] sm:$0xff]   ;;  %v15705_v17 = vld [vmem:[%s19260_s19 + $0x248] sm:$0xff]  }
0x137c   :  { %v15695_v44 = vld [vmem:[%s19260_s19 + $0x220] sm:$0xff]   ;;  %v15700_v4 = vld [vmem:[%s19260_s19 + $0x298] sm:$0xff]   ;;  %v15706_v26 = vld [vmem:[%s19260_s19 + $0x2c8] sm:$0xff]  }
0x137d   :  { %v3789_v49 = vmax.f32 %v3771_v40, 0.0  ;;  %v15696_v25 = vld [vmem:[%s19260_s19 + $0x2a0] sm:$0xff]   ;;  %v15708_v27 = vld [vmem:[%s19260_s19 + $0x288] sm:$0xff]  }
0x137e   :  { %14010 = vmatpush3.bf16.msra.mxu0 %v15655_v54  ;;  %14038 = vmatpush3.bf16.msra.mxu1 %v15656_v9  ;;  %v3791_v54 = vmax.f32 %v3722_v22, 0.0  ;;  %v3793_v9 = vmax.f32 %v3775_v43, 0.0  ;;  %v15709_v28 = vld [vmem:[%s19260_s19 + $0x240] sm:$0xff]  }
0x137f   :  { %14011 = vmatprep.subr.bf16.mxu0 %v15657_v10  ;;  %14039 = vmatprep.subr.bf16.mxu1 %v15658_v62  ;;  %v15675_v10 = vld [vmem:[%s19258_s17 + $0x80] ss:$16 sps:$4 sm:$0xff]   ;;  %v15678_v62 = vld [vmem:[%s19258_s17 + $0x88] ss:$16 sps:$4 sm:$0xff]  }
0x1380   :  { %v15711_v22 = vld [vmem:[%s19260_s19 + $0x200] sm:$0xff]  }
0x1381   :  { %v15712_v43 = vld [vmem:[%s19260_s19 + $0x280] sm:$0xff]  }
0x1382   :  { %14012 = vmatpush3.bf16.msra.mxu0 %v15659_v14  ;;  %14040 = vmatpush3.bf16.msra.mxu1 %v15660_v15  ;;  %v3799_v14 = vpack.c.bf16 %v3791_v54, %v3787_v61  ;;  %v3801_v15 = vpack.c.bf16 %v3793_v9, %v3789_v49 }
0x1383   :  { %14013 = vmatprep.subr.bf16.mxu0 %v15661_v32  ;;  %14041 = vmatprep.subr.bf16.mxu1 %v15662_v11  ;;  %v15681_v32 = vld [vmem:[%s19260_s19 + $0x278] sm:$0xff]  }
0x1384   :  { %v15682_v11 = vld [vmem:[%s19260_s19 + $0x2f8] sm:$0xff]  }
0x1386   :  { %14014 = vmatpush3.bf16.msra.mxu0 %v15663_v19  ;;  %14042 = vmatpush3.bf16.msra.mxu1 %v15664_v20  ;;  %v15686_v19 = vld [vmem:[%s19260_s19 + $0x2f0] sm:$0xff]  }
0x1387   :  { %14015 = vmatprep.subr.bf16.mxu0 %v15665_v31  ;;  %14043 = vmatprep.subr.bf16.mxu1 %v15666_v58  ;;  %v15687_v20 = vld [vmem:[%s19260_s19 + $0x230] sm:$0xff]   ;;  %v15689_v31 = vld [vmem:[%s19260_s19 + $0x268] sm:$0xff]  }
0x1388   :  { %v15690_v58 = vld [vmem:[%s19260_s19 + $0x2e8] sm:$0xff]  }
0x138a   :  { %14016 = vmatpush3.bf16.msra.mxu0 %v15667_v34  ;;  %14044 = vmatpush3.bf16.msra.mxu1 %v15668_v50  ;;  %v15698_v34 = vld [vmem:[%s19260_s19 + $0x2d8] sm:$0xff]  }
0x138b   :  { %4798 = vmatprep.subr.bf16.mxu0 %v15671_v56  ;;  %4851 = vmatprep.subr.bf16.mxu1 %v15674_v0  ;;  %v15699_v50 = vld [vmem:[%s19260_s19 + $0x218] sm:$0xff]   ;;  %v15701_v56 = vld [vmem:[%s19260_s19 + $0x250] sm:$0xff]  }
0x138c   :  { %v15702_v0 = vld [vmem:[%s19260_s19 + $0x2d0] sm:$0xff]  }
0x138d   :  { %4649 = vmatmul.mubr.bf16.vlgmr.msra.gmra.mxu0 %v3795_v23  ;;  %4698 = vmatmul.mubr.bf16.vlgmr.msra.gmra.mxu1 %v3797_v42  ;;  %v15707_v23 = vld [vmem:[%s19260_s19 + $0x208] sm:$0xff]   ;;  %v15710_v42 = vld [vmem:[%s19260_s19 + $0x2c0] sm:$0xff]  }
0x138e   :  { %4656 = vmatprep.mubr.bf16.mxu0 %v3800_v30  ;;  %4705 = vmatprep.mubr.bf16.mxu1 %v3802_v33 }
0x138f   :  { %4799 = vmatpush1.bf16.msra.mxu0 %v15669_v63  ;;  %4852 = vmatpush1.bf16.msra.mxu1 %v15672_v29  ;;  %v15715_v63 = vld [vmem:[%s19258_s17 + $0xe4] ss:$16 sps:$4 sm:$0xff]   ;;  %v15718_v29 = vld [vmem:[%s19258_s17 + $0xec] ss:$16 sps:$4 sm:$0xff]  }
0x1390   :  { %4800 = vmatprep.subr.bf16.mxu0 %v15677_v46  ;;  %4853 = vmatprep.subr.bf16.mxu1 %v15680_v36 }
0x1393   :  { %4801 = vmatpush1.bf16.msra.mxu0 %v15675_v10  ;;  %4854 = vmatpush1.bf16.msra.mxu1 %v15678_v62 }
0x1394   :  { %14057 = vmatprep.subr.bf16.mxu0 %v15681_v32  ;;  %14085 = vmatprep.subr.bf16.mxu1 %v15682_v11 }
0x1395   :  { %4657 = vmatmul.mubr.bf16.gmra.mxu0 %v3799_v14  ;;  %4706 = vmatmul.mubr.bf16.gmra.mxu1 %v3801_v15 }
0x1396   :  { %4818 = vmatprep.mubr.bf16.mxu0 %v16115_v2  ;;  %4871 = vmatprep.mubr.bf16.mxu1 %v16115_v2 }
0x139d   :  { %12758 = vmatmul.mubr.msk.bf16.vlgmr.msra.gmra.mxu0 %vm299_vm10, %v16969_v1  ;;  %12760 = vmatmul.mubr.msk.bf16.vlgmr.msra.gmra.mxu1 %vm299_vm10, %v16969_v1 }
0x139e   :  { %4828 = vmatprep.mubr.bf16.mxu0 %v16115_v2  ;;  %4881 = vmatprep.mubr.bf16.mxu1 %v16115_v2 }
0x139f   :  { %14058 = vmatpush3.bf16.msra.mxu0 %v15683_v12  ;;  %14086 = vmatpush3.bf16.msra.mxu1 %v15684_v38 }
0x13a0   :  { %14059 = vmatprep.subr.bf16.mxu0 %v15685_v18  ;;  %14087 = vmatprep.subr.bf16.mxu1 %v15686_v19 }
0x13a3   :  { %14060 = vmatpush3.bf16.msra.mxu0 %v15687_v20  ;;  %14088 = vmatpush3.bf16.msra.mxu1 %v15688_v59 }
0x13a4   :  { %14061 = vmatprep.subr.bf16.mxu0 %v15689_v31  ;;  %14089 = vmatprep.subr.bf16.mxu1 %v15690_v58 }
0x13a5   :  { %12759 = vmatmul.mubr.msk.bf16.gmra.mxu0 %vm299_vm10, %v17001_v7  ;;  %12761 = vmatmul.mubr.msk.bf16.gmra.mxu1 %vm299_vm10, %v17001_v7 }
0x13a7   :  { %14062 = vmatpush3.bf16.msra.mxu0 %v15691_v21  ;;  %14090 = vmatpush3.bf16.msra.mxu1 %v15692_v24 }
0x13a8   :  { %14063 = vmatprep.subr.bf16.mxu0 %v15693_v60  ;;  %14091 = vmatprep.subr.bf16.mxu1 %v15694_v57 }
0x13ab   :  { %14064 = vmatpush3.bf16.msra.mxu0 %v15695_v44  ;;  %14092 = vmatpush3.bf16.msra.mxu1 %v15696_v25 }
0x13ac   :  { %14065 = vmatprep.subr.bf16.mxu0 %v15697_v37  ;;  %14093 = vmatprep.subr.bf16.mxu1 %v15698_v34 }
0x13af   :  { %14066 = vmatpush3.bf16.msra.mxu0 %v15699_v50  ;;  %14094 = vmatpush3.bf16.msra.mxu1 %v15700_v4 }
0x13b0   :  { %14067 = vmatprep.subr.bf16.mxu0 %v15701_v56  ;;  %14095 = vmatprep.subr.bf16.mxu1 %v15702_v0 }
0x13b3   :  { %14068 = vmatpush3.bf16.msra.mxu0 %v15703_v3  ;;  %14096 = vmatpush3.bf16.msra.mxu1 %v15704_v48 }
0x13b4   :  { %14069 = vmatprep.subr.bf16.mxu0 %v15705_v17  ;;  %14097 = vmatprep.subr.bf16.mxu1 %v15706_v26 }
0x13b7   :  { %14070 = vmatpush3.bf16.msra.mxu0 %v15707_v23  ;;  %14098 = vmatpush3.bf16.msra.mxu1 %v15708_v27 }
0x13b8   :  { %14071 = vmatprep.subr.bf16.mxu0 %v15709_v28  ;;  %14099 = vmatprep.subr.bf16.mxu1 %v15710_v42 }
0x13bb   :  { %14072 = vmatpush3.bf16.msra.mxu0 %v15711_v22  ;;  %14100 = vmatpush3.bf16.msra.mxu1 %v15712_v43 }
0x13bc   :  { %5359 = vmatprep.subr.bf16.mxu0 %v15715_v63  ;;  %5412 = vmatprep.subr.bf16.mxu1 %v15718_v29 }
0x142d   :  { %v13961_v30 = vpop.f32.mrf.mxu0  ;;  %v13989_v33 = vpop.f32.mrf.mxu1 }
0x142f   :  { %v13962_v46 = vpop.f32.mrf.mxu0  ;;  %v13990_v36 = vpop.f32.mrf.mxu1 }
0x1430   :  { %v13963_v47 = vadd.f32 %v13962_v46, %v13961_v30  ;;  %v13991_v40 = vadd.f32 %v13990_v36, %v13989_v33 }
0x1431   :  { %v13964_v54 = vpop.f32.mrf.mxu0  ;;  %v13992_v9 = vpop.f32.mrf.mxu1 }
0x1432   :  { %v4410_v10 = vadd.f32 %v13991_v40, %v13963_v47 }
0x1433   :  { %v13965_v62 = vpop.f32.mrf.mxu0  ;;  %v13993_v61 = vpop.f32.mrf.mxu1 }
0x1434   :  { %v13966_v49 = vadd.f32 %v13965_v62, %v13964_v54  ;;  %v13994_v14 = vadd.f32 %v13993_v61, %v13992_v9  ;;  %v12749_v62 = vld [vmem:[%s19259_s18 + $0x8] sm:$0xf] }
0x1435   :  { %v13967_v15 = vpop.f32.mrf.mxu0  ;;  %v13995_v32 = vpop.f32.mrf.mxu1 }
0x1436   :  { %v4413_v11 = vadd.f32 %v13994_v14, %v13966_v49 }
0x1437   :  { %v13968_v12 = vpop.f32.mrf.mxu0  ;;  %v13996_v38 = vpop.f32.mrf.mxu1 }
0x1438   :  { %v13969_v18 = vadd.f32 %v13968_v12, %v13967_v15  ;;  %v13997_v19 = vadd.f32 %v13996_v38, %v13995_v32  ;;  %v4733_v32 = vrot.slane %v12749_v62, %v17146_v5  ;;  %v4729_v12 = vrot.slane %v12749_v62, %v17155_v8 }
0x1439   :  { %v13970_v20 = vpop.f32.mrf.mxu0  ;;  %v13998_v59 = vpop.f32.mrf.mxu1  ;;  %v4737_v38 = vrot.slane %v12749_v62, %v17158_v53 }
0x143a   :  { %v4418_v31 = vadd.f32 %v13997_v19, %v13969_v18 }
0x143b   :  { %v13971_v58 = vpop.f32.mrf.mxu0  ;;  %v13999_v21 = vpop.f32.mrf.mxu1 }
0x143c   :  { %v13972_v24 = vadd.f32 %v13971_v58, %v13970_v20  ;;  %v14000_v60 = vadd.f32 %v13999_v21, %v13998_v59 }
0x143e   :  { %v4421_v57 = vadd.f32 %v14000_v60, %v13972_v24 }
0x144d   :  { %v14017_v44 = vpop.f32.mrf.mxu0  ;;  %v14045_v25 = vpop.f32.mrf.mxu1 }
0x144f   :  { %v14018_v37 = vpop.f32.mrf.mxu0  ;;  %v14046_v34 = vpop.f32.mrf.mxu1 }
0x1450   :  { %v14019_v50 = vadd.f32 %v14018_v37, %v14017_v44  ;;  %v14047_v4 = vadd.f32 %v14046_v34, %v14045_v25 }
0x1451   :  { %v14020_v56 = vpop.f32.mrf.mxu0  ;;  %v14048_v0 = vpop.f32.mrf.mxu1 }
0x1452   :  { %v4651_v3 = vadd.f32 %v14019_v50, %v4410_v10 }
0x1453   :  { %v14021_v48 = vpop.f32.mrf.mxu0  ;;  %v14049_v17 = vpop.f32.mrf.mxu1 }
0x1454   :  { %v17432_v26 = vadd.f32 %v14047_v4, %v4651_v3  ;;  %v14022_v23 = vadd.f32 %v14021_v48, %v14020_v56  ;;  %v14050_v22 = vadd.f32 %v14049_v17, %v14048_v0 }
0x1455   :  { %v14023_v27 = vpop.f32.mrf.mxu0  ;;  %v14051_v28 = vpop.f32.mrf.mxu1 }
0x1456   :  { %v4654_v42 = vadd.f32 %v14022_v23, %v4413_v11  ;;  %v4741_v11 = vrot.slane %v12749_v62, %v17149_v13  ;;  %v15721_v62 = vld [vmem:[%s19258_s17 + $0xc4] ss:$16 sps:$4 sm:$0xff]  }
0x1457   :  { %v14024_v43 = vpop.f32.mrf.mxu0  ;;  %v14052_v63 = vpop.f32.mrf.mxu1 }
0x1458   :  { %v17434_v29 = vadd.f32 %v14050_v22, %v4654_v42  ;;  %v14025_v30 = vadd.f32 %v14024_v43, %v14023_v27  ;;  %v14053_v33 = vadd.f32 %v14052_v63, %v14051_v28 }
0x1459   :  { %v14026_v46 = vpop.f32.mrf.mxu0  ;;  %v14054_v36 = vpop.f32.mrf.mxu1 }
0x145a   :  { %v4659_v47 = vadd.f32 %v14025_v30, %v4418_v31 }
0x145b   :  { %v14027_v40 = vpop.f32.mrf.mxu0  ;;  %v14055_v54 = vpop.f32.mrf.mxu1 }
0x145c   :  { %v17436_v9 = vadd.f32 %v14053_v33, %v4659_v47  ;;  %v14028_v10 = vadd.f32 %v14027_v40, %v14026_v46  ;;  %v14056_v15 = vadd.f32 %v14055_v54, %v14054_v36  ;;  %v15713_v33 = vld [vmem:[%s19258_s17 + $0xe0] ss:$16 sps:$4 sm:$0xff]   ;;  %v15716_v46 = vld [vmem:[%s19258_s17 + $0xe8] ss:$16 sps:$4 sm:$0xff]  }
0x145d   :  { %v4820_v61 = vpop.f32.mrf.mxu0  ;;  %v4873_v49 = vpop.f32.mrf.mxu1 }
0x145e   :  { %v4662_v14 = vadd.f32 %v14028_v10, %v4421_v57  ;;  %v4821_v57 = vadd.f32 %v4820_v61, %v4729_v12  ;;  %v4874_v44 = vadd.f32 %v4873_v49, %v4737_v38  ;;  %v15724_v61 = vld [vmem:[%s19258_s17 + $0xcc] ss:$16 sps:$4 sm:$0xff]  }
0x145f   :  { %v4822_v18 = vpop.f32.mrf.mxu0  ;;  %v4875_v19 = vpop.f32.mrf.mxu1 }
0x1460   :  { %v17445_v20 = vadd.f32 %v14056_v15, %v4662_v14  ;;  %v4823_v58 = vadd.f32 %v4822_v18, %v4733_v32  ;;  %v4876_v21 = vadd.f32 %v4875_v19, %v4741_v11  ;;  %v4892_v28 = vmax.f32 %v4821_v57, 0.0 }
0x1461   :  { %v4824_v59 = vpop.f32.mrf.mxu0  ;;  %v4877_v31 = vpop.f32.mrf.mxu1  ;;  %v4894_v42 = vmax.f32 %v4874_v44, 0.0 }
0x1462   :  { %v4825_v24 = vadd.f32 %v4824_v59, %v4729_v12  ;;  %v4878_v60 = vadd.f32 %v4877_v31, %v4737_v38  ;;  %v4893_v48 = vmax.f32 %v4823_v58, 0.0  ;;  %v4895_v17 = vmax.f32 %v4876_v21, 0.0 }
0x1463   :  { %v4826_v25 = vpop.f32.mrf.mxu0  ;;  %v4879_v37 = vpop.f32.mrf.mxu1 }
0x1464   :  { %v4827_v34 = vadd.f32 %v4826_v25, %v4733_v32  ;;  %v4880_v50 = vadd.f32 %v4879_v37, %v4741_v11  ;;  %v4896_v4 = vmax.f32 %v4825_v24, 0.0  ;;  %v4898_v56 = vmax.f32 %v4878_v60, 0.0  ;;  %v15719_v24 = vld [vmem:[%s19258_s17 + $0xc0] ss:$16 sps:$4 sm:$0xff]   ;;  %v15722_v60 = vld [vmem:[%s19258_s17 + $0xc8] ss:$16 sps:$4 sm:$0xff]  }
0x1465   :  { %v4830_v0 = vpop.f32.mrf.mxu0  ;;  %v4883_v3 = vpop.f32.mrf.mxu1 }
0x1466   :  { %v4897_v23 = vmax.f32 %v4827_v34, 0.0  ;;  %v4899_v27 = vmax.f32 %v4880_v50, 0.0  ;;  %v4908_v36 = vpack.c.bf16 %v4896_v4, %v4892_v28  ;;  %v4910_v47 = vpack.c.bf16 %v4898_v56, %v4894_v42  ;;  %v15732_v28 = vld [vmem:[%s19260_s19 + $0x3b0] sm:$0xff]   ;;  %v15734_v42 = vld [vmem:[%s19260_s19 + $0x3e8] sm:$0xff]  }
0x1467   :  { %v4832_v22 = vpop.f32.mrf.mxu0  ;;  %v4885_v43 = vpop.f32.mrf.mxu1  ;;  %v4831_v18 = vadd.f32 %v4830_v0, %v4729_v12  ;;  %v4884_v19 = vadd.f32 %v4883_v3, %v4737_v38 }
0x1468   :  { %v4909_v63 = vpack.c.bf16 %v4897_v23, %v4893_v48  ;;  %v4911_v30 = vpack.c.bf16 %v4899_v27, %v4895_v17  ;;  %v4833_v40 = vadd.f32 %v4832_v22, %v4733_v32  ;;  %v4886_v49 = vadd.f32 %v4885_v43, %v4741_v11  ;;  %v15727_v48 = vld [vmem:[%s19260_s19 + $0x338] sm:$0xff]   ;;  %v15729_v23 = vld [vmem:[%s19260_s19 + $0x370] sm:$0xff]   ;;  %v15735_v22 = vld [vmem:[%s19260_s19 + $0x328] sm:$0xff]  }
0x1469   :  { %v4834_v54 = vpop.f32.mrf.mxu0  ;;  %v4887_v10 = vpop.f32.mrf.mxu1  ;;  %v4900_v34 = vmax.f32 %v4831_v18, 0.0  ;;  %v4902_v50 = vmax.f32 %v4884_v19, 0.0  ;;  %v15728_v17 = vld [vmem:[%s19260_s19 + $0x3b8] sm:$0xff]   ;;  %v15731_v27 = vld [vmem:[%s19260_s19 + $0x330] sm:$0xff]   ;;  %v15736_v43 = vld [vmem:[%s19260_s19 + $0x3a8] sm:$0xff]  }
0x146a   :  { %v4835_v14 = vadd.f32 %v4834_v54, %v4729_v12  ;;  %v4888_v15 = vadd.f32 %v4887_v10, %v4737_v38  ;;  %5205 = vmatprep.mubr.bf16.mxu0 %v4909_v63  ;;  %5254 = vmatprep.mubr.bf16.mxu1 %v4911_v30  ;;  %v15725_v12 = vld [vmem:[%s19260_s19 + $0x378] sm:$0xff]   ;;  %v4903_v38 = vmax.f32 %v4886_v49, 0.0  ;;  %v15737_v63 = vld [vmem:[%s19260_s19 + $0x360] sm:$0xff]   ;;  %v15745_v10 = vld [vmem:[%s19260_s19 + $0x350] sm:$0xff]  }
0x146b   :  { %v4836_v59 = vpop.f32.mrf.mxu0  ;;  %v4889_v31 = vpop.f32.mrf.mxu1  ;;  %5206 = vmatmul.mubr.bf16.vlgmr.msra.gmra.mxu0 %v4908_v36  ;;  %5255 = vmatmul.mubr.bf16.vlgmr.msra.gmra.mxu1 %v4910_v47  ;;  %v15738_v30 = vld [vmem:[%s19260_s19 + $0x3e0] sm:$0xff]   ;;  %v15741_v36 = vld [vmem:[%s19260_s19 + $0x358] sm:$0xff]   ;;  %v15748_v49 = vld [vmem:[%s19260_s19 + $0x390] sm:$0xff]  }
0x146c   :  { %v4837_v58 = vadd.f32 %v4836_v59, %v4733_v32  ;;  %v4890_v21 = vadd.f32 %v4889_v31, %v4741_v11  ;;  %5360 = vmatpush1.bf16.msra.mxu0 %v15713_v33  ;;  %5413 = vmatpush1.bf16.msra.mxu1 %v15716_v46  ;;  %v4904_v57 = vmax.f32 %v4835_v14, 0.0  ;;  %v4906_v44 = vmax.f32 %v4888_v15, 0.0  ;;  %v15726_v32 = vld [vmem:[%s19260_s19 + $0x3f8] sm:$0xff]   ;;  %v15739_v33 = vld [vmem:[%s19260_s19 + $0x320] sm:$0xff]   ;;  %v15749_v14 = vld [vmem:[%s19260_s19 + $0x348] sm:$0xff]  }
0x146d   :  { %5361 = vmatprep.subr.bf16.mxu0 %v15721_v62  ;;  %5414 = vmatprep.subr.bf16.mxu1 %v15724_v61  ;;  %v4901_v11 = vmax.f32 %v4833_v40, 0.0  ;;  %v15740_v46 = vld [vmem:[%s19260_s19 + $0x3a0] sm:$0xff]   ;;  %v15742_v47 = vld [vmem:[%s19260_s19 + $0x3d8] sm:$0xff]   ;;  %v15746_v62 = vld [vmem:[%s19260_s19 + $0x3d0] sm:$0xff]  }
0x146e   :  { %v4905_v25 = vmax.f32 %v4837_v58, 0.0  ;;  %v4907_v37 = vmax.f32 %v4890_v21, 0.0  ;;  %v4912_v0 = vpack.c.bf16 %v4904_v57, %v4900_v34  ;;  %v4914_v3 = vpack.c.bf16 %v4906_v44, %v4902_v50  ;;  %v15743_v40 = vld [vmem:[%s19260_s19 + $0x318] sm:$0xff]   ;;  %v15747_v61 = vld [vmem:[%s19260_s19 + $0x310] sm:$0xff]   ;;  %v15750_v15 = vld [vmem:[%s19260_s19 + $0x3c8] sm:$0xff]  }
0x146f   :  { %v15744_v54 = vld [vmem:[%s19260_s19 + $0x398] sm:$0xff]   ;;  %v15751_v18 = vld [vmem:[%s19260_s19 + $0x308] sm:$0xff]   ;;  %v15753_v59 = vld [vmem:[%s19260_s19 + $0x340] sm:$0xff]  }
0x1470   :  { %v4913_v4 = vpack.c.bf16 %v4905_v25, %v4901_v11  ;;  %v4915_v56 = vpack.c.bf16 %v4907_v37, %v4903_v38  ;;  %5362 = vmatpush1.bf16.msra.mxu0 %v15719_v24  ;;  %5415 = vmatpush1.bf16.msra.mxu1 %v15722_v60  ;;  %v15752_v19 = vld [vmem:[%s19260_s19 + $0x388] sm:$0xff]   ;;  %v15754_v31 = vld [vmem:[%s19260_s19 + $0x3c0] sm:$0xff]  }
0x1471   :  { %14113 = vmatprep.subr.bf16.mxu0 %v15725_v12  ;;  %14141 = vmatprep.subr.bf16.mxu1 %v15726_v32  ;;  %v15755_v58 = vld [vmem:[%s19260_s19 + $0x300] sm:$0xff]  }
0x1472   :  { %5213 = vmatprep.mubr.bf16.mxu0 %v4913_v4  ;;  %5262 = vmatprep.mubr.bf16.mxu1 %v4915_v56  ;;  %v15756_v21 = vld [vmem:[%s19260_s19 + $0x380] sm:$0xff]  }
0x1473   :  { %5214 = vmatmul.mubr.bf16.gmra.mxu0 %v4912_v0  ;;  %5263 = vmatmul.mubr.bf16.gmra.mxu1 %v4914_v3 }
0x1474   :  { %5379 = vmatprep.mubr.bf16.mxu0 %v16115_v2  ;;  %5432 = vmatprep.mubr.bf16.mxu1 %v16115_v2 }
0x147b   :  { %12875 = vmatmul.mubr.msk.bf16.vlgmr.msra.gmra.mxu0 %vm299_vm10, %v16969_v1  ;;  %12877 = vmatmul.mubr.msk.bf16.vlgmr.msra.gmra.mxu1 %vm299_vm10, %v16969_v1  ;;  %v15730_v1 = vld [vmem:[%s19260_s19 + $0x3f0] sm:$0xff]  }
0x147c   :  { %5389 = vmatprep.mubr.bf16.mxu0 %v16115_v2  ;;  %5442 = vmatprep.mubr.bf16.mxu1 %v16115_v2 }
0x147d   :  { %14114 = vmatpush3.bf16.msra.mxu0 %v15727_v48  ;;  %14142 = vmatpush3.bf16.msra.mxu1 %v15728_v17 }
0x147e   :  { %14115 = vmatprep.subr.bf16.mxu0 %v15729_v23  ;;  %14143 = vmatprep.subr.bf16.mxu1 %v15730_v1 }
0x1481   :  { %14116 = vmatpush3.bf16.msra.mxu0 %v15731_v27  ;;  %14144 = vmatpush3.bf16.msra.mxu1 %v15732_v28 }
0x1482   :  { %14145 = vmatprep.subr.bf16.mxu1 %v15734_v42 }
0x1483   :  { %12876 = vmatmul.mubr.msk.bf16.gmra.mxu0 %vm299_vm10, %v17001_v7  ;;  %12878 = vmatmul.mubr.msk.bf16.gmra.mxu1 %vm299_vm10, %v17001_v7  ;;  %v15733_v7 = vld [vmem:[%s19260_s19 + $0x368] sm:$0xff]  }
0x1484   :  { %14117 = vmatprep.subr.bf16.mxu0 %v15733_v7 }
0x1485   :  { %14118 = vmatpush3.bf16.msra.mxu0 %v15735_v22  ;;  %14146 = vmatpush3.bf16.msra.mxu1 %v15736_v43 }
0x1486   :  { %14119 = vmatprep.subr.bf16.mxu0 %v15737_v63  ;;  %14147 = vmatprep.subr.bf16.mxu1 %v15738_v30 }
0x1489   :  { %14120 = vmatpush3.bf16.msra.mxu0 %v15739_v33  ;;  %14148 = vmatpush3.bf16.msra.mxu1 %v15740_v46  ;;  %v12866_v46 = vld [vmem:[%s19259_s18 + $0xc] sm:$0xf] }
0x148a   :  { %14121 = vmatprep.subr.bf16.mxu0 %v15741_v36  ;;  %14149 = vmatprep.subr.bf16.mxu1 %v15742_v47 }
0x148d   :  { %14122 = vmatpush3.bf16.msra.mxu0 %v15743_v40  ;;  %14150 = vmatpush3.bf16.msra.mxu1 %v15744_v54  ;;  %v5294_v40 = vrot.slane %v12866_v46, %v17146_v5  ;;  %v5302_v54 = vrot.slane %v12866_v46, %v17149_v13 }
0x148e   :  { %14123 = vmatprep.subr.bf16.mxu0 %v15745_v10  ;;  %14151 = vmatprep.subr.bf16.mxu1 %v15746_v62  ;;  %v5290_v10 = vrot.slane %v12866_v46, %v17155_v8  ;;  %v5298_v62 = vrot.slane %v12866_v46, %v17158_v53 }
0x1491   :  { %14124 = vmatpush3.bf16.msra.mxu0 %v15747_v61  ;;  %14152 = vmatpush3.bf16.msra.mxu1 %v15748_v49 }
0x1492   :  { %14125 = vmatprep.subr.bf16.mxu0 %v15749_v14  ;;  %14153 = vmatprep.subr.bf16.mxu1 %v15750_v15 }
0x1495   :  { %14126 = vmatpush3.bf16.msra.mxu0 %v15751_v18  ;;  %14154 = vmatpush3.bf16.msra.mxu1 %v15752_v19 }
0x1496   :  { %14127 = vmatprep.subr.bf16.mxu0 %v15753_v59  ;;  %14155 = vmatprep.subr.bf16.mxu1 %v15754_v31 }
0x1499   :  { %14128 = vmatpush3.bf16.msra.mxu0 %v15755_v58  ;;  %14156 = vmatpush3.bf16.msra.mxu1 %v15756_v21 }
0x152b   :  { %v14073_v24 = vpop.f32.mrf.mxu0  ;;  %v14101_v60 = vpop.f32.mrf.mxu1 }
0x152d   :  { %v14074_v57 = vpop.f32.mrf.mxu0  ;;  %v14102_v44 = vpop.f32.mrf.mxu1 }
0x152e   :  { %v14075_v12 = vadd.f32 %v14074_v57, %v14073_v24  ;;  %v14103_v32 = vadd.f32 %v14102_v44, %v14101_v60 }
0x152f   :  { %v14076_v11 = vpop.f32.mrf.mxu0  ;;  %v14104_v38 = vpop.f32.mrf.mxu1 }
0x1530   :  { %v5257_v25 = vadd.f32 %v14103_v32, %v14075_v12 }
0x1531   :  { %v14077_v37 = vpop.f32.mrf.mxu0  ;;  %v14105_v34 = vpop.f32.mrf.mxu1 }
0x1532   :  { %v17574_v50 = vadd.f32 %v5257_v25, %v17432_v26  ;;  %v14078_v4 = vadd.f32 %v14077_v37, %v14076_v11  ;;  %v14106_v56 = vadd.f32 %v14105_v34, %v14104_v38 }
0x1533   :  { %v14079_v0 = vpop.f32.mrf.mxu0  ;;  %v14107_v3 = vpop.f32.mrf.mxu1 }
0x1534   :  { %v5260_v48 = vadd.f32 %v14106_v56, %v14078_v4 }
0x1535   :  { %v14080_v17 = vpop.f32.mrf.mxu0  ;;  %v14108_v23 = vpop.f32.mrf.mxu1 }
0x1536   :  { %v17577_v1 = vadd.f32 %v5260_v48, %v17434_v29  ;;  %v14081_v27 = vadd.f32 %v14080_v17, %v14079_v0  ;;  %v14109_v28 = vadd.f32 %v14108_v23, %v14107_v3 }
0x1537   :  { %v14082_v7 = vpop.f32.mrf.mxu0  ;;  %v14110_v42 = vpop.f32.mrf.mxu1 }
0x1538   :  { %v5265_v22 = vadd.f32 %v14109_v28, %v14081_v27 }
0x1539   :  { %v14083_v43 = vpop.f32.mrf.mxu0  ;;  %v14111_v63 = vpop.f32.mrf.mxu1 }
0x153a   :  { %v17580_v26 = vadd.f32 %v5265_v22, %v17436_v9  ;;  %v14084_v30 = vadd.f32 %v14083_v43, %v14082_v7  ;;  %v14112_v33 = vadd.f32 %v14111_v63, %v14110_v42 }
0x153b   :  { %v5381_v36 = vpop.f32.mrf.mxu0  ;;  %v5434_v47 = vpop.f32.mrf.mxu1 }
0x153c   :  { %v5268_v29 = vadd.f32 %v14112_v33, %v14084_v30  ;;  %v5382_v58 = vadd.f32 %v5381_v36, %v5290_v10  ;;  %v5435_v21 = vadd.f32 %v5434_v47, %v5298_v62 }
0x153d   :  { %v5383_v61 = vpop.f32.mrf.mxu0  ;;  %v5436_v9 = vpop.f32.mrf.mxu1 }
0x153e   :  { %v17590_v49 = vadd.f32 %v5268_v29, %v17445_v20  ;;  %v5384_v18 = vadd.f32 %v5383_v61, %v5294_v40  ;;  %v5437_v19 = vadd.f32 %v5436_v9, %v5302_v54  ;;  %v5453_v4 = vmax.f32 %v5382_v58, 0.0 }
0x153f   :  { %v5385_v14 = vpop.f32.mrf.mxu0  ;;  %v5438_v15 = vpop.f32.mrf.mxu1  ;;  %v5455_v56 = vmax.f32 %v5435_v21, 0.0 }
0x1540   :  { %v5386_v59 = vadd.f32 %v5385_v14, %v5290_v10  ;;  %v5439_v31 = vadd.f32 %v5438_v15, %v5298_v62  ;;  %v5454_v25 = vmax.f32 %v5384_v18, 0.0  ;;  %v5456_v37 = vmax.f32 %v5437_v19, 0.0 }
0x1541   :  { %v5387_v24 = vpop.f32.mrf.mxu0  ;;  %v5440_v60 = vpop.f32.mrf.mxu1 }
0x1542   :  { %v5388_v57 = vadd.f32 %v5387_v24, %v5294_v40  ;;  %v5441_v44 = vadd.f32 %v5440_v60, %v5302_v54  ;;  %v5457_v12 = vmax.f32 %v5386_v59, 0.0  ;;  %v5459_v32 = vmax.f32 %v5439_v31, 0.0 }
0x1543   :  { %v5391_v11 = vpop.f32.mrf.mxu0  ;;  %v5444_v38 = vpop.f32.mrf.mxu1 }
0x1544   :  { %v5458_v20 = vmax.f32 %v5388_v57, 0.0  ;;  %v5460_v34 = vmax.f32 %v5441_v44, 0.0  ;;  %v5469_v23 = vpack.c.bf16 %v5457_v12, %v5453_v4  ;;  %v5471_v27 = vpack.c.bf16 %v5459_v32, %v5455_v56 }
0x1545   :  { %v5393_v0 = vpop.f32.mrf.mxu0  ;;  %v5446_v3 = vpop.f32.mrf.mxu1  ;;  %v5392_v30 = vadd.f32 %v5391_v11, %v5290_v10  ;;  %v5445_v33 = vadd.f32 %v5444_v38, %v5298_v62 }
0x1546   :  { %v5470_v48 = vpack.c.bf16 %v5458_v20, %v5454_v25  ;;  %v5472_v17 = vpack.c.bf16 %v5460_v34, %v5456_v37  ;;  %v5394_v28 = vadd.f32 %v5393_v0, %v5294_v40  ;;  %v5447_v22 = vadd.f32 %v5446_v3, %v5302_v54  ;;  %v12975_v37 = vld [vmem:[%s19261_s20] ss:$0 sm:$0xff] }
0x1547   :  { %v5395_v7 = vpop.f32.mrf.mxu0  ;;  %v5448_v42 = vpop.f32.mrf.mxu1  ;;  %v5461_v59 = vmax.f32 %v5392_v30, 0.0  ;;  %v5463_v31 = vmax.f32 %v5445_v33, 0.0 }
0x1548   :  { %v5396_v43 = vadd.f32 %v5395_v7, %v5290_v10  ;;  %v5449_v63 = vadd.f32 %v5448_v42, %v5298_v62  ;;  %5766 = vmatprep.mubr.bf16.mxu0 %v5470_v48  ;;  %5815 = vmatprep.mubr.bf16.mxu1 %v5472_v17  ;;  %v5462_v14 = vmax.f32 %v5394_v28, 0.0  ;;  %v5464_v15 = vmax.f32 %v5447_v22, 0.0 }
0x1549   :  { %v5397_v46 = vpop.f32.mrf.mxu0  ;;  %v5450_v36 = vpop.f32.mrf.mxu1  ;;  %5767 = vmatmul.mubr.bf16.vlgmr.msra.gmra.mxu0 %v5469_v23  ;;  %5816 = vmatmul.mubr.bf16.vlgmr.msra.gmra.mxu1 %v5471_v27 }
0x154a   :  { %v5398_v47 = vadd.f32 %v5397_v46, %v5294_v40  ;;  %v5451_v29 = vadd.f32 %v5450_v36, %v5302_v54  ;;  %v5465_v61 = vmax.f32 %v5396_v43, 0.0  ;;  %v5467_v9 = vmax.f32 %v5449_v63, 0.0 }
0x154c   :  { %v5466_v18 = vmax.f32 %v5398_v47, 0.0  ;;  %v5468_v19 = vmax.f32 %v5451_v29, 0.0  ;;  %v5473_v24 = vpack.c.bf16 %v5465_v61, %v5461_v59  ;;  %v5475_v60 = vpack.c.bf16 %v5467_v9, %v5463_v31 }
0x154e   :  { %v5474_v58 = vpack.c.bf16 %v5466_v18, %v5462_v14  ;;  %v5476_v21 = vpack.c.bf16 %v5468_v19, %v5464_v15 }
0x1550   :  { %5774 = vmatprep.mubr.bf16.mxu0 %v5474_v58  ;;  %5823 = vmatprep.mubr.bf16.mxu1 %v5476_v21 }
0x1551   :  { %5775 = vmatmul.mubr.bf16.gmra.mxu0 %v5473_v24  ;;  %5824 = vmatmul.mubr.bf16.gmra.mxu1 %v5475_v60 }
0x1609   :  { %v14129_v10 = vpop.f32.mrf.mxu0  ;;  %v14157_v62 = vpop.f32.mrf.mxu1 }
0x160b   :  { %v14130_v40 = vpop.f32.mrf.mxu0  ;;  %v14158_v54 = vpop.f32.mrf.mxu1 }
0x160c   :  { %v14131_v57 = vadd.f32 %v14130_v40, %v14129_v10  ;;  %v14159_v44 = vadd.f32 %v14158_v54, %v14157_v62 }
0x160d   :  { %v14132_v12 = vpop.f32.mrf.mxu0  ;;  %v14160_v32 = vpop.f32.mrf.mxu1 }
0x160e   :  { %v5818_v11 = vadd.f32 %v14159_v44, %v14131_v57 }
0x160f   :  { %v14133_v38 = vpop.f32.mrf.mxu0  ;;  %v14161_v25 = vpop.f32.mrf.mxu1 }
0x1610   :  { %v5832_v20 = vadd.f32 %v5818_v11, %v17574_v50  ;;  %v14134_v34 = vadd.f32 %v14133_v38, %v14132_v12  ;;  %v14162_v4 = vadd.f32 %v14161_v25, %v14160_v32 }
0x1611   :  { %v14135_v56 = vpop.f32.mrf.mxu0  ;;  %v14163_v0 = vpop.f32.mrf.mxu1 }
0x1612   :  { %v5821_v3 = vadd.f32 %v14162_v4, %v14134_v34  ;;  %v5843_v48 = vadd.f32 %v12975_v37, %v5832_v20  ;;  %v12981_v20 = vld [vmem:[%s19290_s4 + $0x98] sm:$0xff]  ;;  %v12990_v34 = vld [vmem:[%s19291_s5 + $0x90] sm:$0xff] }
0x1613   :  { %v14136_v17 = vpop.f32.mrf.mxu0  ;;  %v14164_v23 = vpop.f32.mrf.mxu1  ;;  %15052 = vmatprep.subr.mxu0 %v12981_v20  ;;  %v12980_v4 = vld [vmem:[%s19290_s4 + $0x90] sm:$0xff] }
0x1614   :  { %v5833_v27 = vadd.f32 %v5821_v3, %v17577_v1  ;;  %v14137_v28 = vadd.f32 %v14136_v17, %v14135_v56  ;;  %v14165_v7 = vadd.f32 %v14164_v23, %v14163_v0  ;;  %v5847_v42 = vadd.f32 %v5843_v48, %v16959_v55  ;;  %15053 = vmatpush3.msra.mxu0 %v12981_v20  ;;  %v12979_v56 = vld [vmem:[%s19290_s4 + $0x88] sm:$0xff]  ;;  %v12978_v3 = vld [vmem:[%s19290_s4 + $0x80] sm:$0xff]  ;;  %v13001_v17 = vld [vmem:[%s19292_s29 + $0x98] sm:$0xff] }
0x1615   :  { %v14138_v22 = vpop.f32.mrf.mxu0  ;;  %v14166_v43 = vpop.f32.mrf.mxu1  ;;  %15054 = vmatprep.subr.mxu0 %v12980_v4  ;;  %v12989_v0 = vld [vmem:[%s19291_s5 + $0x88] sm:$0xff]  ;;  %v12988_v48 = vld [vmem:[%s19291_s5 + $0x80] sm:$0xff] }
0x1616   :  { %v5826_v63 = vadd.f32 %v14165_v7, %v14137_v28  ;;  %v5853_v30 = vsel %vm299_vm10, %v5847_v42, 0.0  ;;  %v5844_v50 = vadd.f32 %v12975_v37, %v5833_v27  ;;  %15055 = vmatpush3.msra.mxu0 %v12980_v4 }
0x1617   :  { %v14139_v33 = vpop.f32.mrf.mxu0  ;;  %v14167_v46 = vpop.f32.mrf.mxu1  ;;  %5854 = vadd.xlane.f32.xlu1 %v5853_v30  ;;  %15056 = vmatprep.subr.mxu0 %v12979_v56 }
0x1618   :  { %v5834_v36 = vadd.f32 %v5826_v63, %v17580_v26  ;;  %v14140_v47 = vadd.f32 %v14139_v33, %v14138_v22  ;;  %v14168_v29 = vadd.f32 %v14167_v46, %v14166_v43  ;;  %v5848_v61 = vadd.f32 %v5844_v50, %v16957_v41  ;;  %15057 = vmatpush3.msra.mxu0 %v12979_v56  ;;  %v13003_v56 = vld [vmem:[%s19251_s10 + $0x4] ss:$0 sm:$0xff] }
0x1619   :  { %15058 = vmatprep.subr.mxu0 %v12978_v3 }
0x161a   :  { %v5829_v1 = vadd.f32 %v14168_v29, %v14140_v47  ;;  %v5856_v9 = vsel %vm299_vm10, %v5848_v61, 0.0  ;;  %v5845_v14 = vadd.f32 %v12975_v37, %v5834_v36  ;;  %15059 = vmatpush3.msra.mxu0 %v12978_v3  ;;  %v12976_v47 = vld [vmem:[%s19256_s15] ss:$0 sm:$0xff] }
0x161b   :  { %5857 = vadd.xlane.f32.xlu0 %v5856_v9  ;;  %15080 = vmatprep.subr.mxu0 %v13001_v17 }
0x161c   :  { %v5835_v55 = vadd.f32 %v5829_v1, %v17590_v49  ;;  %v5849_v15 = vadd.f32 %v5845_v14, %v16987_v6 }
0x161e   :  { %v5859_v18 = vsel %vm299_vm10, %v5849_v15, 0.0  ;;  %v5846_v19 = vadd.f32 %v12975_v37, %v5835_v55  ;;  %v12991_v37 = vld [vmem:[%s19291_s5 + $0x98] sm:$0xff] }
0x161f   :  { %5860 = vadd.xlane.f32.xlu1 %v5859_v18  ;;  %15066 = vmatprep.subr.mxu1 %v12991_v37 }
0x1620   :  { %v5850_v59 = vadd.f32 %v5846_v19, %v16997_v52  ;;  %15067 = vmatpush3.msra.mxu1 %v12991_v37 }
0x1621   :  { %15068 = vmatprep.subr.mxu1 %v12990_v34 }
0x1622   :  { %v5862_v26 = vsel %vm299_vm10, %v5850_v59, 0.0  ;;  %15069 = vmatpush3.msra.mxu1 %v12990_v34 }
0x1623   :  { %5863 = vadd.xlane.f32.xlu0 %v5862_v26  ;;  %15070 = vmatprep.subr.mxu1 %v12989_v0  ;;  %v13000_v26 = vld [vmem:[%s19292_s29 + $0x90] sm:$0xff] }
0x1624   :  { %15071 = vmatpush3.msra.mxu1 %v12989_v0 }
0x1625   :  { %15072 = vmatprep.subr.mxu1 %v12988_v48 }
0x1626   :  { %15073 = vmatpush3.msra.mxu1 %v12988_v48 }
0x16a0   :  { %v5855_v31 = vpop.xlane.xlu1 %5854 }
0x16a1   :  { %v5865_v41 = vmul.f32 0.03125, %v5855_v31 }
0x16a3   :  { %v17607_v58 = vsub.f32 %v5847_v42, %v5865_v41 }
0x16a4   :  { %v5858_v21 = vpop.xlane.xlu0 %5857 }
0x16a5   :  { %v5866_v24 = vmul.f32 0.03125, %v5858_v21  ;;  %v5873_v49 = vmul.f32 %v17607_v58, %v17607_v58 }
0x16a7   :  { %v17611_v60 = vsub.f32 %v5848_v61, %v5866_v24  ;;  %v5877_v6 = vsel %vm299_vm10, %v5873_v49, 0.0  ;;  %v12977_v61 = vld [vmem:[%s19257_s16] ss:$0 sm:$0xff]  ;;  %v12999_v24 = vld [vmem:[%s19292_s29 + $0x88] sm:$0xff] }
0x16a8   :  { %5878 = vadd.xlane.f32.xlu1 %v5877_v6  ;;  %v5861_v10 = vpop.xlane.xlu1 %5860 }
0x16a9   :  { %v5867_v62 = vmul.f32 0.03125, %v5861_v10  ;;  %v5874_v52 = vmul.f32 %v17611_v60, %v17611_v60 }
0x16ab   :  { %v17616_v40 = vsub.f32 %v5849_v15, %v5867_v62  ;;  %v5880_v54 = vsel %vm299_vm10, %v5874_v52, 0.0  ;;  %v12983_v62 = vld [vmem:[%s19294_s0 + $0x4] ss:$0 sm:$0xff] }
0x16ac   :  { %5881 = vadd.xlane.f32.xlu0 %v5880_v54  ;;  %v5864_v57 = vpop.xlane.xlu0 %5863 }
0x16ad   :  { %v5868_v44 = vmul.f32 0.03125, %v5864_v57  ;;  %v5875_v12 = vmul.f32 %v17616_v40, %v17616_v40 }
0x16af   :  { %v17621_v32 = vsub.f32 %v5850_v59, %v5868_v44  ;;  %v5883_v11 = vsel %vm299_vm10, %v5875_v12, 0.0  ;;  %v12993_v44 = vld [vmem:[%s19295_s7 + $0x4] ss:$0 sm:$0xff] }
0x16b0   :  { %5884 = vadd.xlane.f32.xlu1 %v5883_v11 }
0x16b1   :  { %v5876_v38 = vmul.f32 %v17621_v32, %v17621_v32 }
0x16b3   :  { %v5886_v25 = vsel %vm299_vm10, %v5876_v38, 0.0 }
0x16b4   :  { %5887 = vadd.xlane.f32.xlu0 %v5886_v25 }
0x1731   :  { %v5879_v23 = vpop.xlane.xlu1 %5878 }
0x1732   :  { %v5889_v27 = vmul.f32 0.03125, %v5879_v23 }
0x1734   :  { %v5893_v28 = vadd.f32 1e-05, %v5889_v27 }
0x1735   :  { %v5882_v7 = vpop.xlane.xlu0 %5881 }
0x1736   :  { %16005 = vrsqrt.f32 %v5893_v28  ;;  %v5890_v42 = vmul.f32 0.03125, %v5882_v7  ;;  %v13034_v28 = vld [vmem:[%s19291_s5 + $0xb8] sm:$0xff] }
0x1738   :  { %v5894_v22 = vadd.f32 1e-05, %v5890_v42 }
0x1739   :  { %v5885_v43 = vpop.xlane.xlu1 %5884 }
0x173a   :  { %16007 = vrsqrt.f32 %v5894_v22  ;;  %v5891_v63 = vmul.f32 0.03125, %v5885_v43  ;;  %v13033_v43 = vld [vmem:[%s19291_s5 + $0xb0] sm:$0xff] }
0x173c   :  { %v5895_v30 = vadd.f32 1e-05, %v5891_v63  ;;  %v13032_v63 = vld [vmem:[%s19291_s5 + $0xa8] sm:$0xff] }
0x173d   :  { %v5888_v50 = vpop.xlane.xlu0 %5887 }
0x173e   :  { %16009 = vrsqrt.f32 %v5895_v30  ;;  %v5892_v33 = vmul.f32 0.03125, %v5888_v50  ;;  %v13031_v50 = vld [vmem:[%s19291_s5 + $0xa0] sm:$0xff] }
0x1740   :  { %v5896_v46 = vadd.f32 1e-05, %v5892_v33 }
0x1742   :  { %16011 = vrsqrt.f32 %v5896_v46 }
0x1743   :  { %v16006_v36 = vpop.eup %16005 }
0x1744   :  { %v5901_v29 = vmul.f32 %v16006_v36, %v17607_v58 }
0x1746   :  { %v5911_v1 = vmul.f32 %v12976_v47, %v5901_v29 }
0x1747   :  { %v16008_v9 = vpop.eup %16007 }
0x1748   :  { %v17661_v14 = vadd.f32 %v12977_v61, %v5911_v1  ;;  %v5902_v55 = vmul.f32 %v16008_v9, %v17611_v60  ;;  %v12998_v60 = vld [vmem:[%s19292_s29 + $0x80] sm:$0xff] }
0x174a   :  { %v5912_v15 = vmul.f32 %v12976_v47, %v5902_v55  ;;  %15060 = vmatprep.mubr.msk.f32.mxu0 %vm299_vm10, %v17661_v14  ;;  %15074 = vmatprep.mubr.msk.f32.mxu1 %vm299_vm10, %v17661_v14 }
0x174b   :  { %v16010_v18 = vpop.eup %16009 }
0x174c   :  { %v17668_v19 = vadd.f32 %v12977_v61, %v5912_v15  ;;  %v5903_v59 = vmul.f32 %v16010_v18, %v17616_v40 }
0x174e   :  { %v5913_v31 = vmul.f32 %v12976_v47, %v5903_v59  ;;  %15061 = vmatmul.mubr.msk.f32.vlgmr.msra.gmra.mxu0 %vm299_vm10, %v17668_v19  ;;  %15075 = vmatmul.mubr.msk.f32.vlgmr.msra.gmra.mxu1 %vm299_vm10, %v17668_v19 }
0x174f   :  { %v16012_v41 = vpop.eup %16011  ;;  %15081 = vmatpush3.msra.mxu0 %v13001_v17 }
0x1750   :  { %v17678_v58 = vadd.f32 %v12977_v61, %v5913_v31  ;;  %v5904_v21 = vmul.f32 %v16012_v41, %v17621_v32  ;;  %15082 = vmatprep.subr.mxu0 %v13000_v26 }
0x1751   :  { %15083 = vmatpush3.msra.mxu0 %v13000_v26 }
0x1752   :  { %v5914_v49 = vmul.f32 %v12976_v47, %v5904_v21  ;;  %15063 = vmatprep.mubr.msk.f32.mxu0 %vm299_vm10, %v17678_v58  ;;  %15077 = vmatprep.mubr.msk.f32.mxu1 %vm299_vm10, %v17678_v58 }
0x1753   :  { %15084 = vmatprep.subr.mxu0 %v12999_v24 }
0x1754   :  { %v17691_v6 = vadd.f32 %v12977_v61, %v5914_v49  ;;  %15085 = vmatpush3.msra.mxu0 %v12999_v24 }
0x1755   :  { %15086 = vmatprep.subr.mxu0 %v12998_v60 }
0x1756   :  { %15064 = vmatmul.mubr.msk.f32.gmra.mxu0 %vm299_vm10, %v17691_v6  ;;  %15078 = vmatmul.mubr.msk.f32.gmra.mxu1 %vm299_vm10, %v17691_v6 }
0x1757   :  { %15088 = vmatprep.mubr.msk.f32.mxu0 %vm299_vm10, %v17661_v14  ;;  %15087 = vmatpush3.msra.mxu0 %v12998_v60  ;;  %v13036_v60 = vld [vmem:[%s19295_s7 + $0x5] ss:$0 sm:$0xff] }
0x175a   :  { %15089 = vmatmul.mubr.msk.f32.vlgmr.msra.gmra.mxu0 %vm299_vm10, %v17668_v19 }
0x175b   :  { %15091 = vmatprep.mubr.msk.f32.mxu0 %vm299_vm10, %v17678_v58 }
0x175e   :  { %15092 = vmatmul.mubr.msk.f32.gmra.mxu0 %vm299_vm10, %v17691_v6 }
0x180e   :  { %v15062_v10 = vpop.f32.mrf.mxu0  ;;  %v15076_v52 = vpop.f32.mrf.mxu1 }
0x180f   :  { %v6120_v4 = vadd.f32 %v15076_v52, %v12993_v44  ;;  %v6022_v42 = vadd.f32 %v15062_v10, %v12983_v62 }
0x1810   :  { %v6016_v40 = vpop.f32.mrf.mxu0  ;;  %v6114_v57 = vpop.f32.mrf.mxu1 }
0x1811   :  { %v6017_v54 = vadd.f32 %v12983_v62, %v6016_v40  ;;  %v6115_v17 = vadd.f32 %v12993_v44, %v6114_v57 }
0x1813   :  { %15102 = vmatprep.mubr.msk.f32.mxu1 %vm1187_vm6, %v6017_v54 }
0x1816   :  { %v15065_v12 = vpop.f32.mrf.mxu0  ;;  %v15079_v32 = vpop.f32.mrf.mxu1 }
0x1817   :  { %v6130_v11 = vadd.f32 %v15079_v32, %v12993_v44  ;;  %v6032_v30 = vadd.f32 %v15065_v12, %v12983_v62 }
0x1818   :  { %v6026_v38 = vpop.f32.mrf.mxu0  ;;  %v6124_v25 = vpop.f32.mrf.mxu1 }
0x1819   :  { %v6125_v37 = vadd.f32 %v12993_v44, %v6124_v25  ;;  %15094 = vmatprep.subr.msk.mxu1 %vm1187_vm6, %v6130_v11  ;;  %v6027_v22 = vadd.f32 %v12983_v62, %v6026_v38 }
0x181a   :  { %v15090_v20 = vpop.f32.mrf.mxu0  ;;  %15095 = vmatpush3.xpose.msk.msra.mxu1 %vm1187_vm6, %v6130_v11 }
0x181b   :  { %15096 = vmatprep.subr.msk.mxu1 %vm1187_vm6, %v6125_v37  ;;  %v6218_v27 = vadd.f32 %v15090_v20, %v13003_v56 }
0x181c   :  { %v6212_v34 = vpop.f32.mrf.mxu0 }
0x181d   :  { %v6213_v7 = vadd.f32 %v13003_v56, %v6212_v34 }
0x181e   :  { %v15093_v0 = vpop.f32.mrf.mxu0  ;;  %15097 = vmatpush3.xpose.msk.msra.mxu1 %vm1187_vm6, %v6125_v37 }
0x181f   :  { %v6228_v3 = vadd.f32 %v15093_v0, %v13003_v56  ;;  %15098 = vmatprep.subr.msk.mxu1 %vm1187_vm6, %v6120_v4 }
0x1820   :  { %v6222_v48 = vpop.f32.mrf.mxu0 }
0x1821   :  { %v6223_v23 = vadd.f32 %v13003_v56, %v6222_v48  ;;  %15108 = vmatprep.subr.mxu0 %v6228_v3 }
0x1822   :  { %15099 = vmatpush3.xpose.msk.msra.mxu1 %vm1187_vm6, %v6120_v4  ;;  %15109 = vmatpush3.msra.mxu0 %v6228_v3 }
0x1823   :  { %15100 = vmatprep.subr.msk.mxu1 %vm1187_vm6, %v6115_v17  ;;  %15110 = vmatprep.subr.mxu0 %v6223_v23 }
0x1824   :  { %15111 = vmatpush3.msra.mxu0 %v6223_v23 }
0x1825   :  { %15112 = vmatprep.subr.mxu0 %v6218_v27 }
0x1826   :  { %15101 = vmatpush3.xpose.msk.msra.mxu1 %vm1187_vm6, %v6115_v17  ;;  %15113 = vmatpush3.msra.mxu0 %v6218_v27 }
0x1827   :  { %15114 = vmatprep.subr.mxu0 %v6213_v7  ;;  %15136 = vmatprep.subr.mxu1 %v13034_v28 }
0x1828   :  { %15115 = vmatpush3.msra.mxu0 %v6213_v7 }
0x1829   :  { %15103 = vmatmul.mubr.msk.f32.vlgmr.msra.gmra.mxu1 %vm1187_vm6, %v6022_v42 }
0x182a   :  { %15105 = vmatprep.mubr.msk.f32.mxu1 %vm1187_vm6, %v6027_v22  ;;  %15137 = vmatpush3.msra.mxu1 %v13034_v28  ;;  %v13024_v22 = vld [vmem:[%s19290_s4 + $0xb8] sm:$0xff] }
0x182b   :  { %15138 = vmatprep.subr.mxu1 %v13033_v43  ;;  %15122 = vmatprep.subr.mxu0 %v13024_v22 }
0x182c   :  { %15139 = vmatpush3.msra.mxu1 %v13033_v43 }
0x182d   :  { %15106 = vmatmul.mubr.msk.f32.gmra.mxu1 %vm1187_vm6, %v6032_v30  ;;  %15140 = vmatprep.subr.mxu1 %v13032_v63 }
0x182e   :  { %15141 = vmatpush3.msra.mxu1 %v13032_v63  ;;  %15144 = vmatprep.mubr.msk.f32.mxu1 %vm299_vm10, %v17661_v14 }
0x182f   :  { %15142 = vmatprep.subr.mxu1 %v13031_v50 }
0x1830   :  { %15143 = vmatpush3.msra.mxu1 %v13031_v50 }
0x1831   :  { %15145 = vmatmul.mubr.msk.f32.vlgmr.msra.gmra.mxu1 %vm299_vm10, %v17668_v19 }
0x1832   :  { %15147 = vmatprep.mubr.msk.f32.mxu1 %vm299_vm10, %v17678_v58 }
0x1835   :  { %15148 = vmatmul.mubr.msk.f32.gmra.mxu1 %vm299_vm10, %v17691_v6 }
0x18e9   :  { %v15104_v33 = vpop.f32.mrf.mxu1 }
0x18ea   :  { %v6341_v46 = vmul.f32 0.35355338, %v15104_v33 }
0x18eb   :  { %v6321_v36 = vpop.f32.mrf.mxu1 }
0x18ec   :  { %v6340_v47 = vmul.f32 0.35355338, %v6321_v36  ;;  %v6345_v29 = vsel %vm16510_vm7, %v6341_v46, -1e+30 }
0x18ed   :  { %v15107_v61 = vpop.f32.mrf.mxu1  ;;  %v6351_v1 = vsel %vm299_vm10, %v6345_v29, -inf }
0x18ee   :  { %v6343_v9 = vmul.f32 0.35355338, %v15107_v61  ;;  %6352 = vmax.xlane.f32.xlu0 %v6351_v1  ;;  %v6344_v55 = vsel %vm16515_vm8, %v6340_v47, -1e+30  ;;  %v13023_v61 = vld [vmem:[%s19290_s4 + $0xb0] sm:$0xff] }
0x18ef   :  { %v6331_v15 = vpop.f32.mrf.mxu1  ;;  %v6348_v18 = vsel %vm299_vm10, %v6344_v55, -inf }
0x18f0   :  { %v6342_v59 = vmul.f32 0.35355338, %v6331_v15  ;;  %6349 = vmax.xlane.f32.xlu1 %v6348_v18  ;;  %v6347_v26 = vsel %vm16530_vm11, %v6343_v9, -1e+30  ;;  %v13021_v18 = vld [vmem:[%s19290_s4 + $0xa0] sm:$0xff] }
0x18f1   :  { %v15146_v31 = vpop.f32.mrf.mxu1  ;;  %v6357_v41 = vsel %vm299_vm10, %v6347_v26, -inf }
0x18f2   :  { %6358 = vmax.xlane.f32.xlu0 %v6357_v41  ;;  %v6346_v21 = vsel %vm16526_vm9, %v6342_v59, -1e+30  ;;  %v6674_v54 = vadd.f32 %v15146_v31, %v13036_v60  ;;  %v13044_v59 = vld [vmem:[%s19292_s29 + $0xb8] sm:$0xff]  ;;  %v13042_v31 = vld [vmem:[%s19292_s29 + $0xa8] sm:$0xff]  ;;  %v13041_v41 = vld [vmem:[%s19292_s29 + $0xa0] sm:$0xff] }
0x18f3   :  { %v6668_v24 = vpop.f32.mrf.mxu1  ;;  %v6354_v49 = vsel %vm299_vm10, %v6346_v21, -inf }
0x18f4   :  { %6355 = vmax.xlane.f32.xlu1 %v6354_v49  ;;  %v6669_v57 = vadd.f32 %v13036_v60, %v6668_v24 }
0x18f5   :  { %v15149_v10 = vpop.f32.mrf.mxu1 }
0x18f6   :  { %v6684_v62 = vadd.f32 %v15149_v10, %v13036_v60 }
0x18f7   :  { %v6678_v52 = vpop.f32.mrf.mxu1 }
0x18f8   :  { %v6679_v40 = vadd.f32 %v13036_v60, %v6678_v52  ;;  %15164 = vmatprep.subr.msk.mxu1 %vm1187_vm6, %v6684_v62  ;;  %v13026_v52 = vld [vmem:[%s19294_s0 + $0x5] ss:$0 sm:$0xff] }
0x18f9   :  { %15165 = vmatpush3.xpose.msk.msra.mxu1 %vm1187_vm6, %v6684_v62 }
0x18fa   :  { %15166 = vmatprep.subr.msk.mxu1 %vm1187_vm6, %v6679_v40 }
0x18fd   :  { %15167 = vmatpush3.xpose.msk.msra.mxu1 %vm1187_vm6, %v6679_v40 }
0x18fe   :  { %15168 = vmatprep.subr.msk.mxu1 %vm1187_vm6, %v6674_v54 }
0x1901   :  { %15169 = vmatpush3.xpose.msk.msra.mxu1 %vm1187_vm6, %v6674_v54 }
0x1902   :  { %15170 = vmatprep.subr.msk.mxu1 %vm1187_vm6, %v6669_v57 }
0x1905   :  { %15171 = vmatpush3.xpose.msk.msra.mxu1 %vm1187_vm6, %v6669_v57 }
0x1977   :  { %v6353_v44 = vpop.xlane.xlu0 %6352 }
0x1978   :  { %v6361_v12 = vsub.f32 %v6345_v29, %v6353_v44 }
0x1979   :  { %v6350_v32 = vpop.xlane.xlu1 %6349 }
0x197a   :  { %v6366_v11 = vmul.f32 1.442695, %v6361_v12  ;;  %v6360_v38 = vsub.f32 %v6344_v55, %v6350_v32  ;;  %v13022_v55 = vld [vmem:[%s19290_s4 + $0xa8] sm:$0xff]  ;;  %v13085_v12 = vld [vmem:[%s19291_s5 + $0xd8] sm:$0xff] }
0x197b   :  { %v6359_v25 = vpop.xlane.xlu0 %6358 }
0x197c   :  { %16013 = vpow2.f32 %v6366_v11  ;;  %v6364_v37 = vmul.f32 1.442695, %v6360_v38  ;;  %v6363_v20 = vsub.f32 %v6347_v26, %v6359_v25  ;;  %v13043_v26 = vld [vmem:[%s19292_s29 + $0xb0] sm:$0xff] }
0x197d   :  { %v6356_v34 = vpop.xlane.xlu1 %6355 }
0x197e   :  { %16015 = vpow2.f32 %v6364_v37  ;;  %v6370_v4 = vmul.f32 1.442695, %v6363_v20  ;;  %v6362_v56 = vsub.f32 %v6346_v21, %v6356_v34  ;;  %v13020_v21 = vld [vmem:[%s19252_s11 + $0x20] sm:$0xff] }
0x197f   :  { %15200 = vmatprep.subr.mxu1 %v13020_v21  ;;  %v13046_v20 = vld [vmem:[%s19251_s10 + $0x5] ss:$0 sm:$0xff] }
0x1980   :  { %16017 = vpow2.f32 %v6370_v4  ;;  %v6368_v0 = vmul.f32 1.442695, %v6362_v56 }
0x1982   :  { %16019 = vpow2.f32 %v6368_v0  ;;  %v13084_v0 = vld [vmem:[%s19291_s5 + $0xd0] sm:$0xff] }
0x1989   :  { %v16014_v3 = vpop.eup %16013 }
0x198a   :  { %v6375_v48 = vsel %vm299_vm10, %v16014_v3, 0.0 }
0x198b   :  { %v16016_v17 = vpop.eup %16015  ;;  %6376 = vadd.xlane.f32.xlu0 %v6375_v48  ;;  %v13083_v48 = vld [vmem:[%s19291_s5 + $0xc8] sm:$0xff] }
0x198c   :  { %v6372_v23 = vsel %vm299_vm10, %v16016_v17, 0.0 }
0x198d   :  { %v16018_v27 = vpop.eup %16017  ;;  %6373 = vadd.xlane.f32.xlu1 %v6372_v23  ;;  %v13082_v23 = vld [vmem:[%s19291_s5 + $0xc0] sm:$0xff] }
0x198e   :  { %v6381_v28 = vsel %vm299_vm10, %v16018_v27, 0.0 }
0x198f   :  { %v16020_v7 = vpop.eup %16019  ;;  %6382 = vadd.xlane.f32.xlu0 %v6381_v28 }
0x1990   :  { %v6378_v42 = vsel %vm299_vm10, %v16020_v7, 0.0 }
0x1991   :  { %6379 = vadd.xlane.f32.xlu1 %v6378_v42 }
0x1a14   :  { %v6377_v43 = vpop.xlane.xlu0 %6376 }
0x1a15   :  { %16021 = vrcp.f32 %v6377_v43 }
0x1a16   :  { %v6374_v63 = vpop.xlane.xlu1 %6373 }
0x1a17   :  { %16023 = vrcp.f32 %v6374_v63 }
0x1a18   :  { %v6383_v30 = vpop.xlane.xlu0 %6382 }
0x1a19   :  { %16025 = vrcp.f32 %v6383_v30 }
0x1a1a   :  { %v6380_v50 = vpop.xlane.xlu1 %6379 }
0x1a1b   :  { %16027 = vrcp.f32 %v6380_v50 }
0x1a22   :  { %v16022_v33 = vpop.eup %16021 }
0x1a23   :  { %v6389_v47 = vmul.f32 %v16022_v33, %v16014_v3 }
0x1a24   :  { %v16024_v46 = vpop.eup %16023 }
0x1a25   :  { %v6388_v36 = vmul.f32 %v16024_v46, %v16016_v17 }
0x1a26   :  { %v16026_v29 = vpop.eup %16025 }
0x1a27   :  { %15116 = vmatprep.mubr.msk.f32.mxu0 %vm299_vm10, %v6388_v36  ;;  %v6391_v15 = vmul.f32 %v16026_v29, %v16018_v27 }
0x1a28   :  { %v16028_v1 = vpop.eup %16027  ;;  %15117 = vmatmul.mubr.msk.f32.vlgmr.msra.gmra.mxu0 %vm299_vm10, %v6389_v47 }
0x1a29   :  { %15123 = vmatpush3.msra.mxu0 %v13024_v22  ;;  %v6390_v9 = vmul.f32 %v16028_v1, %v16020_v7 }
0x1a2a   :  { %15124 = vmatprep.subr.mxu0 %v13023_v61 }
0x1a2b   :  { %15119 = vmatprep.mubr.msk.f32.mxu0 %vm299_vm10, %v6390_v9  ;;  %15125 = vmatpush3.msra.mxu0 %v13023_v61 }
0x1a2c   :  { %15120 = vmatmul.mubr.msk.f32.gmra.mxu0 %vm299_vm10, %v6391_v15  ;;  %15126 = vmatprep.subr.mxu0 %v13022_v55 }
0x1a2d   :  { %15127 = vmatpush3.msra.mxu0 %v13022_v55  ;;  %15130 = vmatprep.mubr.msk.f32.mxu0 %vm299_vm10, %v17661_v14 }
0x1a2e   :  { %15128 = vmatprep.subr.mxu0 %v13021_v18 }
0x1a2f   :  { %15129 = vmatpush3.msra.mxu0 %v13021_v18 }
0x1a30   :  { %15131 = vmatmul.mubr.msk.f32.vlgmr.msra.gmra.mxu0 %vm299_vm10, %v17668_v19  ;;  %15150 = vmatprep.subr.mxu0 %v13044_v59 }
0x1a31   :  { %15133 = vmatprep.mubr.msk.f32.mxu0 %vm299_vm10, %v17678_v58  ;;  %15151 = vmatpush3.msra.mxu0 %v13044_v59 }
0x1a32   :  { %15152 = vmatprep.subr.mxu0 %v13043_v26 }
0x1a33   :  { %15153 = vmatpush3.msra.mxu0 %v13043_v26 }
0x1a34   :  { %15134 = vmatmul.mubr.msk.f32.gmra.mxu0 %vm299_vm10, %v17691_v6  ;;  %15154 = vmatprep.subr.mxu0 %v13042_v31 }
0x1a35   :  { %15155 = vmatpush3.msra.mxu0 %v13042_v31  ;;  %15158 = vmatprep.mubr.msk.f32.mxu0 %vm299_vm10, %v17661_v14 }
0x1a36   :  { %15156 = vmatprep.subr.mxu0 %v13041_v41 }
0x1a37   :  { %15157 = vmatpush3.msra.mxu0 %v13041_v41  ;;  %v13087_v41 = vld [vmem:[%s19295_s7 + $0x6] ss:$0 sm:$0xff] }
0x1a38   :  { %15159 = vmatmul.mubr.msk.f32.vlgmr.msra.gmra.mxu0 %vm299_vm10, %v17668_v19 }
0x1a39   :  { %15161 = vmatprep.mubr.msk.f32.mxu0 %vm299_vm10, %v17678_v58 }
0x1a3c   :  { %15162 = vmatmul.mubr.msk.f32.gmra.mxu0 %vm299_vm10, %v17691_v6 }
0x1ae8   :  { %v15118_v24 = vpop.f32.mrf.mxu0 }
0x1aea   :  { %v6470_v49 = vpop.f32.mrf.mxu0 }
0x1aec   :  { %v15121_v60 = vpop.f32.mrf.mxu0 }
0x1aee   :  { %v6480_v10 = vpop.f32.mrf.mxu0 }
0x1af0   :  { %v15132_v62 = vpop.f32.mrf.mxu0 }
0x1af1   :  { %v6576_v57 = vadd.f32 %v15132_v62, %v13026_v52 }
0x1af2   :  { %v6570_v40 = vpop.f32.mrf.mxu0 }
0x1af3   :  { %v6571_v54 = vadd.f32 %v13026_v52, %v6570_v40 }
0x1af4   :  { %v15135_v44 = vpop.f32.mrf.mxu0 }
0x1af5   :  { %15172 = vmatprep.mubr.msk.f32.mxu1 %vm1187_vm6, %v6571_v54  ;;  %v6586_v38 = vadd.f32 %v15135_v44, %v13026_v52 }
0x1af6   :  { %v6580_v32 = vpop.f32.mrf.mxu0  ;;  %15173 = vmatmul.mubr.msk.f32.vlgmr.msra.gmra.mxu1 %vm1187_vm6, %v6576_v57 }
0x1af7   :  { %v6581_v11 = vadd.f32 %v13026_v52, %v6580_v32  ;;  %15201 = vmatpush3.msra.mxu1 %v13020_v21 }
0x1af8   :  { %v15160_v25 = vpop.f32.mrf.mxu0  ;;  %15222 = vmatprep.subr.mxu1 %v13085_v12 }
0x1af9   :  { %15175 = vmatprep.mubr.msk.f32.mxu1 %vm1187_vm6, %v6581_v11  ;;  %v6772_v17 = vadd.f32 %v15160_v25, %v13046_v20 }
0x1afa   :  { %v6766_v37 = vpop.f32.mrf.mxu0  ;;  %15176 = vmatmul.mubr.msk.f32.gmra.mxu1 %vm1187_vm6, %v6586_v38 }
0x1afb   :  { %15202 = vmatprep.mubr.msk.f32.mxu1 %vm1187_vm6, %v6470_v49  ;;  %v6767_v27 = vadd.f32 %v13046_v20, %v6766_v37 }
0x1afc   :  { %v15163_v34 = vpop.f32.mrf.mxu0 }
0x1afd   :  { %v6782_v4 = vadd.f32 %v15163_v34, %v13046_v20 }
0x1afe   :  { %v6776_v56 = vpop.f32.mrf.mxu0  ;;  %15203 = vmatmul.mubr.msk.f32.vlgmr.msra.gmra.mxu1 %vm1187_vm6, %v15118_v24 }
0x1aff   :  { %v6777_v3 = vadd.f32 %v13046_v20, %v6776_v56  ;;  %15178 = vmatprep.subr.mxu0 %v6782_v4  ;;  %15205 = vmatprep.mubr.msk.f32.mxu1 %vm1187_vm6, %v6480_v10 }
0x1b00   :  { %15223 = vmatpush3.msra.mxu1 %v13085_v12  ;;  %15179 = vmatpush3.msra.mxu0 %v6782_v4 }
0x1b01   :  { %15224 = vmatprep.subr.mxu1 %v13084_v0  ;;  %15180 = vmatprep.subr.mxu0 %v6777_v3 }
0x1b02   :  { %15225 = vmatpush3.msra.mxu1 %v13084_v0  ;;  %15181 = vmatpush3.msra.mxu0 %v6777_v3 }
0x1b03   :  { %15206 = vmatmul.mubr.msk.f32.gmra.mxu1 %vm1187_vm6, %v15121_v60  ;;  %15226 = vmatprep.subr.mxu1 %v13083_v48 }
0x1b04   :  { %15182 = vmatprep.subr.mxu0 %v6772_v17  ;;  %15227 = vmatpush3.msra.mxu1 %v13083_v48 }
0x1b05   :  { %15230 = vmatprep.mubr.msk.f32.mxu1 %vm299_vm10, %v17661_v14  ;;  %15183 = vmatpush3.msra.mxu0 %v6772_v17 }
0x1b06   :  { %15228 = vmatprep.subr.mxu1 %v13082_v23  ;;  %15184 = vmatprep.subr.mxu0 %v6767_v27 }
0x1b07   :  { %15229 = vmatpush3.msra.mxu1 %v13082_v23  ;;  %15185 = vmatpush3.msra.mxu0 %v6767_v27  ;;  %v13063_v27 = vld [vmem:[%s19252_s11 + $0x28] sm:$0xff] }
0x1b08   :  { %15231 = vmatmul.mubr.msk.f32.vlgmr.msra.gmra.mxu1 %vm299_vm10, %v17668_v19  ;;  %15192 = vmatprep.subr.mxu0 %v13063_v27 }
0x1b09   :  { %15233 = vmatprep.mubr.msk.f32.mxu1 %vm299_vm10, %v17678_v58 }
0x1b0c   :  { %15234 = vmatmul.mubr.msk.f32.gmra.mxu1 %vm299_vm10, %v17691_v6 }
0x1bb6   :  { %v15174_v28 = vpop.f32.mrf.mxu1 }
0x1bb7   :  { %v6895_v7 = vmul.f32 0.35355338, %v15174_v28 }
0x1bb8   :  { %v6875_v42 = vpop.f32.mrf.mxu1 }
0x1bb9   :  { %v6894_v22 = vmul.f32 0.35355338, %v6875_v42  ;;  %v6899_v43 = vsel %vm16510_vm7, %v6895_v7, -1e+30 }
0x1bba   :  { %v15177_v63 = vpop.f32.mrf.mxu1  ;;  %v6905_v30 = vsel %vm299_vm10, %v6899_v43, -inf }
0x1bbb   :  { %v6897_v50 = vmul.f32 0.35355338, %v15177_v63  ;;  %6906 = vmax.xlane.f32.xlu0 %v6905_v30  ;;  %v6898_v33 = vsel %vm16515_vm8, %v6894_v22, -1e+30 }
0x1bbc   :  { %v6885_v46 = vpop.f32.mrf.mxu1  ;;  %v6902_v36 = vsel %vm299_vm10, %v6898_v33, -inf }
0x1bbd   :  { %v6896_v47 = vmul.f32 0.35355338, %v6885_v46  ;;  %6903 = vmax.xlane.f32.xlu1 %v6902_v36  ;;  %v6901_v29 = vsel %vm16530_vm11, %v6897_v50, -1e+30 }
0x1bbe   :  { %v17862_v61 = vpop.f32.mrf.mxu1  ;;  %v6911_v1 = vsel %vm299_vm10, %v6901_v29, -inf }
0x1bbf   :  { %6912 = vmax.xlane.f32.xlu0 %v6911_v1  ;;  %v6900_v9 = vsel %vm16526_vm9, %v6896_v47, -1e+30 }
0x1bc0   :  { %v17867_v55 = vpop.f32.mrf.mxu1  ;;  %v6908_v15 = vsel %vm299_vm10, %v6900_v9, -inf }
0x1bc1   :  { %6909 = vmax.xlane.f32.xlu1 %v6908_v15  ;;  %v13074_v15 = vld [vmem:[%s19290_s4 + $0xd0] sm:$0xff] }
0x1bc3   :  { %v17870_v18 = vpop.f32.mrf.mxu1 }
0x1bc5   :  { %v17872_v59 = vpop.f32.mrf.mxu1 }
0x1bc8   :  { %v15232_v26 = vpop.f32.mrf.mxu1 }
0x1bc9   :  { %v7422_v10 = vadd.f32 %v15232_v26, %v13087_v41 }
0x1bca   :  { %v7416_v31 = vpop.f32.mrf.mxu1 }
0x1bcb   :  { %v7417_v62 = vadd.f32 %v13087_v41, %v7416_v31  ;;  %v13073_v31 = vld [vmem:[%s19290_s4 + $0xc8] sm:$0xff] }
0x1bcc   :  { %v15235_v21 = vpop.f32.mrf.mxu1 }
0x1bcd   :  { %v7432_v24 = vadd.f32 %v15235_v21, %v13087_v41  ;;  %v13072_v21 = vld [vmem:[%s19290_s4 + $0xc0] sm:$0xff] }
0x1bce   :  { %v7426_v49 = vpop.f32.mrf.mxu1 }
0x1bcf   :  { %v7427_v60 = vadd.f32 %v13087_v41, %v7426_v49  ;;  %15250 = vmatprep.subr.msk.mxu1 %vm1187_vm6, %v7432_v24  ;;  %v13094_v49 = vld [vmem:[%s19292_s29 + $0xd0] sm:$0xff] }
0x1bd0   :  { %15251 = vmatpush3.xpose.msk.msra.mxu1 %vm1187_vm6, %v7432_v24  ;;  %v13095_v24 = vld [vmem:[%s19292_s29 + $0xd8] sm:$0xff] }
0x1bd1   :  { %15252 = vmatprep.subr.msk.mxu1 %vm1187_vm6, %v7427_v60 }
0x1bd4   :  { %15253 = vmatpush3.xpose.msk.msra.mxu1 %vm1187_vm6, %v7427_v60  ;;  %v13093_v60 = vld [vmem:[%s19292_s29 + $0xc8] sm:$0xff] }
0x1bd5   :  { %15254 = vmatprep.subr.msk.mxu1 %vm1187_vm6, %v7422_v10 }
0x1bd8   :  { %15255 = vmatpush3.xpose.msk.msra.mxu1 %vm1187_vm6, %v7422_v10  ;;  %v13092_v10 = vld [vmem:[%s19292_s29 + $0xc0] sm:$0xff] }
0x1bd9   :  { %15256 = vmatprep.subr.msk.mxu1 %vm1187_vm6, %v7417_v62 }
0x1bdc   :  { %15257 = vmatpush3.xpose.msk.msra.mxu1 %vm1187_vm6, %v7417_v62  ;;  %v13122_v62 = vld [vmem:[%s19290_s4 + $0xf8] sm:$0xff] }
0x1bdd   :  { %15286 = vmatprep.subr.mxu1 %v13122_v62 }
0x1c44   :  { %v6907_v52 = vpop.xlane.xlu0 %6906 }
0x1c45   :  { %v6915_v40 = vsub.f32 %v6899_v43, %v6907_v52 }
0x1c46   :  { %v6904_v54 = vpop.xlane.xlu1 %6903 }
0x1c47   :  { %v6920_v57 = vmul.f32 1.442695, %v6915_v40  ;;  %v6914_v44 = vsub.f32 %v6898_v33, %v6904_v54 }
0x1c48   :  { %v6913_v12 = vpop.xlane.xlu0 %6912 }
0x1c49   :  { %16029 = vpow2.f32 %v6920_v57  ;;  %v6918_v32 = vmul.f32 1.442695, %v6914_v44  ;;  %v6917_v11 = vsub.f32 %v6901_v29, %v6913_v12  ;;  %v13075_v29 = vld [vmem:[%s19290_s4 + $0xd8] sm:$0xff]  ;;  %v13077_v12 = vld [vmem:[%s19294_s0 + $0x6] ss:$0 sm:$0xff] }
0x1c4a   :  { %v6910_v38 = vpop.xlane.xlu1 %6909 }
0x1c4b   :  { %16031 = vpow2.f32 %v6918_v32  ;;  %v6924_v25 = vmul.f32 1.442695, %v6917_v11  ;;  %v6916_v37 = vsub.f32 %v6900_v9, %v6910_v38 }
0x1c4d   :  { %16033 = vpow2.f32 %v6924_v25  ;;  %v6922_v20 = vmul.f32 1.442695, %v6916_v37  ;;  %v13121_v37 = vld [vmem:[%s19290_s4 + $0xf0] sm:$0xff] }
0x1c4f   :  { %16035 = vpow2.f32 %v6922_v20 }
0x1c56   :  { %v16030_v34 = vpop.eup %16029 }
0x1c57   :  { %v6929_v4 = vsel %vm299_vm10, %v16030_v34, 0.0 }
0x1c58   :  { %v16032_v56 = vpop.eup %16031  ;;  %6930 = vadd.xlane.f32.xlu0 %v6929_v4  ;;  %v13120_v4 = vld [vmem:[%s19290_s4 + $0xe8] sm:$0xff] }
0x1c59   :  { %v6926_v0 = vsel %vm299_vm10, %v16032_v56, 0.0 }
0x1c5a   :  { %v16034_v3 = vpop.eup %16033  ;;  %6927 = vadd.xlane.f32.xlu1 %v6926_v0 }
0x1c5b   :  { %v6935_v48 = vsel %vm299_vm10, %v16034_v3, 0.0 }
0x1c5c   :  { %v16036_v17 = vpop.eup %16035  ;;  %6936 = vadd.xlane.f32.xlu0 %v6935_v48 }
0x1c5d   :  { %v6932_v23 = vsel %vm299_vm10, %v16036_v17, 0.0 }
0x1c5e   :  { %6933 = vadd.xlane.f32.xlu1 %v6932_v23  ;;  %v13097_v23 = vld [vmem:[%s19251_s10 + $0x6] ss:$0 sm:$0xff] }
0x1ce1   :  { %v6931_v28 = vpop.xlane.xlu0 %6930 }
0x1ce2   :  { %16037 = vrcp.f32 %v6931_v28 }
0x1ce3   :  { %v6928_v7 = vpop.xlane.xlu1 %6927 }
0x1ce4   :  { %16039 = vrcp.f32 %v6928_v7 }
0x1ce5   :  { %v6937_v42 = vpop.xlane.xlu0 %6936 }
0x1ce6   :  { %16041 = vrcp.f32 %v6937_v42  ;;  %v13141_v42 = vld [vmem:[%s19292_s29 + $0xf0] sm:$0xff] }
0x1ce7   :  { %v6934_v22 = vpop.xlane.xlu1 %6933 }
0x1ce8   :  { %16043 = vrcp.f32 %v6934_v22 }
0x1cef   :  { %v16038_v43 = vpop.eup %16037 }
0x1cf0   :  { %v6943_v50 = vmul.f32 %v16038_v43, %v16030_v34  ;;  %v13140_v43 = vld [vmem:[%s19292_s29 + $0xe8] sm:$0xff] }
0x1cf1   :  { %v16040_v63 = vpop.eup %16039 }
0x1cf2   :  { %v6942_v30 = vmul.f32 %v16040_v63, %v16032_v56 }
0x1cf3   :  { %v16042_v33 = vpop.eup %16041 }
0x1cf4   :  { %15186 = vmatprep.mubr.msk.f32.mxu0 %vm299_vm10, %v6942_v30  ;;  %v6945_v47 = vmul.f32 %v16042_v33, %v16034_v3  ;;  %v13119_v3 = vld [vmem:[%s19290_s4 + $0xe0] sm:$0xff] }
0x1cf5   :  { %v16044_v46 = vpop.eup %16043  ;;  %15187 = vmatmul.mubr.msk.f32.vlgmr.msra.gmra.mxu0 %vm299_vm10, %v6943_v50  ;;  %v13139_v30 = vld [vmem:[%s19292_s29 + $0xe0] sm:$0xff] }
0x1cf6   :  { %v6944_v36 = vmul.f32 %v16044_v46, %v16036_v17  ;;  %15193 = vmatpush3.msra.mxu0 %v13063_v27  ;;  %v13142_v17 = vld [vmem:[%s19292_s29 + $0xf8] sm:$0xff] }
0x1cf7   :  { %15208 = vmatprep.subr.mxu0 %v13075_v29 }
0x1cf8   :  { %15189 = vmatprep.mubr.msk.f32.mxu0 %vm299_vm10, %v6944_v36 }
0x1cf9   :  { %15190 = vmatmul.mubr.msk.f32.gmra.mxu0 %vm299_vm10, %v6945_v47 }
0x1db5   :  { %v15188_v1 = vpop.f32.mrf.mxu0 }
0x1db7   :  { %v7024_v9 = vpop.f32.mrf.mxu0 }
0x1db8   :  { %15194 = vmatprep.mubr.msk.f32.mxu0 %vm1187_vm6, %v7024_v9 }
0x1db9   :  { %v15191_v26 = vpop.f32.mrf.mxu0  ;;  %15195 = vmatmul.mubr.msk.f32.vlgmr.msra.gmra.mxu0 %vm1187_vm6, %v15188_v1 }
0x1dba   :  { %15209 = vmatpush3.msra.mxu0 %v13075_v29 }
0x1dbb   :  { %v7034_v41 = vpop.f32.mrf.mxu0  ;;  %15210 = vmatprep.subr.mxu0 %v13074_v15 }
0x1dbc   :  { %15197 = vmatprep.mubr.msk.f32.mxu0 %vm1187_vm6, %v7034_v41  ;;  %15211 = vmatpush3.msra.mxu0 %v13074_v15 }
0x1dbd   :  { %15198 = vmatmul.mubr.msk.f32.gmra.mxu0 %vm1187_vm6, %v15191_v26  ;;  %15212 = vmatprep.subr.mxu0 %v13073_v31 }
0x1dbe   :  { %15213 = vmatpush3.msra.mxu0 %v13073_v31  ;;  %15216 = vmatprep.mubr.msk.f32.mxu0 %vm299_vm10, %v17661_v14 }
0x1dbf   :  { %15214 = vmatprep.subr.mxu0 %v13072_v21 }
0x1dc0   :  { %15215 = vmatpush3.msra.mxu0 %v13072_v21  ;;  %v18007_v21 = vld [vmem:[%s19294_s0 + $0x7] ss:$0 sm:$0xff] }
0x1dc1   :  { %15217 = vmatmul.mubr.msk.f32.vlgmr.msra.gmra.mxu0 %vm299_vm10, %v17668_v19  ;;  %15236 = vmatprep.subr.mxu0 %v13095_v24 }
0x1dc2   :  { %15219 = vmatprep.mubr.msk.f32.mxu0 %vm299_vm10, %v17678_v58  ;;  %15237 = vmatpush3.msra.mxu0 %v13095_v24 }
0x1dc3   :  { %15238 = vmatprep.subr.mxu0 %v13094_v49 }
0x1dc4   :  { %15239 = vmatpush3.msra.mxu0 %v13094_v49 }
0x1dc5   :  { %15220 = vmatmul.mubr.msk.f32.gmra.mxu0 %vm299_vm10, %v17691_v6  ;;  %15240 = vmatprep.subr.mxu0 %v13093_v60 }
0x1dc6   :  { %15241 = vmatpush3.msra.mxu0 %v13093_v60  ;;  %15244 = vmatprep.mubr.msk.f32.mxu0 %vm299_vm10, %v17661_v14 }
0x1dc7   :  { %15242 = vmatprep.subr.mxu0 %v13092_v10 }
0x1dc8   :  { %15243 = vmatpush3.msra.mxu0 %v13092_v10 }
0x1dc9   :  { %15245 = vmatmul.mubr.msk.f32.vlgmr.msra.gmra.mxu0 %vm299_vm10, %v17668_v19 }
0x1dca   :  { %15247 = vmatprep.mubr.msk.f32.mxu0 %vm299_vm10, %v17678_v58 }
0x1dcd   :  { %15248 = vmatmul.mubr.msk.f32.gmra.mxu0 %vm299_vm10, %v17691_v6 }
0x1e79   :  { %v17943_v52 = vpop.f32.mrf.mxu0 }
0x1e7b   :  { %v17945_v40 = vpop.f32.mrf.mxu0 }
0x1e7d   :  { %v17947_v54 = vpop.f32.mrf.mxu0 }
0x1e7f   :  { %v17949_v57 = vpop.f32.mrf.mxu0 }
0x1e81   :  { %v15218_v44 = vpop.f32.mrf.mxu0 }
0x1e82   :  { %v7324_v38 = vadd.f32 %v15218_v44, %v13077_v12 }
0x1e83   :  { %v7318_v32 = vpop.f32.mrf.mxu0 }
0x1e84   :  { %v7319_v11 = vadd.f32 %v13077_v12, %v7318_v32 }
0x1e85   :  { %v15221_v25 = vpop.f32.mrf.mxu0 }
0x1e86   :  { %15258 = vmatprep.mubr.msk.f32.mxu1 %vm1187_vm6, %v7319_v11  ;;  %v7334_v56 = vadd.f32 %v15221_v25, %v13077_v12 }
0x1e87   :  { %v7328_v20 = vpop.f32.mrf.mxu0  ;;  %15259 = vmatmul.mubr.msk.f32.vlgmr.msra.gmra.mxu1 %vm1187_vm6, %v7324_v38 }
0x1e88   :  { %v7329_v34 = vadd.f32 %v13077_v12, %v7328_v20  ;;  %15287 = vmatpush3.msra.mxu1 %v13122_v62 }
0x1e89   :  { %v15246_v0 = vpop.f32.mrf.mxu0  ;;  %15288 = vmatprep.subr.mxu1 %v13121_v37 }
0x1e8a   :  { %15261 = vmatprep.mubr.msk.f32.mxu1 %vm1187_vm6, %v7329_v34  ;;  %15289 = vmatpush3.msra.mxu1 %v13121_v37  ;;  %v7520_v63 = vadd.f32 %v15246_v0, %v13097_v23 }
0x1e8b   :  { %v7514_v48 = vpop.f32.mrf.mxu0  ;;  %15262 = vmatmul.mubr.msk.f32.gmra.mxu1 %vm1187_vm6, %v7334_v56  ;;  %15290 = vmatprep.subr.mxu1 %v13120_v4 }
0x1e8c   :  { %15291 = vmatpush3.msra.mxu1 %v13120_v4  ;;  %15294 = vmatprep.mubr.msk.f32.mxu1 %vm299_vm10, %v17661_v14  ;;  %v7515_v50 = vadd.f32 %v13097_v23, %v7514_v48  ;;  %v13144_v4 = vld [vmem:[%s19251_s10 + $0x7] ss:$0 sm:$0xff] }
0x1e8d   :  { %v15249_v27 = vpop.f32.mrf.mxu0  ;;  %15292 = vmatprep.subr.mxu1 %v13119_v3 }
0x1e8e   :  { %v7530_v28 = vadd.f32 %v15249_v27, %v13097_v23  ;;  %15293 = vmatpush3.msra.mxu1 %v13119_v3 }
0x1e8f   :  { %v7524_v7 = vpop.f32.mrf.mxu0  ;;  %15295 = vmatmul.mubr.msk.f32.vlgmr.msra.gmra.mxu1 %vm299_vm10, %v17668_v19  ;;  %15314 = vmatprep.subr.mxu1 %v13142_v17 }
0x1e90   :  { %v7525_v22 = vadd.f32 %v13097_v23, %v7524_v7  ;;  %15264 = vmatprep.subr.mxu0 %v7530_v28  ;;  %15297 = vmatprep.mubr.msk.f32.mxu1 %vm299_vm10, %v17678_v58 }
0x1e91   :  { %15315 = vmatpush3.msra.mxu1 %v13142_v17  ;;  %15265 = vmatpush3.msra.mxu0 %v7530_v28 }
0x1e92   :  { %15316 = vmatprep.subr.mxu1 %v13141_v42  ;;  %15266 = vmatprep.subr.mxu0 %v7525_v22 }
0x1e93   :  { %15317 = vmatpush3.msra.mxu1 %v13141_v42  ;;  %15267 = vmatpush3.msra.mxu0 %v7525_v22 }
0x1e94   :  { %15298 = vmatmul.mubr.msk.f32.gmra.mxu1 %vm299_vm10, %v17691_v6  ;;  %15318 = vmatprep.subr.mxu1 %v13140_v43 }
0x1e95   :  { %15268 = vmatprep.subr.mxu0 %v7520_v63  ;;  %15319 = vmatpush3.msra.mxu1 %v13140_v43 }
0x1e96   :  { %15322 = vmatprep.mubr.msk.f32.mxu1 %vm299_vm10, %v17661_v14  ;;  %15269 = vmatpush3.msra.mxu0 %v7520_v63 }
0x1e97   :  { %15320 = vmatprep.subr.mxu1 %v13139_v30  ;;  %15270 = vmatprep.subr.mxu0 %v7515_v50 }
0x1e98   :  { %15321 = vmatpush3.msra.mxu1 %v13139_v30  ;;  %15271 = vmatpush3.msra.mxu0 %v7515_v50 }
0x1e99   :  { %15323 = vmatmul.mubr.msk.f32.vlgmr.msra.gmra.mxu1 %vm299_vm10, %v17668_v19 }
0x1e9a   :  { %15325 = vmatprep.mubr.msk.f32.mxu1 %vm299_vm10, %v17678_v58 }
0x1e9d   :  { %15326 = vmatmul.mubr.msk.f32.gmra.mxu1 %vm299_vm10, %v17691_v6 }
0x1f47   :  { %v15260_v33 = vpop.f32.mrf.mxu1 }
0x1f48   :  { %v7643_v46 = vmul.f32 0.35355338, %v15260_v33 }
0x1f49   :  { %v7623_v36 = vpop.f32.mrf.mxu1 }
0x1f4a   :  { %v7642_v47 = vmul.f32 0.35355338, %v7623_v36  ;;  %v7647_v29 = vsel %vm16510_vm7, %v7643_v46, -1e+30 }
0x1f4b   :  { %v15263_v1 = vpop.f32.mrf.mxu1  ;;  %v7653_v9 = vsel %vm299_vm10, %v7647_v29, -inf }
0x1f4c   :  { %v7645_v15 = vmul.f32 0.35355338, %v15263_v1  ;;  %7654 = vmax.xlane.f32.xlu0 %v7653_v9  ;;  %v7646_v26 = vsel %vm16515_vm8, %v7642_v47, -1e+30 }
0x1f4d   :  { %v7633_v31 = vpop.f32.mrf.mxu1  ;;  %v7650_v41 = vsel %vm299_vm10, %v7646_v26, -inf }
0x1f4e   :  { %v7644_v24 = vmul.f32 0.35355338, %v7633_v31  ;;  %7651 = vmax.xlane.f32.xlu1 %v7650_v41  ;;  %v7649_v49 = vsel %vm16530_vm11, %v7645_v15, -1e+30 }
0x1f4f   :  { %v15296_v60 = vpop.f32.mrf.mxu1  ;;  %v7659_v10 = vsel %vm299_vm10, %v7649_v49, -inf }
0x1f50   :  { %v18013_v62 = vadd.f32 %v15296_v60, %v18007_v21  ;;  %7660 = vmax.xlane.f32.xlu0 %v7659_v10  ;;  %v7648_v44 = vsel %vm16526_vm9, %v7644_v24, -1e+30  ;;  %v13114_v24 = vld [vmem:[%s19252_s11 + $0x30] sm:$0xff] }
0x1f51   :  { %v18017_v12 = vpop.f32.mrf.mxu1  ;;  %v7656_v32 = vsel %vm299_vm10, %v7648_v44, -inf  ;;  %15278 = vmatprep.subr.mxu0 %v13114_v24 }
0x1f52   :  { %7657 = vmax.xlane.f32.xlu1 %v7656_v32 }
0x1f54   :  { %v15299_v11 = vpop.f32.mrf.mxu1 }
0x1f55   :  { %v18021_v38 = vadd.f32 %v15299_v11, %v18007_v21 }
0x1f56   :  { %v7983_v25 = vpop.f32.mrf.mxu1 }
0x1f57   :  { %v18024_v37 = vadd.f32 %v18007_v21, %v7983_v25 }
0x1f59   :  { %v15324_v20 = vpop.f32.mrf.mxu1 }
0x1f5a   :  { %v8175_v17 = vadd.f32 %v15324_v20, %v13144_v4 }
0x1f5b   :  { %v8169_v34 = vpop.f32.mrf.mxu1 }
0x1f5c   :  { %v8170_v23 = vadd.f32 %v13144_v4, %v8169_v34 }
0x1f5d   :  { %v15327_v56 = vpop.f32.mrf.mxu1 }
0x1f5e   :  { %v8185_v0 = vadd.f32 %v15327_v56, %v13144_v4 }
0x1f5f   :  { %v8179_v3 = vpop.f32.mrf.mxu1 }
0x1f60   :  { %v8180_v48 = vadd.f32 %v13144_v4, %v8179_v3  ;;  %15342 = vmatprep.subr.mxu1 %v8185_v0  ;;  %v13132_v3 = vld [vmem:[%s19291_s5 + $0xf8] sm:$0xff] }
0x1f61   :  { %15343 = vmatpush3.msra.mxu1 %v8185_v0 }
0x1f62   :  { %15344 = vmatprep.subr.mxu1 %v8180_v48 }
0x1f63   :  { %15345 = vmatpush3.msra.mxu1 %v8180_v48 }
0x1f64   :  { %15346 = vmatprep.subr.mxu1 %v8175_v17 }
0x1f65   :  { %15347 = vmatpush3.msra.mxu1 %v8175_v17 }
0x1f66   :  { %15348 = vmatprep.subr.mxu1 %v8170_v23 }
0x1f67   :  { %15349 = vmatpush3.msra.mxu1 %v8170_v23  ;;  %v13131_v23 = vld [vmem:[%s19291_s5 + $0xf0] sm:$0xff] }
0x1fd5   :  { %v7655_v27 = vpop.xlane.xlu0 %7654 }
0x1fd6   :  { %v7663_v28 = vsub.f32 %v7647_v29, %v7655_v27 }
0x1fd7   :  { %v7652_v7 = vpop.xlane.xlu1 %7651 }
0x1fd8   :  { %v7668_v42 = vmul.f32 1.442695, %v7663_v28  ;;  %v7662_v22 = vsub.f32 %v7646_v26, %v7652_v7  ;;  %v13130_v28 = vld [vmem:[%s19291_s5 + $0xe8] sm:$0xff] }
0x1fd9   :  { %v7661_v43 = vpop.xlane.xlu0 %7660 }
0x1fda   :  { %16045 = vpow2.f32 %v7668_v42  ;;  %v7666_v63 = vmul.f32 1.442695, %v7662_v22  ;;  %v7665_v30 = vsub.f32 %v7649_v49, %v7661_v43  ;;  %v13129_v42 = vld [vmem:[%s19291_s5 + $0xe0] sm:$0xff]  ;;  %v7974_v22 = vadd.f32 %v18007_v21, %v18017_v12 }
0x1fdb   :  { %v7658_v50 = vpop.xlane.xlu1 %7657  ;;  %v7226_v43 = vadd.f32 %v17862_v61, %v17943_v52  ;;  %v7231_v12 = vadd.f32 %v17872_v59, %v17949_v57 }
0x1fdc   :  { %16047 = vpow2.f32 %v7666_v63  ;;  %v7672_v33 = vmul.f32 1.442695, %v7665_v30  ;;  %v7664_v46 = vsub.f32 %v7648_v44, %v7658_v50  ;;  %v7221_v30 = vadd.f32 %v17867_v55, %v17945_v40  ;;  %v13134_v55 = vld [vmem:[%s19295_s7 + $0x7] ss:$0 sm:$0xff] }
0x1fde   :  { %16049 = vpow2.f32 %v7672_v33  ;;  %v7670_v36 = vmul.f32 1.442695, %v7664_v46  ;;  %v7236_v46 = vadd.f32 %v17870_v18, %v17947_v54 }
0x1fe0   :  { %16051 = vpow2.f32 %v7670_v36 }
0x1fe7   :  { %v16046_v47 = vpop.eup %16045 }
0x1fe8   :  { %v7677_v1 = vsel %vm299_vm10, %v16046_v47, 0.0 }
0x1fe9   :  { %v16048_v9 = vpop.eup %16047  ;;  %7678 = vadd.xlane.f32.xlu0 %v7677_v1 }
0x1fea   :  { %v7674_v29 = vsel %vm299_vm10, %v16048_v9, 0.0 }
0x1feb   :  { %v16050_v15 = vpop.eup %16049  ;;  %7675 = vadd.xlane.f32.xlu1 %v7674_v29 }
0x1fec   :  { %v7683_v26 = vsel %vm299_vm10, %v16050_v15, 0.0 }
0x1fed   :  { %v16052_v31 = vpop.eup %16051  ;;  %7684 = vadd.xlane.f32.xlu0 %v7683_v26 }
0x1fee   :  { %v7680_v41 = vsel %vm299_vm10, %v16052_v31, 0.0 }
0x1fef   :  { %7681 = vadd.xlane.f32.xlu1 %v7680_v41 }
0x2072   :  { %v7679_v49 = vpop.xlane.xlu0 %7678 }
0x2073   :  { %16053 = vrcp.f32 %v7679_v49 }
0x2074   :  { %v7676_v60 = vpop.xlane.xlu1 %7675 }
0x2075   :  { %16055 = vrcp.f32 %v7676_v60 }
0x2076   :  { %v7685_v10 = vpop.xlane.xlu0 %7684 }
0x2077   :  { %16057 = vrcp.f32 %v7685_v10 }
0x2078   :  { %v7682_v44 = vpop.xlane.xlu1 %7681 }
0x2079   :  { %16059 = vrcp.f32 %v7682_v44 }
0x2080   :  { %v16054_v32 = vpop.eup %16053 }
0x2081   :  { %v7691_v20 = vmul.f32 %v16054_v32, %v16046_v47 }
0x2082   :  { %v16056_v11 = vpop.eup %16055 }
0x2083   :  { %v7690_v25 = vmul.f32 %v16056_v11, %v16048_v9 }
0x2084   :  { %v16058_v34 = vpop.eup %16057 }
0x2085   :  { %15272 = vmatprep.mubr.msk.f32.mxu0 %vm299_vm10, %v7690_v25  ;;  %v7693_v0 = vmul.f32 %v16058_v34, %v16050_v15 }
0x2086   :  { %v16060_v4 = vpop.eup %16059  ;;  %15273 = vmatmul.mubr.msk.f32.vlgmr.msra.gmra.mxu0 %vm299_vm10, %v7691_v20 }
0x2087   :  { %v7692_v56 = vmul.f32 %v16060_v4, %v16052_v31  ;;  %15279 = vmatpush3.msra.mxu0 %v13114_v24 }
0x2088   :  { %15300 = vmatprep.subr.mxu0 %v13132_v3 }
0x2089   :  { %15275 = vmatprep.mubr.msk.f32.mxu0 %vm299_vm10, %v7692_v56 }
0x208a   :  { %15276 = vmatmul.mubr.msk.f32.gmra.mxu0 %vm299_vm10, %v7693_v0 }
0x2146   :  { %v15274_v48 = vpop.f32.mrf.mxu0 }
0x2148   :  { %v7772_v17 = vpop.f32.mrf.mxu0 }
0x2149   :  { %15280 = vmatprep.mubr.msk.f32.mxu0 %vm1187_vm6, %v7772_v17 }
0x214a   :  { %v15277_v27 = vpop.f32.mrf.mxu0  ;;  %15281 = vmatmul.mubr.msk.f32.vlgmr.msra.gmra.mxu0 %vm1187_vm6, %v15274_v48 }
0x214b   :  { %15301 = vmatpush3.msra.mxu0 %v13132_v3 }
0x214c   :  { %v7782_v7 = vpop.f32.mrf.mxu0  ;;  %15302 = vmatprep.subr.mxu0 %v13131_v23 }
0x214d   :  { %15283 = vmatprep.mubr.msk.f32.mxu0 %vm1187_vm6, %v7782_v7  ;;  %15303 = vmatpush3.msra.mxu0 %v13131_v23 }
0x214e   :  { %15284 = vmatmul.mubr.msk.f32.gmra.mxu0 %vm1187_vm6, %v15277_v27  ;;  %15304 = vmatprep.subr.mxu0 %v13130_v28 }
0x214f   :  { %15305 = vmatpush3.msra.mxu0 %v13130_v28  ;;  %15308 = vmatprep.mubr.msk.f32.mxu0 %vm299_vm10, %v17661_v14 }
0x2150   :  { %15306 = vmatprep.subr.mxu0 %v13129_v42 }
0x2151   :  { %15307 = vmatpush3.msra.mxu0 %v13129_v42 }
0x2152   :  { %15309 = vmatmul.mubr.msk.f32.vlgmr.msra.gmra.mxu0 %vm299_vm10, %v17668_v19 }
0x2153   :  { %15311 = vmatprep.mubr.msk.f32.mxu0 %vm299_vm10, %v17678_v58 }
0x2156   :  { %15312 = vmatmul.mubr.msk.f32.gmra.mxu0 %vm299_vm10, %v17691_v6 }
0x2157   :  { %15336 = vmatprep.mubr.msk.f32.mxu0 %vm1187_vm6, %v7974_v22 }
0x220a   :  { %v15282_v63 = vpop.f32.mrf.mxu0 }
0x220b   :  { %v18071_v50 = vadd.f32 %v15282_v63, %v7226_v43 }
0x220c   :  { %v7871_v33 = vpop.f32.mrf.mxu0 }
0x220d   :  { %v18075_v36 = vadd.f32 %v7871_v33, %v7221_v30  ;;  %v13161_v33 = vld [vmem:[%s19252_s11 + $0x38] sm:$0xff]  ;;  %s16118_s11 = smov [#allocation2]  }
0x220e   :  { %v15285_v21 = vpop.f32.mrf.mxu0  ;;  %15356 = vmatprep.subr.mxu1 %v13161_v33  ;;  %s12348_s0 = sshll.u32 %s16118_s11, 4  ;;  %s12349_s0 = int_to_ptr.vmem [resolvable:$true] %s12348_s0 }
0x220f   :  { %v18079_v47 = vadd.f32 %v15285_v21, %v7236_v46  ;;  %p16098_p1 = scmp.lt.s32.totalorder %s12349_s0, %s12349_s0 }
0x2210   :  { %v7881_v1 = vpop.f32.mrf.mxu0 }
0x2211   :  { %v18081_v61 = vadd.f32 %v7881_v1, %v7231_v12 }
0x2212   :  { %v15310_v52 = vpop.f32.mrf.mxu0 }
0x2213   :  { %v8077_v59 = vadd.f32 %v15310_v52, %v13134_v55 }
0x2214   :  { %v8071_v9 = vpop.f32.mrf.mxu0 }
0x2215   :  { %v8072_v57 = vadd.f32 %v13134_v55, %v8071_v9 }
0x2216   :  { %v15313_v40 = vpop.f32.mrf.mxu0 }
0x2217   :  { %v8087_v29 = vadd.f32 %v15313_v40, %v13134_v55 }
0x2218   :  { %v8081_v18 = vpop.f32.mrf.mxu0 }
0x2219   :  { %v8082_v54 = vadd.f32 %v13134_v55, %v8081_v18  ;;  %15328 = vmatprep.subr.msk.mxu0 %vm1187_vm6, %v8087_v29 }
0x221a   :  { %15329 = vmatpush3.xpose.msk.msra.mxu0 %vm1187_vm6, %v8087_v29 }
0x221b   :  { %15330 = vmatprep.subr.msk.mxu0 %vm1187_vm6, %v8082_v54 }
0x221e   :  { %15331 = vmatpush3.xpose.msk.msra.mxu0 %vm1187_vm6, %v8082_v54 }
0x221f   :  { %15332 = vmatprep.subr.msk.mxu0 %vm1187_vm6, %v8077_v59 }
0x2222   :  { %15333 = vmatpush3.xpose.msk.msra.mxu0 %vm1187_vm6, %v8077_v59 }
0x2223   :  { %15334 = vmatprep.subr.msk.mxu0 %vm1187_vm6, %v8072_v57 }
0x2226   :  { %15335 = vmatpush3.xpose.msk.msra.mxu0 %vm1187_vm6, %v8072_v57 }
0x2229   :  { %15337 = vmatmul.mubr.msk.f32.vlgmr.msra.gmra.mxu0 %vm1187_vm6, %v18013_v62 }
0x222a   :  { %15339 = vmatprep.mubr.msk.f32.mxu0 %vm1187_vm6, %v18024_v37 }
0x222d   :  { %15340 = vmatmul.mubr.msk.f32.gmra.mxu0 %vm1187_vm6, %v18021_v38 }
0x222e   :  { %8753 = vmatprep.mubr.bf16.mxu0 %v16115_v2 }
0x22e9   :  { %v15338_v15 = vpop.f32.mrf.mxu0 }
0x22ea   :  { %v8298_v26 = vmul.f32 0.35355338, %v15338_v15 }
0x22eb   :  { %v8278_v31 = vpop.f32.mrf.mxu0 }
0x22ec   :  { %v8297_v41 = vmul.f32 0.35355338, %v8278_v31  ;;  %v8302_v24 = vsel %vm16510_vm7, %v8298_v26, -1e+30 }
0x22ed   :  { %v15341_v49 = vpop.f32.mrf.mxu0  ;;  %v8308_v60 = vsel %vm299_vm10, %v8302_v24, -inf }
0x22ee   :  { %v8300_v10 = vmul.f32 0.35355338, %v15341_v49  ;;  %8309 = vmax.xlane.f32.xlu0 %v8308_v60  ;;  %v8301_v62 = vsel %vm16515_vm8, %v8297_v41, -1e+30 }
0x22ef   :  { %v8288_v37 = vpop.f32.mrf.mxu0  ;;  %v8305_v38 = vsel %vm299_vm10, %v8301_v62, -inf }
0x22f0   :  { %v8299_v44 = vmul.f32 0.35355338, %v8288_v37  ;;  %8306 = vmax.xlane.f32.xlu1 %v8305_v38  ;;  %v8304_v32 = vsel %vm16530_vm11, %v8300_v10, -1e+30 }
0x22f1   :  { %v8314_v11 = vsel %vm299_vm10, %v8304_v32, -inf }
0x22f2   :  { %8315 = vmax.xlane.f32.xlu0 %v8314_v11  ;;  %v8303_v35 = vsel %vm16526_vm9, %v8299_v44, -1e+30 }
0x22f3   :  { %v8311_v25 = vsel %vm299_vm10, %v8303_v35, -inf }
0x22f4   :  { %8312 = vmax.xlane.f32.xlu1 %v8311_v25 }
0x2377   :  { %v8310_v20 = vpop.xlane.xlu0 %8309 }
0x2378   :  { %v8318_v39 = vsub.f32 %v8302_v24, %v8310_v20  ;;  %v13167_v24 = vld [vmem:[%s19253_s12 + $0x1] ss:$0 sm:$0xff]  ;;  %s16093_s12 = scalar_lea.vmem %s12349_s0, 32 }
0x2379   :  { %v8307_v34 = vpop.xlane.xlu1 %8306  ;;  %p16094_p0 = scmp.ne.s32.totalorder %s12349_s0, %s16093_s12  ;;  %p16099_p2 = scmp.lt.s32.totalorder %s16093_s12, %s16093_s12 }
0x237a   :  { %v8323_v4 = vmul.f32 1.442695, %v8318_v39  ;;  %v8317_v56 = vsub.f32 %v8301_v62, %v8307_v34 }
0x237b   :  { %v8316_v0 = vpop.xlane.xlu0 %8315  ;;  %p16100_p3 = por %p16099_p2, %p16098_p1 }
0x237c   :  { %16061 = vpow2.f32 %v8323_v4  ;;  %v8321_v3 = vmul.f32 1.442695, %v8317_v56  ;;  %v8320_v48 = vsub.f32 %v8304_v32, %v8316_v0 }
0x237d   :  { %v8313_v51 = vpop.xlane.xlu1 %8312  ;;  %p16101_p4 = pnand %p16100_p3, %p16094_p0 }
0x237e   :  { %16063 = vpow2.f32 %v8321_v3  ;;  %v8327_v17 = vmul.f32 1.442695, %v8320_v48  ;;  %v8319_v23 = vsub.f32 %v8303_v35, %v8313_v51 }
0x2380   :  { %16065 = vpow2.f32 %v8327_v17  ;;  %v8325_v27 = vmul.f32 1.442695, %v8319_v23 }
0x2382   :  { %16067 = vpow2.f32 %v8325_v27 }
0x2389   :  { %v16062_v45 = vpop.eup %16061 }
0x238a   :  { %v8332_v28 = vsel %vm299_vm10, %v16062_v45, 0.0 }
0x238b   :  { %v16064_v7 = vpop.eup %16063  ;;  %8333 = vadd.xlane.f32.xlu0 %v8332_v28 }
0x238c   :  { %v8329_v42 = vsel %vm299_vm10, %v16064_v7, 0.0 }
0x238d   :  { %v16066_v22 = vpop.eup %16065  ;;  %8330 = vadd.xlane.f32.xlu1 %v8329_v42 }
0x238e   :  { %v8338_v43 = vsel %vm299_vm10, %v16066_v22, 0.0 }
0x238f   :  { %v16068_v63 = vpop.eup %16067  ;;  %8339 = vadd.xlane.f32.xlu0 %v8338_v43 }
0x2390   :  { %v8335_v30 = vsel %vm299_vm10, %v16068_v63, 0.0 }
0x2391   :  { %8336 = vadd.xlane.f32.xlu1 %v8335_v30 }
0x2414   :  { %v8334_v46 = vpop.xlane.xlu0 %8333 }
0x2415   :  { %16069 = vrcp.f32 %v8334_v46  ;;  %v15762_v46 = vld [vmem:[%s19258_s17 + $0x12c] ss:$16 sps:$4 sm:$0xff]  }
0x2416   :  { %v8331_v21 = vpop.xlane.xlu1 %8330 }
0x2417   :  { %16071 = vrcp.f32 %v8331_v21  ;;  %v15757_v21 = vld [vmem:[%s19258_s17 + $0x120] ss:$16 sps:$4 sm:$0xff]  }
0x2418   :  { %v8340_v12 = vpop.xlane.xlu0 %8339 }
0x2419   :  { %16073 = vrcp.f32 %v8340_v12  ;;  %v15760_v12 = vld [vmem:[%s19258_s17 + $0x128] ss:$16 sps:$4 sm:$0xff]  }
0x241a   :  { %v8337_v1 = vpop.xlane.xlu1 %8336 }
0x241b   :  { %16075 = vrcp.f32 %v8337_v1  ;;  %v15765_v1 = vld [vmem:[%s19258_s17 + $0x104] ss:$16 sps:$4 sm:$0xff]  }
0x2422   :  { %v16070_v52 = vpop.eup %16069 }
0x2423   :  { %v8346_v40 = vmul.f32 %v16070_v52, %v16062_v45  ;;  %v15768_v52 = vld [vmem:[%s19258_s17 + $0x10c] ss:$16 sps:$4 sm:$0xff]  }
0x2424   :  { %v16072_v9 = vpop.eup %16071 }
0x2425   :  { %v8345_v55 = vmul.f32 %v16072_v9, %v16064_v7  ;;  %v15763_v9 = vld [vmem:[%s19258_s17 + $0x100] ss:$16 sps:$4 sm:$0xff]  }
0x2426   :  { %v16074_v29 = vpop.eup %16073 }
0x2427   :  { %15350 = vmatprep.mubr.msk.f32.mxu1 %vm299_vm10, %v8345_v55  ;;  %v8348_v59 = vmul.f32 %v16074_v29, %v16066_v22  ;;  %v15766_v55 = vld [vmem:[%s19258_s17 + $0x108] ss:$16 sps:$4 sm:$0xff]   ;;  %v15774_v29 = vld [vmem:[%s19258_s17 + $0x16c] ss:$16 sps:$4 sm:$0xff]  }
0x2428   :  { %v16076_v18 = vpop.eup %16075  ;;  %15351 = vmatmul.mubr.msk.f32.vlgmr.msra.gmra.mxu1 %vm299_vm10, %v8346_v40  ;;  %v15771_v40 = vld [vmem:[%s19258_s17 + $0x164] ss:$16 sps:$4 sm:$0xff]  }
0x2429   :  { %v8347_v54 = vmul.f32 %v16076_v18, %v16068_v63  ;;  %15357 = vmatpush3.msra.mxu1 %v13161_v33  ;;  %v15759_v33 = vld [vmem:[%s19258_s17 + $0x124] ss:$16 sps:$4 sm:$0xff]  }
0x242a   :  { %8733 = vmatprep.subr.bf16.mxu0 %v15759_v33  ;;  %8786 = vmatprep.subr.bf16.mxu1 %v15762_v46  ;;  %v15791_v33 = vld [vmem:[%s19260_s19 + $0x528] sm:$0xff]  }
0x242b   :  { %15353 = vmatprep.mubr.msk.f32.mxu1 %vm299_vm10, %v8347_v54  ;;  %8734 = vmatpush1.bf16.msra.mxu0 %v15757_v21  ;;  %v15792_v46 = vld [vmem:[%s19260_s19 + $0x5a8] sm:$0xff]   ;;  %v15793_v21 = vld [vmem:[%s19260_s19 + $0x560] sm:$0xff]  }
0x242c   :  { %15354 = vmatmul.mubr.msk.f32.gmra.mxu1 %vm299_vm10, %v8348_v59  ;;  %8735 = vmatprep.subr.bf16.mxu0 %v15765_v1  ;;  %v15795_v1 = vld [vmem:[%s19260_s19 + $0x520] sm:$0xff]  }
0x242f   :  { %8736 = vmatpush1.bf16.msra.mxu0 %v15763_v9  ;;  %v15797_v9 = vld [vmem:[%s19260_s19 + $0x558] sm:$0xff]  }
0x2430   :  { %9000 = vmatprep.subr.bf16.mxu0 %v15771_v40  ;;  %v15799_v40 = vld [vmem:[%s19260_s19 + $0x518] sm:$0xff]  }
0x24e8   :  { %v15352_v57 = vpop.f32.mrf.mxu1 }
0x24ea   :  { %v8427_v15 = vpop.f32.mrf.mxu1 }
0x24eb   :  { %15358 = vmatprep.mubr.msk.f32.mxu1 %vm1187_vm6, %v8427_v15 }
0x24ec   :  { %v15355_v26 = vpop.f32.mrf.mxu1  ;;  %15359 = vmatmul.mubr.msk.f32.vlgmr.msra.gmra.mxu1 %vm1187_vm6, %v15352_v57 }
0x24ed   :  { %8787 = vmatpush1.bf16.msra.mxu1 %v15760_v12  ;;  %v15794_v12 = vld [vmem:[%s19260_s19 + $0x5e0] sm:$0xff]  }
0x24ee   :  { %v8437_v31 = vpop.f32.mrf.mxu1  ;;  %8788 = vmatprep.subr.bf16.mxu1 %v15768_v52  ;;  %v15796_v52 = vld [vmem:[%s19260_s19 + $0x5a0] sm:$0xff]  }
0x24ef   :  { %15361 = vmatprep.mubr.msk.f32.mxu1 %vm1187_vm6, %v8437_v31 }
0x24f0   :  { %15362 = vmatmul.mubr.msk.f32.gmra.mxu1 %vm1187_vm6, %v15355_v26 }
0x24f1   :  { %8806 = vmatprep.mubr.bf16.mxu1 %v16115_v2  ;;  %8789 = vmatpush1.bf16.msra.mxu1 %v15766_v55  ;;  %v15798_v55 = vld [vmem:[%s19260_s19 + $0x5d8] sm:$0xff]  }
0x24f2   :  { %9053 = vmatprep.subr.bf16.mxu1 %v15774_v29  ;;  %v15800_v29 = vld [vmem:[%s19260_s19 + $0x598] sm:$0xff]  }
0x25ac   :  { %v15360_v41 = vpop.f32.mrf.mxu1 }
0x25ad   :  { %v8546_v49 = vadd.f32 %v15360_v41, %v18071_v50 }
0x25ae   :  { %v8526_v60 = vpop.f32.mrf.mxu1 }
0x25af   :  { %v8558_v10 = vadd.f32 %v13167_v24, %v8546_v49  ;;  %v8545_v62 = vadd.f32 %v8526_v60, %v18075_v36 }
0x25b0   :  { %v15363_v37 = vpop.f32.mrf.mxu1 }
0x25b1   :  { %v8557_v38 = vadd.f32 %v13167_v24, %v8545_v62  ;;  %v8548_v44 = vadd.f32 %v15363_v37, %v18079_v47  ;;  %v8562_v32 = vadd.f32 %v8558_v10, %v17668_v19  ;;  %v13170_v37 = vld [vmem:[%s19254_s13 + $0x1] ss:$0 sm:$0xff] }
0x25b2   :  { %v8536_v11 = vpop.f32.mrf.mxu1 }
0x25b3   :  { %v8560_v35 = vadd.f32 %v13167_v24, %v8548_v44  ;;  %v8547_v25 = vadd.f32 %v8536_v11, %v18081_v61  ;;  %v8572_v20 = vsel %vm299_vm10, %v8562_v32, 0.0  ;;  %v8561_v39 = vadd.f32 %v8557_v38, %v17661_v14 }
0x25b4   :  { %8573 = vadd.xlane.f32.xlu0 %v8572_v20 }
0x25b5   :  { %v8559_v50 = vadd.f32 %v13167_v24, %v8547_v25  ;;  %v8569_v34 = vsel %vm299_vm10, %v8561_v39, 0.0  ;;  %v8564_v36 = vadd.f32 %v8560_v35, %v17691_v6  ;;  %v13171_v25 = vld [vmem:[%s19255_s14 + $0x1] ss:$0 sm:$0xff] }
0x25b6   :  { %8570 = vadd.xlane.f32.xlu1 %v8569_v34 }
0x25b7   :  { %v8578_v4 = vsel %vm299_vm10, %v8564_v36, 0.0  ;;  %v8563_v47 = vadd.f32 %v8559_v50, %v17678_v58 }
0x25b8   :  { %8579 = vadd.xlane.f32.xlu0 %v8578_v4 }
0x25b9   :  { %v8575_v19 = vsel %vm299_vm10, %v8563_v47, 0.0 }
0x25ba   :  { %8576 = vadd.xlane.f32.xlu1 %v8575_v19  ;;  %v15772_v19 = vld [vmem:[%s19258_s17 + $0x168] ss:$16 sps:$4 sm:$0xff]  }
0x263d   :  { %v8574_v61 = vpop.xlane.xlu0 %8573 }
0x263e   :  { %v8582_v56 = vmul.f32 0.03125, %v8574_v61 }
0x263f   :  { %v8571_v0 = vpop.xlane.xlu1 %8570 }
0x2640   :  { %v8586_v3 = vsub.f32 %v8562_v32, %v8582_v56  ;;  %v8581_v14 = vmul.f32 0.03125, %v8571_v0  ;;  %v15777_v0 = vld [vmem:[%s19258_s17 + $0x144] ss:$16 sps:$4 sm:$0xff]  }
0x2641   :  { %v8580_v48 = vpop.xlane.xlu0 %8579 }
0x2642   :  { %v8585_v51 = vsub.f32 %v8561_v39, %v8581_v14  ;;  %v8584_v17 = vmul.f32 0.03125, %v8580_v48  ;;  %v8590_v23 = vmul.f32 %v8586_v3, %v8586_v3  ;;  %v15775_v48 = vld [vmem:[%s19258_s17 + $0x140] ss:$16 sps:$4 sm:$0xff]  }
0x2643   :  { %v8577_v27 = vpop.xlane.xlu1 %8576 }
0x2644   :  { %v8588_v6 = vsub.f32 %v8564_v36, %v8584_v17  ;;  %v8583_v45 = vmul.f32 0.03125, %v8577_v27  ;;  %v8596_v28 = vsel %vm299_vm10, %v8590_v23, 0.0  ;;  %v8589_v7 = vmul.f32 %v8585_v51, %v8585_v51  ;;  %v15781_v23 = vld [vmem:[%s19260_s19 + $0x578] sm:$0xff]  }
0x2645   :  { %8597 = vadd.xlane.f32.xlu0 %v8596_v28  ;;  %v15782_v27 = vld [vmem:[%s19260_s19 + $0x5f8] sm:$0xff]  }
0x2646   :  { %v8587_v58 = vsub.f32 %v8563_v47, %v8583_v45  ;;  %v8593_v42 = vsel %vm299_vm10, %v8589_v7, 0.0  ;;  %v8592_v22 = vmul.f32 %v8588_v6, %v8588_v6  ;;  %v15769_v47 = vld [vmem:[%s19258_s17 + $0x160] ss:$16 sps:$4 sm:$0xff]   ;;  %v15783_v28 = vld [vmem:[%s19260_s19 + $0x538] sm:$0xff]  }
0x2647   :  { %8594 = vadd.xlane.f32.xlu1 %v8593_v42  ;;  %v15784_v7 = vld [vmem:[%s19260_s19 + $0x5b8] sm:$0xff]   ;;  %v15786_v42 = vld [vmem:[%s19260_s19 + $0x5f0] sm:$0xff]  }
0x2648   :  { %v8602_v43 = vsel %vm299_vm10, %v8592_v22, 0.0  ;;  %v8591_v63 = vmul.f32 %v8587_v58, %v8587_v58  ;;  %v15787_v22 = vld [vmem:[%s19260_s19 + $0x530] sm:$0xff]  }
0x2649   :  { %8603 = vadd.xlane.f32.xlu0 %v8602_v43  ;;  %v15788_v43 = vld [vmem:[%s19260_s19 + $0x5b0] sm:$0xff]  }
0x264a   :  { %v8599_v30 = vsel %vm299_vm10, %v8591_v63, 0.0  ;;  %v15789_v63 = vld [vmem:[%s19260_s19 + $0x568] sm:$0xff]  }
0x264b   :  { %8600 = vadd.xlane.f32.xlu1 %v8599_v30  ;;  %v15790_v30 = vld [vmem:[%s19260_s19 + $0x5e8] sm:$0xff]  }
0x26ce   :  { %v8598_v18 = vpop.xlane.xlu0 %8597 }
0x26cf   :  { %v8606_v54 = vmul.f32 0.03125, %v8598_v18  ;;  %v15801_v18 = vld [vmem:[%s19260_s19 + $0x550] sm:$0xff]  }
0x26d0   :  { %v8595_v59 = vpop.xlane.xlu1 %8594 }
0x26d1   :  { %v8610_v57 = vadd.f32 1e-05, %v8606_v54  ;;  %v8605_v15 = vmul.f32 0.03125, %v8595_v59  ;;  %v15802_v54 = vld [vmem:[%s19260_s19 + $0x5d0] sm:$0xff]  }
0x26d2   :  { %v8604_v26 = vpop.xlane.xlu0 %8603  ;;  %v15803_v59 = vld [vmem:[%s19260_s19 + $0x510] sm:$0xff]  }
0x26d3   :  { %16077 = vrsqrt.f32 %v8610_v57  ;;  %v8609_v31 = vadd.f32 1e-05, %v8605_v15  ;;  %v8608_v41 = vmul.f32 0.03125, %v8604_v26  ;;  %v15804_v57 = vld [vmem:[%s19260_s19 + $0x590] sm:$0xff]   ;;  %v15805_v15 = vld [vmem:[%s19260_s19 + $0x548] sm:$0xff]  }
0x26d4   :  { %v8601_v24 = vpop.xlane.xlu1 %8600  ;;  %v15806_v26 = vld [vmem:[%s19260_s19 + $0x5c8] sm:$0xff]  }
0x26d5   :  { %16079 = vrsqrt.f32 %v8609_v31  ;;  %v8612_v49 = vadd.f32 1e-05, %v8608_v41  ;;  %v8607_v60 = vmul.f32 0.03125, %v8601_v24  ;;  %v15807_v31 = vld [vmem:[%s19260_s19 + $0x508] sm:$0xff]   ;;  %v15809_v24 = vld [vmem:[%s19260_s19 + $0x540] sm:$0xff]  }
0x26d6   :  { %v15808_v41 = vld [vmem:[%s19260_s19 + $0x588] sm:$0xff]  }
0x26d7   :  { %16081 = vrsqrt.f32 %v8612_v49  ;;  %v8611_v10 = vadd.f32 1e-05, %v8607_v60  ;;  %v15810_v49 = vld [vmem:[%s19260_s19 + $0x5c0] sm:$0xff]  }
0x26d8   :  { %v15811_v60 = vld [vmem:[%s19260_s19 + $0x500] sm:$0xff]  }
0x26d9   :  { %16083 = vrsqrt.f32 %v8611_v10  ;;  %v15812_v10 = vld [vmem:[%s19260_s19 + $0x580] sm:$0xff]  }
0x26e0   :  { %v16078_v62 = vpop.eup %16077 }
0x26e1   :  { %v8618_v38 = vmul.f32 %v16078_v62, %v8586_v3  ;;  %v15780_v3 = vld [vmem:[%s19258_s17 + $0x14c] ss:$16 sps:$4 sm:$0xff]  }
0x26e2   :  { %v16080_v44 = vpop.eup %16079  ;;  %v15813_v62 = vld [vmem:[%s19260_s19 + $0x478] sm:$0xff]  }
0x26e3   :  { %v8628_v32 = vmul.f32 %v13170_v37, %v8618_v38  ;;  %v8617_v11 = vmul.f32 %v16080_v44, %v8585_v51  ;;  %v15778_v51 = vld [vmem:[%s19258_s17 + $0x148] ss:$16 sps:$4 sm:$0xff]  }
0x26e4   :  { %v16082_v35 = vpop.eup %16081 }
0x26e5   :  { %v8627_v20 = vmul.f32 %v13170_v37, %v8617_v11  ;;  %v18184_v50 = vadd.f32 %v13171_v25, %v8628_v32  ;;  %v8620_v36 = vmul.f32 %v16082_v35, %v8588_v6 }
0x26e6   :  { %v16084_v39 = vpop.eup %16083 }
0x26e7   :  { %v18186_v34 = vadd.f32 %v13171_v25, %v8627_v20  ;;  %v8619_v4 = vmul.f32 %v16084_v39, %v8587_v58  ;;  %v8630_v14 = vmul.f32 %v13170_v37, %v8620_v36  ;;  %v15785_v58 = vld [vmem:[%s19260_s19 + $0x570] sm:$0xff]  }
0x26e9   :  { %v18196_v61 = vpack.c.bf16 %v18184_v50, %v18186_v34  ;;  %v8629_v56 = vmul.f32 %v13170_v37, %v8619_v4  ;;  %v18224_v6 = vadd.f32 %v13171_v25, %v8630_v14  ;;  %v15814_v37 = vld [vmem:[%s19260_s19 + $0x4f8] sm:$0xff]  }
0x26eb   :  { %13189 = vmatmul.mubr.msk.bf16.vlgmr.msra.gmra.mxu0 %vm299_vm10, %v18196_v61  ;;  %13191 = vmatmul.mubr.msk.bf16.vlgmr.msra.gmra.mxu1 %vm299_vm10, %v18196_v61  ;;  %v18214_v17 = vadd.f32 %v13171_v25, %v8629_v56 }
0x26ec   :  { %9001 = vmatpush1.bf16.msra.mxu0 %v15769_v47  ;;  %9054 = vmatpush1.bf16.msra.mxu1 %v15772_v19 }
0x26ed   :  { %8763 = vmatprep.mubr.bf16.mxu0 %v16115_v2  ;;  %8816 = vmatprep.mubr.bf16.mxu1 %v16115_v2  ;;  %v18228_v45 = vpack.c.bf16 %v18224_v6, %v18214_v17 }
0x26ee   :  { %9002 = vmatprep.subr.bf16.mxu0 %v15777_v0  ;;  %9055 = vmatprep.subr.bf16.mxu1 %v15780_v3 }
0x26f0   :  { %9003 = vmatpush1.bf16.msra.mxu0 %v15775_v48  ;;  %9056 = vmatpush1.bf16.msra.mxu1 %v15778_v51  ;;  %v13265_v48 = vld [vmem:[%s19259_s18 + $0x14] sm:$0xf] }
0x26f1   :  { %14349 = vmatprep.subr.bf16.mxu0 %v15781_v23  ;;  %14377 = vmatprep.subr.bf16.mxu1 %v15782_v27  ;;  %v8935_v27 = vrot.slane %v13265_v48, %v17146_v5 }
0x26f3   :  { %13190 = vmatmul.mubr.msk.bf16.gmra.mxu0 %vm299_vm10, %v18228_v45  ;;  %13192 = vmatmul.mubr.msk.bf16.gmra.mxu1 %vm299_vm10, %v18228_v45 }
0x26f4   :  { %9020 = vmatprep.mubr.bf16.mxu0 %v16115_v2  ;;  %9073 = vmatprep.mubr.bf16.mxu1 %v16115_v2 }
0x26fb   :  { %13274 = vmatmul.mubr.msk.bf16.vlgmr.msra.gmra.mxu0 %vm299_vm10, %v18196_v61  ;;  %13276 = vmatmul.mubr.msk.bf16.vlgmr.msra.gmra.mxu1 %vm299_vm10, %v18196_v61 }
0x26fc   :  { %9030 = vmatprep.mubr.bf16.mxu0 %v16115_v2  ;;  %9083 = vmatprep.mubr.bf16.mxu1 %v16115_v2 }
0x26fd   :  { %14350 = vmatpush3.bf16.msra.mxu0 %v15783_v28  ;;  %14378 = vmatpush3.bf16.msra.mxu1 %v15784_v7  ;;  %v8943_v28 = vrot.slane %v13265_v48, %v17149_v13  ;;  %v8931_v7 = vrot.slane %v13265_v48, %v17155_v8 }
0x26fe   :  { %14351 = vmatprep.subr.bf16.mxu0 %v15785_v58  ;;  %14379 = vmatprep.subr.bf16.mxu1 %v15786_v42  ;;  %v8939_v58 = vrot.slane %v13265_v48, %v17158_v53 }
0x2701   :  { %14352 = vmatpush3.bf16.msra.mxu0 %v15787_v22  ;;  %14380 = vmatpush3.bf16.msra.mxu1 %v15788_v43 }
0x2702   :  { %14353 = vmatprep.subr.bf16.mxu0 %v15789_v63  ;;  %14381 = vmatprep.subr.bf16.mxu1 %v15790_v30 }
0x2703   :  { %13275 = vmatmul.mubr.msk.bf16.gmra.mxu0 %vm299_vm10, %v18228_v45  ;;  %13277 = vmatmul.mubr.msk.bf16.gmra.mxu1 %vm299_vm10, %v18228_v45 }
0x2705   :  { %14354 = vmatpush3.bf16.msra.mxu0 %v15791_v33  ;;  %14382 = vmatpush3.bf16.msra.mxu1 %v15792_v46 }
0x2706   :  { %14355 = vmatprep.subr.bf16.mxu0 %v15793_v21  ;;  %14383 = vmatprep.subr.bf16.mxu1 %v15794_v12 }
0x2709   :  { %14356 = vmatpush3.bf16.msra.mxu0 %v15795_v1  ;;  %14384 = vmatpush3.bf16.msra.mxu1 %v15796_v52 }
0x270a   :  { %14357 = vmatprep.subr.bf16.mxu0 %v15797_v9  ;;  %14385 = vmatprep.subr.bf16.mxu1 %v15798_v55 }
0x270d   :  { %14358 = vmatpush3.bf16.msra.mxu0 %v15799_v40  ;;  %14386 = vmatpush3.bf16.msra.mxu1 %v15800_v29 }
0x270e   :  { %14359 = vmatprep.subr.bf16.mxu0 %v15801_v18  ;;  %14387 = vmatprep.subr.bf16.mxu1 %v15802_v54 }
0x2711   :  { %14360 = vmatpush3.bf16.msra.mxu0 %v15803_v59  ;;  %14388 = vmatpush3.bf16.msra.mxu1 %v15804_v57  ;;  %v18380_v57 = vld [vmem:[%s19259_s18 + $0x10] sm:$0xf] }
0x2712   :  { %14361 = vmatprep.subr.bf16.mxu0 %v15805_v15  ;;  %14389 = vmatprep.subr.bf16.mxu1 %v15806_v26 }
0x2715   :  { %14362 = vmatpush3.bf16.msra.mxu0 %v15807_v31  ;;  %14390 = vmatpush3.bf16.msra.mxu1 %v15808_v41 }
0x2716   :  { %14363 = vmatprep.subr.bf16.mxu0 %v15809_v24  ;;  %14391 = vmatprep.subr.bf16.mxu1 %v15810_v49  ;;  %v18384_v24 = vrot.slane %v18380_v57, %v17146_v5 }
0x2719   :  { %14364 = vmatpush3.bf16.msra.mxu0 %v15811_v60  ;;  %14392 = vmatpush3.bf16.msra.mxu1 %v15812_v10 }
0x271a   :  { %14405 = vmatprep.subr.bf16.mxu0 %v15813_v62  ;;  %14433 = vmatprep.subr.bf16.mxu1 %v15814_v37  ;;  %v18388_v37 = vrot.slane %v18380_v57, %v17149_v13 }
0x27ab   :  { %v18342_v38 = vpop.f32.mrf.mxu0  ;;  %v18344_v44 = vpop.f32.mrf.mxu1 }
0x27ad   :  { %v18346_v32 = vpop.f32.mrf.mxu0  ;;  %v18348_v11 = vpop.f32.mrf.mxu1 }
0x27af   :  { %v18350_v35 = vpop.f32.mrf.mxu0  ;;  %v18352_v25 = vpop.f32.mrf.mxu1 }
0x27b1   :  { %v8761_v20 = vpop.f32.mrf.mxu0  ;;  %v8814_v39 = vpop.f32.mrf.mxu1 }
0x27b3   :  { %v18354_v36 = vpop.f32.mrf.mxu0  ;;  %v18356_v4 = vpop.f32.mrf.mxu1 }
0x27b5   :  { %v18358_v47 = vpop.f32.mrf.mxu0  ;;  %v18360_v19 = vpop.f32.mrf.mxu1 }
0x27b7   :  { %v18362_v56 = vpop.f32.mrf.mxu0  ;;  %v18364_v0 = vpop.f32.mrf.mxu1 }
0x27b9   :  { %v18366_v3 = vpop.f32.mrf.mxu0  ;;  %v18368_v14 = vpop.f32.mrf.mxu1 }
0x27bb   :  { %v9022_v51 = vpop.f32.mrf.mxu0  ;;  %v9075_v23 = vpop.f32.mrf.mxu1 }
0x27bc   :  { %v9023_v12 = vadd.f32 %v9022_v51, %v8931_v7  ;;  %v9076_v1 = vadd.f32 %v9075_v23, %v8939_v58  ;;  %v15815_v23 = vld [vmem:[%s19260_s19 + $0x438] sm:$0xff]  }
0x27bd   :  { %v9024_v42 = vpop.f32.mrf.mxu0  ;;  %v9077_v22 = vpop.f32.mrf.mxu1 }
0x27be   :  { %v9025_v30 = vadd.f32 %v9024_v42, %v8935_v27  ;;  %v9078_v33 = vadd.f32 %v9077_v22, %v8943_v28  ;;  %v9094_v49 = vmax.f32 %v9023_v12, 0.0  ;;  %v9096_v60 = vmax.f32 %v9076_v1, 0.0  ;;  %v15816_v42 = vld [vmem:[%s19260_s19 + $0x4b8] sm:$0xff]   ;;  %v15818_v12 = vld [vmem:[%s19260_s19 + $0x4f0] sm:$0xff]  }
0x27bf   :  { %v9026_v43 = vpop.f32.mrf.mxu0  ;;  %v9079_v63 = vpop.f32.mrf.mxu1  ;;  %v8762_v22 = vadd.f32 %v8761_v20, %v18384_v24  ;;  %v8815_v20 = vadd.f32 %v8814_v39, %v18388_v37  ;;  %v8758_v39 = vadd.f32 %v18346_v32, %v18384_v24 }
0x27c0   :  { %v9027_v46 = vadd.f32 %v9026_v43, %v8931_v7  ;;  %v9080_v21 = vadd.f32 %v9079_v63, %v8939_v58  ;;  %v9095_v15 = vmax.f32 %v9025_v30, 0.0  ;;  %v9097_v26 = vmax.f32 %v9078_v33, 0.0 }
0x27c1   :  { %v9028_v52 = vpop.f32.mrf.mxu0  ;;  %v9081_v9 = vpop.f32.mrf.mxu1  ;;  %v8832_v32 = vmax.f32 %v8762_v22, 0.0  ;;  %v15825_v22 = vld [vmem:[%s19260_s19 + $0x460] sm:$0xff]  }
0x27c2   :  { %v9029_v55 = vadd.f32 %v9028_v52, %v8935_v27  ;;  %v9082_v40 = vadd.f32 %v9081_v9, %v8943_v28  ;;  %v9098_v29 = vmax.f32 %v9027_v46, 0.0  ;;  %v9100_v18 = vmax.f32 %v9080_v21, 0.0  ;;  %v15817_v21 = vld [vmem:[%s19260_s19 + $0x470] sm:$0xff]  }
0x27c3   :  { %v9032_v54 = vpop.f32.mrf.mxu0  ;;  %v9085_v59 = vpop.f32.mrf.mxu1 }
0x27c4   :  { %v9099_v31 = vmax.f32 %v9029_v55, 0.0  ;;  %v9101_v41 = vmax.f32 %v9082_v40, 0.0  ;;  %v9110_v43 = vpack.c.bf16 %v9098_v29, %v9094_v49  ;;  %v9112_v63 = vpack.c.bf16 %v9100_v18, %v9096_v60 }
0x27c5   :  { %v9034_v10 = vpop.f32.mrf.mxu0  ;;  %v9087_v62 = vpop.f32.mrf.mxu1  ;;  %v9033_v55 = vadd.f32 %v9032_v54, %v8931_v7  ;;  %v9086_v40 = vadd.f32 %v9085_v59, %v8939_v58 }
0x27c6   :  { %v9111_v48 = vpack.c.bf16 %v9099_v31, %v9095_v15  ;;  %v9113_v51 = vpack.c.bf16 %v9101_v41, %v9097_v26  ;;  %v9035_v30 = vadd.f32 %v9034_v10, %v8935_v27  ;;  %v9088_v1 = vadd.f32 %v9087_v62, %v8943_v28  ;;  %v15819_v31 = vld [vmem:[%s19260_s19 + $0x430] sm:$0xff]  }
0x27c7   :  { %v9036_v33 = vpop.f32.mrf.mxu0  ;;  %v9089_v46 = vpop.f32.mrf.mxu1  ;;  %v15820_v41 = vld [vmem:[%s19260_s19 + $0x4b0] sm:$0xff]   ;;  %v8834_v62 = vmax.f32 %v8815_v20, 0.0  ;;  %v15829_v20 = vld [vmem:[%s19260_s19 + $0x458] sm:$0xff]  }
0x27c8   :  { %v9037_v52 = vadd.f32 %v9036_v33, %v8931_v7  ;;  %v9090_v9 = vadd.f32 %v9089_v46, %v8939_v58  ;;  %9407 = vmatprep.mubr.bf16.mxu0 %v9111_v48  ;;  %9456 = vmatprep.mubr.bf16.mxu1 %v9113_v51  ;;  %v8811_v7 = vadd.f32 %v18348_v11, %v18388_v37  ;;  %v9103_v59 = vmax.f32 %v9035_v30, 0.0 }
0x27c9   :  { %v9038_v29 = vpop.f32.mrf.mxu0  ;;  %v9091_v18 = vpop.f32.mrf.mxu1  ;;  %9408 = vmatmul.mubr.bf16.vlgmr.msra.gmra.mxu0 %v9110_v43  ;;  %9457 = vmatmul.mubr.bf16.vlgmr.msra.gmra.mxu1 %v9112_v63  ;;  %v9105_v49 = vmax.f32 %v9088_v1, 0.0  ;;  %v9102_v48 = vmax.f32 %v9033_v55, 0.0  ;;  %v9104_v11 = vmax.f32 %v9086_v40, 0.0  ;;  %v15824_v43 = vld [vmem:[%s19260_s19 + $0x4a8] sm:$0xff]   ;;  %v8828_v63 = vmax.f32 %v8758_v39, 0.0  ;;  %v15830_v55 = vld [vmem:[%s19260_s19 + $0x4d8] sm:$0xff]  }
0x27ca   :  { %v9039_v15 = vadd.f32 %v9038_v29, %v8935_v27  ;;  %v9092_v26 = vadd.f32 %v9091_v18, %v8943_v28  ;;  %14406 = vmatpush3.bf16.msra.mxu0 %v15815_v23  ;;  %14434 = vmatpush3.bf16.msra.mxu1 %v15816_v42  ;;  %v9106_v58 = vmax.f32 %v9037_v52, 0.0  ;;  %v9108_v54 = vmax.f32 %v9090_v9, 0.0  ;;  %v15821_v27 = vld [vmem:[%s19260_s19 + $0x468] sm:$0xff]   ;;  %v15827_v52 = vld [vmem:[%s19260_s19 + $0x420] sm:$0xff]   ;;  %v15831_v40 = vld [vmem:[%s19260_s19 + $0x418] sm:$0xff]  }
0x27cb   :  { %14407 = vmatprep.subr.bf16.mxu0 %v15817_v21  ;;  %14435 = vmatprep.subr.bf16.mxu1 %v15818_v12  ;;  %v15822_v28 = vld [vmem:[%s19260_s19 + $0x4e8] sm:$0xff]   ;;  %v8830_v30 = vmax.f32 %v8811_v7, 0.0  ;;  %v15826_v21 = vld [vmem:[%s19260_s19 + $0x4e0] sm:$0xff]   ;;  %v8844_v12 = vpack.c.bf16 %v8832_v32, %v8828_v63  ;;  %v15832_v29 = vld [vmem:[%s19260_s19 + $0x498] sm:$0xff]   ;;  %v8658_v7 = vrot.slane %v18380_v57, %v17155_v8 }
0x27cc   :  { %v9107_v60 = vmax.f32 %v9039_v15, 0.0  ;;  %v9109_v10 = vmax.f32 %v9092_v26, 0.0  ;;  %v15823_v42 = vld [vmem:[%s19260_s19 + $0x428] sm:$0xff]   ;;  %v9114_v33 = vpack.c.bf16 %v9106_v58, %v9102_v48  ;;  %v9116_v46 = vpack.c.bf16 %v9108_v54, %v9104_v11  ;;  %v15828_v9 = vld [vmem:[%s19260_s19 + $0x4a0] sm:$0xff]   ;;  %v15833_v18 = vld [vmem:[%s19260_s19 + $0x450] sm:$0xff]  }
0x27cd   :  { %v8846_v1 = vpack.c.bf16 %v8834_v62, %v8830_v30  ;;  %v15834_v15 = vld [vmem:[%s19260_s19 + $0x4d0] sm:$0xff]   ;;  %v15838_v39 = vld [vmem:[%s19260_s19 + $0x4c8] sm:$0xff]   ;;  %v8666_v58 = vrot.slane %v18380_v57, %v17158_v53  ;;  %v8760_v54 = vadd.f32 %v18350_v35, %v8658_v7  ;;  %v15841_v57 = vld [vmem:[%s19260_s19 + $0x440] sm:$0xff]   ;;  %v8768_v62 = vadd.f32 %v18358_v47, %v18384_v24 }
0x27ce   :  { %v9115_v51 = vpack.c.bf16 %v9107_v60, %v9103_v59  ;;  %v9117_v23 = vpack.c.bf16 %v9109_v10, %v9105_v49  ;;  %14408 = vmatpush3.bf16.msra.mxu0 %v15819_v31  ;;  %14436 = vmatpush3.bf16.msra.mxu1 %v15820_v41  ;;  %v15835_v26 = vld [vmem:[%s19260_s19 + $0x410] sm:$0xff]   ;;  %v15837_v41 = vld [vmem:[%s19260_s19 + $0x448] sm:$0xff]   ;;  %v15842_v35 = vld [vmem:[%s19260_s19 + $0x4c0] sm:$0xff]   ;;  %v8756_v49 = vadd.f32 %v18342_v38, %v8658_v7 }
0x27cf   :  { %14409 = vmatprep.subr.bf16.mxu0 %v15821_v27  ;;  %14437 = vmatprep.subr.bf16.mxu1 %v15822_v28  ;;  %v15836_v31 = vld [vmem:[%s19260_s19 + $0x490] sm:$0xff]   ;;  %v15839_v27 = vld [vmem:[%s19260_s19 + $0x408] sm:$0xff]   ;;  %v8813_v59 = vadd.f32 %v18352_v25, %v8666_v58  ;;  %v8772_v60 = vadd.f32 %v18366_v3, %v18384_v24  ;;  %v8825_v10 = vadd.f32 %v18368_v14, %v18388_v37  ;;  %v8831_v32 = vmax.f32 %v8760_v54, 0.0  ;;  %v15843_v38 = vld [vmem:[%s19260_s19 + $0x400] sm:$0xff]  }
0x27d0   :  { %9415 = vmatprep.mubr.bf16.mxu0 %v9115_v51  ;;  %9464 = vmatprep.mubr.bf16.mxu1 %v9117_v23  ;;  %v15840_v28 = vld [vmem:[%s19260_s19 + $0x488] sm:$0xff]   ;;  %v8809_v25 = vadd.f32 %v18344_v44, %v8666_v58  ;;  %v8821_v48 = vadd.f32 %v18360_v19, %v18388_v37  ;;  %v15844_v3 = vld [vmem:[%s19260_s19 + $0x480] sm:$0xff]   ;;  %v8827_v19 = vmax.f32 %v8756_v49, 0.0  ;;  %v8836_v23 = vmax.f32 %v8768_v62, 0.0  ;;  %v15876_v62 = vld [vmem:[%s19260_s19 + $0x698] sm:$0xff]  }
0x27d1   :  { %9416 = vmatmul.mubr.bf16.gmra.mxu0 %v9114_v33  ;;  %9465 = vmatmul.mubr.bf16.gmra.mxu1 %v9116_v46  ;;  %v8833_v14 = vmax.f32 %v8813_v59, 0.0  ;;  %v15847_v44 = vld [vmem:[%s19258_s17 + $0x1a4] ss:$16 sps:$4 sm:$0xff]   ;;  %v15850_v47 = vld [vmem:[%s19258_s17 + $0x1ac] ss:$16 sps:$4 sm:$0xff]   ;;  %v8840_v24 = vmax.f32 %v8772_v60, 0.0  ;;  %v8770_v63 = vadd.f32 %v18362_v56, %v8658_v7  ;;  %v8823_v30 = vadd.f32 %v18364_v0, %v8666_v58 }
0x27d2   :  { %14410 = vmatpush3.bf16.msra.mxu0 %v15823_v42  ;;  %14438 = vmatpush3.bf16.msra.mxu1 %v15824_v43  ;;  %v8842_v37 = vmax.f32 %v8825_v10, 0.0  ;;  %v8829_v11 = vmax.f32 %v8809_v25, 0.0  ;;  %v8843_v51 = vpack.c.bf16 %v8831_v32, %v8827_v19  ;;  %v8838_v42 = vmax.f32 %v8821_v48, 0.0  ;;  %v15845_v33 = vld [vmem:[%s19258_s17 + $0x1a0] ss:$16 sps:$4 sm:$0xff]   ;;  %v15865_v54 = vld [vmem:[%s19260_s19 + $0x668] sm:$0xff]  }
0x27d3   :  { %9697 = vmatprep.mubr.bf16.mxu0 %v8844_v12  ;;  %9746 = vmatprep.mubr.bf16.mxu1 %v8846_v1  ;;  %v15848_v46 = vld [vmem:[%s19258_s17 + $0x1a8] ss:$16 sps:$4 sm:$0xff]   ;;  %v15853_v12 = vld [vmem:[%s19258_s17 + $0x184] ss:$16 sps:$4 sm:$0xff]   ;;  %v15856_v56 = vld [vmem:[%s19258_s17 + $0x18c] ss:$16 sps:$4 sm:$0xff]   ;;  %v8766_v0 = vadd.f32 %v18354_v36, %v8658_v7  ;;  %v8819_v1 = vadd.f32 %v18356_v4, %v8666_v58 }
0x27d4   :  { %14411 = vmatprep.subr.bf16.mxu0 %v15825_v22  ;;  %14439 = vmatprep.subr.bf16.mxu1 %v15826_v21  ;;  %v8845_v43 = vpack.c.bf16 %v8833_v14, %v8829_v11  ;;  %v8848_v22 = vpack.c.bf16 %v8840_v24, %v8836_v23  ;;  %v8850_v21 = vpack.c.bf16 %v8842_v37, %v8838_v42  ;;  %v15863_v7 = vld [vmem:[%s19260_s19 + $0x630] sm:$0xff]   ;;  %v15868_v59 = vld [vmem:[%s19260_s19 + $0x6a8] sm:$0xff]   ;;  %v15871_v49 = vld [vmem:[%s19260_s19 + $0x620] sm:$0xff]  }
0x27d5   :  { %v8835_v36 = vmax.f32 %v8766_v0, 0.0  ;;  %v8837_v4 = vmax.f32 %v8819_v1, 0.0  ;;  %v15864_v58 = vld [vmem:[%s19260_s19 + $0x6b0] sm:$0xff]   ;;  %v15872_v60 = vld [vmem:[%s19260_s19 + $0x6a0] sm:$0xff]   ;;  %v15873_v10 = vld [vmem:[%s19260_s19 + $0x658] sm:$0xff]  }
0x27d6   :  { %14412 = vmatpush3.bf16.msra.mxu0 %v15827_v52  ;;  %14440 = vmatpush3.bf16.msra.mxu1 %v15828_v9  ;;  %v8839_v52 = vmax.f32 %v8770_v63, 0.0  ;;  %v8841_v9 = vmax.f32 %v8823_v30, 0.0  ;;  %v15874_v25 = vld [vmem:[%s19260_s19 + $0x6d8] sm:$0xff]   ;;  %v15877_v48 = vld [vmem:[%s19260_s19 + $0x650] sm:$0xff]   ;;  %v15883_v19 = vld [vmem:[%s19260_s19 + $0x608] sm:$0xff]  }
0x27d7   :  { %14413 = vmatprep.subr.bf16.mxu0 %v15829_v20  ;;  %14441 = vmatprep.subr.bf16.mxu1 %v15830_v55  ;;  %v15851_v20 = vld [vmem:[%s19258_s17 + $0x180] ss:$16 sps:$4 sm:$0xff]   ;;  %v15854_v55 = vld [vmem:[%s19258_s17 + $0x188] ss:$16 sps:$4 sm:$0xff]   ;;  %v15891_v42 = vld [vmem:[%s19258_s17 + $0x1e4] ss:$16 sps:$4 sm:$0xff]  }
0x27d8   :  { %v15875_v32 = vld [vmem:[%s19260_s19 + $0x618] sm:$0xff]   ;;  %v15880_v14 = vld [vmem:[%s19260_s19 + $0x690] sm:$0xff]   ;;  %v15884_v24 = vld [vmem:[%s19260_s19 + $0x688] sm:$0xff]  }
0x27d9   :  { %v15885_v37 = vld [vmem:[%s19260_s19 + $0x640] sm:$0xff]  }
0x27da   :  { %14414 = vmatpush3.bf16.msra.mxu0 %v15831_v40  ;;  %14442 = vmatpush3.bf16.msra.mxu1 %v15832_v29  ;;  %v8847_v40 = vpack.c.bf16 %v8839_v52, %v8835_v36  ;;  %v8849_v29 = vpack.c.bf16 %v8841_v9, %v8837_v4  ;;  %v15886_v11 = vld [vmem:[%s19260_s19 + $0x6c0] sm:$0xff]  }
0x27db   :  { %14415 = vmatprep.subr.bf16.mxu0 %v15833_v18  ;;  %14443 = vmatprep.subr.bf16.mxu1 %v15834_v15  ;;  %v15857_v18 = vld [vmem:[%s19260_s19 + $0x678] sm:$0xff]   ;;  %v15888_v23 = vld [vmem:[%s19260_s19 + $0x680] sm:$0xff]  }
0x27dc   :  { %v15858_v15 = vld [vmem:[%s19260_s19 + $0x6f8] sm:$0xff]  }
0x27de   :  { %14416 = vmatpush3.bf16.msra.mxu0 %v15835_v26  ;;  %14444 = vmatpush3.bf16.msra.mxu1 %v15836_v31  ;;  %v15859_v26 = vld [vmem:[%s19260_s19 + $0x638] sm:$0xff]  }
0x27df   :  { %14417 = vmatprep.subr.bf16.mxu0 %v15837_v41  ;;  %14445 = vmatprep.subr.bf16.mxu1 %v15838_v39  ;;  %v15860_v31 = vld [vmem:[%s19260_s19 + $0x6b8] sm:$0xff]   ;;  %v15861_v41 = vld [vmem:[%s19260_s19 + $0x670] sm:$0xff]  }
0x27e0   :  { %v15862_v39 = vld [vmem:[%s19260_s19 + $0x6f0] sm:$0xff]  }
0x27e2   :  { %14418 = vmatpush3.bf16.msra.mxu0 %v15839_v27  ;;  %14446 = vmatpush3.bf16.msra.mxu1 %v15840_v28  ;;  %v15866_v27 = vld [vmem:[%s19260_s19 + $0x6e8] sm:$0xff]  }
0x27e3   :  { %14419 = vmatprep.subr.bf16.mxu0 %v15841_v57  ;;  %14447 = vmatprep.subr.bf16.mxu1 %v15842_v35  ;;  %v15867_v28 = vld [vmem:[%s19260_s19 + $0x628] sm:$0xff]   ;;  %v15869_v57 = vld [vmem:[%s19260_s19 + $0x660] sm:$0xff]  }
0x27e4   :  { %v15870_v35 = vld [vmem:[%s19260_s19 + $0x6e0] sm:$0xff]  }
0x27e6   :  { %14420 = vmatpush3.bf16.msra.mxu0 %v15843_v38  ;;  %14448 = vmatpush3.bf16.msra.mxu1 %v15844_v3  ;;  %v15878_v38 = vld [vmem:[%s19260_s19 + $0x6d0] sm:$0xff]  }
0x27e7   :  { %9847 = vmatprep.subr.bf16.mxu0 %v15847_v44  ;;  %9900 = vmatprep.subr.bf16.mxu1 %v15850_v47  ;;  %v15879_v3 = vld [vmem:[%s19260_s19 + $0x610] sm:$0xff]   ;;  %v15881_v44 = vld [vmem:[%s19260_s19 + $0x648] sm:$0xff]  }
0x27e8   :  { %v15882_v47 = vld [vmem:[%s19260_s19 + $0x6c8] sm:$0xff]  }
0x27e9   :  { %9698 = vmatmul.mubr.bf16.vlgmr.msra.gmra.mxu0 %v8843_v51  ;;  %9747 = vmatmul.mubr.bf16.vlgmr.msra.gmra.mxu1 %v8845_v43  ;;  %v15887_v51 = vld [vmem:[%s19260_s19 + $0x600] sm:$0xff]   ;;  %v15894_v43 = vld [vmem:[%s19258_s17 + $0x1ec] ss:$16 sps:$4 sm:$0xff]  }
0x27ea   :  { %9705 = vmatprep.mubr.bf16.mxu0 %v8848_v22  ;;  %9754 = vmatprep.mubr.bf16.mxu1 %v8850_v21 }
0x27eb   :  { %9848 = vmatpush1.bf16.msra.mxu0 %v15845_v33  ;;  %9901 = vmatpush1.bf16.msra.mxu1 %v15848_v46 }
0x27ec   :  { %9849 = vmatprep.subr.bf16.mxu0 %v15853_v12  ;;  %9902 = vmatprep.subr.bf16.mxu1 %v15856_v56 }
0x27ef   :  { %9850 = vmatpush1.bf16.msra.mxu0 %v15851_v20  ;;  %9903 = vmatpush1.bf16.msra.mxu1 %v15854_v55 }
0x27f0   :  { %14461 = vmatprep.subr.bf16.mxu0 %v15857_v18  ;;  %14489 = vmatprep.subr.bf16.mxu1 %v15858_v15 }
0x27f1   :  { %9706 = vmatmul.mubr.bf16.gmra.mxu0 %v8847_v40  ;;  %9755 = vmatmul.mubr.bf16.gmra.mxu1 %v8849_v29 }
0x27f2   :  { %9867 = vmatprep.mubr.bf16.mxu0 %v16115_v2  ;;  %9920 = vmatprep.mubr.bf16.mxu1 %v16115_v2 }
0x27f9   :  { %13423 = vmatmul.mubr.msk.bf16.vlgmr.msra.gmra.mxu0 %vm299_vm10, %v18196_v61  ;;  %13425 = vmatmul.mubr.msk.bf16.vlgmr.msra.gmra.mxu1 %vm299_vm10, %v18196_v61 }
0x27fa   :  { %9877 = vmatprep.mubr.bf16.mxu0 %v16115_v2  ;;  %9930 = vmatprep.mubr.bf16.mxu1 %v16115_v2 }
0x27fb   :  { %14462 = vmatpush3.bf16.msra.mxu0 %v15859_v26  ;;  %14490 = vmatpush3.bf16.msra.mxu1 %v15860_v31 }
0x27fc   :  { %14463 = vmatprep.subr.bf16.mxu0 %v15861_v41  ;;  %14491 = vmatprep.subr.bf16.mxu1 %v15862_v39 }
0x27ff   :  { %14464 = vmatpush3.bf16.msra.mxu0 %v15863_v7  ;;  %14492 = vmatpush3.bf16.msra.mxu1 %v15864_v58 }
0x2800   :  { %14465 = vmatprep.subr.bf16.mxu0 %v15865_v54  ;;  %14493 = vmatprep.subr.bf16.mxu1 %v15866_v27 }
0x2801   :  { %13424 = vmatmul.mubr.msk.bf16.gmra.mxu0 %vm299_vm10, %v18228_v45  ;;  %13426 = vmatmul.mubr.msk.bf16.gmra.mxu1 %vm299_vm10, %v18228_v45 }
0x2803   :  { %14466 = vmatpush3.bf16.msra.mxu0 %v15867_v28  ;;  %14494 = vmatpush3.bf16.msra.mxu1 %v15868_v59 }
0x2804   :  { %14467 = vmatprep.subr.bf16.mxu0 %v15869_v57  ;;  %14495 = vmatprep.subr.bf16.mxu1 %v15870_v35 }
0x2807   :  { %14468 = vmatpush3.bf16.msra.mxu0 %v15871_v49  ;;  %14496 = vmatpush3.bf16.msra.mxu1 %v15872_v60 }
0x2808   :  { %14469 = vmatprep.subr.bf16.mxu0 %v15873_v10  ;;  %14497 = vmatprep.subr.bf16.mxu1 %v15874_v25 }
0x280b   :  { %14470 = vmatpush3.bf16.msra.mxu0 %v15875_v32  ;;  %14498 = vmatpush3.bf16.msra.mxu1 %v15876_v62 }
0x280c   :  { %14471 = vmatprep.subr.bf16.mxu0 %v15877_v48  ;;  %14499 = vmatprep.subr.bf16.mxu1 %v15878_v38 }
0x280f   :  { %14472 = vmatpush3.bf16.msra.mxu0 %v15879_v3  ;;  %14500 = vmatpush3.bf16.msra.mxu1 %v15880_v14 }
0x2810   :  { %14473 = vmatprep.subr.bf16.mxu0 %v15881_v44  ;;  %14501 = vmatprep.subr.bf16.mxu1 %v15882_v47 }
0x2813   :  { %14474 = vmatpush3.bf16.msra.mxu0 %v15883_v19  ;;  %14502 = vmatpush3.bf16.msra.mxu1 %v15884_v24 }
0x2814   :  { %14475 = vmatprep.subr.bf16.mxu0 %v15885_v37  ;;  %14503 = vmatprep.subr.bf16.mxu1 %v15886_v11 }
0x2817   :  { %14476 = vmatpush3.bf16.msra.mxu0 %v15887_v51  ;;  %14504 = vmatpush3.bf16.msra.mxu1 %v15888_v23 }
0x2818   :  { %10408 = vmatprep.subr.bf16.mxu0 %v15891_v42  ;;  %10461 = vmatprep.subr.bf16.mxu1 %v15894_v43 }
0x2889   :  { %v14365_v63 = vpop.f32.mrf.mxu0  ;;  %v14393_v30 = vpop.f32.mrf.mxu1 }
0x288b   :  { %v14366_v33 = vpop.f32.mrf.mxu0  ;;  %v14394_v46 = vpop.f32.mrf.mxu1 }
0x288c   :  { %v14367_v22 = vadd.f32 %v14366_v33, %v14365_v63  ;;  %v14395_v21 = vadd.f32 %v14394_v46, %v14393_v30 }
0x288d   :  { %v14368_v12 = vpop.f32.mrf.mxu0  ;;  %v14396_v56 = vpop.f32.mrf.mxu1 }
0x288e   :  { %v9459_v0 = vadd.f32 %v14395_v21, %v14367_v22 }
0x288f   :  { %v14369_v1 = vpop.f32.mrf.mxu0  ;;  %v14397_v52 = vpop.f32.mrf.mxu1 }
0x2890   :  { %v14370_v9 = vadd.f32 %v14369_v1, %v14368_v12  ;;  %v14398_v20 = vadd.f32 %v14397_v52, %v14396_v56  ;;  %v13414_v12 = vld [vmem:[%s19259_s18 + $0x18] sm:$0xf] }
0x2891   :  { %v14371_v55 = vpop.f32.mrf.mxu0  ;;  %v14399_v36 = vpop.f32.mrf.mxu1  ;;  %v9782_v52 = vrot.slane %v13414_v12, %v17146_v5 }
0x2892   :  { %v9462_v4 = vadd.f32 %v14398_v20, %v14370_v9  ;;  %v9790_v9 = vrot.slane %v13414_v12, %v17149_v13  ;;  %v9778_v20 = vrot.slane %v13414_v12, %v17155_v8 }
0x2893   :  { %v14372_v40 = vpop.f32.mrf.mxu0  ;;  %v14400_v29 = vpop.f32.mrf.mxu1 }
0x2894   :  { %v14373_v18 = vadd.f32 %v14372_v40, %v14371_v55  ;;  %v14401_v15 = vadd.f32 %v14400_v29, %v14399_v36  ;;  %v9786_v55 = vrot.slane %v13414_v12, %v17158_v53 }
0x2895   :  { %v14374_v26 = vpop.f32.mrf.mxu0  ;;  %v14402_v31 = vpop.f32.mrf.mxu1 }
0x2896   :  { %v9467_v41 = vadd.f32 %v14401_v15, %v14373_v18 }
0x2897   :  { %v14375_v39 = vpop.f32.mrf.mxu0  ;;  %v14403_v7 = vpop.f32.mrf.mxu1 }
0x2898   :  { %v14376_v58 = vadd.f32 %v14375_v39, %v14374_v26  ;;  %v14404_v54 = vadd.f32 %v14403_v7, %v14402_v31 }
0x289a   :  { %v9470_v27 = vadd.f32 %v14404_v54, %v14376_v58 }
0x28a9   :  { %v14421_v28 = vpop.f32.mrf.mxu0  ;;  %v14449_v59 = vpop.f32.mrf.mxu1 }
0x28ab   :  { %v14422_v57 = vpop.f32.mrf.mxu0  ;;  %v14450_v35 = vpop.f32.mrf.mxu1 }
0x28ac   :  { %v14423_v49 = vadd.f32 %v14422_v57, %v14421_v28  ;;  %v14451_v60 = vadd.f32 %v14450_v35, %v14449_v59 }
0x28ad   :  { %v14424_v10 = vpop.f32.mrf.mxu0  ;;  %v14452_v25 = vpop.f32.mrf.mxu1 }
0x28ae   :  { %v9700_v32 = vadd.f32 %v14423_v49, %v9459_v0 }
0x28af   :  { %v14425_v62 = vpop.f32.mrf.mxu0  ;;  %v14453_v48 = vpop.f32.mrf.mxu1 }
0x28b0   :  { %v18644_v38 = vadd.f32 %v14451_v60, %v9700_v32  ;;  %v14426_v3 = vadd.f32 %v14425_v62, %v14424_v10  ;;  %v14454_v14 = vadd.f32 %v14453_v48, %v14452_v25 }
0x28b1   :  { %v14427_v44 = vpop.f32.mrf.mxu0  ;;  %v14455_v47 = vpop.f32.mrf.mxu1 }
0x28b2   :  { %v9703_v19 = vadd.f32 %v14426_v3, %v9462_v4 }
0x28b3   :  { %v14428_v24 = vpop.f32.mrf.mxu0  ;;  %v14456_v37 = vpop.f32.mrf.mxu1 }
0x28b4   :  { %v18646_v11 = vadd.f32 %v14454_v14, %v9703_v19  ;;  %v14429_v51 = vadd.f32 %v14428_v24, %v14427_v44  ;;  %v14457_v23 = vadd.f32 %v14456_v37, %v14455_v47  ;;  %v15889_v19 = vld [vmem:[%s19258_s17 + $0x1e0] ss:$16 sps:$4 sm:$0xff]   ;;  %v15892_v24 = vld [vmem:[%s19258_s17 + $0x1e8] ss:$16 sps:$4 sm:$0xff]  }
0x28b5   :  { %v14430_v42 = vpop.f32.mrf.mxu0  ;;  %v14458_v43 = vpop.f32.mrf.mxu1 }
0x28b6   :  { %v9708_v63 = vadd.f32 %v14429_v51, %v9467_v41 }
0x28b7   :  { %v14431_v30 = vpop.f32.mrf.mxu0  ;;  %v14459_v33 = vpop.f32.mrf.mxu1 }
0x28b8   :  { %v18648_v46 = vadd.f32 %v14457_v23, %v9708_v63  ;;  %v14432_v22 = vadd.f32 %v14431_v30, %v14430_v42  ;;  %v14460_v21 = vadd.f32 %v14459_v33, %v14458_v43  ;;  %v15897_v63 = vld [vmem:[%s19258_s17 + $0x1c4] ss:$16 sps:$4 sm:$0xff]   ;;  %v15900_v30 = vld [vmem:[%s19258_s17 + $0x1cc] ss:$16 sps:$4 sm:$0xff]  }
0x28b9   :  { %v9869_v56 = vpop.f32.mrf.mxu0  ;;  %v9922_v0 = vpop.f32.mrf.mxu1 }
0x28ba   :  { %v9711_v1 = vadd.f32 %v14432_v22, %v9470_v27  ;;  %v9870_v39 = vadd.f32 %v9869_v56, %v9778_v20  ;;  %v9923_v7 = vadd.f32 %v9922_v0, %v9786_v55 }
0x28bb   :  { %v9871_v36 = vpop.f32.mrf.mxu0  ;;  %v9924_v4 = vpop.f32.mrf.mxu1 }
0x28bc   :  { %v18657_v40 = vadd.f32 %v14460_v21, %v9711_v1  ;;  %v9872_v15 = vadd.f32 %v9871_v36, %v9782_v52  ;;  %v9925_v26 = vadd.f32 %v9924_v4, %v9790_v9  ;;  %v9941_v62 = vmax.f32 %v9870_v39, 0.0 }
0x28bd   :  { %v9873_v29 = vpop.f32.mrf.mxu0  ;;  %v9926_v18 = vpop.f32.mrf.mxu1  ;;  %v9943_v48 = vmax.f32 %v9923_v7, 0.0 }
0x28be   :  { %v9874_v31 = vadd.f32 %v9873_v29, %v9778_v20  ;;  %v9927_v41 = vadd.f32 %v9926_v18, %v9786_v55  ;;  %v9942_v60 = vmax.f32 %v9872_v15, 0.0  ;;  %v9944_v10 = vmax.f32 %v9925_v26, 0.0  ;;  %v15895_v29 = vld [vmem:[%s19258_s17 + $0x1c0] ss:$16 sps:$4 sm:$0xff]   ;;  %v15898_v18 = vld [vmem:[%s19258_s17 + $0x1c8] ss:$16 sps:$4 sm:$0xff]  }
0x28bf   :  { %v9875_v58 = vpop.f32.mrf.mxu0  ;;  %v9928_v54 = vpop.f32.mrf.mxu1 }
0x28c0   :  { %v9876_v27 = vadd.f32 %v9875_v58, %v9782_v52  ;;  %v9929_v28 = vadd.f32 %v9928_v54, %v9790_v9  ;;  %v9945_v59 = vmax.f32 %v9874_v31, 0.0  ;;  %v9947_v57 = vmax.f32 %v9927_v41, 0.0 }
0x28c1   :  { %v9879_v35 = vpop.f32.mrf.mxu0  ;;  %v9932_v49 = vpop.f32.mrf.mxu1 }
0x28c2   :  { %v9946_v25 = vmax.f32 %v9876_v27, 0.0  ;;  %v9948_v32 = vmax.f32 %v9929_v28, 0.0  ;;  %v9957_v37 = vpack.c.bf16 %v9945_v59, %v9941_v62  ;;  %v9959_v51 = vpack.c.bf16 %v9947_v57, %v9943_v48  ;;  %v15903_v59 = vld [vmem:[%s19260_s19 + $0x738] sm:$0xff]   ;;  %v15914_v62 = vld [vmem:[%s19260_s19 + $0x7e0] sm:$0xff]  }
0x28c3   :  { %v9881_v3 = vpop.f32.mrf.mxu0  ;;  %v9934_v14 = vpop.f32.mrf.mxu1  ;;  %v9880_v12 = vadd.f32 %v9879_v35, %v9778_v20  ;;  %v9933_v56 = vadd.f32 %v9932_v49, %v9786_v55  ;;  %v15904_v57 = vld [vmem:[%s19260_s19 + $0x7b8] sm:$0xff]   ;;  %v15905_v35 = vld [vmem:[%s19260_s19 + $0x770] sm:$0xff]   ;;  %v15915_v48 = vld [vmem:[%s19260_s19 + $0x720] sm:$0xff]  }
0x28c4   :  { %v9958_v44 = vpack.c.bf16 %v9946_v25, %v9942_v60  ;;  %v9960_v47 = vpack.c.bf16 %v9948_v32, %v9944_v10  ;;  %v9882_v23 = vadd.f32 %v9881_v3, %v9782_v52  ;;  %v9935_v33 = vadd.f32 %v9934_v14, %v9790_v9  ;;  %v15908_v49 = vld [vmem:[%s19260_s19 + $0x7b0] sm:$0xff]   ;;  %v15910_v60 = vld [vmem:[%s19260_s19 + $0x7e8] sm:$0xff]   ;;  %v15913_v32 = vld [vmem:[%s19260_s19 + $0x760] sm:$0xff]  }
0x28c5   :  { %v9883_v42 = vpop.f32.mrf.mxu0  ;;  %v9936_v43 = vpop.f32.mrf.mxu1  ;;  %v9949_v39 = vmax.f32 %v9880_v12, 0.0  ;;  %v9951_v7 = vmax.f32 %v9933_v56, 0.0  ;;  %v15911_v10 = vld [vmem:[%s19260_s19 + $0x728] sm:$0xff]   ;;  %v15916_v3 = vld [vmem:[%s19260_s19 + $0x7a0] sm:$0xff]   ;;  %v15917_v14 = vld [vmem:[%s19260_s19 + $0x758] sm:$0xff]  }
0x28c6   :  { %v9884_v22 = vadd.f32 %v9883_v42, %v9778_v20  ;;  %v9937_v21 = vadd.f32 %v9936_v43, %v9786_v55  ;;  %10254 = vmatprep.mubr.bf16.mxu0 %v9958_v44  ;;  %10303 = vmatprep.mubr.bf16.mxu1 %v9960_v47  ;;  %v15901_v20 = vld [vmem:[%s19260_s19 + $0x778] sm:$0xff]   ;;  %v9952_v55 = vmax.f32 %v9935_v33, 0.0  ;;  %v15912_v25 = vld [vmem:[%s19260_s19 + $0x7a8] sm:$0xff]   ;;  %v15929_v33 = vld [vmem:[%s19260_s19 + $0x740] sm:$0xff]  }
0x28c7   :  { %v9885_v0 = vpop.f32.mrf.mxu0  ;;  %v9938_v1 = vpop.f32.mrf.mxu1  ;;  %10255 = vmatmul.mubr.bf16.vlgmr.msra.gmra.mxu0 %v9957_v37  ;;  %10304 = vmatmul.mubr.bf16.vlgmr.msra.gmra.mxu1 %v9959_v51  ;;  %v15918_v44 = vld [vmem:[%s19260_s19 + $0x7d8] sm:$0xff]   ;;  %v15922_v37 = vld [vmem:[%s19260_s19 + $0x7d0] sm:$0xff]   ;;  %v15925_v42 = vld [vmem:[%s19260_s19 + $0x748] sm:$0xff]  }
0x28c8   :  { %v9886_v36 = vadd.f32 %v9885_v0, %v9782_v52  ;;  %v9939_v4 = vadd.f32 %v9938_v1, %v9790_v9  ;;  %10409 = vmatpush1.bf16.msra.mxu0 %v15889_v19  ;;  %10462 = vmatpush1.bf16.msra.mxu1 %v15892_v24  ;;  %v9953_v15 = vmax.f32 %v9884_v22, 0.0  ;;  %v9955_v26 = vmax.f32 %v9937_v21, 0.0  ;;  %v15902_v52 = vld [vmem:[%s19260_s19 + $0x7f8] sm:$0xff]   ;;  %v15921_v24 = vld [vmem:[%s19260_s19 + $0x750] sm:$0xff]   ;;  %v15926_v43 = vld [vmem:[%s19260_s19 + $0x7c8] sm:$0xff]  }
0x28c9   :  { %10410 = vmatprep.subr.bf16.mxu0 %v15897_v63  ;;  %10463 = vmatprep.subr.bf16.mxu1 %v15900_v30  ;;  %v9950_v9 = vmax.f32 %v9882_v23, 0.0  ;;  %v15919_v47 = vld [vmem:[%s19260_s19 + $0x718] sm:$0xff]   ;;  %v15923_v51 = vld [vmem:[%s19260_s19 + $0x710] sm:$0xff]   ;;  %v15927_v63 = vld [vmem:[%s19260_s19 + $0x708] sm:$0xff]  }
0x28ca   :  { %v9954_v31 = vmax.f32 %v9886_v36, 0.0  ;;  %v9956_v41 = vmax.f32 %v9939_v4, 0.0  ;;  %v9961_v27 = vpack.c.bf16 %v9953_v15, %v9949_v39  ;;  %v9963_v28 = vpack.c.bf16 %v9955_v26, %v9951_v7  ;;  %v15920_v19 = vld [vmem:[%s19260_s19 + $0x798] sm:$0xff]   ;;  %v15924_v23 = vld [vmem:[%s19260_s19 + $0x790] sm:$0xff]   ;;  %v15928_v30 = vld [vmem:[%s19260_s19 + $0x788] sm:$0xff]  }
0x28cb   :  { %v15930_v22 = vld [vmem:[%s19260_s19 + $0x7c0] sm:$0xff]  }
0x28cc   :  { %v9962_v58 = vpack.c.bf16 %v9954_v31, %v9950_v9  ;;  %v9964_v54 = vpack.c.bf16 %v9956_v41, %v9952_v55  ;;  %10411 = vmatpush1.bf16.msra.mxu0 %v15895_v29  ;;  %10464 = vmatpush1.bf16.msra.mxu1 %v15898_v18  ;;  %v15931_v21 = vld [vmem:[%s19260_s19 + $0x700] sm:$0xff]  }
0x28cd   :  { %14517 = vmatprep.subr.bf16.mxu0 %v15901_v20  ;;  %14545 = vmatprep.subr.bf16.mxu1 %v15902_v52  ;;  %v15932_v12 = vld [vmem:[%s19260_s19 + $0x780] sm:$0xff]  }
0x28ce   :  { %10262 = vmatprep.mubr.bf16.mxu0 %v9962_v58  ;;  %10311 = vmatprep.mubr.bf16.mxu1 %v9964_v54 }
0x28cf   :  { %10263 = vmatmul.mubr.bf16.gmra.mxu0 %v9961_v27  ;;  %10312 = vmatmul.mubr.bf16.gmra.mxu1 %v9963_v28 }
0x28d0   :  { %10428 = vmatprep.mubr.bf16.mxu0 %v16115_v2  ;;  %10481 = vmatprep.mubr.bf16.mxu1 %v16115_v2 }
0x28d7   :  { %13540 = vmatmul.mubr.msk.bf16.vlgmr.msra.gmra.mxu0 %vm299_vm10, %v18196_v61  ;;  %13542 = vmatmul.mubr.msk.bf16.vlgmr.msra.gmra.mxu1 %vm299_vm10, %v18196_v61  ;;  %v15906_v61 = vld [vmem:[%s19260_s19 + $0x7f0] sm:$0xff]  }
0x28d8   :  { %10438 = vmatprep.mubr.bf16.mxu0 %v16115_v2  ;;  %10491 = vmatprep.mubr.bf16.mxu1 %v16115_v2  ;;  %v15907_v2 = vld [vmem:[%s19260_s19 + $0x730] sm:$0xff]  }
0x28d9   :  { %14518 = vmatpush3.bf16.msra.mxu0 %v15903_v59  ;;  %14546 = vmatpush3.bf16.msra.mxu1 %v15904_v57 }
0x28da   :  { %14519 = vmatprep.subr.bf16.mxu0 %v15905_v35  ;;  %14547 = vmatprep.subr.bf16.mxu1 %v15906_v61 }
0x28dd   :  { %14520 = vmatpush3.bf16.msra.mxu0 %v15907_v2  ;;  %14548 = vmatpush3.bf16.msra.mxu1 %v15908_v49 }
0x28de   :  { %14549 = vmatprep.subr.bf16.mxu1 %v15910_v60 }
0x28df   :  { %13541 = vmatmul.mubr.msk.bf16.gmra.mxu0 %vm299_vm10, %v18228_v45  ;;  %13543 = vmatmul.mubr.msk.bf16.gmra.mxu1 %vm299_vm10, %v18228_v45  ;;  %v15909_v45 = vld [vmem:[%s19260_s19 + $0x768] sm:$0xff]  }
0x28e0   :  { %14521 = vmatprep.subr.bf16.mxu0 %v15909_v45 }
0x28e1   :  { %14522 = vmatpush3.bf16.msra.mxu0 %v15911_v10  ;;  %14550 = vmatpush3.bf16.msra.mxu1 %v15912_v25  ;;  %v13531_v10 = vld [vmem:[%s19259_s18 + $0x1c] sm:$0xf] }
0x28e2   :  { %14523 = vmatprep.subr.bf16.mxu0 %v15913_v32  ;;  %14551 = vmatprep.subr.bf16.mxu1 %v15914_v62  ;;  %v10343_v62 = vrot.slane %v13531_v10, %v17146_v5 }
0x28e5   :  { %14524 = vmatpush3.bf16.msra.mxu0 %v15915_v48  ;;  %14552 = vmatpush3.bf16.msra.mxu1 %v15916_v3  ;;  %v10351_v48 = vrot.slane %v13531_v10, %v17149_v13  ;;  %v10339_v3 = vrot.slane %v13531_v10, %v17155_v8 }
0x28e6   :  { %14525 = vmatprep.subr.bf16.mxu0 %v15917_v14  ;;  %14553 = vmatprep.subr.bf16.mxu1 %v15918_v44  ;;  %v10347_v14 = vrot.slane %v13531_v10, %v17158_v53 }
0x28e9   :  { %14526 = vmatpush3.bf16.msra.mxu0 %v15919_v47  ;;  %14554 = vmatpush3.bf16.msra.mxu1 %v15920_v19 }
0x28ea   :  { %14527 = vmatprep.subr.bf16.mxu0 %v15921_v24  ;;  %14555 = vmatprep.subr.bf16.mxu1 %v15922_v37 }
0x28ed   :  { %14528 = vmatpush3.bf16.msra.mxu0 %v15923_v51  ;;  %14556 = vmatpush3.bf16.msra.mxu1 %v15924_v23 }
0x28ee   :  { %14529 = vmatprep.subr.bf16.mxu0 %v15925_v42  ;;  %14557 = vmatprep.subr.bf16.mxu1 %v15926_v43 }
0x28f1   :  { %14530 = vmatpush3.bf16.msra.mxu0 %v15927_v63  ;;  %14558 = vmatpush3.bf16.msra.mxu1 %v15928_v30 }
0x28f2   :  { %14531 = vmatprep.subr.bf16.mxu0 %v15929_v33  ;;  %14559 = vmatprep.subr.bf16.mxu1 %v15930_v22 }
0x28f5   :  { %14532 = vmatpush3.bf16.msra.mxu0 %v15931_v21  ;;  %14560 = vmatpush3.bf16.msra.mxu1 %v15932_v12 }
0x28f6   :  { %15364 = vmatprep.subr.mxu0 %v16116_v16  ;;  %15375 = vmatprep.subr.mxu1 %v16116_v16 }
0x2987   :  { %v14477_v56 = vpop.f32.mrf.mxu0  ;;  %v14505_v0 = vpop.f32.mrf.mxu1 }
0x2989   :  { %v14478_v1 = vpop.f32.mrf.mxu0  ;;  %v14506_v36 = vpop.f32.mrf.mxu1 }
0x298a   :  { %v14479_v4 = vadd.f32 %v14478_v1, %v14477_v56  ;;  %v14507_v29 = vadd.f32 %v14506_v36, %v14505_v0 }
0x298b   :  { %v14480_v18 = vpop.f32.mrf.mxu0  ;;  %v14508_v15 = vpop.f32.mrf.mxu1 }
0x298c   :  { %v10306_v26 = vadd.f32 %v14507_v29, %v14479_v4 }
0x298d   :  { %v14481_v20 = vpop.f32.mrf.mxu0  ;;  %v14509_v52 = vpop.f32.mrf.mxu1 }
0x298e   :  { %v18788_v9 = vadd.f32 %v10306_v26, %v18644_v38  ;;  %v14482_v55 = vadd.f32 %v14481_v20, %v14480_v18  ;;  %v14510_v31 = vadd.f32 %v14509_v52, %v14508_v15 }
0x298f   :  { %v14483_v41 = vpop.f32.mrf.mxu0  ;;  %v14511_v39 = vpop.f32.mrf.mxu1 }
0x2990   :  { %v10309_v7 = vadd.f32 %v14510_v31, %v14482_v55 }
0x2991   :  { %v14484_v58 = vpop.f32.mrf.mxu0  ;;  %v14512_v54 = vpop.f32.mrf.mxu1 }
0x2992   :  { %v18791_v27 = vadd.f32 %v10309_v7, %v18646_v11  ;;  %v14485_v28 = vadd.f32 %v14484_v58, %v14483_v41  ;;  %v14513_v59 = vadd.f32 %v14512_v54, %v14511_v39 }
0x2993   :  { %v14486_v57 = vpop.f32.mrf.mxu0  ;;  %v14514_v35 = vpop.f32.mrf.mxu1 }
0x2994   :  { %v10314_v61 = vadd.f32 %v14513_v59, %v14485_v28 }
0x2995   :  { %v14487_v2 = vpop.f32.mrf.mxu0  ;;  %v14515_v49 = vpop.f32.mrf.mxu1 }
0x2996   :  { %v18794_v38 = vadd.f32 %v10314_v61, %v18648_v46  ;;  %v14488_v45 = vadd.f32 %v14487_v2, %v14486_v57  ;;  %v14516_v60 = vadd.f32 %v14515_v49, %v14514_v35 }
0x2997   :  { %v10430_v25 = vpop.f32.mrf.mxu0  ;;  %v10483_v32 = vpop.f32.mrf.mxu1 }
0x2998   :  { %v10317_v11 = vadd.f32 %v14516_v60, %v14488_v45  ;;  %v10431_v43 = vadd.f32 %v10430_v25, %v10339_v3  ;;  %v10484_v63 = vadd.f32 %v10483_v32, %v10347_v14 }
0x2999   :  { %v10432_v44 = vpop.f32.mrf.mxu0  ;;  %v10485_v46 = vpop.f32.mrf.mxu1 }
0x299a   :  { %v18804_v47 = vadd.f32 %v10317_v11, %v18657_v40  ;;  %v10433_v37 = vadd.f32 %v10432_v44, %v10343_v62  ;;  %v10486_v51 = vadd.f32 %v10485_v46, %v10351_v48  ;;  %v10502_v1 = vmax.f32 %v10431_v43, 0.0 }
0x299b   :  { %v10434_v19 = vpop.f32.mrf.mxu0  ;;  %v10487_v24 = vpop.f32.mrf.mxu1  ;;  %v10504_v36 = vmax.f32 %v10484_v63, 0.0 }
0x299c   :  { %v10435_v23 = vadd.f32 %v10434_v19, %v10339_v3  ;;  %v10488_v42 = vadd.f32 %v10487_v24, %v10347_v14  ;;  %v10503_v12 = vmax.f32 %v10433_v37, 0.0  ;;  %v10505_v56 = vmax.f32 %v10486_v51, 0.0 }
0x299d   :  { %v10436_v5 = vpop.f32.mrf.mxu0  ;;  %v10489_v30 = vpop.f32.mrf.mxu1 }
0x299e   :  { %v10437_v13 = vadd.f32 %v10436_v5, %v10343_v62  ;;  %v10490_v33 = vadd.f32 %v10489_v30, %v10351_v48  ;;  %v10506_v8 = vmax.f32 %v10435_v23, 0.0  ;;  %v10508_v22 = vmax.f32 %v10488_v42, 0.0  ;;  %v13641_v5 = vld [vmem:[%s19261_s20 + $0x1] ss:$0 sm:$0xff] }
0x299f   :  { %v10440_v53 = vpop.f32.mrf.mxu0  ;;  %v10493_v21 = vpop.f32.mrf.mxu1 }
0x29a0   :  { %v10507_v40 = vmax.f32 %v10437_v13, 0.0  ;;  %v10509_v0 = vmax.f32 %v10490_v33, 0.0  ;;  %v10518_v26 = vpack.c.bf16 %v10506_v8, %v10502_v1  ;;  %v10520_v20 = vpack.c.bf16 %v10508_v22, %v10504_v36 }
0x29a1   :  { %v10442_v4 = vpop.f32.mrf.mxu0  ;;  %v10495_v29 = vpop.f32.mrf.mxu1  ;;  %v10441_v58 = vadd.f32 %v10440_v53, %v10339_v3  ;;  %v10494_v54 = vadd.f32 %v10493_v21, %v10347_v14 }
0x29a2   :  { %v10519_v18 = vpack.c.bf16 %v10507_v40, %v10503_v12  ;;  %v10521_v15 = vpack.c.bf16 %v10509_v0, %v10505_v56  ;;  %v10443_v52 = vadd.f32 %v10442_v4, %v10343_v62  ;;  %v10496_v41 = vadd.f32 %v10495_v29, %v10351_v48 }
0x29a3   :  { %v10444_v55 = vpop.f32.mrf.mxu0  ;;  %v10497_v31 = vpop.f32.mrf.mxu1  ;;  %v10510_v25 = vmax.f32 %v10441_v58, 0.0  ;;  %v10512_v32 = vmax.f32 %v10494_v54, 0.0 }
0x29a4   :  { %v10445_v39 = vadd.f32 %v10444_v55, %v10339_v3  ;;  %v10498_v7 = vadd.f32 %v10497_v31, %v10347_v14  ;;  %10815 = vmatprep.mubr.bf16.mxu0 %v10519_v18  ;;  %10864 = vmatprep.mubr.bf16.mxu1 %v10521_v15  ;;  %v10511_v49 = vmax.f32 %v10443_v52, 0.0  ;;  %v10513_v45 = vmax.f32 %v10496_v41, 0.0 }
0x29a5   :  { %v10446_v28 = vpop.f32.mrf.mxu0  ;;  %v10499_v59 = vpop.f32.mrf.mxu1  ;;  %10816 = vmatmul.mubr.bf16.vlgmr.msra.gmra.mxu0 %v10518_v26  ;;  %10865 = vmatmul.mubr.bf16.vlgmr.msra.gmra.mxu1 %v10520_v20 }
0x29a6   :  { %v10447_v57 = vadd.f32 %v10446_v28, %v10343_v62  ;;  %v10500_v35 = vadd.f32 %v10499_v59, %v10351_v48  ;;  %v10514_v61 = vmax.f32 %v10445_v39, 0.0  ;;  %v10516_v2 = vmax.f32 %v10498_v7, 0.0 }
0x29a8   :  { %v10515_v60 = vmax.f32 %v10447_v57, 0.0  ;;  %v10517_v10 = vmax.f32 %v10500_v35, 0.0  ;;  %v10522_v46 = vpack.c.bf16 %v10514_v61, %v10510_v25  ;;  %v10524_v19 = vpack.c.bf16 %v10516_v2, %v10512_v32 }
0x29aa   :  { %v10523_v11 = vpack.c.bf16 %v10515_v60, %v10511_v49  ;;  %v10525_v44 = vpack.c.bf16 %v10517_v10, %v10513_v45 }
0x29ac   :  { %10823 = vmatprep.mubr.bf16.mxu0 %v10523_v11  ;;  %10872 = vmatprep.mubr.bf16.mxu1 %v10525_v44 }
0x29ad   :  { %10824 = vmatmul.mubr.bf16.gmra.mxu0 %v10522_v46  ;;  %10873 = vmatmul.mubr.bf16.gmra.mxu1 %v10524_v19 }
0x29ae   :  { %15383 = vmatprep.mubr.msk.f32.mxu1 %vm16117_vm12, %v16116_v16  ;;  %15372 = vmatprep.mubr.msk.f32.mxu0 %vm16117_vm12, %v16116_v16 }
0x2a65   :  { %v14533_v3 = vpop.f32.mrf.mxu0  ;;  %v14561_v14 = vpop.f32.mrf.mxu1 }
0x2a67   :  { %v14534_v62 = vpop.f32.mrf.mxu0  ;;  %v14562_v48 = vpop.f32.mrf.mxu1 }
0x2a68   :  { %v14535_v24 = vadd.f32 %v14534_v62, %v14533_v3  ;;  %v14563_v37 = vadd.f32 %v14562_v48, %v14561_v14  ;;  %v10980_v62 = vld [vmem:[%s19262_s21 + $0x18] sm:$0xff] }
0x2a69   :  { %v14536_v51 = vpop.f32.mrf.mxu0  ;;  %v14564_v23 = vpop.f32.mrf.mxu1  ;;  %15376 = vmatpush3.msra.mxu1 %v10980_v62  ;;  %v13649_v48 = vld [vmem:[%s19262_s21 + $0x38] sm:$0xff] }
0x2a6a   :  { %v10867_v42 = vadd.f32 %v14563_v37, %v14535_v24  ;;  %15377 = vmatprep.subr.mxu1 %v16116_v16  ;;  %v10979_v24 = vld [vmem:[%s19262_s21 + $0x10] sm:$0xff]  ;;  %15365 = vmatpush3.msra.mxu0 %v13649_v48 }
0x2a6b   :  { %v14537_v43 = vpop.f32.mrf.mxu0  ;;  %v14565_v63 = vpop.f32.mrf.mxu1  ;;  %15378 = vmatpush3.msra.mxu1 %v10979_v24  ;;  %15366 = vmatprep.subr.mxu0 %v16116_v16  ;;  %v13648_v37 = vld [vmem:[%s19262_s21 + $0x30] sm:$0xff]  ;;  %v13685_v24 = vld [vmem:[%s19262_s21 + $0x118] sm:$0xff] }
0x2a6c   :  { %v10881_v30 = vadd.f32 %v10867_v42, %v18788_v9  ;;  %v14538_v13 = vadd.f32 %v14537_v43, %v14536_v51  ;;  %v14566_v33 = vadd.f32 %v14565_v63, %v14564_v23  ;;  %15379 = vmatprep.subr.mxu1 %v16116_v16  ;;  %v10978_v51 = vld [vmem:[%s19262_s21 + $0x8] sm:$0xff]  ;;  %15367 = vmatpush3.msra.mxu0 %v13648_v37  ;;  %v10977_v42 = vld [vmem:[%s19262_s21] sm:$0xff]  ;;  %v13689_v37 = vld [vmem:[%s19262_s21 + $0x130] sm:$0xff] }
0x2a6d   :  { %v14539_v8 = vpop.f32.mrf.mxu0  ;;  %v14567_v22 = vpop.f32.mrf.mxu1  ;;  %15380 = vmatpush3.msra.mxu1 %v10978_v51  ;;  %15368 = vmatprep.subr.mxu0 %v16116_v16  ;;  %v13647_v23 = vld [vmem:[%s19262_s21 + $0x28] sm:$0xff]  ;;  %v13646_v43 = vld [vmem:[%s19262_s21 + $0x20] sm:$0xff]  ;;  %v13684_v51 = vld [vmem:[%s19262_s21 + $0x110] sm:$0xff] }
0x2a6e   :  { %v10870_v53 = vadd.f32 %v14566_v33, %v14538_v13  ;;  %v10893_v21 = vadd.f32 %v13641_v5, %v10881_v30  ;;  %15381 = vmatprep.subr.mxu1 %v16116_v16  ;;  %15369 = vmatpush3.msra.mxu0 %v13647_v23 }
0x2a6f   :  { %v14540_v12 = vpop.f32.mrf.mxu0  ;;  %v14568_v56 = vpop.f32.mrf.mxu1  ;;  %15382 = vmatpush3.msra.mxu1 %v10977_v42  ;;  %15370 = vmatprep.subr.mxu0 %v16116_v16  ;;  %v13688_v42 = vld [vmem:[%s19262_s21 + $0x128] sm:$0xff] }
0x2a70   :  { %v10882_v40 = vadd.f32 %v10870_v53, %v18791_v27  ;;  %v14541_v0 = vadd.f32 %v14540_v12, %v14539_v8  ;;  %v14569_v1 = vadd.f32 %v14568_v56, %v14567_v22  ;;  %v10897_v36 = vadd.f32 %v10893_v21, %v18186_v34  ;;  %15371 = vmatpush3.msra.mxu0 %v13646_v43  ;;  %v18876_v53 = vld [vmem:[%s19256_s15 + $0x1] ss:$0 sm:$0xff]  ;;  %v13683_v43 = vld [vmem:[%s19262_s21 + $0x108] sm:$0xff] }
0x2a71   :  { %v14542_v4 = vpop.f32.mrf.mxu0  ;;  %v14570_v29 = vpop.f32.mrf.mxu1  ;;  %15397 = vmatprep.subr.mxu1 %v16116_v16  ;;  %15386 = vmatprep.subr.mxu0 %v16116_v16  ;;  %v18881_v12 = vld [vmem:[%s19257_s16 + $0x1] ss:$0 sm:$0xff] }
0x2a72   :  { %v10875_v18 = vadd.f32 %v14569_v1, %v14541_v0  ;;  %v10905_v15 = vsel %vm299_vm10, %v10897_v36, 0.0  ;;  %v10894_v9 = vadd.f32 %v13641_v5, %v10882_v40  ;;  %v13660_v1 = vld [vmem:[%s19262_s21 + $0x78] sm:$0xff] }
0x2a73   :  { %v14543_v26 = vpop.f32.mrf.mxu0  ;;  %v14571_v20 = vpop.f32.mrf.mxu1  ;;  %10906 = vadd.xlane.f32.xlu1 %v10905_v15 }
0x2a74   :  { %v10883_v52 = vadd.f32 %v10875_v18, %v18794_v38  ;;  %v14544_v55 = vadd.f32 %v14543_v26, %v14542_v4  ;;  %v14572_v31 = vadd.f32 %v14571_v20, %v14570_v29  ;;  %v10898_v41 = vadd.f32 %v10894_v9, %v18184_v50  ;;  %v13655_v29 = vld [vmem:[%s19262_s21 + $0x58] sm:$0xff]  ;;  %v13659_v18 = vld [vmem:[%s19262_s21 + $0x70] sm:$0xff]  ;;  %v13658_v26 = vld [vmem:[%s19262_s21 + $0x68] sm:$0xff] }
0x2a75   :  { %v13654_v9 = vld [vmem:[%s19262_s21 + $0x50] sm:$0xff] }
0x2a76   :  { %v10878_v27 = vadd.f32 %v14572_v31, %v14544_v55  ;;  %v10908_v39 = vsel %vm299_vm10, %v10898_v41, 0.0  ;;  %v10895_v7 = vadd.f32 %v13641_v5, %v10883_v52  ;;  %v13653_v55 = vld [vmem:[%s19262_s21 + $0x48] sm:$0xff]  ;;  %v13657_v31 = vld [vmem:[%s19262_s21 + $0x60] sm:$0xff] }
0x2a77   :  { %10909 = vadd.xlane.f32.xlu0 %v10908_v39  ;;  %v13670_v39 = vld [vmem:[%s19262_s21 + $0xb8] sm:$0xff] }
0x2a78   :  { %v10884_v34 = vadd.f32 %v10878_v27, %v18804_v47  ;;  %v10899_v58 = vadd.f32 %v10895_v7, %v18214_v17  ;;  %v13652_v27 = vld [vmem:[%s19262_s21 + $0x40] sm:$0xff] }
0x2a7a   :  { %v10911_v54 = vsel %vm299_vm10, %v10899_v58, 0.0  ;;  %v10896_v28 = vadd.f32 %v13641_v5, %v10884_v34 }
0x2a7b   :  { %10912 = vadd.xlane.f32.xlu1 %v10911_v54  ;;  %v13669_v54 = vld [vmem:[%s19262_s21 + $0xb0] sm:$0xff] }
0x2a7c   :  { %v10900_v59 = vadd.f32 %v10896_v28, %v18224_v6  ;;  %v13664_v28 = vld [vmem:[%s19262_s21 + $0x90] sm:$0xff] }
0x2a7e   :  { %v10914_v38 = vsel %vm299_vm10, %v10900_v59, 0.0 }
0x2a7f   :  { %10915 = vadd.xlane.f32.xlu0 %v10914_v38  ;;  %v13668_v38 = vld [vmem:[%s19262_s21 + $0xa8] sm:$0xff] }
0x2afc   :  { %v10907_v57 = vpop.xlane.xlu1 %10906 }
0x2afd   :  { %v10917_v50 = vmul.f32 0.03125, %v10907_v57  ;;  %v13663_v57 = vld [vmem:[%s19262_s21 + $0x88] sm:$0xff] }
0x2aff   :  { %v10921_v35 = vsub.f32 %v10897_v36, %v10917_v50  ;;  %v13667_v50 = vld [vmem:[%s19262_s21 + $0xa0] sm:$0xff] }
0x2b00   :  { %v10910_v61 = vpop.xlane.xlu0 %10909 }
0x2b01   :  { %v10918_v2 = vmul.f32 0.03125, %v10910_v61  ;;  %v10925_v49 = vmul.f32 %v10921_v35, %v10921_v35  ;;  %v13662_v61 = vld [vmem:[%s19262_s21 + $0x80] sm:$0xff] }
0x2b03   :  { %v18821_v45 = vsub.f32 %v10898_v41, %v10918_v2  ;;  %v10929_v47 = vsel %vm299_vm10, %v10925_v49, 0.0  ;;  %v13680_v49 = vld [vmem:[%s19262_s21 + $0xf8] sm:$0xff] }
0x2b04   :  { %10930 = vadd.xlane.f32.xlu1 %v10929_v47  ;;  %v10913_v17 = vpop.xlane.xlu1 %10912 }
0x2b05   :  { %v10919_v60 = vmul.f32 0.03125, %v10913_v17  ;;  %v10926_v10 = vmul.f32 %v18821_v45, %v18821_v45  ;;  %v13679_v17 = vld [vmem:[%s19262_s21 + $0xf0] sm:$0xff] }
0x2b07   :  { %v18826_v6 = vsub.f32 %v10899_v58, %v10919_v60  ;;  %v10932_v25 = vsel %vm299_vm10, %v10926_v10, 0.0  ;;  %v13665_v58 = vld [vmem:[%s19262_s21 + $0x98] sm:$0xff]  ;;  %v13674_v10 = vld [vmem:[%s19262_s21 + $0xd0] sm:$0xff] }
0x2b08   :  { %10933 = vadd.xlane.f32.xlu0 %v10932_v25  ;;  %v10916_v32 = vpop.xlane.xlu0 %10915  ;;  %v13678_v25 = vld [vmem:[%s19262_s21 + $0xe8] sm:$0xff] }
0x2b09   :  { %v10920_v11 = vmul.f32 0.03125, %v10916_v32  ;;  %v10927_v44 = vmul.f32 %v18826_v6, %v18826_v6  ;;  %v13673_v32 = vld [vmem:[%s19262_s21 + $0xc8] sm:$0xff] }
0x2b0b   :  { %v18831_v46 = vsub.f32 %v10900_v59, %v10920_v11  ;;  %v10935_v19 = vsel %vm299_vm10, %v10927_v44, 0.0 }
0x2b0c   :  { %10936 = vadd.xlane.f32.xlu1 %v10935_v19  ;;  %v13677_v19 = vld [vmem:[%s19262_s21 + $0xe0] sm:$0xff] }
0x2b0d   :  { %v10928_v3 = vmul.f32 %v18831_v46, %v18831_v46 }
0x2b0f   :  { %v10938_v14 = vsel %vm299_vm10, %v10928_v3, 0.0 }
0x2b10   :  { %10939 = vadd.xlane.f32.xlu0 %v10938_v14  ;;  %v13690_v14 = vld [vmem:[%s19262_s21 + $0x138] sm:$0xff] }
0x2b8d   :  { %v10931_v63 = vpop.xlane.xlu1 %10930 }
0x2b8e   :  { %v10941_v5 = vmul.f32 0.03125, %v10931_v63  ;;  %v13687_v63 = vld [vmem:[%s19262_s21 + $0x120] sm:$0xff] }
0x2b90   :  { %v10945_v30 = vadd.f32 1e-05, %v10941_v5 }
0x2b91   :  { %v10934_v13 = vpop.xlane.xlu0 %10933 }
0x2b92   :  { %16085 = vrsqrt.f32 %v10945_v30  ;;  %v10942_v33 = vmul.f32 0.03125, %v10934_v13  ;;  %v13682_v30 = vld [vmem:[%s19262_s21 + $0x100] sm:$0xff]  ;;  %v13700_v13 = vld [vmem:[%s19262_s21 + $0x178] sm:$0xff] }
0x2b94   :  { %v10946_v8 = vadd.f32 1e-05, %v10942_v33  ;;  %v13695_v33 = vld [vmem:[%s19262_s21 + $0x158] sm:$0xff] }
0x2b95   :  { %v10937_v40 = vpop.xlane.xlu1 %10936 }
0x2b96   :  { %16087 = vrsqrt.f32 %v10946_v8  ;;  %v10943_v36 = vmul.f32 0.03125, %v10937_v40  ;;  %v13699_v8 = vld [vmem:[%s19262_s21 + $0x170] sm:$0xff]  ;;  %v13693_v40 = vld [vmem:[%s19262_s21 + $0x148] sm:$0xff] }
0x2b98   :  { %v10947_v52 = vadd.f32 1e-05, %v10943_v36 }
0x2b99   :  { %v10940_v2 = vpop.xlane.xlu0 %10939 }
0x2b9a   :  { %16089 = vrsqrt.f32 %v10947_v52  ;;  %v10944_v47 = vmul.f32 0.03125, %v10940_v2  ;;  %v13703_v52 = vld [vmem:[%s19262_s21 + $0x188] sm:$0xff]  ;;  %v12258_v2 = vld [vmem:[%s19264_s23 + $0x58] sm:$0xff] }
0x2b9c   :  { %v10948_v44 = vadd.f32 1e-05, %v10944_v47  ;;  %v12255_v47 = vld [vmem:[%s19264_s23 + $0x40] sm:$0xff] }
0x2b9e   :  { %16091 = vrsqrt.f32 %v10948_v44  ;;  %v12248_v44 = vld [vmem:[%s19264_s23 + $0x8] sm:$0xff] }
0x2b9f   :  { %v16086_v22 = vpop.eup %16085 }
0x2ba0   :  { %v10953_v21 = vmul.f32 %v16086_v22, %v10921_v35 }
0x2ba2   :  { %v10963_v56 = vmul.f32 %v18876_v53, %v10953_v21  ;;  %v13694_v21 = vld [vmem:[%s19262_s21 + $0x150] sm:$0xff] }
0x2ba3   :  { %v16088_v15 = vpop.eup %16087 }
0x2ba4   :  { %v10973_v0 = vadd.f32 %v18881_v12, %v10963_v56  ;;  %v10954_v20 = vmul.f32 %v16088_v15, %v18821_v45  ;;  %v13675_v45 = vld [vmem:[%s19262_s21 + $0xd8] sm:$0xff]  ;;  %v13698_v56 = vld [vmem:[%s19262_s21 + $0x168] sm:$0xff] }
0x2ba5   :  { %v13705_v15 = vld [vmem:[%s19262_s21 + $0x198] sm:$0xff] }
0x2ba6   :  { %15384 = vmatmul.mubr.msk.f32.vlgmr.msra.gmra.mxu1 %vm299_vm10, %v10973_v0  ;;  %v10987_v4 = vrot.slane %v10973_v0, 2  ;;  %v11216_v41 = vrot.slane %v10973_v0, 6  ;;  %v10964_v7 = vmul.f32 %v18876_v53, %v10954_v20  ;;  %v11137_v34 = vrot.slane %v10973_v0, 4  ;;  %v13708_v20 = vld [vmem:[%s19262_s21 + $0x1a8] sm:$0xff] }
0x2ba7   :  { %15398 = vmatpush3.msra.mxu1 %v13660_v1  ;;  %15405 = vmatprep.mubr.msk.f32.mxu1 %vm16117_vm12, %v16116_v16  ;;  %v16090_v60 = vpop.eup %16089  ;;  %v13697_v1 = vld [vmem:[%s19262_s21 + $0x160] sm:$0xff] }
0x2ba8   :  { %15399 = vmatprep.subr.mxu1 %v16116_v16  ;;  %15373 = vmatmul.mubr.msk.f32.vlgmr.msra.gmra.mxu0 %vm299_vm10, %v10987_v4  ;;  %v18940_v59 = vadd.f32 %v18881_v12, %v10964_v7  ;;  %v10955_v11 = vmul.f32 %v16090_v60, %v18826_v6  ;;  %v13672_v6 = vld [vmem:[%s19262_s21 + $0xc0] sm:$0xff]  ;;  %v13714_v7 = vld [vmem:[%s19262_s21 + $0x1d0] sm:$0xff] }
0x2ba9   :  { %15387 = vmatpush3.msra.mxu0 %v13655_v29  ;;  %15400 = vmatpush3.msra.mxu1 %v13659_v18  ;;  %v13692_v4 = vld [vmem:[%s19262_s21 + $0x140] sm:$0xff]  ;;  %v12253_v60 = vld [vmem:[%s19264_s23 + $0x30] sm:$0xff] }
0x2baa   :  { %15388 = vmatprep.subr.mxu0 %v16116_v16  ;;  %15401 = vmatprep.subr.mxu1 %v16116_v16  ;;  %v11374_v35 = vrot.slane %v18940_v59, 2  ;;  %v11532_v3 = vrot.slane %v18940_v59, 6  ;;  %v10965_v62 = vmul.f32 %v18876_v53, %v10955_v11  ;;  %v11453_v48 = vrot.slane %v18940_v59, 4  ;;  %v12249_v11 = vld [vmem:[%s19264_s23 + $0x10] sm:$0xff] }
0x2bab   :  { %15389 = vmatpush3.msra.mxu0 %v13654_v9  ;;  %15402 = vmatpush3.msra.mxu1 %v13658_v26  ;;  %v16092_v22 = vpop.eup %16091  ;;  %v13704_v9 = vld [vmem:[%s19262_s21 + $0x190] sm:$0xff] }
0x2bac   :  { %15390 = vmatprep.subr.mxu0 %v16116_v16  ;;  %15403 = vmatprep.subr.mxu1 %v16116_v16  ;;  %v10975_v23 = vadd.f32 %v18881_v12, %v10965_v62  ;;  %v10956_v0 = vmul.f32 %v16092_v22, %v18831_v46  ;;  %v13710_v46 = vld [vmem:[%s19262_s21 + $0x1b8] sm:$0xff] }
0x2bad   :  { %15391 = vmatpush3.msra.mxu0 %v13653_v55  ;;  %15404 = vmatpush3.msra.mxu1 %v13657_v31  ;;  %v13702_v31 = vld [vmem:[%s19262_s21 + $0x180] sm:$0xff] }
0x2bae   :  { %15392 = vmatprep.subr.mxu0 %v16116_v16  ;;  %15406 = vmatmul.mubr.msk.f32.vlgmr.msra.gmra.mxu1 %vm299_vm10, %v11216_v41  ;;  %v11690_v5 = vrot.slane %v10975_v23, 2  ;;  %v11848_v36 = vrot.slane %v10975_v23, 6  ;;  %v10966_v29 = vmul.f32 %v18876_v53, %v10956_v0  ;;  %v11769_v18 = vrot.slane %v10975_v23, 4  ;;  %v13709_v53 = vld [vmem:[%s19262_s21 + $0x1b0] sm:$0xff]  ;;  %v13720_v41 = vld [vmem:[%s19262_s21 + $0x1f8] sm:$0xff] }
0x2baf   :  { %15419 = vmatprep.subr.mxu1 %v16116_v16  ;;  %15393 = vmatpush3.msra.mxu0 %v13652_v27  ;;  %v13715_v27 = vld [vmem:[%s19262_s21 + $0x1d8] sm:$0xff] }
0x2bb0   :  { %15394 = vmatprep.mubr.msk.f32.mxu0 %vm16117_vm12, %v16116_v16  ;;  %15420 = vmatpush3.msra.mxu1 %v13670_v39  ;;  %v10976_v26 = vadd.f32 %v18881_v12, %v10966_v29  ;;  %v13707_v12 = vld [vmem:[%s19262_s21 + $0x1a0] sm:$0xff]  ;;  %v13719_v39 = vld [vmem:[%s19262_s21 + $0x1f0] sm:$0xff] }
0x2bb1   :  { %15395 = vmatmul.mubr.msk.f32.vlgmr.msra.gmra.mxu0 %vm299_vm10, %v11137_v34  ;;  %15408 = vmatprep.subr.mxu0 %v16116_v16  ;;  %v13718_v34 = vld [vmem:[%s19262_s21 + $0x1e8] sm:$0xff] }
0x2bb2   :  { %15421 = vmatprep.subr.mxu1 %v16116_v16  ;;  %15409 = vmatpush3.msra.mxu0 %v13665_v58  ;;  %v12006_v55 = vrot.slane %v10976_v26, 2  ;;  %v13713_v58 = vld [vmem:[%s19262_s21 + $0x1c8] sm:$0xff] }
0x2bb3   :  { %15422 = vmatpush3.msra.mxu1 %v13669_v54  ;;  %15410 = vmatprep.subr.mxu0 %v16116_v16  ;;  %v13717_v54 = vld [vmem:[%s19262_s21 + $0x1e0] sm:$0xff] }
0x2bb4   :  { %15423 = vmatprep.subr.mxu1 %v16116_v16  ;;  %15411 = vmatpush3.msra.mxu0 %v13664_v28  ;;  %v12164_v28 = vrot.slane %v10976_v26, 6 }
0x2bb5   :  { %15424 = vmatpush3.msra.mxu1 %v13668_v38  ;;  %15412 = vmatprep.subr.mxu0 %v16116_v16  ;;  %v12085_v38 = vrot.slane %v10976_v26, 4 }
0x2bb6   :  { %15425 = vmatprep.subr.mxu1 %v16116_v16  ;;  %15413 = vmatpush3.msra.mxu0 %v13663_v57  ;;  %v12262_v57 = vld [vmem:[%s19264_s23 + $0x78] sm:$0xff] }
0x2bb7   :  { %15426 = vmatpush3.msra.mxu1 %v13667_v50  ;;  %15427 = vmatprep.mubr.msk.f32.mxu1 %vm16117_vm12, %v16116_v16  ;;  %v12261_v50 = vld [vmem:[%s19264_s23 + $0x70] sm:$0xff] }
0x2bb8   :  { %15414 = vmatprep.subr.mxu0 %v16116_v16  ;;  %15428 = vmatmul.mubr.msk.f32.vlgmr.msra.gmra.mxu1 %vm299_vm10, %v11374_v35  ;;  %v12260_v35 = vld [vmem:[%s19264_s23 + $0x68] sm:$0xff] }
0x2bb9   :  { %15441 = vmatprep.subr.mxu1 %v16116_v16  ;;  %15415 = vmatpush3.msra.mxu0 %v13662_v61  ;;  %v12259_v61 = vld [vmem:[%s19264_s23 + $0x60] sm:$0xff] }
0x2bba   :  { %15416 = vmatprep.mubr.msk.f32.mxu0 %vm16117_vm12, %v16116_v16  ;;  %15442 = vmatpush3.msra.mxu1 %v13680_v49  ;;  %v12257_v49 = vld [vmem:[%s19264_s23 + $0x50] sm:$0xff] }
0x2bbb   :  { %15417 = vmatmul.mubr.msk.f32.vlgmr.msra.gmra.mxu0 %vm299_vm10, %v18940_v59  ;;  %15430 = vmatprep.subr.mxu0 %v16116_v16  ;;  %v13712_v59 = vld [vmem:[%s19262_s21 + $0x1c0] sm:$0xff] }
0x2bbc   :  { %15443 = vmatprep.subr.mxu1 %v16116_v16  ;;  %15431 = vmatpush3.msra.mxu0 %v13675_v45  ;;  %v12256_v45 = vld [vmem:[%s19264_s23 + $0x48] sm:$0xff] }
0x2bbd   :  { %15444 = vmatpush3.msra.mxu1 %v13679_v17  ;;  %15432 = vmatprep.subr.mxu0 %v16116_v16  ;;  %v12254_v17 = vld [vmem:[%s19264_s23 + $0x38] sm:$0xff] }
0x2bbe   :  { %15445 = vmatprep.subr.mxu1 %v16116_v16  ;;  %15433 = vmatpush3.msra.mxu0 %v13674_v10  ;;  %v12252_v10 = vld [vmem:[%s19264_s23 + $0x28] sm:$0xff] }
0x2bbf   :  { %15446 = vmatpush3.msra.mxu1 %v13678_v25  ;;  %15434 = vmatprep.subr.mxu0 %v16116_v16  ;;  %v12251_v25 = vld [vmem:[%s19264_s23 + $0x20] sm:$0xff] }
0x2bc0   :  { %15447 = vmatprep.subr.mxu1 %v16116_v16  ;;  %15435 = vmatpush3.msra.mxu0 %v13673_v32  ;;  %v12250_v32 = vld [vmem:[%s19264_s23 + $0x18] sm:$0xff] }
0x2bc1   :  { %15448 = vmatpush3.msra.mxu1 %v13677_v19  ;;  %15449 = vmatprep.mubr.msk.f32.mxu1 %vm16117_vm12, %v16116_v16  ;;  %v12247_v19 = vld [vmem:[%s19264_s23] sm:$0xff] }
0x2bc2   :  { %15436 = vmatprep.subr.mxu0 %v16116_v16  ;;  %15450 = vmatmul.mubr.msk.f32.vlgmr.msra.gmra.mxu1 %vm299_vm10, %v11532_v3 }
0x2bc3   :  { %15463 = vmatprep.subr.mxu1 %v16116_v16  ;;  %15437 = vmatpush3.msra.mxu0 %v13672_v6 }
0x2bc4   :  { %15438 = vmatprep.mubr.msk.f32.mxu0 %vm16117_vm12, %v16116_v16  ;;  %15464 = vmatpush3.msra.mxu1 %v13690_v14 }
0x2bc5   :  { %15439 = vmatmul.mubr.msk.f32.vlgmr.msra.gmra.mxu0 %vm299_vm10, %v11453_v48  ;;  %15452 = vmatprep.subr.mxu0 %v16116_v16 }
0x2bc6   :  { %15465 = vmatprep.subr.mxu1 %v16116_v16  ;;  %15453 = vmatpush3.msra.mxu0 %v13685_v24 }
0x2bc7   :  { %15466 = vmatpush3.msra.mxu1 %v13689_v37  ;;  %15454 = vmatprep.subr.mxu0 %v16116_v16 }
0x2bc8   :  { %15467 = vmatprep.subr.mxu1 %v16116_v16  ;;  %15455 = vmatpush3.msra.mxu0 %v13684_v51 }
0x2bc9   :  { %15468 = vmatpush3.msra.mxu1 %v13688_v42  ;;  %15456 = vmatprep.subr.mxu0 %v16116_v16 }
0x2bca   :  { %15469 = vmatprep.subr.mxu1 %v16116_v16  ;;  %15457 = vmatpush3.msra.mxu0 %v13683_v43 }
0x2bcb   :  { %15470 = vmatpush3.msra.mxu1 %v13687_v63  ;;  %15471 = vmatprep.mubr.msk.f32.mxu1 %vm16117_vm12, %v16116_v16 }
0x2bcc   :  { %15458 = vmatprep.subr.mxu0 %v16116_v16  ;;  %15472 = vmatmul.mubr.msk.f32.vlgmr.msra.gmra.mxu1 %vm299_vm10, %v11690_v5 }
0x2bcd   :  { %15485 = vmatprep.subr.mxu1 %v16116_v16  ;;  %15459 = vmatpush3.msra.mxu0 %v13682_v30 }
0x2bce   :  { %15460 = vmatprep.mubr.msk.f32.mxu0 %vm16117_vm12, %v16116_v16  ;;  %15486 = vmatpush3.msra.mxu1 %v13700_v13 }
0x2bcf   :  { %15461 = vmatmul.mubr.msk.f32.vlgmr.msra.gmra.mxu0 %vm299_vm10, %v10975_v23  ;;  %15474 = vmatprep.subr.mxu0 %v16116_v16 }
0x2bd0   :  { %15487 = vmatprep.subr.mxu1 %v16116_v16  ;;  %15475 = vmatpush3.msra.mxu0 %v13695_v33 }
0x2bd1   :  { %15488 = vmatpush3.msra.mxu1 %v13699_v8  ;;  %15476 = vmatprep.subr.mxu0 %v16116_v16 }
0x2bd2   :  { %15489 = vmatprep.subr.mxu1 %v16116_v16  ;;  %15477 = vmatpush3.msra.mxu0 %v13694_v21 }
0x2bd3   :  { %15490 = vmatpush3.msra.mxu1 %v13698_v56  ;;  %15478 = vmatprep.subr.mxu0 %v16116_v16 }
0x2bd4   :  { %15491 = vmatprep.subr.mxu1 %v16116_v16  ;;  %15479 = vmatpush3.msra.mxu0 %v13693_v40 }
0x2bd5   :  { %15492 = vmatpush3.msra.mxu1 %v13697_v1  ;;  %15493 = vmatprep.mubr.msk.f32.mxu1 %vm16117_vm12, %v16116_v16 }
0x2bd6   :  { %15480 = vmatprep.subr.mxu0 %v16116_v16  ;;  %15494 = vmatmul.mubr.msk.f32.vlgmr.msra.gmra.mxu1 %vm299_vm10, %v11848_v36 }
0x2bd7   :  { %15507 = vmatprep.subr.mxu1 %v16116_v16  ;;  %15481 = vmatpush3.msra.mxu0 %v13692_v4 }
0x2bd8   :  { %15482 = vmatprep.mubr.msk.f32.mxu0 %vm16117_vm12, %v16116_v16  ;;  %15508 = vmatpush3.msra.mxu1 %v13710_v46 }
0x2bd9   :  { %15483 = vmatmul.mubr.msk.f32.vlgmr.msra.gmra.mxu0 %vm299_vm10, %v11769_v18  ;;  %15496 = vmatprep.subr.mxu0 %v16116_v16 }
0x2bda   :  { %15509 = vmatprep.subr.mxu1 %v16116_v16  ;;  %15497 = vmatpush3.msra.mxu0 %v13705_v15 }
0x2bdb   :  { %15510 = vmatpush3.msra.mxu1 %v13709_v53  ;;  %15498 = vmatprep.subr.mxu0 %v16116_v16 }
0x2bdc   :  { %15511 = vmatprep.subr.mxu1 %v16116_v16  ;;  %15499 = vmatpush3.msra.mxu0 %v13704_v9 }
0x2bdd   :  { %15512 = vmatpush3.msra.mxu1 %v13708_v20  ;;  %15500 = vmatprep.subr.mxu0 %v16116_v16 }
0x2bde   :  { %15513 = vmatprep.subr.mxu1 %v16116_v16  ;;  %15501 = vmatpush3.msra.mxu0 %v13703_v52 }
0x2bdf   :  { %15514 = vmatpush3.msra.mxu1 %v13707_v12  ;;  %15515 = vmatprep.mubr.msk.f32.mxu1 %vm16117_vm12, %v16116_v16 }
0x2be0   :  { %15502 = vmatprep.subr.mxu0 %v16116_v16  ;;  %15516 = vmatmul.mubr.msk.f32.vlgmr.msra.gmra.mxu1 %vm299_vm10, %v12006_v55 }
0x2be1   :  { %15529 = vmatprep.subr.mxu1 %v16116_v16  ;;  %15503 = vmatpush3.msra.mxu0 %v13702_v31 }
0x2be2   :  { %15504 = vmatprep.mubr.msk.f32.mxu0 %vm16117_vm12, %v16116_v16  ;;  %15530 = vmatpush3.msra.mxu1 %v13720_v41 }
0x2be3   :  { %15505 = vmatmul.mubr.msk.f32.vlgmr.msra.gmra.mxu0 %vm299_vm10, %v10976_v26  ;;  %15518 = vmatprep.subr.mxu0 %v16116_v16 }
0x2be4   :  { %15531 = vmatprep.subr.mxu1 %v16116_v16  ;;  %15519 = vmatpush3.msra.mxu0 %v13715_v27 }
0x2be5   :  { %15532 = vmatpush3.msra.mxu1 %v13719_v39  ;;  %15520 = vmatprep.subr.mxu0 %v16116_v16 }
0x2be6   :  { %15533 = vmatprep.subr.mxu1 %v16116_v16  ;;  %15521 = vmatpush3.msra.mxu0 %v13714_v7 }
0x2be7   :  { %15534 = vmatpush3.msra.mxu1 %v13718_v34  ;;  %15522 = vmatprep.subr.mxu0 %v16116_v16 }
0x2be8   :  { %15535 = vmatprep.subr.mxu1 %v16116_v16  ;;  %15523 = vmatpush3.msra.mxu0 %v13713_v58 }
0x2be9   :  { %15536 = vmatpush3.msra.mxu1 %v13717_v54  ;;  %15537 = vmatprep.mubr.msk.f32.mxu1 %vm16117_vm12, %v16116_v16 }
0x2bea   :  { %15524 = vmatprep.subr.mxu0 %v16116_v16  ;;  %15538 = vmatmul.mubr.msk.f32.vlgmr.msra.gmra.mxu1 %vm299_vm10, %v12164_v28  ;;  %v13722_v28 = vld [vmem:[%s19263_s22] ss:$0 sm:$0xff] }
0x2beb   :  { %15525 = vmatpush3.msra.mxu0 %v13712_v59  ;;  %15526 = vmatprep.mubr.msk.f32.mxu0 %vm16117_vm12, %v16116_v16 }
0x2bec   :  { %15527 = vmatmul.mubr.msk.f32.vlgmr.msra.gmra.mxu0 %vm299_vm10, %v12085_v38  ;;  %15540 = vmatprep.subr.mxu0 %v16116_v16  ;;  %vm12340_vm10 = vcmask 74752  }
0x2bed   :  { %15572 = vmatprep.mubr.msk.f32.mxu0 %vm16117_vm12, %v16116_v16  ;;  %15541 = vmatpush3.msra.mxu0 %v12262_v57 }
0x2bee   :  { %15542 = vmatprep.subr.mxu0 %v16116_v16 }
0x2bef   :  { %15543 = vmatpush3.msra.mxu0 %v12261_v50 }
0x2bf0   :  { %15544 = vmatprep.subr.mxu0 %v16116_v16 }
0x2bf1   :  { %15545 = vmatpush3.msra.mxu0 %v12260_v35  ;;  %v13723_v35 = vld [vmem:[%s19265_s24] ss:$0 sm:$0xff] }
0x2bf2   :  { %15546 = vmatprep.subr.mxu0 %v16116_v16 }
0x2bf3   :  { %15547 = vmatpush3.msra.mxu0 %v12259_v61 }
0x2bf4   :  { %15548 = vmatprep.subr.mxu0 %v16116_v16 }
0x2bf5   :  { %15549 = vmatpush3.msra.mxu0 %v12258_v2 }
0x2bf6   :  { %15550 = vmatprep.subr.mxu0 %v16116_v16 }
0x2bf7   :  { %15551 = vmatpush3.msra.mxu0 %v12257_v49 }
0x2bf8   :  { %15552 = vmatprep.subr.mxu0 %v16116_v16 }
0x2bf9   :  { %15553 = vmatpush3.msra.mxu0 %v12256_v45 }
0x2bfa   :  { %15554 = vmatprep.subr.mxu0 %v16116_v16 }
0x2bfb   :  { %15555 = vmatpush3.msra.mxu0 %v12255_v47 }
0x2bfc   :  { %15556 = vmatprep.subr.mxu0 %v16116_v16 }
0x2bfd   :  { %15557 = vmatpush3.msra.mxu0 %v12254_v17 }
0x2bfe   :  { %15558 = vmatprep.subr.mxu0 %v16116_v16 }
0x2bff   :  { %15559 = vmatpush3.msra.mxu0 %v12253_v60 }
0x2c00   :  { %15560 = vmatprep.subr.mxu0 %v16116_v16 }
0x2c01   :  { %15561 = vmatpush3.msra.mxu0 %v12252_v10 }
0x2c02   :  { %15562 = vmatprep.subr.mxu0 %v16116_v16 }
0x2c03   :  { %15563 = vmatpush3.msra.mxu0 %v12251_v25 }
0x2c04   :  { %15564 = vmatprep.subr.mxu0 %v16116_v16 }
0x2c05   :  { %15565 = vmatpush3.msra.mxu0 %v12250_v32 }
0x2c06   :  { %15566 = vmatprep.subr.mxu0 %v16116_v16 }
0x2c07   :  { %15567 = vmatpush3.msra.mxu0 %v12249_v11 }
0x2c08   :  { %15568 = vmatprep.subr.mxu0 %v16116_v16 }
0x2c09   :  { %15569 = vmatpush3.msra.mxu0 %v12248_v44 }
0x2c0a   :  { %15570 = vmatprep.subr.mxu0 %v16116_v16 }
0x2c0b   :  { %15571 = vmatpush3.msra.mxu0 %v12247_v19 }
0x2c66   :  { %v11128_v3 = vpop.f32.mrf.mxu1 }
0x2c68   :  { %v11056_v6 = vpop.f32.mrf.mxu0  ;;  %v15385_v14 = vpop.f32.mrf.mxu1 }
0x2c69   :  { %v11129_v13 = vadd.f32 %v11128_v3, %v11056_v6 }
0x2c6a   :  { %v15374_v62 = vpop.f32.mrf.mxu0 }
0x2c6e   :  { %v11285_v48 = vpop.f32.mrf.mxu1 }
0x2c70   :  { %v15407_v24 = vpop.f32.mrf.mxu1 }
0x2c71   :  { %v11206_v37 = vpop.f32.mrf.mxu0 }
0x2c72   :  { %v11210_v8 = vadd.f32 %v11206_v37, %v11129_v13 }
0x2c73   :  { %v15396_v51 = vpop.f32.mrf.mxu0 }
0x2c74   :  { %v11289_v21 = vadd.f32 %v11285_v48, %v11210_v8 }
0x2c78   :  { %v11443_v23 = vpop.f32.mrf.mxu1 }
0x2c7a   :  { %v15429_v42 = vpop.f32.mrf.mxu1 }
0x2c7b   :  { %v11364_v43 = vpop.f32.mrf.mxu0 }
0x2c7c   :  { %v11368_v40 = vadd.f32 %v11364_v43, %v11289_v21 }
0x2c7d   :  { %v15418_v63 = vpop.f32.mrf.mxu0 }
0x2c7e   :  { %v11447_v36 = vadd.f32 %v11443_v23, %v11368_v40 }
0x2c82   :  { %v11601_v5 = vpop.f32.mrf.mxu1 }
0x2c84   :  { %v15451_v30 = vpop.f32.mrf.mxu1 }
0x2c85   :  { %v11522_v16 = vpop.f32.mrf.mxu0 }
0x2c86   :  { %v11526_v4 = vadd.f32 %v11522_v16, %v11447_v36 }
0x2c87   :  { %v15440_v33 = vpop.f32.mrf.mxu0 }
0x2c88   :  { %v11605_v18 = vadd.f32 %v11601_v5, %v11526_v4 }
0x2c8c   :  { %v11759_v22 = vpop.f32.mrf.mxu1 }
0x2c8e   :  { %v15473_v56 = vpop.f32.mrf.mxu1 }
0x2c8f   :  { %v11680_v0 = vpop.f32.mrf.mxu0 }
0x2c90   :  { %v11684_v53 = vadd.f32 %v11680_v0, %v11605_v18 }
0x2c91   :  { %v15462_v1 = vpop.f32.mrf.mxu0 }
0x2c92   :  { %v11763_v26 = vadd.f32 %v11759_v22, %v11684_v53 }
0x2c96   :  { %v11917_v46 = vpop.f32.mrf.mxu1 }
0x2c98   :  { %v15495_v29 = vpop.f32.mrf.mxu1 }
0x2c99   :  { %v11838_v15 = vpop.f32.mrf.mxu0 }
0x2c9a   :  { %v11842_v52 = vadd.f32 %v11838_v15, %v11763_v26 }
0x2c9b   :  { %v15484_v9 = vpop.f32.mrf.mxu0 }
0x2c9c   :  { %v11921_v31 = vadd.f32 %v11917_v46, %v11842_v52 }
0x2ca0   :  { %v12075_v20 = vpop.f32.mrf.mxu1 }
0x2ca2   :  { %v15517_v12 = vpop.f32.mrf.mxu1 }
0x2ca3   :  { %v11996_v55 = vpop.f32.mrf.mxu0 }
0x2ca4   :  { %v12000_v27 = vadd.f32 %v11996_v55, %v11921_v31 }
0x2ca5   :  { %v15506_v41 = vpop.f32.mrf.mxu0 }
0x2ca6   :  { %v12079_v7 = vadd.f32 %v12075_v20, %v12000_v27 }
0x2caa   :  { %v12233_v39 = vpop.f32.mrf.mxu1 }
0x2cac   :  { %v12154_v34 = vpop.f32.mrf.mxu0  ;;  %v15539_v58 = vpop.f32.mrf.mxu1 }
0x2cad   :  { %v12158_v54 = vadd.f32 %v12154_v34, %v12079_v7 }
0x2cae   :  { %v15528_v59 = vpop.f32.mrf.mxu0 }
0x2caf   :  { %v12237_v38 = vadd.f32 %v12233_v39, %v12158_v54 }
0x2cb1   :  { %v12245_v57 = vadd.f32 %v13722_v28, %v12237_v38 }
0x2cb3   :  { %v12246_v50 = vmax.f32 %v12245_v57, 0.0 }
0x2cb5   :  { %15573 = vmatmul.mubr.f32.vlgmr.msra.gmra.mxu0 %v12246_v50 }
0x2d75   :  { %v12336_v61 = vpop.f32.mrf.mxu0 }
0x2d76   :  { %v12337_v2 = vadd.f32 %v13723_v35, %v12336_v61 }
0x2d77   :  { %v15574_v49 = vpop.f32.mrf.mxu0 }
0x2d78   :  { %12341 = vst.msk [vmem:[#allocation2] sm:$0x3] %vm12340_vm10, %v12337_v2 }
0x2d79   :  { %16104 = shalt.err (!%p16101_p4)
}
0x2d7a   :  { %12351 = dma.vmem_to_hbm [thread:$0]  %s12349_s0, 32, %s19266_s25, [#allocation3]  }
0x2d7b   :  { %16113 = dma.done.wait [#allocation3], 32  }
0x2d7c   :  { %16114 = vsyncadd [#allocation3], 4294967264 }
0x2d7d   :  { %12355 = vsyncpa [#allocation3], 1 }

</bundles_post_ra>
